<compile_context>
chip_gen: v5e
topology: v5e:2x2
jax: 0.10.0
libtpu: 0.0.40
codegen_flags: <defaults>
</compile_context>

<pallas_src>
import functools

import jax
import jax.numpy as jnp
import numpy as np
from jax.experimental import pallas as pl
from jax.experimental.pallas import tpu as pltpu

BN_EPS = 1e-5


# ----------------------------- fused Pallas kernel ---------------------------

def _conv3x3_cm(x, w_ref, b_ref, masks_ref, W):
    """3x3 SAME conv in channels-major layout.

    x: (Cin, H*W) f32 activation value.
    w_ref: (Cout, 9*Cin) BN-scaled weights, tap-major / channel-minor,
           tap order t = (dy+1)*3 + (dx+1).
    b_ref: (Cout, 1) folded BN bias.
    masks_ref: (9, H*W) {0,1} border-validity mask per tap.
    Returns (Cout, H*W) f32 (conv + bias, no activation).
    """
    HW = x.shape[1]
    taps = []
    t = 0
    for dy in (-1, 0, 1):
        for dx in (-1, 0, 1):
            off = dy * W + dx
            if off == 0:
                taps.append(x)                      # center tap: always valid
            else:
                # shifted[p] = x[(p + off) mod HW]; border wrap is zeroed by mask.
                shifted = pltpu.roll(x, (-off) % HW, 1)
                taps.append(shifted * masks_ref[t:t + 1, :])
            t += 1
    x9 = jnp.concatenate(taps, axis=0)              # (9*Cin, HW) im2col
    y = jnp.dot(w_ref[...], x9, preferred_element_type=jnp.float32)
    return y + b_ref[...]


def _neck_fused_kernel(*refs, W, n_blocks):
    """Whole Neck forward for one batch element, activations resident in VMEM."""
    masks_ref, x1_ref, x2_ref, hw_ref, hb_ref = refs[:5]
    change_ref, h1_ref, h2_ref = refs[-3:]
    blk_refs = refs[5:-3]

    wh = hw_ref[...]                                # (mid, Cin)
    bh = hb_ref[...]                                # (mid, 1)

    # Shared head: 1x1 conv + folded BN + ReLU, channels-major matmul.
    h1 = jnp.maximum(jnp.dot(wh, x1_ref[0], preferred_element_type=jnp.float32) + bh, 0.0)
    h2 = jnp.maximum(jnp.dot(wh, x2_ref[0], preferred_element_type=jnp.float32) + bh, 0.0)
    h1_ref[0] = h1
    h2_ref[0] = h2

    # torch.cat(dim=1) == concat along the channel (sublane) axis.
    x = jnp.concatenate([h1, h2], axis=0)           # (2*mid, HW)

    idx = 0
    for b in range(n_blocks):
        if b == 0:
            w1, b1, w2, b2, dw, db = blk_refs[idx:idx + 6]
            idx += 6
            identity = jnp.dot(dw[...], x, preferred_element_type=jnp.float32) + db[...]
        else:
            w1, b1, w2, b2 = blk_refs[idx:idx + 4]
            idx += 4
            identity = x
        out = jnp.maximum(_conv3x3_cm(x, w1, b1, masks_ref, W), 0.0)
        y = _conv3x3_cm(out, w2, b2, masks_ref, W)
        x = jnp.maximum(y + identity, 0.0)

    change_ref[0] = x


# ----------------------------- host-side helpers ------------------------------

def _make_tap_masks(H, W):
    """(9, H*W) validity masks for the 9 taps of a SAME 3x3 conv."""
    m = np.zeros((9, H, W), np.float32)
    t = 0
    for dy in (-1, 0, 1):
        for dx in (-1, 0, 1):
            r0, r1 = max(0, -dy), H - max(0, dy)
            c0, c1 = max(0, -dx), W - max(0, dx)
            m[t, r0:r1, c0:c1] = 1.0
            t += 1
    return jnp.asarray(m.reshape(9, H * W))


def prep_kernel_params(p):
    """Fold BN scale into conv weights and reshape to kernel layout."""
    def fold1x1(w, s, b):                     # w: (O, I)
        return (w * s[:, None]).astype(jnp.float32), b.reshape(-1, 1).astype(jnp.float32)

    def fold3x3(w, s, b):                     # w: (O, I, 3, 3) -> (O, 9*I) tap-major
        O, I = w.shape[0], w.shape[1]
        wk = jnp.transpose(w, (0, 2, 3, 1)).reshape(O, 9 * I) * s[:, None]
        return wk.astype(jnp.float32), b.reshape(-1, 1).astype(jnp.float32)

    kp = {}
    kp['head_w'], kp['head_b'] = fold1x1(p['head_w'], p['head_s'], p['head_b'])
    blocks = []
    for blk in p['blocks']:
        kb = {}
        kb['w1'], kb['b1'] = fold3x3(blk['w1'], blk['s1'], blk['b1'])
        kb['w2'], kb['b2'] = fold3x3(blk['w2'], blk['s2'], blk['b2'])
        if 'dw' in blk:
            kb['dw'], kb['db'] = fold1x1(blk['dw'], blk['ds'], blk['db'])
        blocks.append(kb)
    kp['blocks'] = blocks
    return kp


def neck_forward(params, x1_nchw, x2_nchw):
    N, Cin, H, W = x1_nchw.shape
    HW = H * W
    kp = prep_kernel_params(params)
    mid = kp['head_w'].shape[0]

    # Channels already lead in NCHW, so flattening spatial dims is a free reshape.
    x1 = x1_nchw.reshape(N, Cin, HW)
    x2 = x2_nchw.reshape(N, Cin, HW)
    masks = _make_tap_masks(H, W)

    def const_spec(a):                        # VMEM-resident operand (no re-copy)
        zeros = (0,) * a.ndim
        return pl.BlockSpec(a.shape, lambda n, _z=zeros: _z)

    def batch_spec(c):
        return pl.BlockSpec((1, c, HW), lambda n: (n, 0, 0))

    args = [masks, x1, x2, kp['head_w'], kp['head_b']]
    in_specs = [const_spec(masks), batch_spec(Cin), batch_spec(Cin),
                const_spec(kp['head_w']), const_spec(kp['head_b'])]
    for i, blk in enumerate(kp['blocks']):
        names = ('w1', 'b1', 'w2', 'b2', 'dw', 'db') if i == 0 else ('w1', 'b1', 'w2', 'b2')
        for nm in names:
            args.append(blk[nm])
            in_specs.append(const_spec(blk[nm]))

    kern = functools.partial(_neck_fused_kernel, W=W, n_blocks=len(kp['blocks']))
    out_shape = tuple(jax.ShapeDtypeStruct((N, mid, HW), jnp.float32) for _ in range(3))
    out_specs = tuple(batch_spec(mid) for _ in range(3))

    change, h1, h2 = pl.pallas_call(
        kern,
        out_shape=out_shape,
        grid=(N,),
        in_specs=in_specs,
        out_specs=out_specs,
        compiler_params=pltpu.CompilerParams(dimension_semantics=("parallel",)),
    )(*args)

    rs = lambda t: t.reshape(N, mid, H, W)
    return rs(change), rs(h1), rs(h2)


# ----------------------------- parameters ------------------------------------

def _bn_fold(key, c):
    """Deterministic non-trivial inference-mode BN folded to (scale, bias)."""
    k1, k2, k3, k4 = jax.random.split(key, 4)
    gamma = jax.random.uniform(k1, (c,), minval=0.5, maxval=1.5)
    beta = 0.1 * jax.random.normal(k2, (c,))
    mean = 0.1 * jax.random.normal(k3, (c,))
    var = jax.random.uniform(k4, (c,), minval=0.5, maxval=1.5)
    scale = gamma / jnp.sqrt(var + BN_EPS)
    bias = beta - mean * scale
    return scale.astype(jnp.float32), bias.astype(jnp.float32)


def init_neck_params(key, embed_dim, mid_dim):
    keys = iter(jax.random.split(key, 64))
    p = {}
    p['head_w'] = (jax.random.normal(next(keys), (mid_dim, embed_dim))
                   / np.sqrt(embed_dim)).astype(jnp.float32)          # OI (1x1)
    p['head_s'], p['head_b'] = _bn_fold(next(keys), mid_dim)
    blocks = []
    inplanes = mid_dim * 2
    for i in range(6):                                                # resCD: 6 ResBlocks
        blk = {}
        blk['w1'] = (jax.random.normal(next(keys), (mid_dim, inplanes, 3, 3))
                     / np.sqrt(9 * inplanes)).astype(jnp.float32)     # OIHW
        blk['s1'], blk['b1'] = _bn_fold(next(keys), mid_dim)
        blk['w2'] = (jax.random.normal(next(keys), (mid_dim, mid_dim, 3, 3))
                     / np.sqrt(9 * mid_dim)).astype(jnp.float32)
        blk['s2'], blk['b2'] = _bn_fold(next(keys), mid_dim)
        if i == 0:                                                    # downsample 1x1+BN
            blk['dw'] = (jax.random.normal(next(keys), (mid_dim, inplanes))
                         / np.sqrt(inplanes)).astype(jnp.float32)
            blk['ds'], blk['db'] = _bn_fold(next(keys), mid_dim)
        blocks.append(blk)
        inplanes = mid_dim
    p['blocks'] = blocks
    return p


# ----------------------------- pure-JAX reference ----------------------------

def neck_forward_ref(params, x1, x2):
    def conv1x1(x, w):
        return jax.lax.conv_general_dilated(
            x, w[:, :, None, None], (1, 1), 'VALID',
            dimension_numbers=('NCHW', 'OIHW', 'NCHW'),
            precision=jax.lax.Precision.HIGHEST)

    def conv3x3(x, w):
        return jax.lax.conv_general_dilated(
            x, w, (1, 1), 'SAME',
            dimension_numbers=('NCHW', 'OIHW', 'NCHW'),
            precision=jax.lax.Precision.HIGHEST)

    def bn(x, s, b):
        return x * s[None, :, None, None] + b[None, :, None, None]

    h1 = jnp.maximum(bn(conv1x1(x1, params['head_w']), params['head_s'], params['head_b']), 0.0)
    h2 = jnp.maximum(bn(conv1x1(x2, params['head_w']), params['head_s'], params['head_b']), 0.0)
    x = jnp.concatenate([h1, h2], axis=1)
    for blk in params['blocks']:
        identity = x
        if 'dw' in blk:
            identity = bn(conv1x1(x, blk['dw']), blk['ds'], blk['db'])
        out = jnp.maximum(bn(conv3x3(x, blk['w1']), blk['s1'], blk['b1']), 0.0)
        x = jnp.maximum(bn(conv3x3(out, blk['w2']), blk['s2'], blk['b2']) + identity, 0.0)
    return x, h1, h2


# ----------------------------- main ------------------------------------------

if __name__ == "__main__":
    key = jax.random.PRNGKey(0)
    kx1, kx2, kp = jax.random.split(key, 3)

    N, embed_dim, H, W, mid_dim = 2, 32, 16, 16, 32   # small synthetic shapes
    x1 = jax.random.normal(kx1, (N, embed_dim, H, W), jnp.float32)
    x2 = jax.random.normal(kx2, (N, embed_dim, H, W), jnp.float32)
    params = init_neck_params(kp, embed_dim, mid_dim)

    fwd = jax.jit(neck_forward)
    change, h1, h2 = jax.block_until_ready(fwd(params, x1, x2))

    # Sanity check vs. pure-JAX (XLA conv, f32 HIGHEST precision) reference.
    rc, r1, r2 = jax.block_until_ready(neck_forward_ref(params, x1, x2))
    for a, b in ((change, rc), (h1, r1), (h2, r2)):
        np.testing.assert_allclose(np.asarray(a), np.asarray(b),
                                   atol=5e-3, rtol=5e-3)

    assert change.shape == (N, mid_dim, H, W)
    assert h1.shape == (N, mid_dim, H, W) and h2.shape == (N, mid_dim, H, W)
    print("KERNEL_OK")
</pallas_src>

<mosaic_0001>
module attributes {stable_mosaic.version = 11 : i64} {
  func.func @_neck_fused_kernel(%arg0: i32, %arg1: memref<9x256xf32, #tpu.memory_space<vmem>>, %arg2: memref<1x32x256xf32, #tpu.memory_space<vmem>>, %arg3: memref<1x32x256xf32, #tpu.memory_space<vmem>>, %arg4: memref<32x32xf32, #tpu.memory_space<vmem>>, %arg5: memref<32x1xf32, #tpu.memory_space<vmem>>, %arg6: memref<32x576xf32, #tpu.memory_space<vmem>>, %arg7: memref<32x1xf32, #tpu.memory_space<vmem>>, %arg8: memref<32x288xf32, #tpu.memory_space<vmem>>, %arg9: memref<32x1xf32, #tpu.memory_space<vmem>>, %arg10: memref<32x64xf32, #tpu.memory_space<vmem>>, %arg11: memref<32x1xf32, #tpu.memory_space<vmem>>, %arg12: memref<32x288xf32, #tpu.memory_space<vmem>>, %arg13: memref<32x1xf32, #tpu.memory_space<vmem>>, %arg14: memref<32x288xf32, #tpu.memory_space<vmem>>, %arg15: memref<32x1xf32, #tpu.memory_space<vmem>>, %arg16: memref<32x288xf32, #tpu.memory_space<vmem>>, %arg17: memref<32x1xf32, #tpu.memory_space<vmem>>, %arg18: memref<32x288xf32, #tpu.memory_space<vmem>>, %arg19: memref<32x1xf32, #tpu.memory_space<vmem>>, %arg20: memref<32x288xf32, #tpu.memory_space<vmem>>, %arg21: memref<32x1xf32, #tpu.memory_space<vmem>>, %arg22: memref<32x288xf32, #tpu.memory_space<vmem>>, %arg23: memref<32x1xf32, #tpu.memory_space<vmem>>, %arg24: memref<32x288xf32, #tpu.memory_space<vmem>>, %arg25: memref<32x1xf32, #tpu.memory_space<vmem>>, %arg26: memref<32x288xf32, #tpu.memory_space<vmem>>, %arg27: memref<32x1xf32, #tpu.memory_space<vmem>>, %arg28: memref<32x288xf32, #tpu.memory_space<vmem>>, %arg29: memref<32x1xf32, #tpu.memory_space<vmem>>, %arg30: memref<32x288xf32, #tpu.memory_space<vmem>>, %arg31: memref<32x1xf32, #tpu.memory_space<vmem>>, %arg32: memref<1x32x256xf32, #tpu.memory_space<vmem>>, %arg33: memref<1x32x256xf32, #tpu.memory_space<vmem>>, %arg34: memref<1x32x256xf32, #tpu.memory_space<vmem>>) attributes {dimension_semantics = [#tpu.dimension_semantics<parallel>], iteration_bounds = array<i64: 2>, scalar_prefetch = 0 : i64, scratch_operands = 0 : i64, tpu.core_type = #tpu.core_type<tc>, window_params = [{pipeline_mode = #tpu.pipeline_mode<synchronous>, transform_indices = @transform_0, window_bounds = array<i64: 9, 256>}, {transform_indices = @transform_1, window_bounds = array<i64: 1, 32, 256>}, {transform_indices = @transform_2, window_bounds = array<i64: 1, 32, 256>}, {pipeline_mode = #tpu.pipeline_mode<synchronous>, transform_indices = @transform_3, window_bounds = array<i64: 32, 32>}, {pipeline_mode = #tpu.pipeline_mode<synchronous>, transform_indices = @transform_4, window_bounds = array<i64: 32, 1>}, {pipeline_mode = #tpu.pipeline_mode<synchronous>, transform_indices = @transform_5, window_bounds = array<i64: 32, 576>}, {pipeline_mode = #tpu.pipeline_mode<synchronous>, transform_indices = @transform_6, window_bounds = array<i64: 32, 1>}, {pipeline_mode = #tpu.pipeline_mode<synchronous>, transform_indices = @transform_7, window_bounds = array<i64: 32, 288>}, {pipeline_mode = #tpu.pipeline_mode<synchronous>, transform_indices = @transform_8, window_bounds = array<i64: 32, 1>}, {pipeline_mode = #tpu.pipeline_mode<synchronous>, transform_indices = @transform_9, window_bounds = array<i64: 32, 64>}, {pipeline_mode = #tpu.pipeline_mode<synchronous>, transform_indices = @transform_10, window_bounds = array<i64: 32, 1>}, {pipeline_mode = #tpu.pipeline_mode<synchronous>, transform_indices = @transform_11, window_bounds = array<i64: 32, 288>}, {pipeline_mode = #tpu.pipeline_mode<synchronous>, transform_indices = @transform_12, window_bounds = array<i64: 32, 1>}, {pipeline_mode = #tpu.pipeline_mode<synchronous>, transform_indices = @transform_13, window_bounds = array<i64: 32, 288>}, {pipeline_mode = #tpu.pipeline_mode<synchronous>, transform_indices = @transform_14, window_bounds = array<i64: 32, 1>}, {pipeline_mode = #tpu.pipeline_mode<synchronous>, transform_indices = @transform_15, window_bounds = array<i64: 32, 288>}, {pipeline_mode = #tpu.pipeline_mode<synchronous>, transform_indices = @transform_16, window_bounds = array<i64: 32, 1>}, {pipeline_mode = #tpu.pipeline_mode<synchronous>, transform_indices = @transform_17, window_bounds = array<i64: 32, 288>}, {pipeline_mode = #tpu.pipeline_mode<synchronous>, transform_indices = @transform_18, window_bounds = array<i64: 32, 1>}, {pipeline_mode = #tpu.pipeline_mode<synchronous>, transform_indices = @transform_19, window_bounds = array<i64: 32, 288>}, {pipeline_mode = #tpu.pipeline_mode<synchronous>, transform_indices = @transform_20, window_bounds = array<i64: 32, 1>}, {pipeline_mode = #tpu.pipeline_mode<synchronous>, transform_indices = @transform_21, window_bounds = array<i64: 32, 288>}, {pipeline_mode = #tpu.pipeline_mode<synchronous>, transform_indices = @transform_22, window_bounds = array<i64: 32, 1>}, {pipeline_mode = #tpu.pipeline_mode<synchronous>, transform_indices = @transform_23, window_bounds = array<i64: 32, 288>}, {pipeline_mode = #tpu.pipeline_mode<synchronous>, transform_indices = @transform_24, window_bounds = array<i64: 32, 1>}, {pipeline_mode = #tpu.pipeline_mode<synchronous>, transform_indices = @transform_25, window_bounds = array<i64: 32, 288>}, {pipeline_mode = #tpu.pipeline_mode<synchronous>, transform_indices = @transform_26, window_bounds = array<i64: 32, 1>}, {pipeline_mode = #tpu.pipeline_mode<synchronous>, transform_indices = @transform_27, window_bounds = array<i64: 32, 288>}, {pipeline_mode = #tpu.pipeline_mode<synchronous>, transform_indices = @transform_28, window_bounds = array<i64: 32, 1>}, {pipeline_mode = #tpu.pipeline_mode<synchronous>, transform_indices = @transform_29, window_bounds = array<i64: 32, 288>}, {pipeline_mode = #tpu.pipeline_mode<synchronous>, transform_indices = @transform_30, window_bounds = array<i64: 32, 1>}, {transform_indices = @transform_31, window_bounds = array<i64: 1, 32, 256>}, {transform_indices = @transform_32, window_bounds = array<i64: 1, 32, 256>}, {transform_indices = @transform_33, window_bounds = array<i64: 1, 32, 256>}]} {
    %c0 = arith.constant 0 : index
    %c0_0 = arith.constant 0 : index
    %0 = vector.load %arg4[%c0, %c0_0] : memref<32x32xf32, #tpu.memory_space<vmem>>, vector<32x32xf32>
    %c0_1 = arith.constant 0 : index
    %c0_2 = arith.constant 0 : index
    %1 = vector.load %arg5[%c0_1, %c0_2] : memref<32x1xf32, #tpu.memory_space<vmem>>, vector<32x1xf32>
    %c0_3 = arith.constant 0 : index
    %c0_4 = arith.constant 0 : index
    %c0_5 = arith.constant 0 : index
    %2 = vector.load %arg2[%c0_3, %c0_4, %c0_5] : memref<1x32x256xf32, #tpu.memory_space<vmem>>, vector<1x32x256xf32>
    %3 = vector.shape_cast %2 : vector<1x32x256xf32> to vector<32x256xf32>
    %cst = arith.constant dense<0.000000e+00> : vector<32x256xf32>
    %4 = tpu.matmul %0, %3, %cst {dimension_numbers = #tpu.dot_dimension_numbers<[1], [0], [0], [1], [0, 0, 1, 1], [], []>} : vector<32x32xf32>, vector<32x256xf32>, vector<32x256xf32> -> vector<32x256xf32>
    %5 = vector.broadcast %1 : vector<32x1xf32> to vector<32x256xf32>
    %6 = arith.addf %4, %5 : vector<32x256xf32>
    %cst_6 = arith.constant 0.000000e+00 : f32
    %7 = vector.broadcast %cst_6 : f32 to vector<32x256xf32>
    %8 = arith.maximumf %6, %7 : vector<32x256xf32>
    %c0_7 = arith.constant 0 : index
    %c0_8 = arith.constant 0 : index
    %c0_9 = arith.constant 0 : index
    %9 = vector.load %arg3[%c0_7, %c0_8, %c0_9] : memref<1x32x256xf32, #tpu.memory_space<vmem>>, vector<1x32x256xf32>
    %10 = vector.shape_cast %9 : vector<1x32x256xf32> to vector<32x256xf32>
    %cst_10 = arith.constant dense<0.000000e+00> : vector<32x256xf32>
    %11 = tpu.matmul %0, %10, %cst_10 {dimension_numbers = #tpu.dot_dimension_numbers<[1], [0], [0], [1], [0, 0, 1, 1], [], []>} : vector<32x32xf32>, vector<32x256xf32>, vector<32x256xf32> -> vector<32x256xf32>
    %12 = vector.broadcast %1 : vector<32x1xf32> to vector<32x256xf32>
    %13 = arith.addf %11, %12 : vector<32x256xf32>
    %cst_11 = arith.constant 0.000000e+00 : f32
    %14 = vector.broadcast %cst_11 : f32 to vector<32x256xf32>
    %15 = arith.maximumf %13, %14 : vector<32x256xf32>
    %c0_12 = arith.constant 0 : index
    %c0_13 = arith.constant 0 : index
    %c0_14 = arith.constant 0 : index
    %16 = vector.load %arg33[%c0_12, %c0_13, %c0_14] : memref<1x32x256xf32, #tpu.memory_space<vmem>>, vector<1x32x256xf32>
    %17 = vector.shape_cast %16 : vector<1x32x256xf32> to vector<32x256xf32>
    %18 = vector.shape_cast %8 : vector<32x256xf32> to vector<1x32x256xf32>
    tpu.vector_store %arg33[%c0_12, %c0_13, %c0_14], %18 {strides = array<i32>} : memref<1x32x256xf32, #tpu.memory_space<vmem>>, vector<1x32x256xf32>,
    %c0_15 = arith.constant 0 : index
    %c0_16 = arith.constant 0 : index
    %c0_17 = arith.constant 0 : index
    %19 = vector.load %arg34[%c0_15, %c0_16, %c0_17] : memref<1x32x256xf32, #tpu.memory_space<vmem>>, vector<1x32x256xf32>
    %20 = vector.shape_cast %19 : vector<1x32x256xf32> to vector<32x256xf32>
    %21 = vector.shape_cast %15 : vector<32x256xf32> to vector<1x32x256xf32>
    tpu.vector_store %arg34[%c0_15, %c0_16, %c0_17], %21 {strides = array<i32>} : memref<1x32x256xf32, #tpu.memory_space<vmem>>, vector<1x32x256xf32>,
    %22 = tpu.concatenate %8, %15 in 0 : vector<32x256xf32>, vector<32x256xf32> -> vector<64x256xf32>
    %c0_18 = arith.constant 0 : index
    %c0_19 = arith.constant 0 : index
    %23 = vector.load %arg10[%c0_18, %c0_19] : memref<32x64xf32, #tpu.memory_space<vmem>>, vector<32x64xf32>
    %cst_20 = arith.constant dense<0.000000e+00> : vector<32x256xf32>
    %24 = tpu.matmul %23, %22, %cst_20 {dimension_numbers = #tpu.dot_dimension_numbers<[1], [0], [0], [1], [0, 0, 1, 1], [], []>} : vector<32x64xf32>, vector<64x256xf32>, vector<32x256xf32> -> vector<32x256xf32>
    %c0_21 = arith.constant 0 : index
    %c0_22 = arith.constant 0 : index
    %25 = vector.load %arg11[%c0_21, %c0_22] : memref<32x1xf32, #tpu.memory_space<vmem>>, vector<32x1xf32>
    %26 = vector.broadcast %25 : vector<32x1xf32> to vector<32x256xf32>
    %27 = arith.addf %24, %26 : vector<32x256xf32>
    %c17_i32 = arith.constant 17 : i32
    %28 = tpu.dynamic_rotate %22 by %c17_i32 dim 1 : vector<64x256xf32>, i32 -> vector<64x256xf32>
    %c0_23 = arith.constant 0 : index
    %c0_24 = arith.constant 0 : index
    %29 = vector.load %arg1[%c0_23, %c0_24] : memref<9x256xf32, #tpu.memory_space<vmem>>, vector<1x256xf32>
    %30 = vector.broadcast %29 : vector<1x256xf32> to vector<64x256xf32>
    %31 = arith.mulf %28, %30 : vector<64x256xf32>
    %c16_i32 = arith.constant 16 : i32
    %32 = tpu.dynamic_rotate %22 by %c16_i32 dim 1 : vector<64x256xf32>, i32 -> vector<64x256xf32>
    %c1 = arith.constant 1 : index
    %c0_25 = arith.constant 0 : index
    %33 = vector.load %arg1[%c1, %c0_25] : memref<9x256xf32, #tpu.memory_space<vmem>>, vector<1x256xf32>
    %34 = vector.broadcast %33 : vector<1x256xf32> to vector<64x256xf32>
    %35 = arith.mulf %32, %34 : vector<64x256xf32>
    %c15_i32 = arith.constant 15 : i32
    %36 = tpu.dynamic_rotate %22 by %c15_i32 dim 1 : vector<64x256xf32>, i32 -> vector<64x256xf32>
    %c2 = arith.constant 2 : index
    %c0_26 = arith.constant 0 : index
    %37 = vector.load %arg1[%c2, %c0_26] : memref<9x256xf32, #tpu.memory_space<vmem>>, vector<1x256xf32>
    %38 = vector.broadcast %37 : vector<1x256xf32> to vector<64x256xf32>
    %39 = arith.mulf %36, %38 : vector<64x256xf32>
    %c1_i32 = arith.constant 1 : i32
    %40 = tpu.dynamic_rotate %22 by %c1_i32 dim 1 : vector<64x256xf32>, i32 -> vector<64x256xf32>
    %c3 = arith.constant 3 : index
    %c0_27 = arith.constant 0 : index
    %41 = vector.load %arg1[%c3, %c0_27] : memref<9x256xf32, #tpu.memory_space<vmem>>, vector<1x256xf32>
    %42 = vector.broadcast %41 : vector<1x256xf32> to vector<64x256xf32>
    %43 = arith.mulf %40, %42 : vector<64x256xf32>
    %c255_i32 = arith.constant 255 : i32
    %44 = tpu.dynamic_rotate %22 by %c255_i32 dim 1 : vector<64x256xf32>, i32 -> vector<64x256xf32>
    %c5 = arith.constant 5 : index
    %c0_28 = arith.constant 0 : index
    %45 = vector.load %arg1[%c5, %c0_28] : memref<9x256xf32, #tpu.memory_space<vmem>>, vector<1x256xf32>
    %46 = vector.broadcast %45 : vector<1x256xf32> to vector<64x256xf32>
    %47 = arith.mulf %44, %46 : vector<64x256xf32>
    %c241_i32 = arith.constant 241 : i32
    %48 = tpu.dynamic_rotate %22 by %c241_i32 dim 1 : vector<64x256xf32>, i32 -> vector<64x256xf32>
    %c6 = arith.constant 6 : index
    %c0_29 = arith.constant 0 : index
    %49 = vector.load %arg1[%c6, %c0_29] : memref<9x256xf32, #tpu.memory_space<vmem>>, vector<1x256xf32>
    %50 = vector.broadcast %49 : vector<1x256xf32> to vector<64x256xf32>
    %51 = arith.mulf %48, %50 : vector<64x256xf32>
    %c240_i32 = arith.constant 240 : i32
    %52 = tpu.dynamic_rotate %22 by %c240_i32 dim 1 : vector<64x256xf32>, i32 -> vector<64x256xf32>
    %c7 = arith.constant 7 : index
    %c0_30 = arith.constant 0 : index
    %53 = vector.load %arg1[%c7, %c0_30] : memref<9x256xf32, #tpu.memory_space<vmem>>, vector<1x256xf32>
    %54 = vector.broadcast %53 : vector<1x256xf32> to vector<64x256xf32>
    %55 = arith.mulf %52, %54 : vector<64x256xf32>
    %c239_i32 = arith.constant 239 : i32
    %56 = tpu.dynamic_rotate %22 by %c239_i32 dim 1 : vector<64x256xf32>, i32 -> vector<64x256xf32>
    %c8 = arith.constant 8 : index
    %c0_31 = arith.constant 0 : index
    %57 = vector.load %arg1[%c8, %c0_31] : memref<9x256xf32, #tpu.memory_space<vmem>>, vector<1x256xf32>
    %58 = vector.broadcast %57 : vector<1x256xf32> to vector<64x256xf32>
    %59 = arith.mulf %56, %58 : vector<64x256xf32>
    %60 = tpu.concatenate %31, %35, %39, %43, %22, %47, %51, %55, %59 in 0 : vector<64x256xf32>, vector<64x256xf32>, vector<64x256xf32>, vector<64x256xf32>, vector<64x256xf32>, vector<64x256xf32>, vector<64x256xf32>, vector<64x256xf32>, vector<64x256xf32> -> vector<576x256xf32>
    %c0_32 = arith.constant 0 : index
    %c0_33 = arith.constant 0 : index
    %61 = vector.load %arg6[%c0_32, %c0_33] : memref<32x576xf32, #tpu.memory_space<vmem>>, vector<32x576xf32>
    %cst_34 = arith.constant dense<0.000000e+00> : vector<32x256xf32>
    %62 = tpu.matmul %61, %60, %cst_34 {dimension_numbers = #tpu.dot_dimension_numbers<[1], [0], [0], [1], [0, 0, 1, 1], [], []>} : vector<32x576xf32>, vector<576x256xf32>, vector<32x256xf32> -> vector<32x256xf32>
    %c0_35 = arith.constant 0 : index
    %c0_36 = arith.constant 0 : index
    %63 = vector.load %arg7[%c0_35, %c0_36] : memref<32x1xf32, #tpu.memory_space<vmem>>, vector<32x1xf32>
    %64 = vector.broadcast %63 : vector<32x1xf32> to vector<32x256xf32>
    %65 = arith.addf %62, %64 : vector<32x256xf32>
    %cst_37 = arith.constant 0.000000e+00 : f32
    %66 = vector.broadcast %cst_37 : f32 to vector<32x256xf32>
    %67 = arith.maximumf %65, %66 : vector<32x256xf32>
    %c17_i32_38 = arith.constant 17 : i32
    %68 = tpu.dynamic_rotate %67 by %c17_i32_38 dim 1 : vector<32x256xf32>, i32 -> vector<32x256xf32>
    %c0_39 = arith.constant 0 : index
    %c0_40 = arith.constant 0 : index
    %69 = vector.load %arg1[%c0_39, %c0_40] : memref<9x256xf32, #tpu.memory_space<vmem>>, vector<1x256xf32>
    %70 = vector.broadcast %69 : vector<1x256xf32> to vector<32x256xf32>
    %71 = arith.mulf %68, %70 : vector<32x256xf32>
    %c16_i32_41 = arith.constant 16 : i32
    %72 = tpu.dynamic_rotate %67 by %c16_i32_41 dim 1 : vector<32x256xf32>, i32 -> vector<32x256xf32>
    %c1_42 = arith.constant 1 : index
    %c0_43 = arith.constant 0 : index
    %73 = vector.load %arg1[%c1_42, %c0_43] : memref<9x256xf32, #tpu.memory_space<vmem>>, vector<1x256xf32>
    %74 = vector.broadcast %73 : vector<1x256xf32> to vector<32x256xf32>
    %75 = arith.mulf %72, %74 : vector<32x256xf32>
    %c15_i32_44 = arith.constant 15 : i32
    %76 = tpu.dynamic_rotate %67 by %c15_i32_44 dim 1 : vector<32x256xf32>, i32 -> vector<32x256xf32>
    %c2_45 = arith.constant 2 : index
    %c0_46 = arith.constant 0 : index
    %77 = vector.load %arg1[%c2_45, %c0_46] : memref<9x256xf32, #tpu.memory_space<vmem>>, vector<1x256xf32>
    %78 = vector.broadcast %77 : vector<1x256xf32> to vector<32x256xf32>
    %79 = arith.mulf %76, %78 : vector<32x256xf32>
    %c1_i32_47 = arith.constant 1 : i32
    %80 = tpu.dynamic_rotate %67 by %c1_i32_47 dim 1 : vector<32x256xf32>, i32 -> vector<32x256xf32>
    %c3_48 = arith.constant 3 : index
    %c0_49 = arith.constant 0 : index
    %81 = vector.load %arg1[%c3_48, %c0_49] : memref<9x256xf32, #tpu.memory_space<vmem>>, vector<1x256xf32>
    %82 = vector.broadcast %81 : vector<1x256xf32> to vector<32x256xf32>
    %83 = arith.mulf %80, %82 : vector<32x256xf32>
    %c255_i32_50 = arith.constant 255 : i32
    %84 = tpu.dynamic_rotate %67 by %c255_i32_50 dim 1 : vector<32x256xf32>, i32 -> vector<32x256xf32>
    %c5_51 = arith.constant 5 : index
    %c0_52 = arith.constant 0 : index
    %85 = vector.load %arg1[%c5_51, %c0_52] : memref<9x256xf32, #tpu.memory_space<vmem>>, vector<1x256xf32>
    %86 = vector.broadcast %85 : vector<1x256xf32> to vector<32x256xf32>
    %87 = arith.mulf %84, %86 : vector<32x256xf32>
    %c241_i32_53 = arith.constant 241 : i32
    %88 = tpu.dynamic_rotate %67 by %c241_i32_53 dim 1 : vector<32x256xf32>, i32 -> vector<32x256xf32>
    %c6_54 = arith.constant 6 : index
    %c0_55 = arith.constant 0 : index
    %89 = vector.load %arg1[%c6_54, %c0_55] : memref<9x256xf32, #tpu.memory_space<vmem>>, vector<1x256xf32>
    %90 = vector.broadcast %89 : vector<1x256xf32> to vector<32x256xf32>
    %91 = arith.mulf %88, %90 : vector<32x256xf32>
    %c240_i32_56 = arith.constant 240 : i32
    %92 = tpu.dynamic_rotate %67 by %c240_i32_56 dim 1 : vector<32x256xf32>, i32 -> vector<32x256xf32>
    %c7_57 = arith.constant 7 : index
    %c0_58 = arith.constant 0 : index
    %93 = vector.load %arg1[%c7_57, %c0_58] : memref<9x256xf32, #tpu.memory_space<vmem>>, vector<1x256xf32>
    %94 = vector.broadcast %93 : vector<1x256xf32> to vector<32x256xf32>
    %95 = arith.mulf %92, %94 : vector<32x256xf32>
    %c239_i32_59 = arith.constant 239 : i32
    %96 = tpu.dynamic_rotate %67 by %c239_i32_59 dim 1 : vector<32x256xf32>, i32 -> vector<32x256xf32>
    %c8_60 = arith.constant 8 : index
    %c0_61 = arith.constant 0 : index
    %97 = vector.load %arg1[%c8_60, %c0_61] : memref<9x256xf32, #tpu.memory_space<vmem>>, vector<1x256xf32>
    %98 = vector.broadcast %97 : vector<1x256xf32> to vector<32x256xf32>
    %99 = arith.mulf %96, %98 : vector<32x256xf32>
    %100 = tpu.concatenate %71, %75, %79, %83, %67, %87, %91, %95, %99 in 0 : vector<32x256xf32>, vector<32x256xf32>, vector<32x256xf32>, vector<32x256xf32>, vector<32x256xf32>, vector<32x256xf32>, vector<32x256xf32>, vector<32x256xf32>, vector<32x256xf32> -> vector<288x256xf32>
    %c0_62 = arith.constant 0 : index
    %c0_63 = arith.constant 0 : index
    %101 = vector.load %arg8[%c0_62, %c0_63] : memref<32x288xf32, #tpu.memory_space<vmem>>, vector<32x288xf32>
    %cst_64 = arith.constant dense<0.000000e+00> : vector<32x256xf32>
    %102 = tpu.matmul %101, %100, %cst_64 {dimension_numbers = #tpu.dot_dimension_numbers<[1], [0], [0], [1], [0, 0, 1, 1], [], []>} : vector<32x288xf32>, vector<288x256xf32>, vector<32x256xf32> -> vector<32x256xf32>
    %c0_65 = arith.constant 0 : index
    %c0_66 = arith.constant 0 : index
    %103 = vector.load %arg9[%c0_65, %c0_66] : memref<32x1xf32, #tpu.memory_space<vmem>>, vector<32x1xf32>
    %104 = vector.broadcast %103 : vector<32x1xf32> to vector<32x256xf32>
    %105 = arith.addf %102, %104 : vector<32x256xf32>
    %106 = arith.addf %105, %27 : vector<32x256xf32>
    %cst_67 = arith.constant 0.000000e+00 : f32
    %107 = vector.broadcast %cst_67 : f32 to vector<32x256xf32>
    %108 = arith.maximumf %106, %107 : vector<32x256xf32>
    %c17_i32_68 = arith.constant 17 : i32
    %109 = tpu.dynamic_rotate %108 by %c17_i32_68 dim 1 : vector<32x256xf32>, i32 -> vector<32x256xf32>
    %c0_69 = arith.constant 0 : index
    %c0_70 = arith.constant 0 : index
    %110 = vector.load %arg1[%c0_69, %c0_70] : memref<9x256xf32, #tpu.memory_space<vmem>>, vector<1x256xf32>
    %111 = vector.broadcast %110 : vector<1x256xf32> to vector<32x256xf32>
    %112 = arith.mulf %109, %111 : vector<32x256xf32>
    %c16_i32_71 = arith.constant 16 : i32
    %113 = tpu.dynamic_rotate %108 by %c16_i32_71 dim 1 : vector<32x256xf32>, i32 -> vector<32x256xf32>
    %c1_72 = arith.constant 1 : index
    %c0_73 = arith.constant 0 : index
    %114 = vector.load %arg1[%c1_72, %c0_73] : memref<9x256xf32, #tpu.memory_space<vmem>>, vector<1x256xf32>
    %115 = vector.broadcast %114 : vector<1x256xf32> to vector<32x256xf32>
    %116 = arith.mulf %113, %115 : vector<32x256xf32>
    %c15_i32_74 = arith.constant 15 : i32
    %117 = tpu.dynamic_rotate %108 by %c15_i32_74 dim 1 : vector<32x256xf32>, i32 -> vector<32x256xf32>
    %c2_75 = arith.constant 2 : index
    %c0_76 = arith.constant 0 : index
    %118 = vector.load %arg1[%c2_75, %c0_76] : memref<9x256xf32, #tpu.memory_space<vmem>>, vector<1x256xf32>
    %119 = vector.broadcast %118 : vector<1x256xf32> to vector<32x256xf32>
    %120 = arith.mulf %117, %119 : vector<32x256xf32>
    %c1_i32_77 = arith.constant 1 : i32
    %121 = tpu.dynamic_rotate %108 by %c1_i32_77 dim 1 : vector<32x256xf32>, i32 -> vector<32x256xf32>
    %c3_78 = arith.constant 3 : index
    %c0_79 = arith.constant 0 : index
    %122 = vector.load %arg1[%c3_78, %c0_79] : memref<9x256xf32, #tpu.memory_space<vmem>>, vector<1x256xf32>
    %123 = vector.broadcast %122 : vector<1x256xf32> to vector<32x256xf32>
    %124 = arith.mulf %121, %123 : vector<32x256xf32>
    %c255_i32_80 = arith.constant 255 : i32
    %125 = tpu.dynamic_rotate %108 by %c255_i32_80 dim 1 : vector<32x256xf32>, i32 -> vector<32x256xf32>
    %c5_81 = arith.constant 5 : index
    %c0_82 = arith.constant 0 : index
    %126 = vector.load %arg1[%c5_81, %c0_82] : memref<9x256xf32, #tpu.memory_space<vmem>>, vector<1x256xf32>
    %127 = vector.broadcast %126 : vector<1x256xf32> to vector<32x256xf32>
    %128 = arith.mulf %125, %127 : vector<32x256xf32>
    %c241_i32_83 = arith.constant 241 : i32
    %129 = tpu.dynamic_rotate %108 by %c241_i32_83 dim 1 : vector<32x256xf32>, i32 -> vector<32x256xf32>
    %c6_84 = arith.constant 6 : index
    %c0_85 = arith.constant 0 : index
    %130 = vector.load %arg1[%c6_84, %c0_85] : memref<9x256xf32, #tpu.memory_space<vmem>>, vector<1x256xf32>
    %131 = vector.broadcast %130 : vector<1x256xf32> to vector<32x256xf32>
    %132 = arith.mulf %129, %131 : vector<32x256xf32>
    %c240_i32_86 = arith.constant 240 : i32
    %133 = tpu.dynamic_rotate %108 by %c240_i32_86 dim 1 : vector<32x256xf32>, i32 -> vector<32x256xf32>
    %c7_87 = arith.constant 7 : index
    %c0_88 = arith.constant 0 : index
    %134 = vector.load %arg1[%c7_87, %c0_88] : memref<9x256xf32, #tpu.memory_space<vmem>>, vector<1x256xf32>
    %135 = vector.broadcast %134 : vector<1x256xf32> to vector<32x256xf32>
    %136 = arith.mulf %133, %135 : vector<32x256xf32>
    %c239_i32_89 = arith.constant 239 : i32
    %137 = tpu.dynamic_rotate %108 by %c239_i32_89 dim 1 : vector<32x256xf32>, i32 -> vector<32x256xf32>
    %c8_90 = arith.constant 8 : index
    %c0_91 = arith.constant 0 : index
    %138 = vector.load %arg1[%c8_90, %c0_91] : memref<9x256xf32, #tpu.memory_space<vmem>>, vector<1x256xf32>
    %139 = vector.broadcast %138 : vector<1x256xf32> to vector<32x256xf32>
    %140 = arith.mulf %137, %139 : vector<32x256xf32>
    %141 = tpu.concatenate %112, %116, %120, %124, %108, %128, %132, %136, %140 in 0 : vector<32x256xf32>, vector<32x256xf32>, vector<32x256xf32>, vector<32x256xf32>, vector<32x256xf32>, vector<32x256xf32>, vector<32x256xf32>, vector<32x256xf32>, vector<32x256xf32> -> vector<288x256xf32>
    %c0_92 = arith.constant 0 : index
    %c0_93 = arith.constant 0 : index
    %142 = vector.load %arg12[%c0_92, %c0_93] : memref<32x288xf32, #tpu.memory_space<vmem>>, vector<32x288xf32>
    %cst_94 = arith.constant dense<0.000000e+00> : vector<32x256xf32>
    %143 = tpu.matmul %142, %141, %cst_94 {dimension_numbers = #tpu.dot_dimension_numbers<[1], [0], [0], [1], [0, 0, 1, 1], [], []>} : vector<32x288xf32>, vector<288x256xf32>, vector<32x256xf32> -> vector<32x256xf32>
    %c0_95 = arith.constant 0 : index
    %c0_96 = arith.constant 0 : index
    %144 = vector.load %arg13[%c0_95, %c0_96] : memref<32x1xf32, #tpu.memory_space<vmem>>, vector<32x1xf32>
    %145 = vector.broadcast %144 : vector<32x1xf32> to vector<32x256xf32>
    %146 = arith.addf %143, %145 : vector<32x256xf32>
    %cst_97 = arith.constant 0.000000e+00 : f32
    %147 = vector.broadcast %cst_97 : f32 to vector<32x256xf32>
    %148 = arith.maximumf %146, %147 : vector<32x256xf32>
    %c17_i32_98 = arith.constant 17 : i32
    %149 = tpu.dynamic_rotate %148 by %c17_i32_98 dim 1 : vector<32x256xf32>, i32 -> vector<32x256xf32>
    %c0_99 = arith.constant 0 : index
    %c0_100 = arith.constant 0 : index
    %150 = vector.load %arg1[%c0_99, %c0_100] : memref<9x256xf32, #tpu.memory_space<vmem>>, vector<1x256xf32>
    %151 = vector.broadcast %150 : vector<1x256xf32> to vector<32x256xf32>
    %152 = arith.mulf %149, %151 : vector<32x256xf32>
    %c16_i32_101 = arith.constant 16 : i32
    %153 = tpu.dynamic_rotate %148 by %c16_i32_101 dim 1 : vector<32x256xf32>, i32 -> vector<32x256xf32>
    %c1_102 = arith.constant 1 : index
    %c0_103 = arith.constant 0 : index
    %154 = vector.load %arg1[%c1_102, %c0_103] : memref<9x256xf32, #tpu.memory_space<vmem>>, vector<1x256xf32>
    %155 = vector.broadcast %154 : vector<1x256xf32> to vector<32x256xf32>
    %156 = arith.mulf %153, %155 : vector<32x256xf32>
    %c15_i32_104 = arith.constant 15 : i32
    %157 = tpu.dynamic_rotate %148 by %c15_i32_104 dim 1 : vector<32x256xf32>, i32 -> vector<32x256xf32>
    %c2_105 = arith.constant 2 : index
    %c0_106 = arith.constant 0 : index
    %158 = vector.load %arg1[%c2_105, %c0_106] : memref<9x256xf32, #tpu.memory_space<vmem>>, vector<1x256xf32>
    %159 = vector.broadcast %158 : vector<1x256xf32> to vector<32x256xf32>
    %160 = arith.mulf %157, %159 : vector<32x256xf32>
    %c1_i32_107 = arith.constant 1 : i32
    %161 = tpu.dynamic_rotate %148 by %c1_i32_107 dim 1 : vector<32x256xf32>, i32 -> vector<32x256xf32>
    %c3_108 = arith.constant 3 : index
    %c0_109 = arith.constant 0 : index
    %162 = vector.load %arg1[%c3_108, %c0_109] : memref<9x256xf32, #tpu.memory_space<vmem>>, vector<1x256xf32>
    %163 = vector.broadcast %162 : vector<1x256xf32> to vector<32x256xf32>
    %164 = arith.mulf %161, %163 : vector<32x256xf32>
    %c255_i32_110 = arith.constant 255 : i32
    %165 = tpu.dynamic_rotate %148 by %c255_i32_110 dim 1 : vector<32x256xf32>, i32 -> vector<32x256xf32>
    %c5_111 = arith.constant 5 : index
    %c0_112 = arith.constant 0 : index
    %166 = vector.load %arg1[%c5_111, %c0_112] : memref<9x256xf32, #tpu.memory_space<vmem>>, vector<1x256xf32>
    %167 = vector.broadcast %166 : vector<1x256xf32> to vector<32x256xf32>
    %168 = arith.mulf %165, %167 : vector<32x256xf32>
    %c241_i32_113 = arith.constant 241 : i32
    %169 = tpu.dynamic_rotate %148 by %c241_i32_113 dim 1 : vector<32x256xf32>, i32 -> vector<32x256xf32>
    %c6_114 = arith.constant 6 : index
    %c0_115 = arith.constant 0 : index
    %170 = vector.load %arg1[%c6_114, %c0_115] : memref<9x256xf32, #tpu.memory_space<vmem>>, vector<1x256xf32>
    %171 = vector.broadcast %170 : vector<1x256xf32> to vector<32x256xf32>
    %172 = arith.mulf %169, %171 : vector<32x256xf32>
    %c240_i32_116 = arith.constant 240 : i32
    %173 = tpu.dynamic_rotate %148 by %c240_i32_116 dim 1 : vector<32x256xf32>, i32 -> vector<32x256xf32>
    %c7_117 = arith.constant 7 : index
    %c0_118 = arith.constant 0 : index
    %174 = vector.load %arg1[%c7_117, %c0_118] : memref<9x256xf32, #tpu.memory_space<vmem>>, vector<1x256xf32>
    %175 = vector.broadcast %174 : vector<1x256xf32> to vector<32x256xf32>
    %176 = arith.mulf %173, %175 : vector<32x256xf32>
    %c239_i32_119 = arith.constant 239 : i32
    %177 = tpu.dynamic_rotate %148 by %c239_i32_119 dim 1 : vector<32x256xf32>, i32 -> vector<32x256xf32>
    %c8_120 = arith.constant 8 : index
    %c0_121 = arith.constant 0 : index
    %178 = vector.load %arg1[%c8_120, %c0_121] : memref<9x256xf32, #tpu.memory_space<vmem>>, vector<1x256xf32>
    %179 = vector.broadcast %178 : vector<1x256xf32> to vector<32x256xf32>
    %180 = arith.mulf %177, %179 : vector<32x256xf32>
    %181 = tpu.concatenate %152, %156, %160, %164, %148, %168, %172, %176, %180 in 0 : vector<32x256xf32>, vector<32x256xf32>, vector<32x256xf32>, vector<32x256xf32>, vector<32x256xf32>, vector<32x256xf32>, vector<32x256xf32>, vector<32x256xf32>, vector<32x256xf32> -> vector<288x256xf32>
    %c0_122 = arith.constant 0 : index
    %c0_123 = arith.constant 0 : index
    %182 = vector.load %arg14[%c0_122, %c0_123] : memref<32x288xf32, #tpu.memory_space<vmem>>, vector<32x288xf32>
    %cst_124 = arith.constant dense<0.000000e+00> : vector<32x256xf32>
    %183 = tpu.matmul %182, %181, %cst_124 {dimension_numbers = #tpu.dot_dimension_numbers<[1], [0], [0], [1], [0, 0, 1, 1], [], []>} : vector<32x288xf32>, vector<288x256xf32>, vector<32x256xf32> -> vector<32x256xf32>
    %c0_125 = arith.constant 0 : index
    %c0_126 = arith.constant 0 : index
    %184 = vector.load %arg15[%c0_125, %c0_126] : memref<32x1xf32, #tpu.memory_space<vmem>>, vector<32x1xf32>
    %185 = vector.broadcast %184 : vector<32x1xf32> to vector<32x256xf32>
    %186 = arith.addf %183, %185 : vector<32x256xf32>
    %187 = arith.addf %186, %108 : vector<32x256xf32>
    %cst_127 = arith.constant 0.000000e+00 : f32
    %188 = vector.broadcast %cst_127 : f32 to vector<32x256xf32>
    %189 = arith.maximumf %187, %188 : vector<32x256xf32>
    %c17_i32_128 = arith.constant 17 : i32
    %190 = tpu.dynamic_rotate %189 by %c17_i32_128 dim 1 : vector<32x256xf32>, i32 -> vector<32x256xf32>
    %c0_129 = arith.constant 0 : index
    %c0_130 = arith.constant 0 : index
    %191 = vector.load %arg1[%c0_129, %c0_130] : memref<9x256xf32, #tpu.memory_space<vmem>>, vector<1x256xf32>
    %192 = vector.broadcast %191 : vector<1x256xf32> to vector<32x256xf32>
    %193 = arith.mulf %190, %192 : vector<32x256xf32>
    %c16_i32_131 = arith.constant 16 : i32
    %194 = tpu.dynamic_rotate %189 by %c16_i32_131 dim 1 : vector<32x256xf32>, i32 -> vector<32x256xf32>
    %c1_132 = arith.constant 1 : index
    %c0_133 = arith.constant 0 : index
    %195 = vector.load %arg1[%c1_132, %c0_133] : memref<9x256xf32, #tpu.memory_space<vmem>>, vector<1x256xf32>
    %196 = vector.broadcast %195 : vector<1x256xf32> to vector<32x256xf32>
    %197 = arith.mulf %194, %196 : vector<32x256xf32>
    %c15_i32_134 = arith.constant 15 : i32
    %198 = tpu.dynamic_rotate %189 by %c15_i32_134 dim 1 : vector<32x256xf32>, i32 -> vector<32x256xf32>
    %c2_135 = arith.constant 2 : index
    %c0_136 = arith.constant 0 : index
    %199 = vector.load %arg1[%c2_135, %c0_136] : memref<9x256xf32, #tpu.memory_space<vmem>>, vector<1x256xf32>
    %200 = vector.broadcast %199 : vector<1x256xf32> to vector<32x256xf32>
    %201 = arith.mulf %198, %200 : vector<32x256xf32>
    %c1_i32_137 = arith.constant 1 : i32
    %202 = tpu.dynamic_rotate %189 by %c1_i32_137 dim 1 : vector<32x256xf32>, i32 -> vector<32x256xf32>
    %c3_138 = arith.constant 3 : index
    %c0_139 = arith.constant 0 : index
    %203 = vector.load %arg1[%c3_138, %c0_139] : memref<9x256xf32, #tpu.memory_space<vmem>>, vector<1x256xf32>
    %204 = vector.broadcast %203 : vector<1x256xf32> to vector<32x256xf32>
    %205 = arith.mulf %202, %204 : vector<32x256xf32>
    %c255_i32_140 = arith.constant 255 : i32
    %206 = tpu.dynamic_rotate %189 by %c255_i32_140 dim 1 : vector<32x256xf32>, i32 -> vector<32x256xf32>
    %c5_141 = arith.constant 5 : index
    %c0_142 = arith.constant 0 : index
    %207 = vector.load %arg1[%c5_141, %c0_142] : memref<9x256xf32, #tpu.memory_space<vmem>>, vector<1x256xf32>
    %208 = vector.broadcast %207 : vector<1x256xf32> to vector<32x256xf32>
    %209 = arith.mulf %206, %208 : vector<32x256xf32>
    %c241_i32_143 = arith.constant 241 : i32
    %210 = tpu.dynamic_rotate %189 by %c241_i32_143 dim 1 : vector<32x256xf32>, i32 -> vector<32x256xf32>
    %c6_144 = arith.constant 6 : index
    %c0_145 = arith.constant 0 : index
    %211 = vector.load %arg1[%c6_144, %c0_145] : memref<9x256xf32, #tpu.memory_space<vmem>>, vector<1x256xf32>
    %212 = vector.broadcast %211 : vector<1x256xf32> to vector<32x256xf32>
    %213 = arith.mulf %210, %212 : vector<32x256xf32>
    %c240_i32_146 = arith.constant 240 : i32
    %214 = tpu.dynamic_rotate %189 by %c240_i32_146 dim 1 : vector<32x256xf32>, i32 -> vector<32x256xf32>
    %c7_147 = arith.constant 7 : index
    %c0_148 = arith.constant 0 : index
    %215 = vector.load %arg1[%c7_147, %c0_148] : memref<9x256xf32, #tpu.memory_space<vmem>>, vector<1x256xf32>
    %216 = vector.broadcast %215 : vector<1x256xf32> to vector<32x256xf32>
    %217 = arith.mulf %214, %216 : vector<32x256xf32>
    %c239_i32_149 = arith.constant 239 : i32
    %218 = tpu.dynamic_rotate %189 by %c239_i32_149 dim 1 : vector<32x256xf32>, i32 -> vector<32x256xf32>
    %c8_150 = arith.constant 8 : index
    %c0_151 = arith.constant 0 : index
    %219 = vector.load %arg1[%c8_150, %c0_151] : memref<9x256xf32, #tpu.memory_space<vmem>>, vector<1x256xf32>
    %220 = vector.broadcast %219 : vector<1x256xf32> to vector<32x256xf32>
    %221 = arith.mulf %218, %220 : vector<32x256xf32>
    %222 = tpu.concatenate %193, %197, %201, %205, %189, %209, %213, %217, %221 in 0 : vector<32x256xf32>, vector<32x256xf32>, vector<32x256xf32>, vector<32x256xf32>, vector<32x256xf32>, vector<32x256xf32>, vector<32x256xf32>, vector<32x256xf32>, vector<32x256xf32> -> vector<288x256xf32>
    %c0_152 = arith.constant 0 : index
    %c0_153 = arith.constant 0 : index
    %223 = vector.load %arg16[%c0_152, %c0_153] : memref<32x288xf32, #tpu.memory_space<vmem>>, vector<32x288xf32>
    %cst_154 = arith.constant dense<0.000000e+00> : vector<32x256xf32>
    %224 = tpu.matmul %223, %222, %cst_154 {dimension_numbers = #tpu.dot_dimension_numbers<[1], [0], [0], [1], [0, 0, 1, 1], [], []>} : vector<32x288xf32>, vector<288x256xf32>, vector<32x256xf32> -> vector<32x256xf32>
    %c0_155 = arith.constant 0 : index
    %c0_156 = arith.constant 0 : index
    %225 = vector.load %arg17[%c0_155, %c0_156] : memref<32x1xf32, #tpu.memory_space<vmem>>, vector<32x1xf32>
    %226 = vector.broadcast %225 : vector<32x1xf32> to vector<32x256xf32>
    %227 = arith.addf %224, %226 : vector<32x256xf32>
    %cst_157 = arith.constant 0.000000e+00 : f32
    %228 = vector.broadcast %cst_157 : f32 to vector<32x256xf32>
    %229 = arith.maximumf %227, %228 : vector<32x256xf32>
    %c17_i32_158 = arith.constant 17 : i32
    %230 = tpu.dynamic_rotate %229 by %c17_i32_158 dim 1 : vector<32x256xf32>, i32 -> vector<32x256xf32>
    %c0_159 = arith.constant 0 : index
    %c0_160 = arith.constant 0 : index
    %231 = vector.load %arg1[%c0_159, %c0_160] : memref<9x256xf32, #tpu.memory_space<vmem>>, vector<1x256xf32>
    %232 = vector.broadcast %231 : vector<1x256xf32> to vector<32x256xf32>
    %233 = arith.mulf %230, %232 : vector<32x256xf32>
    %c16_i32_161 = arith.constant 16 : i32
    %234 = tpu.dynamic_rotate %229 by %c16_i32_161 dim 1 : vector<32x256xf32>, i32 -> vector<32x256xf32>
    %c1_162 = arith.constant 1 : index
    %c0_163 = arith.constant 0 : index
    %235 = vector.load %arg1[%c1_162, %c0_163] : memref<9x256xf32, #tpu.memory_space<vmem>>, vector<1x256xf32>
    %236 = vector.broadcast %235 : vector<1x256xf32> to vector<32x256xf32>
    %237 = arith.mulf %234, %236 : vector<32x256xf32>
    %c15_i32_164 = arith.constant 15 : i32
    %238 = tpu.dynamic_rotate %229 by %c15_i32_164 dim 1 : vector<32x256xf32>, i32 -> vector<32x256xf32>
    %c2_165 = arith.constant 2 : index
    %c0_166 = arith.constant 0 : index
    %239 = vector.load %arg1[%c2_165, %c0_166] : memref<9x256xf32, #tpu.memory_space<vmem>>, vector<1x256xf32>
    %240 = vector.broadcast %239 : vector<1x256xf32> to vector<32x256xf32>
    %241 = arith.mulf %238, %240 : vector<32x256xf32>
    %c1_i32_167 = arith.constant 1 : i32
    %242 = tpu.dynamic_rotate %229 by %c1_i32_167 dim 1 : vector<32x256xf32>, i32 -> vector<32x256xf32>
    %c3_168 = arith.constant 3 : index
    %c0_169 = arith.constant 0 : index
    %243 = vector.load %arg1[%c3_168, %c0_169] : memref<9x256xf32, #tpu.memory_space<vmem>>, vector<1x256xf32>
    %244 = vector.broadcast %243 : vector<1x256xf32> to vector<32x256xf32>
    %245 = arith.mulf %242, %244 : vector<32x256xf32>
    %c255_i32_170 = arith.constant 255 : i32
    %246 = tpu.dynamic_rotate %229 by %c255_i32_170 dim 1 : vector<32x256xf32>, i32 -> vector<32x256xf32>
    %c5_171 = arith.constant 5 : index
    %c0_172 = arith.constant 0 : index
    %247 = vector.load %arg1[%c5_171, %c0_172] : memref<9x256xf32, #tpu.memory_space<vmem>>, vector<1x256xf32>
    %248 = vector.broadcast %247 : vector<1x256xf32> to vector<32x256xf32>
    %249 = arith.mulf %246, %248 : vector<32x256xf32>
    %c241_i32_173 = arith.constant 241 : i32
    %250 = tpu.dynamic_rotate %229 by %c241_i32_173 dim 1 : vector<32x256xf32>, i32 -> vector<32x256xf32>
    %c6_174 = arith.constant 6 : index
    %c0_175 = arith.constant 0 : index
    %251 = vector.load %arg1[%c6_174, %c0_175] : memref<9x256xf32, #tpu.memory_space<vmem>>, vector<1x256xf32>
    %252 = vector.broadcast %251 : vector<1x256xf32> to vector<32x256xf32>
    %253 = arith.mulf %250, %252 : vector<32x256xf32>
    %c240_i32_176 = arith.constant 240 : i32
    %254 = tpu.dynamic_rotate %229 by %c240_i32_176 dim 1 : vector<32x256xf32>, i32 -> vector<32x256xf32>
    %c7_177 = arith.constant 7 : index
    %c0_178 = arith.constant 0 : index
    %255 = vector.load %arg1[%c7_177, %c0_178] : memref<9x256xf32, #tpu.memory_space<vmem>>, vector<1x256xf32>
    %256 = vector.broadcast %255 : vector<1x256xf32> to vector<32x256xf32>
    %257 = arith.mulf %254, %256 : vector<32x256xf32>
    %c239_i32_179 = arith.constant 239 : i32
    %258 = tpu.dynamic_rotate %229 by %c239_i32_179 dim 1 : vector<32x256xf32>, i32 -> vector<32x256xf32>
    %c8_180 = arith.constant 8 : index
    %c0_181 = arith.constant 0 : index
    %259 = vector.load %arg1[%c8_180, %c0_181] : memref<9x256xf32, #tpu.memory_space<vmem>>, vector<1x256xf32>
    %260 = vector.broadcast %259 : vector<1x256xf32> to vector<32x256xf32>
    %261 = arith.mulf %258, %260 : vector<32x256xf32>
    %262 = tpu.concatenate %233, %237, %241, %245, %229, %249, %253, %257, %261 in 0 : vector<32x256xf32>, vector<32x256xf32>, vector<32x256xf32>, vector<32x256xf32>, vector<32x256xf32>, vector<32x256xf32>, vector<32x256xf32>, vector<32x256xf32>, vector<32x256xf32> -> vector<288x256xf32>
    %c0_182 = arith.constant 0 : index
    %c0_183 = arith.constant 0 : index
    %263 = vector.load %arg18[%c0_182, %c0_183] : memref<32x288xf32, #tpu.memory_space<vmem>>, vector<32x288xf32>
    %cst_184 = arith.constant dense<0.000000e+00> : vector<32x256xf32>
    %264 = tpu.matmul %263, %262, %cst_184 {dimension_numbers = #tpu.dot_dimension_numbers<[1], [0], [0], [1], [0, 0, 1, 1], [], []>} : vector<32x288xf32>, vector<288x256xf32>, vector<32x256xf32> -> vector<32x256xf32>
    %c0_185 = arith.constant 0 : index
    %c0_186 = arith.constant 0 : index
    %265 = vector.load %arg19[%c0_185, %c0_186] : memref<32x1xf32, #tpu.memory_space<vmem>>, vector<32x1xf32>
    %266 = vector.broadcast %265 : vector<32x1xf32> to vector<32x256xf32>
    %267 = arith.addf %264, %266 : vector<32x256xf32>
    %268 = arith.addf %267, %189 : vector<32x256xf32>
    %cst_187 = arith.constant 0.000000e+00 : f32
    %269 = vector.broadcast %cst_187 : f32 to vector<32x256xf32>
    %270 = arith.maximumf %268, %269 : vector<32x256xf32>
    %c17_i32_188 = arith.constant 17 : i32
    %271 = tpu.dynamic_rotate %270 by %c17_i32_188 dim 1 : vector<32x256xf32>, i32 -> vector<32x256xf32>
    %c0_189 = arith.constant 0 : index
    %c0_190 = arith.constant 0 : index
    %272 = vector.load %arg1[%c0_189, %c0_190] : memref<9x256xf32, #tpu.memory_space<vmem>>, vector<1x256xf32>
    %273 = vector.broadcast %272 : vector<1x256xf32> to vector<32x256xf32>
    %274 = arith.mulf %271, %273 : vector<32x256xf32>
    %c16_i32_191 = arith.constant 16 : i32
    %275 = tpu.dynamic_rotate %270 by %c16_i32_191 dim 1 : vector<32x256xf32>, i32 -> vector<32x256xf32>
    %c1_192 = arith.constant 1 : index
    %c0_193 = arith.constant 0 : index
    %276 = vector.load %arg1[%c1_192, %c0_193] : memref<9x256xf32, #tpu.memory_space<vmem>>, vector<1x256xf32>
    %277 = vector.broadcast %276 : vector<1x256xf32> to vector<32x256xf32>
    %278 = arith.mulf %275, %277 : vector<32x256xf32>
    %c15_i32_194 = arith.constant 15 : i32
    %279 = tpu.dynamic_rotate %270 by %c15_i32_194 dim 1 : vector<32x256xf32>, i32 -> vector<32x256xf32>
    %c2_195 = arith.constant 2 : index
    %c0_196 = arith.constant 0 : index
    %280 = vector.load %arg1[%c2_195, %c0_196] : memref<9x256xf32, #tpu.memory_space<vmem>>, vector<1x256xf32>
    %281 = vector.broadcast %280 : vector<1x256xf32> to vector<32x256xf32>
    %282 = arith.mulf %279, %281 : vector<32x256xf32>
    %c1_i32_197 = arith.constant 1 : i32
    %283 = tpu.dynamic_rotate %270 by %c1_i32_197 dim 1 : vector<32x256xf32>, i32 -> vector<32x256xf32>
    %c3_198 = arith.constant 3 : index
    %c0_199 = arith.constant 0 : index
    %284 = vector.load %arg1[%c3_198, %c0_199] : memref<9x256xf32, #tpu.memory_space<vmem>>, vector<1x256xf32>
    %285 = vector.broadcast %284 : vector<1x256xf32> to vector<32x256xf32>
    %286 = arith.mulf %283, %285 : vector<32x256xf32>
    %c255_i32_200 = arith.constant 255 : i32
    %287 = tpu.dynamic_rotate %270 by %c255_i32_200 dim 1 : vector<32x256xf32>, i32 -> vector<32x256xf32>
    %c5_201 = arith.constant 5 : index
    %c0_202 = arith.constant 0 : index
    %288 = vector.load %arg1[%c5_201, %c0_202] : memref<9x256xf32, #tpu.memory_space<vmem>>, vector<1x256xf32>
    %289 = vector.broadcast %288 : vector<1x256xf32> to vector<32x256xf32>
    %290 = arith.mulf %287, %289 : vector<32x256xf32>
    %c241_i32_203 = arith.constant 241 : i32
    %291 = tpu.dynamic_rotate %270 by %c241_i32_203 dim 1 : vector<32x256xf32>, i32 -> vector<32x256xf32>
    %c6_204 = arith.constant 6 : index
    %c0_205 = arith.constant 0 : index
    %292 = vector.load %arg1[%c6_204, %c0_205] : memref<9x256xf32, #tpu.memory_space<vmem>>, vector<1x256xf32>
    %293 = vector.broadcast %292 : vector<1x256xf32> to vector<32x256xf32>
    %294 = arith.mulf %291, %293 : vector<32x256xf32>
    %c240_i32_206 = arith.constant 240 : i32
    %295 = tpu.dynamic_rotate %270 by %c240_i32_206 dim 1 : vector<32x256xf32>, i32 -> vector<32x256xf32>
    %c7_207 = arith.constant 7 : index
    %c0_208 = arith.constant 0 : index
    %296 = vector.load %arg1[%c7_207, %c0_208] : memref<9x256xf32, #tpu.memory_space<vmem>>, vector<1x256xf32>
    %297 = vector.broadcast %296 : vector<1x256xf32> to vector<32x256xf32>
    %298 = arith.mulf %295, %297 : vector<32x256xf32>
    %c239_i32_209 = arith.constant 239 : i32
    %299 = tpu.dynamic_rotate %270 by %c239_i32_209 dim 1 : vector<32x256xf32>, i32 -> vector<32x256xf32>
    %c8_210 = arith.constant 8 : index
    %c0_211 = arith.constant 0 : index
    %300 = vector.load %arg1[%c8_210, %c0_211] : memref<9x256xf32, #tpu.memory_space<vmem>>, vector<1x256xf32>
    %301 = vector.broadcast %300 : vector<1x256xf32> to vector<32x256xf32>
    %302 = arith.mulf %299, %301 : vector<32x256xf32>
    %303 = tpu.concatenate %274, %278, %282, %286, %270, %290, %294, %298, %302 in 0 : vector<32x256xf32>, vector<32x256xf32>, vector<32x256xf32>, vector<32x256xf32>, vector<32x256xf32>, vector<32x256xf32>, vector<32x256xf32>, vector<32x256xf32>, vector<32x256xf32> -> vector<288x256xf32>
    %c0_212 = arith.constant 0 : index
    %c0_213 = arith.constant 0 : index
    %304 = vector.load %arg20[%c0_212, %c0_213] : memref<32x288xf32, #tpu.memory_space<vmem>>, vector<32x288xf32>
    %cst_214 = arith.constant dense<0.000000e+00> : vector<32x256xf32>
    %305 = tpu.matmul %304, %303, %cst_214 {dimension_numbers = #tpu.dot_dimension_numbers<[1], [0], [0], [1], [0, 0, 1, 1], [], []>} : vector<32x288xf32>, vector<288x256xf32>, vector<32x256xf32> -> vector<32x256xf32>
    %c0_215 = arith.constant 0 : index
    %c0_216 = arith.constant 0 : index
    %306 = vector.load %arg21[%c0_215, %c0_216] : memref<32x1xf32, #tpu.memory_space<vmem>>, vector<32x1xf32>
    %307 = vector.broadcast %306 : vector<32x1xf32> to vector<32x256xf32>
    %308 = arith.addf %305, %307 : vector<32x256xf32>
    %cst_217 = arith.constant 0.000000e+00 : f32
    %309 = vector.broadcast %cst_217 : f32 to vector<32x256xf32>
    %310 = arith.maximumf %308, %309 : vector<32x256xf32>
    %c17_i32_218 = arith.constant 17 : i32
    %311 = tpu.dynamic_rotate %310 by %c17_i32_218 dim 1 : vector<32x256xf32>, i32 -> vector<32x256xf32>
    %c0_219 = arith.constant 0 : index
    %c0_220 = arith.constant 0 : index
    %312 = vector.load %arg1[%c0_219, %c0_220] : memref<9x256xf32, #tpu.memory_space<vmem>>, vector<1x256xf32>
    %313 = vector.broadcast %312 : vector<1x256xf32> to vector<32x256xf32>
    %314 = arith.mulf %311, %313 : vector<32x256xf32>
    %c16_i32_221 = arith.constant 16 : i32
    %315 = tpu.dynamic_rotate %310 by %c16_i32_221 dim 1 : vector<32x256xf32>, i32 -> vector<32x256xf32>
    %c1_222 = arith.constant 1 : index
    %c0_223 = arith.constant 0 : index
    %316 = vector.load %arg1[%c1_222, %c0_223] : memref<9x256xf32, #tpu.memory_space<vmem>>, vector<1x256xf32>
    %317 = vector.broadcast %316 : vector<1x256xf32> to vector<32x256xf32>
    %318 = arith.mulf %315, %317 : vector<32x256xf32>
    %c15_i32_224 = arith.constant 15 : i32
    %319 = tpu.dynamic_rotate %310 by %c15_i32_224 dim 1 : vector<32x256xf32>, i32 -> vector<32x256xf32>
    %c2_225 = arith.constant 2 : index
    %c0_226 = arith.constant 0 : index
    %320 = vector.load %arg1[%c2_225, %c0_226] : memref<9x256xf32, #tpu.memory_space<vmem>>, vector<1x256xf32>
    %321 = vector.broadcast %320 : vector<1x256xf32> to vector<32x256xf32>
    %322 = arith.mulf %319, %321 : vector<32x256xf32>
    %c1_i32_227 = arith.constant 1 : i32
    %323 = tpu.dynamic_rotate %310 by %c1_i32_227 dim 1 : vector<32x256xf32>, i32 -> vector<32x256xf32>
    %c3_228 = arith.constant 3 : index
    %c0_229 = arith.constant 0 : index
    %324 = vector.load %arg1[%c3_228, %c0_229] : memref<9x256xf32, #tpu.memory_space<vmem>>, vector<1x256xf32>
    %325 = vector.broadcast %324 : vector<1x256xf32> to vector<32x256xf32>
    %326 = arith.mulf %323, %325 : vector<32x256xf32>
    %c255_i32_230 = arith.constant 255 : i32
    %327 = tpu.dynamic_rotate %310 by %c255_i32_230 dim 1 : vector<32x256xf32>, i32 -> vector<32x256xf32>
    %c5_231 = arith.constant 5 : index
    %c0_232 = arith.constant 0 : index
    %328 = vector.load %arg1[%c5_231, %c0_232] : memref<9x256xf32, #tpu.memory_space<vmem>>, vector<1x256xf32>
    %329 = vector.broadcast %328 : vector<1x256xf32> to vector<32x256xf32>
    %330 = arith.mulf %327, %329 : vector<32x256xf32>
    %c241_i32_233 = arith.constant 241 : i32
    %331 = tpu.dynamic_rotate %310 by %c241_i32_233 dim 1 : vector<32x256xf32>, i32 -> vector<32x256xf32>
    %c6_234 = arith.constant 6 : index
    %c0_235 = arith.constant 0 : index
    %332 = vector.load %arg1[%c6_234, %c0_235] : memref<9x256xf32, #tpu.memory_space<vmem>>, vector<1x256xf32>
    %333 = vector.broadcast %332 : vector<1x256xf32> to vector<32x256xf32>
    %334 = arith.mulf %331, %333 : vector<32x256xf32>
    %c240_i32_236 = arith.constant 240 : i32
    %335 = tpu.dynamic_rotate %310 by %c240_i32_236 dim 1 : vector<32x256xf32>, i32 -> vector<32x256xf32>
    %c7_237 = arith.constant 7 : index
    %c0_238 = arith.constant 0 : index
    %336 = vector.load %arg1[%c7_237, %c0_238] : memref<9x256xf32, #tpu.memory_space<vmem>>, vector<1x256xf32>
    %337 = vector.broadcast %336 : vector<1x256xf32> to vector<32x256xf32>
    %338 = arith.mulf %335, %337 : vector<32x256xf32>
    %c239_i32_239 = arith.constant 239 : i32
    %339 = tpu.dynamic_rotate %310 by %c239_i32_239 dim 1 : vector<32x256xf32>, i32 -> vector<32x256xf32>
    %c8_240 = arith.constant 8 : index
    %c0_241 = arith.constant 0 : index
    %340 = vector.load %arg1[%c8_240, %c0_241] : memref<9x256xf32, #tpu.memory_space<vmem>>, vector<1x256xf32>
    %341 = vector.broadcast %340 : vector<1x256xf32> to vector<32x256xf32>
    %342 = arith.mulf %339, %341 : vector<32x256xf32>
    %343 = tpu.concatenate %314, %318, %322, %326, %310, %330, %334, %338, %342 in 0 : vector<32x256xf32>, vector<32x256xf32>, vector<32x256xf32>, vector<32x256xf32>, vector<32x256xf32>, vector<32x256xf32>, vector<32x256xf32>, vector<32x256xf32>, vector<32x256xf32> -> vector<288x256xf32>
    %c0_242 = arith.constant 0 : index
    %c0_243 = arith.constant 0 : index
    %344 = vector.load %arg22[%c0_242, %c0_243] : memref<32x288xf32, #tpu.memory_space<vmem>>, vector<32x288xf32>
    %cst_244 = arith.constant dense<0.000000e+00> : vector<32x256xf32>
    %345 = tpu.matmul %344, %343, %cst_244 {dimension_numbers = #tpu.dot_dimension_numbers<[1], [0], [0], [1], [0, 0, 1, 1], [], []>} : vector<32x288xf32>, vector<288x256xf32>, vector<32x256xf32> -> vector<32x256xf32>
    %c0_245 = arith.constant 0 : index
    %c0_246 = arith.constant 0 : index
    %346 = vector.load %arg23[%c0_245, %c0_246] : memref<32x1xf32, #tpu.memory_space<vmem>>, vector<32x1xf32>
    %347 = vector.broadcast %346 : vector<32x1xf32> to vector<32x256xf32>
    %348 = arith.addf %345, %347 : vector<32x256xf32>
    %349 = arith.addf %348, %270 : vector<32x256xf32>
    %cst_247 = arith.constant 0.000000e+00 : f32
    %350 = vector.broadcast %cst_247 : f32 to vector<32x256xf32>
    %351 = arith.maximumf %349, %350 : vector<32x256xf32>
    %c17_i32_248 = arith.constant 17 : i32
    %352 = tpu.dynamic_rotate %351 by %c17_i32_248 dim 1 : vector<32x256xf32>, i32 -> vector<32x256xf32>
    %c0_249 = arith.constant 0 : index
    %c0_250 = arith.constant 0 : index
    %353 = vector.load %arg1[%c0_249, %c0_250] : memref<9x256xf32, #tpu.memory_space<vmem>>, vector<1x256xf32>
    %354 = vector.broadcast %353 : vector<1x256xf32> to vector<32x256xf32>
    %355 = arith.mulf %352, %354 : vector<32x256xf32>
    %c16_i32_251 = arith.constant 16 : i32
    %356 = tpu.dynamic_rotate %351 by %c16_i32_251 dim 1 : vector<32x256xf32>, i32 -> vector<32x256xf32>
    %c1_252 = arith.constant 1 : index
    %c0_253 = arith.constant 0 : index
    %357 = vector.load %arg1[%c1_252, %c0_253] : memref<9x256xf32, #tpu.memory_space<vmem>>, vector<1x256xf32>
    %358 = vector.broadcast %357 : vector<1x256xf32> to vector<32x256xf32>
    %359 = arith.mulf %356, %358 : vector<32x256xf32>
    %c15_i32_254 = arith.constant 15 : i32
    %360 = tpu.dynamic_rotate %351 by %c15_i32_254 dim 1 : vector<32x256xf32>, i32 -> vector<32x256xf32>
    %c2_255 = arith.constant 2 : index
    %c0_256 = arith.constant 0 : index
    %361 = vector.load %arg1[%c2_255, %c0_256] : memref<9x256xf32, #tpu.memory_space<vmem>>, vector<1x256xf32>
    %362 = vector.broadcast %361 : vector<1x256xf32> to vector<32x256xf32>
    %363 = arith.mulf %360, %362 : vector<32x256xf32>
    %c1_i32_257 = arith.constant 1 : i32
    %364 = tpu.dynamic_rotate %351 by %c1_i32_257 dim 1 : vector<32x256xf32>, i32 -> vector<32x256xf32>
    %c3_258 = arith.constant 3 : index
    %c0_259 = arith.constant 0 : index
    %365 = vector.load %arg1[%c3_258, %c0_259] : memref<9x256xf32, #tpu.memory_space<vmem>>, vector<1x256xf32>
    %366 = vector.broadcast %365 : vector<1x256xf32> to vector<32x256xf32>
    %367 = arith.mulf %364, %366 : vector<32x256xf32>
    %c255_i32_260 = arith.constant 255 : i32
    %368 = tpu.dynamic_rotate %351 by %c255_i32_260 dim 1 : vector<32x256xf32>, i32 -> vector<32x256xf32>
    %c5_261 = arith.constant 5 : index
    %c0_262 = arith.constant 0 : index
    %369 = vector.load %arg1[%c5_261, %c0_262] : memref<9x256xf32, #tpu.memory_space<vmem>>, vector<1x256xf32>
    %370 = vector.broadcast %369 : vector<1x256xf32> to vector<32x256xf32>
    %371 = arith.mulf %368, %370 : vector<32x256xf32>
    %c241_i32_263 = arith.constant 241 : i32
    %372 = tpu.dynamic_rotate %351 by %c241_i32_263 dim 1 : vector<32x256xf32>, i32 -> vector<32x256xf32>
    %c6_264 = arith.constant 6 : index
    %c0_265 = arith.constant 0 : index
    %373 = vector.load %arg1[%c6_264, %c0_265] : memref<9x256xf32, #tpu.memory_space<vmem>>, vector<1x256xf32>
    %374 = vector.broadcast %373 : vector<1x256xf32> to vector<32x256xf32>
    %375 = arith.mulf %372, %374 : vector<32x256xf32>
    %c240_i32_266 = arith.constant 240 : i32
    %376 = tpu.dynamic_rotate %351 by %c240_i32_266 dim 1 : vector<32x256xf32>, i32 -> vector<32x256xf32>
    %c7_267 = arith.constant 7 : index
    %c0_268 = arith.constant 0 : index
    %377 = vector.load %arg1[%c7_267, %c0_268] : memref<9x256xf32, #tpu.memory_space<vmem>>, vector<1x256xf32>
    %378 = vector.broadcast %377 : vector<1x256xf32> to vector<32x256xf32>
    %379 = arith.mulf %376, %378 : vector<32x256xf32>
    %c239_i32_269 = arith.constant 239 : i32
    %380 = tpu.dynamic_rotate %351 by %c239_i32_269 dim 1 : vector<32x256xf32>, i32 -> vector<32x256xf32>
    %c8_270 = arith.constant 8 : index
    %c0_271 = arith.constant 0 : index
    %381 = vector.load %arg1[%c8_270, %c0_271] : memref<9x256xf32, #tpu.memory_space<vmem>>, vector<1x256xf32>
    %382 = vector.broadcast %381 : vector<1x256xf32> to vector<32x256xf32>
    %383 = arith.mulf %380, %382 : vector<32x256xf32>
    %384 = tpu.concatenate %355, %359, %363, %367, %351, %371, %375, %379, %383 in 0 : vector<32x256xf32>, vector<32x256xf32>, vector<32x256xf32>, vector<32x256xf32>, vector<32x256xf32>, vector<32x256xf32>, vector<32x256xf32>, vector<32x256xf32>, vector<32x256xf32> -> vector<288x256xf32>
    %c0_272 = arith.constant 0 : index
    %c0_273 = arith.constant 0 : index
    %385 = vector.load %arg24[%c0_272, %c0_273] : memref<32x288xf32, #tpu.memory_space<vmem>>, vector<32x288xf32>
    %cst_274 = arith.constant dense<0.000000e+00> : vector<32x256xf32>
    %386 = tpu.matmul %385, %384, %cst_274 {dimension_numbers = #tpu.dot_dimension_numbers<[1], [0], [0], [1], [0, 0, 1, 1], [], []>} : vector<32x288xf32>, vector<288x256xf32>, vector<32x256xf32> -> vector<32x256xf32>
    %c0_275 = arith.constant 0 : index
    %c0_276 = arith.constant 0 : index
    %387 = vector.load %arg25[%c0_275, %c0_276] : memref<32x1xf32, #tpu.memory_space<vmem>>, vector<32x1xf32>
    %388 = vector.broadcast %387 : vector<32x1xf32> to vector<32x256xf32>
    %389 = arith.addf %386, %388 : vector<32x256xf32>
    %cst_277 = arith.constant 0.000000e+00 : f32
    %390 = vector.broadcast %cst_277 : f32 to vector<32x256xf32>
    %391 = arith.maximumf %389, %390 : vector<32x256xf32>
    %c17_i32_278 = arith.constant 17 : i32
    %392 = tpu.dynamic_rotate %391 by %c17_i32_278 dim 1 : vector<32x256xf32>, i32 -> vector<32x256xf32>
    %c0_279 = arith.constant 0 : index
    %c0_280 = arith.constant 0 : index
    %393 = vector.load %arg1[%c0_279, %c0_280] : memref<9x256xf32, #tpu.memory_space<vmem>>, vector<1x256xf32>
    %394 = vector.broadcast %393 : vector<1x256xf32> to vector<32x256xf32>
    %395 = arith.mulf %392, %394 : vector<32x256xf32>
    %c16_i32_281 = arith.constant 16 : i32
    %396 = tpu.dynamic_rotate %391 by %c16_i32_281 dim 1 : vector<32x256xf32>, i32 -> vector<32x256xf32>
    %c1_282 = arith.constant 1 : index
    %c0_283 = arith.constant 0 : index
    %397 = vector.load %arg1[%c1_282, %c0_283] : memref<9x256xf32, #tpu.memory_space<vmem>>, vector<1x256xf32>
    %398 = vector.broadcast %397 : vector<1x256xf32> to vector<32x256xf32>
    %399 = arith.mulf %396, %398 : vector<32x256xf32>
    %c15_i32_284 = arith.constant 15 : i32
    %400 = tpu.dynamic_rotate %391 by %c15_i32_284 dim 1 : vector<32x256xf32>, i32 -> vector<32x256xf32>
    %c2_285 = arith.constant 2 : index
    %c0_286 = arith.constant 0 : index
    %401 = vector.load %arg1[%c2_285, %c0_286] : memref<9x256xf32, #tpu.memory_space<vmem>>, vector<1x256xf32>
    %402 = vector.broadcast %401 : vector<1x256xf32> to vector<32x256xf32>
    %403 = arith.mulf %400, %402 : vector<32x256xf32>
    %c1_i32_287 = arith.constant 1 : i32
    %404 = tpu.dynamic_rotate %391 by %c1_i32_287 dim 1 : vector<32x256xf32>, i32 -> vector<32x256xf32>
    %c3_288 = arith.constant 3 : index
    %c0_289 = arith.constant 0 : index
    %405 = vector.load %arg1[%c3_288, %c0_289] : memref<9x256xf32, #tpu.memory_space<vmem>>, vector<1x256xf32>
    %406 = vector.broadcast %405 : vector<1x256xf32> to vector<32x256xf32>
    %407 = arith.mulf %404, %406 : vector<32x256xf32>
    %c255_i32_290 = arith.constant 255 : i32
    %408 = tpu.dynamic_rotate %391 by %c255_i32_290 dim 1 : vector<32x256xf32>, i32 -> vector<32x256xf32>
    %c5_291 = arith.constant 5 : index
    %c0_292 = arith.constant 0 : index
    %409 = vector.load %arg1[%c5_291, %c0_292] : memref<9x256xf32, #tpu.memory_space<vmem>>, vector<1x256xf32>
    %410 = vector.broadcast %409 : vector<1x256xf32> to vector<32x256xf32>
    %411 = arith.mulf %408, %410 : vector<32x256xf32>
    %c241_i32_293 = arith.constant 241 : i32
    %412 = tpu.dynamic_rotate %391 by %c241_i32_293 dim 1 : vector<32x256xf32>, i32 -> vector<32x256xf32>
    %c6_294 = arith.constant 6 : index
    %c0_295 = arith.constant 0 : index
    %413 = vector.load %arg1[%c6_294, %c0_295] : memref<9x256xf32, #tpu.memory_space<vmem>>, vector<1x256xf32>
    %414 = vector.broadcast %413 : vector<1x256xf32> to vector<32x256xf32>
    %415 = arith.mulf %412, %414 : vector<32x256xf32>
    %c240_i32_296 = arith.constant 240 : i32
    %416 = tpu.dynamic_rotate %391 by %c240_i32_296 dim 1 : vector<32x256xf32>, i32 -> vector<32x256xf32>
    %c7_297 = arith.constant 7 : index
    %c0_298 = arith.constant 0 : index
    %417 = vector.load %arg1[%c7_297, %c0_298] : memref<9x256xf32, #tpu.memory_space<vmem>>, vector<1x256xf32>
    %418 = vector.broadcast %417 : vector<1x256xf32> to vector<32x256xf32>
    %419 = arith.mulf %416, %418 : vector<32x256xf32>
    %c239_i32_299 = arith.constant 239 : i32
    %420 = tpu.dynamic_rotate %391 by %c239_i32_299 dim 1 : vector<32x256xf32>, i32 -> vector<32x256xf32>
    %c8_300 = arith.constant 8 : index
    %c0_301 = arith.constant 0 : index
    %421 = vector.load %arg1[%c8_300, %c0_301] : memref<9x256xf32, #tpu.memory_space<vmem>>, vector<1x256xf32>
    %422 = vector.broadcast %421 : vector<1x256xf32> to vector<32x256xf32>
    %423 = arith.mulf %420, %422 : vector<32x256xf32>
    %424 = tpu.concatenate %395, %399, %403, %407, %391, %411, %415, %419, %423 in 0 : vector<32x256xf32>, vector<32x256xf32>, vector<32x256xf32>, vector<32x256xf32>, vector<32x256xf32>, vector<32x256xf32>, vector<32x256xf32>, vector<32x256xf32>, vector<32x256xf32> -> vector<288x256xf32>
    %c0_302 = arith.constant 0 : index
    %c0_303 = arith.constant 0 : index
    %425 = vector.load %arg26[%c0_302, %c0_303] : memref<32x288xf32, #tpu.memory_space<vmem>>, vector<32x288xf32>
    %cst_304 = arith.constant dense<0.000000e+00> : vector<32x256xf32>
    %426 = tpu.matmul %425, %424, %cst_304 {dimension_numbers = #tpu.dot_dimension_numbers<[1], [0], [0], [1], [0, 0, 1, 1], [], []>} : vector<32x288xf32>, vector<288x256xf32>, vector<32x256xf32> -> vector<32x256xf32>
    %c0_305 = arith.constant 0 : index
    %c0_306 = arith.constant 0 : index
    %427 = vector.load %arg27[%c0_305, %c0_306] : memref<32x1xf32, #tpu.memory_space<vmem>>, vector<32x1xf32>
    %428 = vector.broadcast %427 : vector<32x1xf32> to vector<32x256xf32>
    %429 = arith.addf %426, %428 : vector<32x256xf32>
    %430 = arith.addf %429, %351 : vector<32x256xf32>
    %cst_307 = arith.constant 0.000000e+00 : f32
    %431 = vector.broadcast %cst_307 : f32 to vector<32x256xf32>
    %432 = arith.maximumf %430, %431 : vector<32x256xf32>
    %c17_i32_308 = arith.constant 17 : i32
    %433 = tpu.dynamic_rotate %432 by %c17_i32_308 dim 1 : vector<32x256xf32>, i32 -> vector<32x256xf32>
    %c0_309 = arith.constant 0 : index
    %c0_310 = arith.constant 0 : index
    %434 = vector.load %arg1[%c0_309, %c0_310] : memref<9x256xf32, #tpu.memory_space<vmem>>, vector<1x256xf32>
    %435 = vector.broadcast %434 : vector<1x256xf32> to vector<32x256xf32>
    %436 = arith.mulf %433, %435 : vector<32x256xf32>
    %c16_i32_311 = arith.constant 16 : i32
    %437 = tpu.dynamic_rotate %432 by %c16_i32_311 dim 1 : vector<32x256xf32>, i32 -> vector<32x256xf32>
    %c1_312 = arith.constant 1 : index
    %c0_313 = arith.constant 0 : index
    %438 = vector.load %arg1[%c1_312, %c0_313] : memref<9x256xf32, #tpu.memory_space<vmem>>, vector<1x256xf32>
    %439 = vector.broadcast %438 : vector<1x256xf32> to vector<32x256xf32>
    %440 = arith.mulf %437, %439 : vector<32x256xf32>
    %c15_i32_314 = arith.constant 15 : i32
    %441 = tpu.dynamic_rotate %432 by %c15_i32_314 dim 1 : vector<32x256xf32>, i32 -> vector<32x256xf32>
    %c2_315 = arith.constant 2 : index
    %c0_316 = arith.constant 0 : index
    %442 = vector.load %arg1[%c2_315, %c0_316] : memref<9x256xf32, #tpu.memory_space<vmem>>, vector<1x256xf32>
    %443 = vector.broadcast %442 : vector<1x256xf32> to vector<32x256xf32>
    %444 = arith.mulf %441, %443 : vector<32x256xf32>
    %c1_i32_317 = arith.constant 1 : i32
    %445 = tpu.dynamic_rotate %432 by %c1_i32_317 dim 1 : vector<32x256xf32>, i32 -> vector<32x256xf32>
    %c3_318 = arith.constant 3 : index
    %c0_319 = arith.constant 0 : index
    %446 = vector.load %arg1[%c3_318, %c0_319] : memref<9x256xf32, #tpu.memory_space<vmem>>, vector<1x256xf32>
    %447 = vector.broadcast %446 : vector<1x256xf32> to vector<32x256xf32>
    %448 = arith.mulf %445, %447 : vector<32x256xf32>
    %c255_i32_320 = arith.constant 255 : i32
    %449 = tpu.dynamic_rotate %432 by %c255_i32_320 dim 1 : vector<32x256xf32>, i32 -> vector<32x256xf32>
    %c5_321 = arith.constant 5 : index
    %c0_322 = arith.constant 0 : index
    %450 = vector.load %arg1[%c5_321, %c0_322] : memref<9x256xf32, #tpu.memory_space<vmem>>, vector<1x256xf32>
    %451 = vector.broadcast %450 : vector<1x256xf32> to vector<32x256xf32>
    %452 = arith.mulf %449, %451 : vector<32x256xf32>
    %c241_i32_323 = arith.constant 241 : i32
    %453 = tpu.dynamic_rotate %432 by %c241_i32_323 dim 1 : vector<32x256xf32>, i32 -> vector<32x256xf32>
    %c6_324 = arith.constant 6 : index
    %c0_325 = arith.constant 0 : index
    %454 = vector.load %arg1[%c6_324, %c0_325] : memref<9x256xf32, #tpu.memory_space<vmem>>, vector<1x256xf32>
    %455 = vector.broadcast %454 : vector<1x256xf32> to vector<32x256xf32>
    %456 = arith.mulf %453, %455 : vector<32x256xf32>
    %c240_i32_326 = arith.constant 240 : i32
    %457 = tpu.dynamic_rotate %432 by %c240_i32_326 dim 1 : vector<32x256xf32>, i32 -> vector<32x256xf32>
    %c7_327 = arith.constant 7 : index
    %c0_328 = arith.constant 0 : index
    %458 = vector.load %arg1[%c7_327, %c0_328] : memref<9x256xf32, #tpu.memory_space<vmem>>, vector<1x256xf32>
    %459 = vector.broadcast %458 : vector<1x256xf32> to vector<32x256xf32>
    %460 = arith.mulf %457, %459 : vector<32x256xf32>
    %c239_i32_329 = arith.constant 239 : i32
    %461 = tpu.dynamic_rotate %432 by %c239_i32_329 dim 1 : vector<32x256xf32>, i32 -> vector<32x256xf32>
    %c8_330 = arith.constant 8 : index
    %c0_331 = arith.constant 0 : index
    %462 = vector.load %arg1[%c8_330, %c0_331] : memref<9x256xf32, #tpu.memory_space<vmem>>, vector<1x256xf32>
    %463 = vector.broadcast %462 : vector<1x256xf32> to vector<32x256xf32>
    %464 = arith.mulf %461, %463 : vector<32x256xf32>
    %465 = tpu.concatenate %436, %440, %444, %448, %432, %452, %456, %460, %464 in 0 : vector<32x256xf32>, vector<32x256xf32>, vector<32x256xf32>, vector<32x256xf32>, vector<32x256xf32>, vector<32x256xf32>, vector<32x256xf32>, vector<32x256xf32>, vector<32x256xf32> -> vector<288x256xf32>
    %c0_332 = arith.constant 0 : index
    %c0_333 = arith.constant 0 : index
    %466 = vector.load %arg28[%c0_332, %c0_333] : memref<32x288xf32, #tpu.memory_space<vmem>>, vector<32x288xf32>
    %cst_334 = arith.constant dense<0.000000e+00> : vector<32x256xf32>
    %467 = tpu.matmul %466, %465, %cst_334 {dimension_numbers = #tpu.dot_dimension_numbers<[1], [0], [0], [1], [0, 0, 1, 1], [], []>} : vector<32x288xf32>, vector<288x256xf32>, vector<32x256xf32> -> vector<32x256xf32>
    %c0_335 = arith.constant 0 : index
    %c0_336 = arith.constant 0 : index
    %468 = vector.load %arg29[%c0_335, %c0_336] : memref<32x1xf32, #tpu.memory_space<vmem>>, vector<32x1xf32>
    %469 = vector.broadcast %468 : vector<32x1xf32> to vector<32x256xf32>
    %470 = arith.addf %467, %469 : vector<32x256xf32>
    %cst_337 = arith.constant 0.000000e+00 : f32
    %471 = vector.broadcast %cst_337 : f32 to vector<32x256xf32>
    %472 = arith.maximumf %470, %471 : vector<32x256xf32>
    %c17_i32_338 = arith.constant 17 : i32
    %473 = tpu.dynamic_rotate %472 by %c17_i32_338 dim 1 : vector<32x256xf32>, i32 -> vector<32x256xf32>
    %c0_339 = arith.constant 0 : index
    %c0_340 = arith.constant 0 : index
    %474 = vector.load %arg1[%c0_339, %c0_340] : memref<9x256xf32, #tpu.memory_space<vmem>>, vector<1x256xf32>
    %475 = vector.broadcast %474 : vector<1x256xf32> to vector<32x256xf32>
    %476 = arith.mulf %473, %475 : vector<32x256xf32>
    %c16_i32_341 = arith.constant 16 : i32
    %477 = tpu.dynamic_rotate %472 by %c16_i32_341 dim 1 : vector<32x256xf32>, i32 -> vector<32x256xf32>
    %c1_342 = arith.constant 1 : index
    %c0_343 = arith.constant 0 : index
    %478 = vector.load %arg1[%c1_342, %c0_343] : memref<9x256xf32, #tpu.memory_space<vmem>>, vector<1x256xf32>
    %479 = vector.broadcast %478 : vector<1x256xf32> to vector<32x256xf32>
    %480 = arith.mulf %477, %479 : vector<32x256xf32>
    %c15_i32_344 = arith.constant 15 : i32
    %481 = tpu.dynamic_rotate %472 by %c15_i32_344 dim 1 : vector<32x256xf32>, i32 -> vector<32x256xf32>
    %c2_345 = arith.constant 2 : index
    %c0_346 = arith.constant 0 : index
    %482 = vector.load %arg1[%c2_345, %c0_346] : memref<9x256xf32, #tpu.memory_space<vmem>>, vector<1x256xf32>
    %483 = vector.broadcast %482 : vector<1x256xf32> to vector<32x256xf32>
    %484 = arith.mulf %481, %483 : vector<32x256xf32>
    %c1_i32_347 = arith.constant 1 : i32
    %485 = tpu.dynamic_rotate %472 by %c1_i32_347 dim 1 : vector<32x256xf32>, i32 -> vector<32x256xf32>
    %c3_348 = arith.constant 3 : index
    %c0_349 = arith.constant 0 : index
    %486 = vector.load %arg1[%c3_348, %c0_349] : memref<9x256xf32, #tpu.memory_space<vmem>>, vector<1x256xf32>
    %487 = vector.broadcast %486 : vector<1x256xf32> to vector<32x256xf32>
    %488 = arith.mulf %485, %487 : vector<32x256xf32>
    %c255_i32_350 = arith.constant 255 : i32
    %489 = tpu.dynamic_rotate %472 by %c255_i32_350 dim 1 : vector<32x256xf32>, i32 -> vector<32x256xf32>
    %c5_351 = arith.constant 5 : index
    %c0_352 = arith.constant 0 : index
    %490 = vector.load %arg1[%c5_351, %c0_352] : memref<9x256xf32, #tpu.memory_space<vmem>>, vector<1x256xf32>
    %491 = vector.broadcast %490 : vector<1x256xf32> to vector<32x256xf32>
    %492 = arith.mulf %489, %491 : vector<32x256xf32>
    %c241_i32_353 = arith.constant 241 : i32
    %493 = tpu.dynamic_rotate %472 by %c241_i32_353 dim 1 : vector<32x256xf32>, i32 -> vector<32x256xf32>
    %c6_354 = arith.constant 6 : index
    %c0_355 = arith.constant 0 : index
    %494 = vector.load %arg1[%c6_354, %c0_355] : memref<9x256xf32, #tpu.memory_space<vmem>>, vector<1x256xf32>
    %495 = vector.broadcast %494 : vector<1x256xf32> to vector<32x256xf32>
    %496 = arith.mulf %493, %495 : vector<32x256xf32>
    %c240_i32_356 = arith.constant 240 : i32
    %497 = tpu.dynamic_rotate %472 by %c240_i32_356 dim 1 : vector<32x256xf32>, i32 -> vector<32x256xf32>
    %c7_357 = arith.constant 7 : index
    %c0_358 = arith.constant 0 : index
    %498 = vector.load %arg1[%c7_357, %c0_358] : memref<9x256xf32, #tpu.memory_space<vmem>>, vector<1x256xf32>
    %499 = vector.broadcast %498 : vector<1x256xf32> to vector<32x256xf32>
    %500 = arith.mulf %497, %499 : vector<32x256xf32>
    %c239_i32_359 = arith.constant 239 : i32
    %501 = tpu.dynamic_rotate %472 by %c239_i32_359 dim 1 : vector<32x256xf32>, i32 -> vector<32x256xf32>
    %c8_360 = arith.constant 8 : index
    %c0_361 = arith.constant 0 : index
    %502 = vector.load %arg1[%c8_360, %c0_361] : memref<9x256xf32, #tpu.memory_space<vmem>>, vector<1x256xf32>
    %503 = vector.broadcast %502 : vector<1x256xf32> to vector<32x256xf32>
    %504 = arith.mulf %501, %503 : vector<32x256xf32>
    %505 = tpu.concatenate %476, %480, %484, %488, %472, %492, %496, %500, %504 in 0 : vector<32x256xf32>, vector<32x256xf32>, vector<32x256xf32>, vector<32x256xf32>, vector<32x256xf32>, vector<32x256xf32>, vector<32x256xf32>, vector<32x256xf32>, vector<32x256xf32> -> vector<288x256xf32>
    %c0_362 = arith.constant 0 : index
    %c0_363 = arith.constant 0 : index
    %506 = vector.load %arg30[%c0_362, %c0_363] : memref<32x288xf32, #tpu.memory_space<vmem>>, vector<32x288xf32>
    %cst_364 = arith.constant dense<0.000000e+00> : vector<32x256xf32>
    %507 = tpu.matmul %506, %505, %cst_364 {dimension_numbers = #tpu.dot_dimension_numbers<[1], [0], [0], [1], [0, 0, 1, 1], [], []>} : vector<32x288xf32>, vector<288x256xf32>, vector<32x256xf32> -> vector<32x256xf32>
    %c0_365 = arith.constant 0 : index
    %c0_366 = arith.constant 0 : index
    %508 = vector.load %arg31[%c0_365, %c0_366] : memref<32x1xf32, #tpu.memory_space<vmem>>, vector<32x1xf32>
    %509 = vector.broadcast %508 : vector<32x1xf32> to vector<32x256xf32>
    %510 = arith.addf %507, %509 : vector<32x256xf32>
    %511 = arith.addf %510, %432 : vector<32x256xf32>
    %cst_367 = arith.constant 0.000000e+00 : f32
    %512 = vector.broadcast %cst_367 : f32 to vector<32x256xf32>
    %513 = arith.maximumf %511, %512 : vector<32x256xf32>
    %c0_368 = arith.constant 0 : index
    %c0_369 = arith.constant 0 : index
    %c0_370 = arith.constant 0 : index
    %514 = vector.load %arg32[%c0_368, %c0_369, %c0_370] : memref<1x32x256xf32, #tpu.memory_space<vmem>>, vector<1x32x256xf32>
    %515 = vector.shape_cast %514 : vector<1x32x256xf32> to vector<32x256xf32>
    %516 = vector.shape_cast %513 : vector<32x256xf32> to vector<1x32x256xf32>
    tpu.vector_store %arg32[%c0_368, %c0_369, %c0_370], %516 {strides = array<i32>} : memref<1x32x256xf32, #tpu.memory_space<vmem>>, vector<1x32x256xf32>,
    return
  }
  func.func @transform_0(%arg0: i32) -> (i32, i32) {
    %c0_i32 = arith.constant 0 : i32
    %c0_i32_0 = arith.constant 0 : i32
    %c0_i32_1 = arith.constant 0 : i32
    return %c0_i32, %c0_i32_0 : i32, i32
  }
  func.func @transform_1(%arg0: i32) -> (i32, i32, i32) {
    %c0_i32 = arith.constant 0 : i32
    %c0_i32_0 = arith.constant 0 : i32
    %c0_i32_1 = arith.constant 0 : i32
    return %arg0, %c0_i32, %c0_i32_0 : i32, i32, i32
  }
  func.func @transform_2(%arg0: i32) -> (i32, i32, i32) {
    %c0_i32 = arith.constant 0 : i32
    %c0_i32_0 = arith.constant 0 : i32
    %c0_i32_1 = arith.constant 0 : i32
    return %arg0, %c0_i32, %c0_i32_0 : i32, i32, i32
  }
  func.func @transform_3(%arg0: i32) -> (i32, i32) {
    %c0_i32 = arith.constant 0 : i32
    %c0_i32_0 = arith.constant 0 : i32
    %c0_i32_1 = arith.constant 0 : i32
    return %c0_i32, %c0_i32_0 : i32, i32
  }
  func.func @transform_4(%arg0: i32) -> (i32, i32) {
    %c0_i32 = arith.constant 0 : i32
    %c0_i32_0 = arith.constant 0 : i32
    %c0_i32_1 = arith.constant 0 : i32
    return %c0_i32, %c0_i32_0 : i32, i32
  }
  func.func @transform_5(%arg0: i32) -> (i32, i32) {
    %c0_i32 = arith.constant 0 : i32
    %c0_i32_0 = arith.constant 0 : i32
    %c0_i32_1 = arith.constant 0 : i32
    return %c0_i32, %c0_i32_0 : i32, i32
  }
  func.func @transform_6(%arg0: i32) -> (i32, i32) {
    %c0_i32 = arith.constant 0 : i32
    %c0_i32_0 = arith.constant 0 : i32
    %c0_i32_1 = arith.constant 0 : i32
    return %c0_i32, %c0_i32_0 : i32, i32
  }
  func.func @transform_7(%arg0: i32) -> (i32, i32) {
    %c0_i32 = arith.constant 0 : i32
    %c0_i32_0 = arith.constant 0 : i32
    %c0_i32_1 = arith.constant 0 : i32
    return %c0_i32, %c0_i32_0 : i32, i32
  }
  func.func @transform_8(%arg0: i32) -> (i32, i32) {
    %c0_i32 = arith.constant 0 : i32
    %c0_i32_0 = arith.constant 0 : i32
    %c0_i32_1 = arith.constant 0 : i32
    return %c0_i32, %c0_i32_0 : i32, i32
  }
  func.func @transform_9(%arg0: i32) -> (i32, i32) {
    %c0_i32 = arith.constant 0 : i32
    %c0_i32_0 = arith.constant 0 : i32
    %c0_i32_1 = arith.constant 0 : i32
    return %c0_i32, %c0_i32_0 : i32, i32
  }
  func.func @transform_10(%arg0: i32) -> (i32, i32) {
    %c0_i32 = arith.constant 0 : i32
    %c0_i32_0 = arith.constant 0 : i32
    %c0_i32_1 = arith.constant 0 : i32
    return %c0_i32, %c0_i32_0 : i32, i32
  }
  func.func @transform_11(%arg0: i32) -> (i32, i32) {
    %c0_i32 = arith.constant 0 : i32
    %c0_i32_0 = arith.constant 0 : i32
    %c0_i32_1 = arith.constant 0 : i32
    return %c0_i32, %c0_i32_0 : i32, i32
  }
  func.func @transform_12(%arg0: i32) -> (i32, i32) {
    %c0_i32 = arith.constant 0 : i32
    %c0_i32_0 = arith.constant 0 : i32
    %c0_i32_1 = arith.constant 0 : i32
    return %c0_i32, %c0_i32_0 : i32, i32
  }
  func.func @transform_13(%arg0: i32) -> (i32, i32) {
    %c0_i32 = arith.constant 0 : i32
    %c0_i32_0 = arith.constant 0 : i32
    %c0_i32_1 = arith.constant 0 : i32
    return %c0_i32, %c0_i32_0 : i32, i32
  }
  func.func @transform_14(%arg0: i32) -> (i32, i32) {
    %c0_i32 = arith.constant 0 : i32
    %c0_i32_0 = arith.constant 0 : i32
    %c0_i32_1 = arith.constant 0 : i32
    return %c0_i32, %c0_i32_0 : i32, i32
  }
  func.func @transform_15(%arg0: i32) -> (i32, i32) {
    %c0_i32 = arith.constant 0 : i32
    %c0_i32_0 = arith.constant 0 : i32
    %c0_i32_1 = arith.constant 0 : i32
    return %c0_i32, %c0_i32_0 : i32, i32
  }
  func.func @transform_16(%arg0: i32) -> (i32, i32) {
    %c0_i32 = arith.constant 0 : i32
    %c0_i32_0 = arith.constant 0 : i32
    %c0_i32_1 = arith.constant 0 : i32
    return %c0_i32, %c0_i32_0 : i32, i32
  }
  func.func @transform_17(%arg0: i32) -> (i32, i32) {
    %c0_i32 = arith.constant 0 : i32
    %c0_i32_0 = arith.constant 0 : i32
    %c0_i32_1 = arith.constant 0 : i32
    return %c0_i32, %c0_i32_0 : i32, i32
  }
  func.func @transform_18(%arg0: i32) -> (i32, i32) {
    %c0_i32 = arith.constant 0 : i32
    %c0_i32_0 = arith.constant 0 : i32
    %c0_i32_1 = arith.constant 0 : i32
    return %c0_i32, %c0_i32_0 : i32, i32
  }
  func.func @transform_19(%arg0: i32) -> (i32, i32) {
    %c0_i32 = arith.constant 0 : i32
    %c0_i32_0 = arith.constant 0 : i32
    %c0_i32_1 = arith.constant 0 : i32
    return %c0_i32, %c0_i32_0 : i32, i32
  }
  func.func @transform_20(%arg0: i32) -> (i32, i32) {
    %c0_i32 = arith.constant 0 : i32
    %c0_i32_0 = arith.constant 0 : i32
    %c0_i32_1 = arith.constant 0 : i32
    return %c0_i32, %c0_i32_0 : i32, i32
  }
  func.func @transform_21(%arg0: i32) -> (i32, i32) {
    %c0_i32 = arith.constant 0 : i32
    %c0_i32_0 = arith.constant 0 : i32
    %c0_i32_1 = arith.constant 0 : i32
    return %c0_i32, %c0_i32_0 : i32, i32
  }
  func.func @transform_22(%arg0: i32) -> (i32, i32) {
    %c0_i32 = arith.constant 0 : i32
    %c0_i32_0 = arith.constant 0 : i32
    %c0_i32_1 = arith.constant 0 : i32
    return %c0_i32, %c0_i32_0 : i32, i32
  }
  func.func @transform_23(%arg0: i32) -> (i32, i32) {
    %c0_i32 = arith.constant 0 : i32
    %c0_i32_0 = arith.constant 0 : i32
    %c0_i32_1 = arith.constant 0 : i32
    return %c0_i32, %c0_i32_0 : i32, i32
  }
  func.func @transform_24(%arg0: i32) -> (i32, i32) {
    %c0_i32 = arith.constant 0 : i32
    %c0_i32_0 = arith.constant 0 : i32
    %c0_i32_1 = arith.constant 0 : i32
    return %c0_i32, %c0_i32_0 : i32, i32
  }
  func.func @transform_25(%arg0: i32) -> (i32, i32) {
    %c0_i32 = arith.constant 0 : i32
    %c0_i32_0 = arith.constant 0 : i32
    %c0_i32_1 = arith.constant 0 : i32
    return %c0_i32, %c0_i32_0 : i32, i32
  }
  func.func @transform_26(%arg0: i32) -> (i32, i32) {
    %c0_i32 = arith.constant 0 : i32
    %c0_i32_0 = arith.constant 0 : i32
    %c0_i32_1 = arith.constant 0 : i32
    return %c0_i32, %c0_i32_0 : i32, i32
  }
  func.func @transform_27(%arg0: i32) -> (i32, i32) {
    %c0_i32 = arith.constant 0 : i32
    %c0_i32_0 = arith.constant 0 : i32
    %c0_i32_1 = arith.constant 0 : i32
    return %c0_i32, %c0_i32_0 : i32, i32
  }
  func.func @transform_28(%arg0: i32) -> (i32, i32) {
    %c0_i32 = arith.constant 0 : i32
    %c0_i32_0 = arith.constant 0 : i32
    %c0_i32_1 = arith.constant 0 : i32
    return %c0_i32, %c0_i32_0 : i32, i32
  }
  func.func @transform_29(%arg0: i32) -> (i32, i32) {
    %c0_i32 = arith.constant 0 : i32
    %c0_i32_0 = arith.constant 0 : i32
    %c0_i32_1 = arith.constant 0 : i32
    return %c0_i32, %c0_i32_0 : i32, i32
  }
  func.func @transform_30(%arg0: i32) -> (i32, i32) {
    %c0_i32 = arith.constant 0 : i32
    %c0_i32_0 = arith.constant 0 : i32
    %c0_i32_1 = arith.constant 0 : i32
    return %c0_i32, %c0_i32_0 : i32, i32
  }
  func.func @transform_31(%arg0: i32) -> (i32, i32, i32) {
    %c0_i32 = arith.constant 0 : i32
    %c0_i32_0 = arith.constant 0 : i32
    %c0_i32_1 = arith.constant 0 : i32
    return %arg0, %c0_i32, %c0_i32_0 : i32, i32, i32
  }
  func.func @transform_32(%arg0: i32) -> (i32, i32, i32) {
    %c0_i32 = arith.constant 0 : i32
    %c0_i32_0 = arith.constant 0 : i32
    %c0_i32_1 = arith.constant 0 : i32
    return %arg0, %c0_i32, %c0_i32_0 : i32, i32, i32
  }
  func.func @transform_33(%arg0: i32) -> (i32, i32, i32) {
    %c0_i32 = arith.constant 0 : i32
    %c0_i32_0 = arith.constant 0 : i32
    %c0_i32_1 = arith.constant 0 : i32
    return %arg0, %c0_i32, %c0_i32_0 : i32, i32, i32
  }
}

</mosaic_0001>

<bundles_post_ra>
// kernel: neck_forward.1
= control target key start
LH: loop header
LB: loop body
LE: loop exit
PB: predicated region body
PF: predicated region fallthrough
CT: control target
= control target key end

     0   :  { %s8093_s6 = smov 1   ;;  %s8094_s10 = smov 2   ;;  %s15838_s0 = inlined_call_operand.smem [shape: u32[34], index: -1, kind: input, shape index: {}] }
   0x1   :  { %s8143_s5 = sld [smem:[%s15838_s0]]   ;;  %s8095_s14 = smov 3  }
   0x2   :  { %s8148_s9 = sld [smem:[%s15838_s0 + %s8093_s6]]   ;;  %s8096_s18 = smov 4  }
   0x3   :  { %s8153_s13 = sld [smem:[%s15838_s0 + %s8094_s10]]   ;;  %s8097_s22 = smov 5  }
   0x4   :  { %s8158_s17 = sld [smem:[%s15838_s0 + %s8095_s14]]   ;;  %s8098_s26 = smov 6  }
   0x5   :  { %s8163_s21 = sld [smem:[%s15838_s0 + %s8096_s18]]   ;;  %s8099_s30 = smov 7  }
   0x6   :  { %s8168_s25 = sld [smem:[%s15838_s0 + %s8097_s22]]   ;;  %s8100_s4 = smov 8  }
   0x7   :  { %16099 = sst [smem:[#allocation2_spill]] %s8143_s5  ;;  %s8101_s10 = smov 9  }
   0x8   :  { %s8173_s29 = sld [smem:[%s15838_s0 + %s8098_s26]]   ;;  %s8102_s15 = smov 10  }
   0x9   :  { %s8178_s3 = sld [smem:[%s15838_s0 + %s8099_s30]]   ;;  %s8103_s20 = smov 11  }
   0xa   :  { %s8183_s8 = sld [smem:[%s15838_s0 + %s8100_s4]]   ;;  %s8104_s26 = smov 12  }
   0xb   :  { %s8188_s14 = sld [smem:[%s15838_s0 + %s8101_s10]]   ;;  %s8105_s1 = smov 13  }
   0xc   :  { %s8193_s19 = sld [smem:[%s15838_s0 + %s8102_s15]]   ;;  %s8106_s7 = smov 14  }
   0xd   :  { %s8198_s24 = sld [smem:[%s15838_s0 + %s8103_s20]]   ;;  %s8107_s15 = smov 15  }
   0xe   :  { %s8203_s30 = sld [smem:[%s15838_s0 + %s8104_s26]]   ;;  %s8108_s22 = smov 16  }
   0xf   :  { %16100 = sst [smem:[#allocation3_spill]] %s8178_s3  ;;  %s8109_s28 = smov 17  }
  0x10   :  { %16101 = sst [smem:[#allocation4_spill]] %s8183_s8 }
  0x11   :  { %s8208_s6 = sld [smem:[%s15838_s0 + %s8105_s1]]  }
  0x12   :  { %s8213_s12 = sld [smem:[%s15838_s0 + %s8106_s7]]   ;;  %s8110_s7 = smov 18  }
  0x13   :  { %s8218_s20 = sld [smem:[%s15838_s0 + %s8107_s15]]   ;;  %s8111_s15 = smov 19  }
  0x14   :  { %s8223_s27 = sld [smem:[%s15838_s0 + %s8108_s22]]   ;;  %s8112_s22 = smov 20  }
  0x15   :  { %s8228_s4 = sld [smem:[%s15838_s0 + %s8109_s28]]   ;;  %s8113_s28 = smov 21  }
  0x17   :  { %16102 = sst [smem:[#allocation5_spill]] %s8208_s6 }
  0x18   :  { %s8233_s6 = sld [smem:[%s15838_s0 + %s8110_s7]]   ;;  %s8114_s7 = smov 22  }
  0x19   :  { %16103 = sst [smem:[#allocation6_spill]] %s8218_s20 }
  0x1a   :  { %16104 = sst [smem:[#allocation7_spill]] %s8223_s27 }
  0x1b   :  { %16105 = sst [smem:[#allocation8_spill]] %s8228_s4 }
  0x1c   :  { %s8238_s20 = sld [smem:[%s15838_s0 + %s8111_s15]]   ;;  %s8115_s15 = smov 23  }
  0x1d   :  { %s8243_s27 = sld [smem:[%s15838_s0 + %s8112_s22]]   ;;  %s8116_s22 = smov 24  }
  0x1e   :  { %16106 = sst [smem:[#allocation9_spill]] %s8233_s6 }
  0x1f   :  { %s8248_s4 = sld [smem:[%s15838_s0 + %s8113_s28]]   ;;  %s8117_s28 = smov 25  }
  0x20   :  { %s8253_s6 = sld [smem:[%s15838_s0 + %s8114_s7]]   ;;  %s8118_s7 = smov 26  }
  0x22   :  { %16107 = sst [smem:[#allocation10_spill]] %s8238_s20 }
  0x23   :  { %16108 = sst [smem:[#allocation11_spill]] %s8243_s27 }
  0x24   :  { %s8258_s20 = sld [smem:[%s15838_s0 + %s8115_s15]]   ;;  %s8119_s15 = smov 27  }
  0x25   :  { %16109 = sst [smem:[#allocation12_spill]] %s8248_s4 }
  0x26   :  { %16110 = sst [smem:[#allocation13_spill]] %s8253_s6 }
  0x27   :  { %s8263_s27 = sld [smem:[%s15838_s0 + %s8116_s22]]   ;;  %s8120_s22 = smov 28  }
  0x28   :  { %s8268_s4 = sld [smem:[%s15838_s0 + %s8117_s28]]   ;;  %s8121_s28 = smov 29  }
  0x29   :  { %s8273_s6 = sld [smem:[%s15838_s0 + %s8118_s7]]   ;;  %s8122_s7 = smov 30  }
  0x2a   :  { %16111 = sst [smem:[#allocation14_spill]] %s8258_s20 }
  0x2b   :  { %s8278_s20 = sld [smem:[%s15838_s0 + %s8119_s15]]   ;;  %s8123_s15 = smov 31  }
  0x2d   :  { %16112 = sst [smem:[#allocation15_spill]] %s8263_s27 }
  0x2e   :  { %16113 = sst [smem:[#allocation16_spill]] %s8268_s4 }
  0x2f   :  { %16114 = sst [smem:[#allocation17_spill]] %s8273_s6 }
  0x30   :  { %s8283_s27 = sld [smem:[%s15838_s0 + %s8120_s22]]   ;;  %s8124_s22 = smov 32  }
  0x31   :  { %16115 = sst [smem:[#allocation18_spill]] %s8278_s20 }
  0x32   :  { %s8288_s4 = sld [smem:[%s15838_s0 + %s8121_s28]]   ;;  %s8125_s28 = smov 33  }
  0x33   :  { %s8293_s6 = sld [smem:[%s15838_s0 + %s8122_s7]]   ;;  %s8310_s7 = smov 0  }
  0x34   :  { %s8298_s20 = sld [smem:[%s15838_s0 + %s8123_s15]]  }
  0x36   :  { %16116 = sst [smem:[#allocation19_spill]] %s8283_s27 }
  0x37   :  { %s8303_s27 = sld [smem:[%s15838_s0 + %s8124_s22]]  }
  0x38   :  { %16117 = sst [smem:[#allocation20_spill]] %s8288_s4 }
  0x39   :  { %s8308_s4 = sld [smem:[%s15838_s0 + %s8125_s28]]  }
  0x3f   :  { %16118 = sst [smem:[#allocation21_spill]] %s8308_s4 }
  0x40 LB: > { %s16119_s8 = sld [smem:[#allocation4_spill]]  ;;  %s7863_s10 = sadd.s32 4294967295, %s8091_s7   ;;  %s8091_s7 = sphi %s8310_s7, %s78_s7  }
  0x41   : > { %s16120_s5 = sld [smem:[#allocation2_spill]]  ;;  %p7867_p0 = scmp.ge.s32.totalorder %s8091_s7, 1 }
  0x42   : > { %s16121_s3 = sld [smem:[#allocation3_spill]]  ;;  %p936_p1 = scmp.lt.s32.totalorder %s8091_s7, 3 }
  0x44   : > { %p937_p2 = pnand %p7867_p0, %p936_p1 }
  0x46   : > { %940 = sbr.rel (%p937_p2) target bundleno = 5460 (0x1554), region = 144 }
  0x4b   : > { %p1035_p3 = scmp.lt.s32.totalorder %s7863_s10, 1  ;;  %v1065_v0 = vld [vmem:[%s8163_s21 + $0x8] sm:$0xff]  ;;  %v8126_v1 = vmov 0   ;;  %v1067_v2 = vld [vmem:[%s8163_s21 + $0x18] sm:$0xff]  ;;  %v1060_v11 = vld [vmem:[%s8158_s17] sm:$0xff]  ;;  %vm1096_vm0 = vcmask 261120  }
  0x4c   : > { %8071 = vset.pattern.permute.xlu1 %v8126_v1  ;;  %8070 = vset.pattern.permute.xlu0 %v8126_v1  ;;  %v1062_v12 = vld [vmem:[%s8158_s17 + $0x10] sm:$0xff]  ;;  %v1064_v13 = vld [vmem:[%s8163_s21] sm:$0xff]  ;;  %v1061_v21 = vld [vmem:[%s8158_s17 + $0x8] sm:$0xff]  ;;  %s15993_s18 = smov 17   ;;  %s15995_s22 = smov 16   ;;  %vm1293_vm7 = vcmask 523264  }
  0x4d   : > { %s16518_s10 = smov (!%p1035_p3, %s7863_s10), 1  ;;  %1083 = vperm.xlu1 %8071, %v1065_v0   ;;  %8072 = vset.pattern.permute.xlu2 %v8126_v1  ;;  %v1066_v16 = vld [vmem:[%s8163_s21 + $0x10] sm:$0xff]  ;;  %v1063_v22 = vld [vmem:[%s8158_s17 + $0x18] sm:$0xff]  ;;  %s16001_s23 = smov 1  }
  0x4e   : > { %1093 = vperm.xlu0 %8070, %v1067_v2   ;;  %s8320_s0 = sshll.u32 %s16518_s10, 6  ;;  %s16126_s4 = sld [smem:[#allocation21_spill]] }
  0x4f   : > { %s1039_s11 = scalar_lea.vmem %s8148_s9, %s8320_s0  ;;  %s8326_s15 = scalar_lea.vmem %s8153_s13, %s8320_s0 }
  0x50   : > { %v1074_v3 = vld [vmem:[%s1039_s11 + $0x30] sm:$0xff]  ;;  %v1075_v4 = vld [vmem:[%s1039_s11 + $0x38] sm:$0xff]  ;;  %v1072_v5 = vld [vmem:[%s1039_s11 + $0x20] sm:$0xff]  ;;  %s8364_s16 = scalar_lea.vmem %s8303_s27, %s8320_s0  ;;  %s16018_s26 = smov 15  }
  0x51   : > { %1121 = vmatpush.msra.mxu0 %v1074_v3  ;;  %8012 = vmatpush.msra.mxu2 %v1074_v3  ;;  %v1073_v6 = vld [vmem:[%s1039_s11 + $0x28] sm:$0xff]  ;;  %v1070_v7 = vld [vmem:[%s1039_s11 + $0x10] sm:$0xff]  ;;  %v1071_v8 = vld [vmem:[%s1039_s11 + $0x18] sm:$0xff]  ;;  %s15979_s1 = smov 127   ;;  %s15997_s2 = smov 112  }
  0x52   : > { %1150 = vmatpush.msra.mxu1 %v1075_v4  ;;  %8016 = vmatpush.msra.mxu3 %v1075_v4  ;;  %v1068_v9 = vld [vmem:[%s1039_s11] sm:$0xff]  ;;  %v1069_v10 = vld [vmem:[%s1039_s11 + $0x8] sm:$0xff]  ;;  %v1181_v14 = vld [vmem:[%s8326_s15 + $0x30] sm:$0xff]  ;;  %s15991_s10 = smov 111   ;;  %s15999_s11 = smov 113  }
  0x53   : > { %1122 = vmatpush.msra.mxu0 %v1072_v5  ;;  %8013 = vmatpush.msra.mxu2 %v1072_v5  ;;  %v1182_v15 = vld [vmem:[%s8326_s15 + $0x38] sm:$0xff]  ;;  %v1179_v17 = vld [vmem:[%s8326_s15 + $0x20] sm:$0xff]  ;;  %v1180_v18 = vld [vmem:[%s8326_s15 + $0x28] sm:$0xff] }
  0x54   : > { %1151 = vmatpush.msra.mxu1 %v1073_v6  ;;  %8017 = vmatpush.msra.mxu3 %v1073_v6  ;;  %v1177_v19 = vld [vmem:[%s8326_s15 + $0x10] sm:$0xff]  ;;  %v1178_v20 = vld [vmem:[%s8326_s15 + $0x18] sm:$0xff]  ;;  %v1175_v23 = vld [vmem:[%s8326_s15] sm:$0xff]  ;;  %s8422_s28 = scalar_lea.vmem %s16126_s4, %s8320_s0  ;;  %s16392_s4 = smov 113  }
  0x55   : > { %1123 = vmatpush.msra.mxu0 %v1070_v7  ;;  %8014 = vmatpush.msra.mxu2 %v1070_v7  ;;  %v1176_v24 = vld [vmem:[%s8326_s15 + $0x8] sm:$0xff]  ;;  %s16298_s15 = sld [smem:[#allocation5_spill]] }
  0x56   : > { %1152 = vmatpush.msra.mxu1 %v1071_v8  ;;  %8018 = vmatpush.msra.mxu3 %v1071_v8 }
  0x57   : > { %1124 = vmatpush.msra.mxu0 %v1068_v9  ;;  %8015 = vmatpush.msra.mxu2 %v1068_v9 }
  0x58   : > { %1153 = vmatpush.msra.mxu1 %v1069_v10  ;;  %8019 = vmatpush.msra.mxu3 %v1069_v10 }
  0x59   : > { %7878 = vmatmul.msk.f32.vlgmr.msra.gmra.mxu0 %vm1096_vm0, %v1060_v11  ;;  %7880 = vmatmul.msk.f32.vlgmr.msra.gmra.mxu2 %vm1096_vm0, %v1062_v12 }
  0x5a   : > { %7882 = vmatmul.msk.f32.vlgmr.msra.gmra.mxu1 %vm1096_vm0, %v1060_v11  ;;  %7884 = vmatmul.msk.f32.vlgmr.msra.gmra.mxu3 %vm1096_vm0, %v1062_v12 }
  0x5b   : > { %1078 = vperm.xlu1 %8071, %v1064_v13   ;;  %1195 = vmatpush.msrb.mxu2 %v1181_v14 }
  0x5c   : > { %1224 = vmatpush.msrb.mxu3 %v1182_v15  ;;  %1088 = vperm.xlu0 %8070, %v1066_v16  }
  0x5d   : > { %1196 = vmatpush.msrb.mxu2 %v1179_v17 }
  0x5e   : > { %1225 = vmatpush.msrb.mxu3 %v1180_v18 }
  0x5f   : > { %1197 = vmatpush.msrb.mxu2 %v1177_v19 }
  0x60   : > { %1226 = vmatpush.msrb.mxu3 %v1178_v20 }
  0x61   : > { %7879 = vmatmul.msk.f32.gmra.mxu0 %vm1096_vm0, %v1061_v21  ;;  %7881 = vmatmul.msk.f32.gmra.mxu2 %vm1096_vm0, %v1063_v22 }
  0x62   : > { %7883 = vmatmul.msk.f32.gmra.mxu1 %vm1096_vm0, %v1061_v21  ;;  %7885 = vmatmul.msk.f32.gmra.mxu3 %vm1096_vm0, %v1063_v22 }
  0x63   : > { %1198 = vmatpush.msrb.mxu2 %v1175_v23  ;;  %1227 = vmatpush.msrb.mxu3 %v1176_v24 }
  0x69   : > { %7886 = vmatmul.msk.f32.vlgmr.msrb.gmra.mxu2 %vm1096_vm0, %v1060_v11 }
  0x6a   : > { %7890 = vmatmul.msk.f32.vlgmr.msrb.gmra.mxu3 %vm1096_vm0, %v1060_v11 }
  0x71   : > { %7887 = vmatmul.msk.f32.gmra.mxu2 %vm1096_vm0, %v1061_v21 }
  0x72   : > { %7891 = vmatmul.msk.f32.gmra.mxu3 %vm1096_vm0, %v1061_v21 }
  0x79   : > { %7888 = vmatmul.msk.f32.gmra.mxu2 %vm1096_vm0, %v1062_v12 }
  0x7a   : > { %7892 = vmatmul.msk.f32.gmra.mxu3 %vm1096_vm0, %v1062_v12 }
  0x81   : > { %7889 = vmatmul.msk.f32.gmra.mxu2 %vm1096_vm0, %v1063_v22 }
  0x82   : > { %7893 = vmatmul.msk.f32.gmra.mxu3 %vm1096_vm0, %v1063_v22 }
  0xbf   : > { %v8358_v25 = vpop.permute.xlu1 %1083 }
  0xc0   : > { %v8360_v26 = vpop.permute.xlu0 %1093 }
  0xcd   : > { %v1079_v27 = vpop.permute.xlu1 %1078 }
  0xce   : > { %v1089_v34 = vpop.permute.xlu0 %1088 }
  0xd6   : > { %v1126_v28 = vpop.f32.mrf.mxu0 }
  0xd7   : > { %v1127_v29 = vadd.f32 %v1126_v28, %v1079_v27  ;;  %v1155_v30 = vpop.f32.mrf.mxu1 }
  0xd8   : > { %v1156_v31 = vadd.f32 %v1155_v30, %v1079_v27 }
  0xd9   : > { %v8366_v32 = vmax.f32 %v1127_v29, 0.0 }
  0xda   : > { %v8368_v33 = vmax.f32 %v1156_v31, 0.0 }
  0xdb   : > { %16122 = vst [vmem:[#allocation22_spill] sm:$0xff] %v8366_v32  ;;  %1364 = vrot.lane.b32.xlu2 %v8366_v32, %s15993_s18  ;;  %1437 = vrot.lane.b32.xlu0 %v8366_v32, %s15995_s22 }
  0xdc   : > { %1249 = vst [vmem:[%s8364_s16] sm:$0xff] %v8366_v32  ;;  %1453 = vrot.lane.b32.xlu1 %v8368_v33, %s15995_s22  ;;  %v1132_v35 = vpop.f32.mrf.mxu2 }
  0xdd   : > { %1250 = vst [vmem:[%s8364_s16 + $0x8] sm:$0xff] %v8368_v33  ;;  %v1161_v36 = vpop.f32.mrf.mxu3  ;;  %v1133_v37 = vadd.f32 %v1132_v35, %v1089_v34 }
  0xde   : > { %v1162_v38 = vadd.f32 %v1161_v36, %v1089_v34  ;;  %v1129_v39 = vpop.f32.mrf.mxu0 }
  0xdf   : > { %v8380_v40 = vmax.f32 %v1133_v37, 0.0  ;;  %v1130_v41 = vadd.f32 %v1129_v39, %v8358_v25  ;;  %v1158_v42 = vpop.f32.mrf.mxu1 }
  0xe0   : > { %v8383_v43 = vmax.f32 %v1162_v38, 0.0  ;;  %v1159_v44 = vadd.f32 %v1158_v42, %v8358_v25 }
  0xe1   : > { %1253 = vst [vmem:[%s8364_s16 + $0x20] sm:$0xff] %v8380_v40  ;;  %v8388_v45 = vmax.f32 %v1130_v41, 0.0 }
  0xe2   : > { %16123 = vst [vmem:[#allocation23_spill] sm:$0xff] %v8383_v43  ;;  %v8392_v46 = vmax.f32 %v1159_v44, 0.0 }
  0xe3   : > { %16124 = vst [vmem:[#allocation24_spill] sm:$0xff] %v8388_v45  ;;  %1457 = vrot.lane.b32.xlu2 %v8383_v43, %s15995_s22  ;;  %1581 = vrot.lane.b32.xlu0 %v8366_v32, %s16001_s23 }
  0xe4   : > { %1254 = vst [vmem:[%s8364_s16 + $0x28] sm:$0xff] %v8383_v43  ;;  %1597 = vrot.lane.b32.xlu1 %v8368_v33, %s16001_s23  ;;  %v1135_v47 = vpop.f32.mrf.mxu2 }
  0xe5   : > { %16125 = vst [vmem:[#allocation25_spill] sm:$0xff] %v8392_v46  ;;  %v1136_v48 = vadd.f32 %v1135_v47, %v8360_v26  ;;  %v1164_v49 = vpop.f32.mrf.mxu3 }
  0xe6   : > { %1251 = vst [vmem:[%s8364_s16 + $0x10] sm:$0xff] %v8388_v45  ;;  %v1165_v50 = vadd.f32 %v1164_v49, %v8360_v26 }
  0xe7   : > { %1252 = vst [vmem:[%s8364_s16 + $0x18] sm:$0xff] %v8392_v46  ;;  %v8406_v51 = vmax.f32 %v1136_v48, 0.0 }
  0xe8   : > { %v8408_v52 = vmax.f32 %v1165_v50, 0.0 }
  0xe9   : > { %1255 = vst [vmem:[%s8364_s16 + $0x30] sm:$0xff] %v8406_v51 }
  0xea   : > { %1256 = vst [vmem:[%s8364_s16 + $0x38] sm:$0xff] %v8408_v52 }
  0xeb   : > { %1601 = vrot.lane.b32.xlu2 %v8383_v43, %s16001_s23  ;;  %1380 = vrot.lane.b32.xlu0 %v8368_v33, %s15993_s18 }
  0xec   : > { %1525 = vrot.lane.b32.xlu1 %v8368_v33, %s16018_s26  ;;  %v1200_v53 = vpop.f32.mrf.mxu2 }
  0xed   : > { %v1201_v54 = vadd.f32 %v1200_v53, %v1079_v27  ;;  %v1229_v55 = vpop.f32.mrf.mxu3 }
  0xee   : > { %v1230_v56 = vadd.f32 %v1229_v55, %v1079_v27 }
  0xef   : > { %v8424_v57 = vmax.f32 %v1201_v54, 0.0 }
  0xf0   : > { %v8426_v58 = vmax.f32 %v1230_v56, 0.0 }
  0xf1   : > { %1257 = vst [vmem:[%s8422_s28] sm:$0xff] %v8424_v57 }
  0xf2   : > { %1258 = vst [vmem:[%s8422_s28 + $0x8] sm:$0xff] %v8426_v58 }
  0xf3   : > { %1439 = vrot.lane.b32.xlu2 %v8388_v45, %s15995_s22  ;;  %1509 = vrot.lane.b32.xlu0 %v8366_v32, %s16018_s26 }
  0xf4   : > { %1441 = vrot.lane.b32.xlu1 %v8380_v40, %s15995_s22  ;;  %v1203_v59 = vpop.f32.mrf.mxu2 }
  0xf5   : > { %v1204_v60 = vadd.f32 %v1203_v59, %v8358_v25  ;;  %v1232_v61 = vpop.f32.mrf.mxu3 }
  0xf6   : > { %v1233_v62 = vadd.f32 %v1232_v61, %v8358_v25 }
  0xf7   : > { %v8440_v63 = vmax.f32 %v1204_v60, 0.0 }
  0xf8   : > { %v8442_v0 = vmax.f32 %v1233_v62, 0.0 }
  0xf9   : > { %1259 = vst [vmem:[%s8422_s28 + $0x10] sm:$0xff] %v8440_v63 }
  0xfa   : > { %1260 = vst [vmem:[%s8422_s28 + $0x18] sm:$0xff] %v8442_v0 }
  0xfb   : > { %1583 = vrot.lane.b32.xlu2 %v8388_v45, %s16001_s23  ;;  %1368 = vrot.lane.b32.xlu0 %v8380_v40, %s15993_s18 }
  0xfc   : > { %1585 = vrot.lane.b32.xlu1 %v8380_v40, %s16001_s23  ;;  %v1206_v1 = vpop.f32.mrf.mxu2 }
  0xfd   : > { %v1207_v2 = vadd.f32 %v1206_v1, %v1089_v34  ;;  %v1235_v3 = vpop.f32.mrf.mxu3 }
  0xfe   : > { %v1236_v4 = vadd.f32 %v1235_v3, %v1089_v34 }
  0xff   : > { %v8454_v5 = vmax.f32 %v1207_v2, 0.0 }
 0x100   : > { %v8456_v6 = vmax.f32 %v1236_v4, 0.0 }
 0x101   : > { %16127 = vst [vmem:[#allocation26_spill] sm:$0xff] %v8454_v5 }
 0x102   : > { %1261 = vst [vmem:[%s8422_s28 + $0x20] sm:$0xff] %v8454_v5 }
 0x103   : > { %1262 = vst [vmem:[%s8422_s28 + $0x28] sm:$0xff] %v8456_v6  ;;  %1382 = vrot.lane.b32.xlu2 %v8392_v46, %s15993_s18  ;;  %1513 = vrot.lane.b32.xlu0 %v8380_v40, %s16018_s26 }
 0x104   : > { %1384 = vrot.lane.b32.xlu1 %v8383_v43, %s15993_s18  ;;  %v1209_v7 = vpop.f32.mrf.mxu2 }
 0x105   : > { %v1210_v8 = vadd.f32 %v1209_v7, %v8360_v26  ;;  %v1238_v9 = vpop.f32.mrf.mxu3 }
 0x106   : > { %v1239_v10 = vadd.f32 %v1238_v9, %v8360_v26 }
 0x107   : > { %v8470_v11 = vmax.f32 %v1210_v8, 0.0 }
 0x108   : > { %v8472_v12 = vmax.f32 %v1239_v10, 0.0 }
 0x109   : > { %16128 = vst [vmem:[#allocation27_spill] sm:$0xff] %v8470_v11  ;;  %1314 = vmatpush.msrb.mxu0 %v8470_v11 }
 0x10a   : > { %1263 = vst [vmem:[%s8422_s28 + $0x30] sm:$0xff] %v8470_v11  ;;  %1343 = vmatpush.msrb.mxu1 %v8472_v12 }
 0x10b   : > { %1264 = vst [vmem:[%s8422_s28 + $0x38] sm:$0xff] %v8472_v12  ;;  %1315 = vmatpush.msrb.mxu0 %v8454_v5  ;;  %1527 = vrot.lane.b32.xlu2 %v8392_v46, %s16018_s26 }
 0x10c   : > { %1344 = vmatpush.msrb.mxu1 %v8456_v6  ;;  %1529 = vrot.lane.b32.xlu1 %v8383_v43, %s16018_s26 }
 0x10d   : > { %1455 = vrot.lane.b32.xlu0 %v8392_v46, %s15995_s22  ;;  %1316 = vmatpush.msrb.mxu0 %v8440_v63 }
 0x10e   : > { %1345 = vmatpush.msrb.mxu1 %v8442_v0 }
 0x10f   : > { %1317 = vmatpush.msrb.mxu0 %v8424_v57 }
 0x110   : > { %1346 = vmatpush.msrb.mxu1 %v8426_v58 }
 0x111   : > { %1318 = vmatpush.msrb.mxu0 %v8406_v51 }
 0x112   : > { %1347 = vmatpush.msrb.mxu1 %v8408_v52 }
 0x113   : > { %1319 = vmatpush.msrb.mxu0 %v8380_v40  ;;  %1370 = vrot.lane.b32.xlu2 %v8406_v51, %s15993_s18 }
 0x114   : > { %1348 = vmatpush.msrb.mxu1 %v8383_v43  ;;  %1366 = vrot.lane.b32.xlu1 %v8388_v45, %s15993_s18 }
 0x115   : > { %1599 = vrot.lane.b32.xlu0 %v8392_v46, %s16001_s23  ;;  %1320 = vmatpush.msrb.mxu0 %v8388_v45 }
 0x116   : > { %1349 = vmatpush.msrb.mxu1 %v8392_v46 }
 0x117   : > { %1321 = vmatpush.msrb.mxu0 %v8366_v32 }
 0x118   : > { %1350 = vmatpush.msrb.mxu1 %v8368_v33 }
 0x11b   : > { %1515 = vrot.lane.b32.xlu2 %v8406_v51, %s16018_s26 }
 0x11c   : > { %1511 = vrot.lane.b32.xlu1 %v8388_v45, %s16018_s26 }
 0x11d   : > { %1443 = vrot.lane.b32.xlu0 %v8406_v51, %s15995_s22 }
 0x123   : > { %1445 = vrot.lane.b32.xlu2 %v8424_v57, %s15995_s22 }
 0x124   : > { %1459 = vrot.lane.b32.xlu1 %v8408_v52, %s15995_s22 }
 0x125   : > { %1587 = vrot.lane.b32.xlu0 %v8406_v51, %s16001_s23 }
 0x12b   : > { %1589 = vrot.lane.b32.xlu2 %v8424_v57, %s16001_s23 }
 0x12c   : > { %1603 = vrot.lane.b32.xlu1 %v8408_v52, %s16001_s23 }
 0x12d   : > { %1386 = vrot.lane.b32.xlu0 %v8408_v52, %s15993_s18 }
 0x133   : > { %1388 = vrot.lane.b32.xlu2 %v8426_v58, %s15993_s18 }
 0x134   : > { %1372 = vrot.lane.b32.xlu1 %v8424_v57, %s15993_s18 }
 0x135   : > { %1531 = vrot.lane.b32.xlu0 %v8408_v52, %s16018_s26  ;;  %v8530_v13 = vpop.permute.xlu2 %1364 }
 0x13b   : > { %1533 = vrot.lane.b32.xlu2 %v8426_v58, %s16018_s26 }
 0x13c   : > { %1517 = vrot.lane.b32.xlu1 %v8424_v57, %s16018_s26 }
 0x13d   : > { %1461 = vrot.lane.b32.xlu0 %v8426_v58, %s15995_s22  ;;  %v8538_v14 = vpop.permute.xlu2 %1457 }
 0x13e   : > { %16129 = vst [vmem:[#allocation28_spill] sm:$0xff] %v8538_v14 }
 0x143   : > { %1463 = vrot.lane.b32.xlu2 %v8442_v0, %s15995_s22 }
 0x144   : > { %1447 = vrot.lane.b32.xlu1 %v8440_v63, %s15995_s22 }
 0x145   : > { %1605 = vrot.lane.b32.xlu0 %v8426_v58, %s16001_s23  ;;  %v8546_v15 = vpop.permute.xlu2 %1601 }
 0x14b   : > { %1607 = vrot.lane.b32.xlu2 %v8442_v0, %s16001_s23 }
 0x14c   : > { %1591 = vrot.lane.b32.xlu1 %v8440_v63, %s16001_s23 }
 0x14d   : > { %1374 = vrot.lane.b32.xlu0 %v8440_v63, %s15993_s18  ;;  %v8554_v16 = vpop.permute.xlu2 %1439  ;;  %v8556_v17 = vpop.permute.xlu0 %1437 }
 0x14e   : > { %v8558_v18 = vpop.permute.xlu1 %1453 }
 0x153   : > { %1376 = vrot.lane.b32.xlu2 %v8454_v5, %s15993_s18 }
 0x154   : > { %1390 = vrot.lane.b32.xlu1 %v8442_v0, %s15993_s18 }
 0x155   : > { %1519 = vrot.lane.b32.xlu0 %v8440_v63, %s16018_s26  ;;  %v8566_v19 = vpop.permute.xlu2 %1583  ;;  %v8568_v20 = vpop.permute.xlu0 %1581 }
 0x156   : > { %v8570_v21 = vpop.permute.xlu1 %1597 }
 0x15b   : > { %1521 = vrot.lane.b32.xlu2 %v8454_v5, %s16018_s26 }
 0x15c   : > { %1535 = vrot.lane.b32.xlu1 %v8442_v0, %s16018_s26 }
 0x15d   : > { %1449 = vrot.lane.b32.xlu0 %v8454_v5, %s15995_s22  ;;  %v8578_v22 = vpop.permute.xlu2 %1382  ;;  %v8580_v23 = vpop.permute.xlu0 %1380 }
 0x15e   : > { %v8582_v24 = vpop.permute.xlu1 %1525 }
 0x15f   : > { %16130 = vst [vmem:[#allocation29_spill] sm:$0xff] %v8582_v24  ;;  %v1396_v24 = vlaneseq }
 0x163   : > { %1681 = vrot.lane.b32.xlu2 %v8456_v6, %s15979_s1 }
 0x164   : > { %1465 = vrot.lane.b32.xlu1 %v8456_v6, %s15995_s22 }
 0x165   : > { %1593 = vrot.lane.b32.xlu0 %v8454_v5, %s16001_s23  ;;  %v8590_v25 = vpop.permute.xlu2 %1527  ;;  %v8592_v26 = vpop.permute.xlu0 %1509 }
 0x166   : > { %16131 = vst [vmem:[#allocation30_spill] sm:$0xff] %v8590_v25  ;;  %v8594_v27 = vpop.permute.xlu1 %1441 }
 0x167   : > { %16132 = vst [vmem:[#allocation31_spill] sm:$0xff] %v8592_v26 }
 0x168   : > { %16133 = vst [vmem:[#allocation32_spill] sm:$0xff] %v8594_v27 }
 0x16b   : > { %1451 = vrot.lane.b32.xlu2 %v8470_v11, %s15995_s22 }
 0x16c   : > { %1609 = vrot.lane.b32.xlu1 %v8456_v6, %s16001_s23 }
 0x16d   : > { %1392 = vrot.lane.b32.xlu0 %v8456_v6, %s15993_s18  ;;  %v8602_v28 = vpop.permute.xlu2 %1370  ;;  %v8604_v29 = vpop.permute.xlu0 %1368 }
 0x16e   : > { %v8606_v30 = vpop.permute.xlu1 %1585 }
 0x173   : > { %1467 = vrot.lane.b32.xlu2 %v8472_v12, %s15995_s22 }
 0x174   : > { %1665 = vrot.lane.b32.xlu1 %v8454_v5, %s15979_s1 }
 0x175   : > { %1537 = vrot.lane.b32.xlu0 %v8456_v6, %s16018_s26  ;;  %v8614_v31 = vpop.permute.xlu2 %1515  ;;  %v8616_v34 = vpop.permute.xlu0 %1513 }
 0x176   : > { %16134 = vst [vmem:[#allocation33_spill] sm:$0xff] %v8614_v31  ;;  %v8618_v35 = vpop.permute.xlu1 %1384 }
 0x177   : > { %16135 = vst [vmem:[#allocation34_spill] sm:$0xff] %v8616_v34  ;;  %v8743_v34 = vld [vmem:[%s16120_s5 + $0x1] ss:$8 sm:$0x3] }
 0x178   : > { %16153 = vst [vmem:[#allocation52_spill] sm:$0xff] %v8743_v34 }
 0x17b   : > { %1595 = vrot.lane.b32.xlu2 %v8470_v11, %s16001_s23 }
 0x17c   : > { %1378 = vrot.lane.b32.xlu1 %v8470_v11, %s15993_s18 }
 0x17d   : > { %1611 = vrot.lane.b32.xlu0 %v8472_v12, %s16001_s23  ;;  %v8626_v36 = vpop.permute.xlu2 %1445 }
 0x17e   : > { %v8628_v37 = vpop.permute.xlu1 %1529 }
 0x17f   : > { %16136 = vst [vmem:[#allocation35_spill] sm:$0xff] %v8628_v37  ;;  %v8630_v38 = vpop.permute.xlu0 %1455  ;;  %v8740_v37 = vand.u32 127, %v1396_v24 }
 0x181   : > { %vm1469_vm1 = vcmp.lt.s32.totalorder %v8740_v37, 16  ;;  %vm1398_vm2 = vcmp.lt.s32.totalorder %v8740_v37, 17  ;;  %vm1613_vm3 = vcmp.lt.s32.totalorder %v8740_v37, 1  ;;  %vm1685_vm4 = vcmp.lt.s32.totalorder %v8740_v37, 127 }
 0x182   : > { %vm1829_vm5 = vcmp.lt.s32.totalorder %v8740_v37, 112  ;;  %vm1541_vm6 = vcmp.lt.s32.totalorder %v8740_v37, 15  ;;  %vm1901_vm8 = vcmp.lt.s32.totalorder %v8740_v37, 111  ;;  %vm1757_vm9 = vcmp.lt.s32.totalorder %v8740_v37, 113 }
 0x183   : > { %1394 = vrot.lane.b32.xlu2 %v8472_v12, %s15993_s18 }
 0x184   : > { %1523 = vrot.lane.b32.xlu1 %v8470_v11, %s16018_s26 }
 0x185   : > { %1683 = vrot.lane.b32.xlu0 %v8472_v12, %s15979_s1  ;;  %v8638_v39 = vpop.permute.xlu2 %1589 }
 0x186   : > { %16137 = vst [vmem:[#allocation36_spill] sm:$0xff] %v8638_v39  ;;  %v8640_v41 = vpop.permute.xlu1 %1366 }
 0x187   : > { %v8642_v42 = vpop.permute.xlu0 %1599 }
 0x18b   : > { %1539 = vrot.lane.b32.xlu2 %v8472_v12, %s16018_s26 }
 0x18c   : > { %1827 = vrot.lane.b32.xlu1 %v8472_v12, %s15997_s2 }
 0x18d   : > { %1811 = vrot.lane.b32.xlu0 %v8470_v11, %s15997_s2  ;;  %v8650_v44 = vpop.permute.xlu2 %1388 }
 0x18e   : > { %v8652_v47 = vpop.permute.xlu1 %1511 }
 0x18f   : > { %16138 = vst [vmem:[#allocation37_spill] sm:$0xff] %v8652_v47  ;;  %v8654_v48 = vpop.permute.xlu0 %1443 }
 0x190   : > { %16139 = vst [vmem:[#allocation38_spill] sm:$0xff] %v8654_v48 }
 0x193   : > { %1667 = vrot.lane.b32.xlu2 %v8470_v11, %s15979_s1 }
 0x194   : > { %1809 = vrot.lane.b32.xlu1 %v8454_v5, %s15997_s2 }
 0x195   : > { %1679 = vrot.lane.b32.xlu0 %v8442_v0, %s15979_s1  ;;  %v8662_v49 = vpop.permute.xlu2 %1533 }
 0x196   : > { %16140 = vst [vmem:[#allocation39_spill] sm:$0xff] %v8662_v49  ;;  %v8664_v50 = vpop.permute.xlu1 %1459 }
 0x197   : > { %16141 = vst [vmem:[#allocation40_spill] sm:$0xff] %v8664_v50  ;;  %v8666_v53 = vpop.permute.xlu0 %1587 }
 0x198   : > { %16142 = vst [vmem:[#allocation41_spill] sm:$0xff] %v8666_v53 }
 0x19b   : > { %1663 = vrot.lane.b32.xlu2 %v8440_v63, %s15979_s1 }
 0x19c   : > { %1677 = vrot.lane.b32.xlu1 %v8426_v58, %s15979_s1 }
 0x19d   : > { %1661 = vrot.lane.b32.xlu0 %v8424_v57, %s15979_s1  ;;  %v8674_v54 = vpop.permute.xlu2 %1463 }
 0x19e   : > { %v8676_v55 = vpop.permute.xlu1 %1603 }
 0x19f   : > { %16143 = vst [vmem:[#allocation42_spill] sm:$0xff] %v8676_v55  ;;  %v8678_v56 = vpop.permute.xlu0 %1386 }
 0x1a3   : > { %1825 = vrot.lane.b32.xlu2 %v8456_v6, %s15997_s2 }
 0x1a4   : > { %1659 = vrot.lane.b32.xlu1 %v8406_v51, %s15979_s1 }
 0x1a5   : > { %1823 = vrot.lane.b32.xlu0 %v8442_v0, %s15997_s2  ;;  %v8686_v59 = vpop.permute.xlu2 %1607 }
 0x1a6   : > { %v8688_v60 = vpop.permute.xlu1 %1372 }
 0x1a7   : > { %v8690_v61 = vpop.permute.xlu0 %1531 }
 0x1a8   : > { %16144 = vst [vmem:[#allocation43_spill] sm:$0xff] %v8690_v61 }
 0x1ab   : > { %1807 = vrot.lane.b32.xlu2 %v8440_v63, %s15997_s2 }
 0x1ac   : > { %1821 = vrot.lane.b32.xlu1 %v8426_v58, %s15997_s2 }
 0x1ad   : > { %1805 = vrot.lane.b32.xlu0 %v8424_v57, %s15997_s2  ;;  %v8698_v62 = vpop.permute.xlu2 %1376 }
 0x1ae   : > { %16145 = vst [vmem:[#allocation44_spill] sm:$0xff] %v8698_v62  ;;  %v8700_v1 = vpop.permute.xlu1 %1517 }
 0x1af   : > { %16146 = vst [vmem:[#allocation45_spill] sm:$0xff] %v8700_v1  ;;  %v8702_v2 = vpop.permute.xlu0 %1461 }
 0x1b3   : > { %1675 = vrot.lane.b32.xlu2 %v8408_v52, %s15979_s1 }
 0x1b4   : > { %1803 = vrot.lane.b32.xlu1 %v8406_v51, %s15997_s2 }
 0x1b5   : > { %1673 = vrot.lane.b32.xlu0 %v8383_v43, %s15979_s1  ;;  %v8710_v3 = vpop.permute.xlu2 %1521 }
 0x1b6   : > { %v8712_v4 = vpop.permute.xlu1 %1447 }
 0x1b7   : > { %16147 = vst [vmem:[#allocation46_spill] sm:$0xff] %v8712_v4  ;;  %v8714_v7 = vpop.permute.xlu0 %1605 }
 0x1b8   : > { %16148 = vst [vmem:[#allocation47_spill] sm:$0xff] %v8714_v7 }
 0x1bb   : > { %1657 = vrot.lane.b32.xlu2 %v8380_v40, %s15979_s1 }
 0x1bc   : > { %1671 = vrot.lane.b32.xlu1 %v8392_v46, %s15979_s1 }
 0x1bd   : > { %1655 = vrot.lane.b32.xlu0 %v8388_v45, %s15979_s1  ;;  %v8722_v8 = vpop.permute.xlu2 %1681 }
 0x1be   : > { %16149 = vst [vmem:[#allocation48_spill] sm:$0xff] %v8722_v8  ;;  %v8724_v9 = vpop.permute.xlu1 %1591 }
 0x1bf   : > { %16150 = vst [vmem:[#allocation49_spill] sm:$0xff] %v8724_v9  ;;  %v8726_v10 = vpop.permute.xlu0 %1374 }
 0x1c3   : > { %1819 = vrot.lane.b32.xlu2 %v8408_v52, %s15997_s2 }
 0x1c4   : > { %1653 = vrot.lane.b32.xlu1 %v8366_v32, %s15979_s1 }
 0x1c5   : > { %1817 = vrot.lane.b32.xlu0 %v8383_v43, %s15997_s2  ;;  %v8734_v26 = vpop.permute.xlu2 %1451  ;;  %v8753_v43 = vperm.slane %v8743_v34, 0 }
 0x1c6   : > { %16151 = vst [vmem:[#allocation50_spill] sm:$0xff] %v8734_v26  ;;  %v8736_v25 = vpop.permute.xlu1 %1390 }
 0x1c7   : > { %v8738_v47 = vpop.permute.xlu0 %1519  ;;  %16154 = vst [vmem:[#allocation53_spill] sm:$0xff] %v8753_v43 }
 0x1c8   : > { %16152 = vst [vmem:[#allocation51_spill] sm:$0xff] %v8738_v47 }
 0x1cb   : > { %1801 = vrot.lane.b32.xlu2 %v8380_v40, %s15997_s2 }
 0x1cc   : > { %1815 = vrot.lane.b32.xlu1 %v8392_v46, %s15997_s2 }
 0x1cd   : > { %1799 = vrot.lane.b32.xlu0 %v8388_v45, %s15997_s2  ;;  %v8755_v61 = vpop.permute.xlu2 %1467 }
 0x1ce   : > { %16155 = vst [vmem:[#allocation54_spill] sm:$0xff] %v8755_v61  ;;  %v8757_v24 = vpop.permute.xlu1 %1535  ;;  %v1485_v31 = vsel %vm1469_vm1, %v8755_v61, %v8734_v26  ;;  %v1482_v61 = vsel %vm1469_vm1, %v8702_v2, %v8626_v36 }
 0x1cf   : > { %v1507_v49 = vmul.f32 %v8753_v43, %v1485_v31  ;;  %v8764_v46 = vpop.permute.xlu0 %1449  ;;  %v1483_v31 = vsel %vm1469_vm1, %v8674_v54, %v8712_v4  ;;  %v1481_v4 = vsel %vm1469_vm1, %v8664_v50, %v8654_v48 }
 0x1d0   : > { %v1503_v1 = vmul.f32 %v8753_v43, %v1483_v31  ;;  %v1499_v50 = vmul.f32 %v8753_v43, %v1481_v4 }
 0x1d1   : > { %1997 = vmatpush.msra.mxu2 %v1507_v49 }
 0x1d3   : > { %1669 = vrot.lane.b32.xlu2 %v8368_v33, %s15979_s1 }
 0x1d4   : > { %1797 = vrot.lane.b32.xlu1 %v8366_v32, %s15997_s2 }
 0x1d5   : > { %1899 = vrot.lane.b32.xlu0 %v8472_v12, %s15991_s10  ;;  %v8772_v45 = vpop.permute.xlu2 %1595 }
 0x1d6   : > { %16156 = vst [vmem:[#allocation55_spill] sm:$0xff] %v8772_v45  ;;  %v8774_v34 = vpop.permute.xlu1 %1465 }
 0x1d7   : > { %v1484_v49 = vsel %vm1469_vm1, %v8774_v34, %v8764_v46  ;;  %v8784_v26 = vpop.permute.xlu0 %1593 }
 0x1d8   : > { %16157 = vst [vmem:[#allocation56_spill] sm:$0xff] %v8784_v26  ;;  %v1505_v32 = vmul.f32 %v8753_v43, %v1484_v49  ;;  %v1501_v49 = vmul.f32 %v8753_v43, %v1482_v61  ;;  %v1479_v61 = vsel %vm1469_vm1, %v8630_v38, %v8554_v16 }
 0x1d9   : > { %v1495_v4 = vmul.f32 %v8753_v43, %v1479_v61  ;;  %v8840_v61 = vld [vmem:[%s16120_s5] ss:$8 sm:$0x3] }
 0x1da   : > { %1998 = vmatpush.msra.mxu2 %v1505_v32  ;;  %v1480_v32 = vsel %vm1469_vm1, %v8538_v14, %v8594_v27  ;;  %v1478_v14 = vsel %vm1469_vm1, %v8558_v18, %v8556_v17  ;;  %16161 = vst [vmem:[#allocation60_spill] sm:$0xff] %v8840_v61 }
 0x1db   : > { %1883 = vrot.lane.b32.xlu2 %v8470_v11, %s15991_s10  ;;  %v1497_v27 = vmul.f32 %v8753_v43, %v1480_v32 }
 0x1dc   : > { %1897 = vrot.lane.b32.xlu1 %v8456_v6, %s15991_s10  ;;  %1999 = vmatpush.msra.mxu2 %v1503_v1 }
 0x1dd   : > { %1881 = vrot.lane.b32.xlu0 %v8454_v5, %s15991_s10  ;;  %v8807_v31 = vpop.permute.xlu2 %1394 }
 0x1de   : > { %v8809_v48 = vpop.permute.xlu1 %1609  ;;  %2000 = vmatpush.msra.mxu2 %v1501_v49 }
 0x1df   : > { %16158 = vst [vmem:[#allocation57_spill] sm:$0xff] %v8809_v48  ;;  %v8816_v1 = vpop.permute.xlu0 %1392 }
 0x1e0   : > { %16159 = vst [vmem:[#allocation58_spill] sm:$0xff] %v8816_v1  ;;  %2001 = vmatpush.msra.mxu2 %v1499_v50  ;;  %v1493_v50 = vmul.f32 %v8753_v43, %v1478_v14  ;;  %v8845_v14 = vld [vmem:[%s16120_s5 + $0x3] ss:$8 sm:$0x3] }
 0x1e1   : > { %16162 = vst [vmem:[#allocation61_spill] sm:$0xff] %v8845_v14 }
 0x1e2   : > { %2002 = vmatpush.msra.mxu2 %v1497_v27 }
 0x1e3   : > { %1813 = vrot.lane.b32.xlu2 %v8368_v33, %s15997_s2 }
 0x1e4   : > { %1879 = vrot.lane.b32.xlu1 %v8440_v63, %s15991_s10  ;;  %2003 = vmatpush.msra.mxu2 %v1495_v4 }
 0x1e5   : > { %1755 = vrot.lane.b32.xlu0 %v8472_v12, %s15999_s11  ;;  %v8831_v49 = vpop.permute.xlu2 %1539 }
 0x1e6   : > { %v8833_v32 = vpop.permute.xlu1 %1665  ;;  %2004 = vmatpush.msra.mxu2 %v1493_v50  ;;  %v8855_v50 = vperm.slane %v8840_v61, 0  ;;  %v1628_v61 = vsel %vm1613_vm3, %v8809_v48, %v8784_v26  ;;  %v1627_v26 = vsel %vm1613_vm3, %v8686_v59, %v8724_v9 }
 0x1e7   : > { %16160 = vst [vmem:[#allocation59_spill] sm:$0xff] %v8833_v32  ;;  %v8835_v27 = vpop.permute.xlu0 %1537 }
 0x1e8   : > { %16165 = vst [vmem:[#allocation64_spill] sm:$0xff] %v8855_v50 }
 0x1eb   : > { %1739 = vrot.lane.b32.xlu2 %v8470_v11, %s15999_s11 }
 0x1ec   : > { %1753 = vrot.lane.b32.xlu1 %v8456_v6, %s15999_s11  ;;  %v1413_v6 = vsel %vm1398_vm2, %v8816_v1, %v8698_v62 }
 0x1ed   : > { %1737 = vrot.lane.b32.xlu0 %v8454_v5, %s15999_s11  ;;  %v8849_v12 = vpop.permute.xlu2 %1667  ;;  %v8867_v5 = vperm.slane %v8845_v14, 0  ;;  %v1412_v14 = vsel %vm1398_vm2, %v8736_v25, %v8726_v10  ;;  %v1433_v48 = vmul.f32 %v8855_v50, %v1413_v6  ;;  %v8905_v6 = vld [vmem:[%s16120_s5 + $0x5] ss:$8 sm:$0x3] }
 0x1ee   : > { %16163 = vst [vmem:[#allocation62_spill] sm:$0xff] %v8849_v12  ;;  %v8852_v4 = vpop.permute.xlu1 %1378 }
 0x1ef   : > { %16164 = vst [vmem:[#allocation63_spill] sm:$0xff] %v8852_v4  ;;  %v1414_v43 = vsel %vm1398_vm2, %v8807_v31, %v8852_v4  ;;  %v8869_v11 = vpop.permute.xlu0 %1611 }
 0x1f0   : > { %16166 = vst [vmem:[#allocation65_spill] sm:$0xff] %v8867_v5  ;;  %v1629_v62 = vsel %vm1613_vm3, %v8869_v11, %v8772_v45  ;;  %v1435_v1 = vmul.f32 %v8855_v50, %v1414_v43  ;;  %v1411_v43 = vsel %vm1398_vm2, %v8650_v44, %v8688_v60  ;;  %v1649_v45 = vmul.f32 %v8867_v5, %v1628_v61 }
 0x1f1   : > { %v1651_v4 = vmul.f32 %v8867_v5, %v1629_v62  ;;  %v1626_v62 = vsel %vm1613_vm3, %v8714_v7, %v8638_v39  ;;  %16167 = vst [vmem:[#allocation66_spill] sm:$0xff] %v8905_v6  ;;  %v1647_v39 = vmul.f32 %v8867_v5, %v1627_v26  ;;  %v1429_v7 = vmul.f32 %v8855_v50, %v1411_v43 }
 0x1f2   : > { %2005 = vmatpush.msra.mxu2 %v1435_v1  ;;  %v1431_v1 = vmul.f32 %v8855_v50, %v1412_v14  ;;  %v1645_v26 = vmul.f32 %v8867_v5, %v1626_v62  ;;  %v1624_v43 = vsel %vm1613_vm3, %v8546_v15, %v8606_v30  ;;  %v1692_v62 = vsel %vm1685_vm4, %v8833_v32, %v8722_v8 }
 0x1f3   : > { %2026 = vmatpush.msra.mxu3 %v1651_v4  ;;  %1895 = vrot.lane.b32.xlu2 %v8442_v0, %s15991_s10  ;;  %v1410_v4 = vsel %vm1398_vm2, %v8678_v56, %v8602_v28 }
 0x1f4   : > { %1735 = vrot.lane.b32.xlu1 %v8440_v63, %s15999_s11  ;;  %2006 = vmatpush.msra.mxu2 %v1433_v48  ;;  %v1625_v48 = vsel %vm1613_vm3, %v8676_v55, %v8666_v53  ;;  %v1409_v53 = vsel %vm1398_vm2, %v8618_v35, %v8604_v29 }
 0x1f5   : > { %1893 = vrot.lane.b32.xlu0 %v8426_v58, %s15991_s10  ;;  %2027 = vmatpush.msra.mxu3 %v1649_v45  ;;  %v8913_v61 = vpop.permute.xlu2 %1663  ;;  %v8925_v45 = vperm.slane %v8905_v6, 0  ;;  %v1643_v55 = vmul.f32 %v8867_v5, %v1625_v48  ;;  %v1407_v48 = vsel %vm1398_vm2, %v8580_v23, %v8530_v13 }
 0x1f6   : > { %16168 = vst [vmem:[#allocation67_spill] sm:$0xff] %v8913_v61  ;;  %v8921_v14 = vpop.permute.xlu1 %1523  ;;  %2007 = vmatpush.msra.mxu2 %v1431_v1 }
 0x1f7   : > { %2028 = vmatpush.msra.mxu3 %v1647_v39  ;;  %v8927_v9 = vpop.permute.xlu0 %1683  ;;  %v1427_v39 = vmul.f32 %v8855_v50, %v1410_v4  ;;  %v8954_v4 = vld [vmem:[%s16120_s5 + $0x7] ss:$8 sm:$0x3] }
 0x1f8   : > { %16169 = vst [vmem:[#allocation68_spill] sm:$0xff] %v8927_v9  ;;  %v1693_v1 = vsel %vm1685_vm4, %v8849_v12, %v8927_v9  ;;  %2008 = vmatpush.msra.mxu2 %v1429_v7  ;;  %v1408_v7 = vsel %vm1398_vm2, %v8578_v22, %v8640_v41  ;;  %v1623_v9 = vsel %vm1613_vm3, %v8642_v42, %v8566_v19 }
 0x1f9   : > { %v1723_v6 = vmul.f32 %v8925_v45, %v1693_v1  ;;  %2029 = vmatpush.msra.mxu3 %v1645_v26  ;;  %16170 = vst [vmem:[#allocation69_spill] sm:$0xff] %v8954_v4  ;;  %v1425_v26 = vmul.f32 %v8855_v50, %v1409_v53  ;;  %v1641_v1 = vmul.f32 %v8867_v5, %v1624_v43  ;;  %v8982_v43 = vperm.slane %v8954_v4, 0  ;;  %v8999_v4 = vld [vmem:[%s8168_s25] sm:$0xff] }
 0x1fa   : > { %2009 = vmatpush.msra.mxu2 %v1427_v39  ;;  %v1721_v39 = vmul.f32 %v8925_v45, %v1692_v62  ;;  %v1622_v53 = vsel %vm1613_vm3, %v8570_v21, %v8568_v20  ;;  %v8985_v62 = vld [vmem:[%s16120_s5 + $0x2] ss:$8 sm:$0x3]  ;;  %v1639_v32 = vmul.f32 %v8867_v5, %v1623_v9  ;;  %v1421_v12 = vmul.f32 %v8855_v50, %v1407_v48 }
 0x1fb   : > { %2030 = vmatpush.msra.mxu3 %v1643_v55  ;;  %2055 = vmatpush.msra.mxu0 %v1723_v6  ;;  %v1423_v6 = vmul.f32 %v8855_v50, %v1408_v7  ;;  %16172 = vst [vmem:[#allocation71_spill] sm:$0xff] %v8982_v43  ;;  %v1557_v7 = vsel %vm1541_vm6, %v8831_v49, %v8921_v14 }
 0x1fc   : > { %1891 = vrot.lane.b32.xlu1 %v8408_v52, %s15991_s10  ;;  %1877 = vrot.lane.b32.xlu2 %v8424_v57, %s15991_s10  ;;  %v1637_v9 = vmul.f32 %v8867_v5, %v1622_v53  ;;  %v1555_v53 = vsel %vm1541_vm6, %v8757_v24, %v8738_v47  ;;  %v16179_v5 = vld [vmem:[#allocation33_spill] sm:$0xff]  ;;  %v16185_v47 = vld [vmem:[#allocation30_spill] sm:$0xff] }
 0x1fd   : > { %1875 = vrot.lane.b32.xlu0 %v8406_v51, %s15991_s10  ;;  %2010 = vmatpush.msra.mxu2 %v1425_v26  ;;  %v8977_v55 = vpop.permute.xlu2 %1825 }
 0x1fe   : > { %16171 = vst [vmem:[#allocation70_spill] sm:$0xff] %v8977_v55  ;;  %2031 = vmatpush.msra.mxu3 %v1641_v1  ;;  %2056 = vmatpush.msra.mxu0 %v1721_v39  ;;  %v8988_v8 = vpop.permute.xlu1 %1827  ;;  %v9007_v39 = vperm.slane %v8985_v62, 0 }
 0x1ff   : > { %16173 = vst [vmem:[#allocation72_spill] sm:$0xff] %v8988_v8  ;;  %2011 = vmatpush.msra.mxu2 %v1423_v6  ;;  %v8995_v26 = vpop.permute.xlu0 %1811  ;;  %v1556_v6 = vsel %vm1541_vm6, %v8835_v27, %v8710_v3 }
 0x200   : > { %16174 = vst [vmem:[#allocation73_spill] sm:$0xff] %v8995_v26  ;;  %2032 = vmatpush.msra.mxu3 %v1639_v32  ;;  %v1837_v1 = vsel %vm1829_vm5, %v8995_v26, %v8988_v8  ;;  %v1579_v32 = vmul.f32 %v9007_v39, %v1557_v7  ;;  %v1577_v50 = vmul.f32 %v9007_v39, %v1556_v6  ;;  %v16180_v6 = vld [vmem:[#allocation43_spill] sm:$0xff] }
 0x201   : > { %16175 = vst [vmem:[#allocation74_spill] sm:$0xff] %v9007_v39  ;;  %v1867_v48 = vmul.f32 %v8982_v43, %v1837_v1  ;;  %2012 = vmatpush.msra.mxu2 %v1421_v12  ;;  %v16176_v1 = vld [vmem:[#allocation45_spill] sm:$0xff]  ;;  %v16177_v12 = vld [vmem:[#allocation39_spill] sm:$0xff]  ;;  %v1553_v8 = vsel %vm1541_vm6, %v16180_v6, %v16179_v5  ;;  %v16182_v5 = vld [vmem:[#allocation34_spill] sm:$0xff] }
 0x202   : > { %2033 = vmatpush.msra.mxu3 %v1637_v9  ;;  %2013 = vmatmul.f32.vlgmr.msra.gmra.mxu2 %v8999_v4  ;;  %v1554_v7 = vsel %vm1541_vm6, %v16177_v12, %v16176_v1  ;;  %v9053_v1 = vld [vmem:[%s8168_s25 + $0x28] sm:$0xff]  ;;  %v16184_v12 = vld [vmem:[#allocation37_spill] sm:$0xff] }
 0x203   : > { %2084 = vmatpush.msra.mxu1 %v1867_v48  ;;  %v16183_v6 = vld [vmem:[#allocation35_spill] sm:$0xff] }
 0x204   : > { %2034 = vmatpush.msra.mxu3 %v1579_v32  ;;  %1873 = vrot.lane.b32.xlu1 %v8380_v40, %s15991_s10  ;;  %v1575_v32 = vmul.f32 %v9007_v39, %v1555_v53 }
 0x205   : > { %1751 = vrot.lane.b32.xlu2 %v8442_v0, %s15999_s11  ;;  %1749 = vrot.lane.b32.xlu0 %v8426_v58, %s15999_s11  ;;  %v9031_v9 = vpop.permute.xlu2 %1807 }
 0x206   : > { %2035 = vmatpush.msra.mxu3 %v1577_v50  ;;  %v9033_v48 = vpop.permute.xlu1 %1809  ;;  %v1573_v50 = vmul.f32 %v9007_v39, %v1554_v7  ;;  %v1551_v7 = vsel %vm1541_vm6, %v16185_v47, %v16184_v12  ;;  %v9100_v12 = vld [vmem:[%s8168_s25 + $0x8] sm:$0xff] }
 0x207   : > { %16178 = vst [vmem:[#allocation75_spill] sm:$0xff] %v9033_v48  ;;  %v1836_v0 = vsel %vm1829_vm5, %v9033_v48, %v8977_v55  ;;  %v9044_v26 = vpop.permute.xlu0 %1679  ;;  %v1552_v55 = vsel %vm1541_vm6, %v16183_v6, %v16182_v5 }
 0x208   : > { %16181 = vst [vmem:[#allocation76_spill] sm:$0xff] %v9044_v26  ;;  %2036 = vmatpush.msra.mxu3 %v1575_v32  ;;  %v1691_v58 = vsel %vm1685_vm4, %v8913_v61, %v9044_v26  ;;  %v1865_v53 = vmul.f32 %v8982_v43, %v1836_v0  ;;  %v1571_v32 = vmul.f32 %v9007_v39, %v1553_v8  ;;  %v1265_v26 = vld [vmem:[%s8188_s14] sm:$0xff] }
 0x209   : > { %v1719_v48 = vmul.f32 %v8925_v45, %v1691_v58  ;;  %v1569_v0 = vmul.f32 %v9007_v39, %v1552_v55  ;;  %v16186_v58 = vld [vmem:[#allocation31_spill] sm:$0xff]  ;;  %v1567_v55 = vmul.f32 %v9007_v39, %v1551_v7  ;;  %7894 = vmatmul.msk.f32.vlgmr.msrb.gmra.mxu0 %vm1293_vm7, %v1265_v26  ;;  %7898 = vmatmul.msk.f32.vlgmr.msrb.gmra.mxu1 %vm1293_vm7, %v1265_v26 }
 0x20a   : > { %2037 = vmatpush.msra.mxu3 %v1573_v50  ;;  %2085 = vmatpush.msra.mxu1 %v1865_v53  ;;  %v16187_v50 = vld [vmem:[#allocation29_spill] sm:$0xff]  ;;  %v16190_v53 = vld [vmem:[#allocation54_spill] sm:$0xff] }
 0x20b   : > { %2057 = vmatpush.msra.mxu0 %v1719_v48  ;;  %2016 = vmatmul.f32.gmra.mxu2 %v9053_v1  ;;  %v1550_v8 = vsel %vm1541_vm6, %v16187_v50, %v16186_v58 }
 0x20c   : > { %2038 = vmatpush.msra.mxu3 %v1571_v32  ;;  %1747 = vrot.lane.b32.xlu1 %v8408_v52, %s15999_s11  ;;  %v16191_v32 = vld [vmem:[#allocation50_spill] sm:$0xff] }
 0x20d   : > { %1733 = vrot.lane.b32.xlu2 %v8424_v57, %s15999_s11  ;;  %1731 = vrot.lane.b32.xlu0 %v8406_v51, %s15999_s11  ;;  %v9078_v48 = vpop.permute.xlu2 %1675  ;;  %v1477_v61 = vsel %vm1469_vm1, %v16191_v32, %v16190_v53  ;;  %v16192_v51 = vld [vmem:[#allocation52_spill] sm:$0xff]  ;;  %v1476_v53 = vsel %vm1469_vm1, %v8764_v46, %v8774_v34  ;;  %v1266_v34 = vld [vmem:[%s8188_s14 + $0x8] sm:$0xff] }
 0x20e   : > { %16188 = vst [vmem:[#allocation34_spill] sm:$0xff] %v9078_v48  ;;  %2039 = vmatpush.msra.mxu3 %v1569_v0  ;;  %v9080_v52 = vpop.permute.xlu1 %1677  ;;  %v9092_v50 = vperm.slane %v16192_v51, 1  ;;  %v1565_v0 = vmul.f32 %v9007_v39, %v1550_v8  ;;  %v9108_v32 = vld [vmem:[%s8168_s25 + $0x50] sm:$0xff]  ;;  %v16194_v51 = vld [vmem:[#allocation46_spill] sm:$0xff] }
 0x20f   : > { %16189 = vst [vmem:[#allocation35_spill] sm:$0xff] %v9080_v52  ;;  %v9088_v58 = vpop.permute.xlu0 %1661  ;;  %v16201_v39 = vld [vmem:[#allocation32_spill] sm:$0xff] }
 0x210   : > { %16193 = vst [vmem:[#allocation30_spill] sm:$0xff] %v9092_v50  ;;  %2040 = vmatpush.msra.mxu3 %v1567_v55  ;;  %v1690_v7 = vsel %vm1685_vm4, %v9088_v58, %v9080_v52  ;;  %v1508_v55 = vmul.f32 %v9092_v50, %v1477_v61  ;;  %v1475_v52 = vsel %vm1469_vm1, %v16194_v51, %v8674_v54  ;;  %v16195_v54 = vld [vmem:[#allocation23_spill] sm:$0xff] }
 0x211   : > { %v1717_v26 = vmul.f32 %v8925_v45, %v1690_v7  ;;  %v1506_v46 = vmul.f32 %v9092_v50, %v1476_v53  ;;  %v1474_v61 = vsel %vm1469_vm1, %v8626_v36, %v8702_v2  ;;  %v16196_v7 = vld [vmem:[#allocation25_spill] sm:$0xff]  ;;  %v16199_v36 = vld [vmem:[#allocation38_spill] sm:$0xff]  ;;  %7895 = vmatmul.msk.f32.gmra.mxu0 %vm1293_vm7, %v1266_v34  ;;  %7899 = vmatmul.msk.f32.gmra.mxu1 %vm1293_vm7, %v1266_v34 }
 0x212   : > { %2041 = vmatpush.msra.mxu3 %v1565_v0  ;;  %v1504_v0 = vmul.f32 %v9092_v50, %v1475_v52  ;;  %v1502_v51 = vmul.f32 %v9092_v50, %v1474_v61  ;;  %v1471_v61 = vsel %vm1469_vm1, %v8554_v16, %v8630_v38  ;;  %v16202_v16 = vld [vmem:[#allocation24_spill] sm:$0xff] }
 0x213   : > { %2042 = vmatmul.f32.vlgmr.msra.gmra.mxu3 %v9100_v12  ;;  %2058 = vmatpush.msra.mxu0 %v1717_v26  ;;  %v16198_v26 = vld [vmem:[#allocation40_spill] sm:$0xff] }
 0x214   : > { %2142 = vmatpush.msrb.mxu3 %v1508_v55  ;;  %2019 = vmatmul.f32.gmra.mxu2 %v9108_v32  ;;  %v1473_v2 = vsel %vm1469_vm1, %v16199_v36, %v16198_v26  ;;  %v16200_v36 = vld [vmem:[#allocation28_spill] sm:$0xff] }
 0x215   : > { %1729 = vrot.lane.b32.xlu1 %v8380_v40, %s15999_s11  ;;  %1889 = vrot.lane.b32.xlu2 %v16195_v54, %s15991_s10  ;;  %v9127_v8 = vpop.permute.xlu2 %1657 }
 0x216   : > { %2143 = vmatpush.msrb.mxu3 %v1506_v46  ;;  %1887 = vrot.lane.b32.xlu0 %v16196_v7, %s15991_s10  ;;  %v9132_v53 = vpop.permute.xlu1 %1659  ;;  %v9152_v46 = vld [vmem:[%s8168_s25 + $0x30] sm:$0xff] }
 0x217   : > { %16197 = vst [vmem:[#allocation54_spill] sm:$0xff] %v9132_v53  ;;  %v1689_v40 = vsel %vm1685_vm4, %v9132_v53, %v9078_v48  ;;  %v9142_v55 = vpop.permute.xlu0 %1823  ;;  %v1472_v48 = vsel %vm1469_vm1, %v16201_v39, %v16200_v36  ;;  %v1500_v53 = vmul.f32 %v9092_v50, %v1473_v2  ;;  %v1470_v2 = vsel %vm1469_vm1, %v8556_v17, %v8558_v18  ;;  %v9201_v36 = vld [vmem:[%s8168_s25 + $0x58] sm:$0xff] }
 0x218   : > { %2144 = vmatpush.msrb.mxu3 %v1504_v0  ;;  %v1835_v52 = vsel %vm1829_vm5, %v9031_v9, %v9142_v55  ;;  %v1715_v26 = vmul.f32 %v8925_v45, %v1689_v40  ;;  %v9161_v0 = vld [vmem:[%s8168_s25 + $0x78] sm:$0xff]  ;;  %v1498_v39 = vmul.f32 %v9092_v50, %v1472_v48  ;;  %v1267_v40 = vld [vmem:[%s8188_s14 + $0x10] sm:$0xff]  ;;  %v1496_v48 = vmul.f32 %v9092_v50, %v1471_v61 }
 0x219   : > { %v1863_v34 = vmul.f32 %v8982_v43, %v1835_v52  ;;  %7896 = vmatmul.msk.f32.gmra.mxu0 %vm1293_vm7, %v1267_v40  ;;  %7900 = vmatmul.msk.f32.gmra.mxu1 %vm1293_vm7, %v1267_v40 }
 0x21a   : > { %2145 = vmatpush.msrb.mxu3 %v1502_v51  ;;  %2059 = vmatpush.msra.mxu0 %v1715_v26  ;;  %v16204_v51 = vld [vmem:[#allocation63_spill] sm:$0xff]  ;;  %v1494_v26 = vmul.f32 %v9092_v50, %v1470_v2  ;;  %v1404_v2 = vsel %vm1398_vm2, %v8726_v10, %v8736_v25  ;;  %v1268_v50 = vld [vmem:[%s8188_s14 + $0x18] sm:$0xff] }
 0x21b   : > { %2045 = vmatmul.f32.gmra.mxu3 %v9152_v46  ;;  %2086 = vmatpush.msra.mxu1 %v1863_v34  ;;  %v1406_v17 = vsel %vm1398_vm2, %v16204_v51, %v8807_v31  ;;  %v16205_v34 = vld [vmem:[#allocation60_spill] sm:$0xff]  ;;  %v16207_v31 = vld [vmem:[#allocation58_spill] sm:$0xff] }
 0x21c   : > { %2146 = vmatpush.msrb.mxu3 %v1500_v53  ;;  %2022 = vmatmul.f32.gmra.mxu2 %v9161_v0  ;;  %v16203_v53 = vld [vmem:[#allocation22_spill] sm:$0xff]  ;;  %v9204_v61 = vperm.slane %v16205_v34, 1 }
 0x21d   : > { %1885 = vrot.lane.b32.xlu1 %v8368_v33, %s15991_s10  ;;  %1871 = vrot.lane.b32.xlu2 %v16202_v16, %s15991_s10  ;;  %v9180_v38 = vpop.permute.xlu2 %1819 }
 0x21e   : > { %2147 = vmatpush.msrb.mxu3 %v1498_v39  ;;  %1869 = vrot.lane.b32.xlu0 %v16203_v53, %s15991_s10  ;;  %v9185_v52 = vpop.permute.xlu1 %1821  ;;  %16206 = vst [vmem:[#allocation50_spill] sm:$0xff] %v9204_v61  ;;  %v16208_v39 = vld [vmem:[#allocation44_spill] sm:$0xff]  ;;  %v1432_v10 = vmul.f32 %v9204_v61, %v1404_v2 }
 0x21f   : > { %v9191_v18 = vpop.permute.xlu0 %1805  ;;  %v1405_v51 = vsel %vm1398_vm2, %v16208_v39, %v16207_v31  ;;  %v1963_v39 = vld [vmem:[%s8173_s29 + $0x10] sm:$0xff] }
 0x220   : > { %2148 = vmatpush.msrb.mxu3 %v1496_v48  ;;  %v1834_v33 = vsel %vm1829_vm5, %v9191_v18, %v9185_v52  ;;  %v1436_v48 = vmul.f32 %v9204_v61, %v1406_v17  ;;  %v1434_v34 = vmul.f32 %v9204_v61, %v1405_v51  ;;  %v1400_v51 = vsel %vm1398_vm2, %v8640_v41, %v8578_v22 }
 0x221   : > { %v1861_v40 = vmul.f32 %v8982_v43, %v1834_v33  ;;  %v1403_v33 = vsel %vm1398_vm2, %v8688_v60, %v8650_v44  ;;  %v1402_v44 = vsel %vm1398_vm2, %v8602_v28, %v8678_v56  ;;  %7897 = vmatmul.msk.f32.gmra.mxu0 %vm1293_vm7, %v1268_v50  ;;  %7901 = vmatmul.msk.f32.gmra.mxu1 %vm1293_vm7, %v1268_v50  ;;  %v9252_v56 = vld [vmem:[%s8168_s25 + $0x80] sm:$0xff] }
 0x222   : > { %2149 = vmatpush.msrb.mxu3 %v1494_v26  ;;  %v1430_v28 = vmul.f32 %v9204_v61, %v1403_v33  ;;  %v1401_v26 = vsel %vm1398_vm2, %v8604_v29, %v8618_v35  ;;  %v1428_v50 = vmul.f32 %v9204_v61, %v1402_v44  ;;  %v1399_v29 = vsel %vm1398_vm2, %v8530_v13, %v8580_v23  ;;  %v9291_v33 = vld [vmem:[%s8364_s16 + $0x8] sm:$0xff] }
 0x223   : > { %2048 = vmatmul.f32.gmra.mxu3 %v9201_v36  ;;  %2087 = vmatpush.msra.mxu1 %v1861_v40  ;;  %v1964_v40 = vld [vmem:[%s8173_s29 + $0x18] sm:$0xff]  ;;  %v1424_v22 = vmul.f32 %v9204_v61, %v1400_v51  ;;  %v1422_v23 = vmul.f32 %v9204_v61, %v1399_v29  ;;  %v8074_v29 = vld [vmem:[%s8364_s16 + $0x30] sm:$0xff] }
 0x224   : > { %2150 = vmatpush.msrb.mxu3 %v1436_v48  ;;  %v1426_v48 = vmul.f32 %v9204_v61, %v1401_v26  ;;  %v16209_v26 = vld [vmem:[#allocation27_spill] sm:$0xff]  ;;  %v8077_v61 = vld [vmem:[%s8364_s16] sm:$0xff] }
 0x225   : > { %1725 = vrot.lane.b32.xlu1 %v16203_v53, %s15999_s11  ;;  %1745 = vrot.lane.b32.xlu2 %v16195_v54, %s15999_s11  ;;  %v9227_v25 = vpop.permute.xlu2 %1801 }
 0x226   : > { %2151 = vmatpush.msrb.mxu3 %v1434_v34  ;;  %1743 = vrot.lane.b32.xlu0 %v16196_v7, %s15999_s11  ;;  %v9232_v17 = vpop.permute.xlu1 %1803  ;;  %v1961_v34 = vld [vmem:[%s8173_s29] sm:$0xff] }
 0x227   : > { %v1833_v60 = vsel %vm1829_vm5, %v9232_v17, %v9180_v38  ;;  %v9242_v54 = vpop.permute.xlu0 %1673 }
 0x228   : > { %2152 = vmatpush.msrb.mxu3 %v1432_v10  ;;  %v1688_v7 = vsel %vm1685_vm4, %v9127_v8, %v9242_v54  ;;  %v1859_v53 = vmul.f32 %v8982_v43, %v1833_v60 }
 0x229   : > { %v1713_v31 = vmul.f32 %v8925_v45, %v1688_v7 }
 0x22a   : > { %2153 = vmatpush.msrb.mxu3 %v1430_v28  ;;  %2088 = vmatpush.msra.mxu1 %v1859_v53 }
 0x22b   : > { %2051 = vmatmul.f32.gmra.mxu3 %v9252_v56  ;;  %2060 = vmatpush.msra.mxu0 %v1713_v31 }
 0x22c   : > { %2154 = vmatpush.msrb.mxu3 %v1428_v50 }
 0x22d   : > { %1977 = vperm.xlu1 %8071, %v1963_v39   ;;  %1727 = vrot.lane.b32.xlu2 %v16202_v16, %s15999_s11  ;;  %v9275_v35 = vpop.permute.xlu2 %1669  ;;  %v16210_v39 = vld [vmem:[#allocation26_spill] sm:$0xff] }
 0x22e   : > { %2155 = vmatpush.msrb.mxu3 %v1426_v48  ;;  %1982 = vperm.xlu0 %8070, %v1964_v40   ;;  %v9278_v41 = vpop.permute.xlu1 %1671  ;;  %v7908_v48 = vld [vmem:[%s16120_s5 + $0x10] ss:$8 sm:$0x3] }
 0x22f   : > { %v9280_v2 = vpop.permute.xlu0 %1655 }
 0x230   : > { %2156 = vmatpush.msrb.mxu3 %v1424_v22  ;;  %v1687_v13 = vsel %vm1685_vm4, %v9280_v2, %v9278_v41 }
 0x231   : > { %v1711_v16 = vmul.f32 %v8925_v45, %v1687_v13  ;;  %v9331_v13 = vperm.slane %v7908_v48, 0 }
 0x232   : > { %2157 = vmatpush.msrb.mxu3 %v1422_v23  ;;  %v9333_v23 = vperm.slane %v7908_v48, 1 }
 0x233   : > { %2158 = vmatmul.f32.vlgmr.msrb.gmra.mxu3 %v8999_v4  ;;  %2061 = vmatpush.msra.mxu0 %v1711_v16  ;;  %16211 = vst [vmem:[#allocation52_spill] sm:$0xff] %v9331_v13 }
 0x234   : > { %16212 = vst [vmem:[#allocation46_spill] sm:$0xff] %v9333_v23 }
 0x235   : > { %1741 = vrot.lane.b32.xlu2 %v9291_v33, %s15999_s11  ;;  %v1884_v10 = vpop.permute.xlu2 %1883 }
 0x236   : > { %1967 = vperm.xlu0 %8070, %v1961_v34   ;;  %v9295_v44 = vpop.permute.xlu1 %1653  ;;  %v16213_v34 = vld [vmem:[#allocation55_spill] sm:$0xff] }
 0x237   : > { %v1686_v60 = vsel %vm1685_vm4, %v9295_v44, %v9275_v35  ;;  %v9301_v7 = vpop.permute.xlu0 %1817 }
 0x238   : > { %v1832_v4 = vsel %vm1829_vm5, %v9227_v25, %v9301_v7  ;;  %v1709_v28 = vmul.f32 %v8925_v45, %v1686_v60  ;;  %v1621_v60 = vsel %vm1613_vm3, %v16213_v34, %v8869_v11  ;;  %v16216_v11 = vld [vmem:[#allocation57_spill] sm:$0xff] }
 0x239   : > { %v1857_v53 = vmul.f32 %v8982_v43, %v1832_v4 }
 0x23a   : > { %2062 = vmatpush.msra.mxu0 %v1709_v28 }
 0x23b   : > { %2161 = vmatmul.f32.gmra.mxu3 %v9053_v1  ;;  %2089 = vmatpush.msra.mxu1 %v1857_v53  ;;  %v8076_v53 = vld [vmem:[%s8364_s16 + $0x10] sm:$0xff] }
 0x23c   : > { %2063 = vmatpush.msra.mxu0 %v16209_v26 }
 0x23d   : > { %v9311_v31 = vpop.permute.xlu2 %1813 }
 0x23e   : > { %v9313_v50 = vpop.permute.xlu1 %1815  ;;  %2064 = vmatpush.msra.mxu0 %v16210_v39  ;;  %v16214_v39 = vld [vmem:[#allocation61_spill] sm:$0xff] }
 0x23f   : > { %v9316_v51 = vpop.permute.xlu0 %1799 }
 0x240   : > { %v1831_v40 = vsel %vm1829_vm5, %v9316_v51, %v9313_v50  ;;  %2065 = vmatpush.msra.mxu0 %v8440_v63 }
 0x241   : > { %v1855_v1 = vmul.f32 %v8982_v43, %v1831_v40  ;;  %v9353_v40 = vperm.slane %v16214_v39, 1 }
 0x242   : > { %2066 = vmatpush.msra.mxu0 %v8424_v57  ;;  %v8075_v57 = vld [vmem:[%s8364_s16 + $0x20] sm:$0xff] }
 0x243   : > { %2164 = vmatmul.f32.gmra.mxu3 %v9108_v32  ;;  %2090 = vmatpush.msra.mxu1 %v1855_v1  ;;  %16215 = vst [vmem:[#allocation23_spill] sm:$0xff] %v9353_v40 }
 0x244   : > { %2067 = vmatpush.msra.mxu0 %v8074_v29  ;;  %v9358_v29 = vld [vmem:[%s8168_s25 + $0x10] sm:$0xff] }
 0x245   : > { %v9328_v22 = vpop.permute.xlu2 %1739 }
 0x246   : > { %v9335_v63 = vpop.permute.xlu1 %1797  ;;  %2068 = vmatpush.msra.mxu0 %v8075_v57  ;;  %v16217_v57 = vld [vmem:[#allocation56_spill] sm:$0xff] }
 0x247   : > { %v1830_v32 = vsel %vm1829_vm5, %v9335_v63, %v9311_v31  ;;  %v1900_v16 = vpop.permute.xlu0 %1899  ;;  %v1620_v34 = vsel %vm1613_vm3, %v16217_v57, %v16216_v11 }
 0x248   : > { %v1909_v4 = vsel %vm1901_vm8, %v1884_v10, %v1900_v16  ;;  %v1917_v28 = vsel %vm1901_vm8, %v1900_v16, %v1884_v10  ;;  %2069 = vmatpush.msra.mxu0 %v8076_v53  ;;  %v1853_v26 = vmul.f32 %v8982_v43, %v1830_v32  ;;  %v1652_v10 = vmul.f32 %v9353_v40, %v1621_v60  ;;  %v16218_v32 = vld [vmem:[#allocation49_spill] sm:$0xff]  ;;  %v16220_v53 = vld [vmem:[#allocation36_spill] sm:$0xff] }
 0x249   : > { %v1939_v1 = vmul.f32 %v9331_v13, %v1909_v4  ;;  %v1940_v48 = vmul.f32 %v9333_v23, %v1917_v28  ;;  %v1619_v16 = vsel %vm1613_vm3, %v16218_v32, %v8686_v59  ;;  %v1650_v4 = vmul.f32 %v9353_v40, %v1620_v34  ;;  %v16219_v28 = vld [vmem:[#allocation47_spill] sm:$0xff]  ;;  %v16221_v59 = vld [vmem:[#allocation42_spill] sm:$0xff] }
 0x24a   : > { %2070 = vmatpush.msra.mxu0 %v8077_v61  ;;  %2091 = vmatpush.msra.mxu1 %v1853_v26  ;;  %v1648_v39 = vmul.f32 %v9353_v40, %v1619_v16  ;;  %v1616_v16 = vsel %vm1613_vm3, %v8606_v30, %v8546_v15  ;;  %v1614_v30 = vsel %vm1613_vm3, %v8568_v20, %v8570_v21 }
 0x24b   : > { %2167 = vmatmul.f32.gmra.mxu3 %v9161_v0  ;;  %2121 = vmatpush.msrb.mxu2 %v1939_v1  ;;  %v1618_v0 = vsel %vm1613_vm3, %v16220_v53, %v16219_v28  ;;  %v16222_v1 = vld [vmem:[#allocation41_spill] sm:$0xff]  ;;  %v9397_v28 = vld [vmem:[%s16120_s5 + $0x6] ss:$8 sm:$0x3]  ;;  %s16393_s5 = smov 112  }
 0x24c   : > { %2266 = vmatpush.msra.mxu3 %v1940_v48  ;;  %2071 = vmatmul.f32.vlgmr.msra.gmra.mxu0 %v9358_v29  ;;  %v1617_v48 = vsel %vm1613_vm3, %v16222_v1, %v16221_v59  ;;  %v1646_v34 = vmul.f32 %v9353_v40, %v1618_v0  ;;  %v1615_v0 = vsel %vm1613_vm3, %v8566_v19, %v8642_v42  ;;  %v9408_v15 = vperm.slane %v9397_v28, 0 }
 0x24d   : > { %2171 = vmatpush.msrb.mxu0 %v1652_v10  ;;  %v1896_v61 = vpop.permute.xlu2 %1895  ;;  %v1644_v53 = vmul.f32 %v9353_v40, %v1617_v48  ;;  %v1640_v1 = vmul.f32 %v9353_v40, %v1615_v0  ;;  %v1549_v48 = vsel %vm1541_vm6, %v8921_v14, %v8831_v49  ;;  %v1548_v49 = vsel %vm1541_vm6, %v8710_v3, %v8835_v27  ;;  %v16225_v0 = vld [vmem:[#allocation45_spill] sm:$0xff] }
 0x24e   : > { %v1898_v60 = vpop.permute.xlu1 %1897 }
 0x24f   : > { %2172 = vmatpush.msrb.mxu0 %v1650_v4  ;;  %v1882_v26 = vpop.permute.xlu0 %1881  ;;  %v9390_v4 = vld [vmem:[%s8168_s25 + $0x38] sm:$0xff] }
 0x250   : > { %v1908_v11 = vsel %vm1901_vm8, %v1882_v26, %v1898_v60  ;;  %v1916_v57 = vsel %vm1901_vm8, %v1898_v60, %v1882_v26  ;;  %v1642_v60 = vmul.f32 %v9353_v40, %v1616_v16 }
 0x251   : > { %2173 = vmatpush.msrb.mxu0 %v1648_v39  ;;  %v1937_v10 = vmul.f32 %v9331_v13, %v1908_v11  ;;  %v1938_v32 = vmul.f32 %v9333_v23, %v1916_v57 }
 0x253   : > { %2174 = vmatpush.msrb.mxu0 %v1646_v34  ;;  %2122 = vmatpush.msrb.mxu2 %v1937_v10  ;;  %v9434_v34 = vld [vmem:[%s8168_s25 + $0x60] sm:$0xff]  ;;  %v9437_v10 = vperm.slane %v8985_v62, 1 }
 0x254   : > { %2267 = vmatpush.msra.mxu3 %v1938_v32  ;;  %2074 = vmatmul.f32.gmra.mxu0 %v9390_v4  ;;  %v16223_v32 = vld [vmem:[#allocation51_spill] sm:$0xff] }
 0x255   : > { %2175 = vmatpush.msrb.mxu0 %v1644_v53  ;;  %v1580_v14 = vmul.f32 %v9437_v10, %v1549_v48  ;;  %v1547_v16 = vsel %vm1541_vm6, %v16223_v32, %v8757_v24  ;;  %v1578_v62 = vmul.f32 %v9437_v10, %v1548_v49  ;;  %v16224_v53 = vld [vmem:[#allocation39_spill] sm:$0xff]  ;;  %v16229_v32 = vld [vmem:[#allocation29_spill] sm:$0xff] }
 0x256   : > { %v1880_v26 = vpop.permute.xlu1 %1879  ;;  %v1878_v39 = vpop.permute.xlu2 %1877  ;;  %v1546_v3 = vsel %vm1541_vm6, %v16225_v0, %v16224_v53  ;;  %v16226_v24 = vld [vmem:[#allocation43_spill] sm:$0xff] }
 0x257   : > { %2176 = vmatpush.msrb.mxu0 %v1642_v60  ;;  %v1907_v19 = vsel %vm1901_vm8, %v1880_v26, %v1896_v61  ;;  %v1915_v42 = vsel %vm1901_vm8, %v1896_v61, %v1880_v26  ;;  %v9418_v59 = vpop.permute.xlu0 %1755  ;;  %v1638_v61 = vmul.f32 %v9353_v40, %v1614_v30  ;;  %v1576_v26 = vmul.f32 %v9437_v10, %v1547_v16  ;;  %v16230_v16 = vld [vmem:[#allocation31_spill] sm:$0xff] }
 0x258   : > { %v1765_v20 = vsel %vm1757_vm9, %v9328_v22, %v9418_v59  ;;  %v1935_v21 = vmul.f32 %v9331_v13, %v1907_v19  ;;  %v1936_v11 = vmul.f32 %v9333_v23, %v1915_v42  ;;  %v16227_v19 = vld [vmem:[#allocation33_spill] sm:$0xff]  ;;  %v1574_v48 = vmul.f32 %v9437_v10, %v1546_v3 }
 0x259   : > { %2177 = vmatpush.msrb.mxu0 %v1640_v1  ;;  %v1795_v57 = vmul.f32 %v9408_v15, %v1765_v20  ;;  %v1545_v42 = vsel %vm1541_vm6, %v16227_v19, %v16226_v24 }
 0x25a   : > { %2123 = vmatpush.msrb.mxu2 %v1935_v21  ;;  %2268 = vmatpush.msra.mxu3 %v1936_v11  ;;  %v9472_v21 = vld [vmem:[%s8168_s25 + $0x88] sm:$0xff]  ;;  %v1544_v11 = vsel %vm1541_vm6, %v16182_v5, %v16183_v6 }
 0x25b   : > { %2178 = vmatpush.msrb.mxu0 %v1638_v61  ;;  %2092 = vmatpush.msra.mxu1 %v1795_v57  ;;  %v1572_v61 = vmul.f32 %v9437_v10, %v1545_v42  ;;  %v16228_v57 = vld [vmem:[#allocation37_spill] sm:$0xff] }
 0x25c   : > { %2077 = vmatmul.f32.gmra.mxu0 %v9434_v34  ;;  %v1543_v49 = vsel %vm1541_vm6, %v16228_v57, %v16185_v47 }
 0x25d   : > { %2179 = vmatpush.msrb.mxu0 %v1580_v14  ;;  %v1570_v14 = vmul.f32 %v9437_v10, %v1544_v11  ;;  %v1568_v0 = vmul.f32 %v9437_v10, %v1543_v49 }
 0x25e   : > { %v9454_v27 = vpop.permute.xlu1 %1753 }
 0x25f   : > { %2180 = vmatpush.msrb.mxu0 %v1578_v62  ;;  %v9456_v60 = vpop.permute.xlu2 %1751  ;;  %v9458_v30 = vpop.permute.xlu0 %1737  ;;  %v1542_v62 = vsel %vm1541_vm6, %v16230_v16, %v16229_v32 }
 0x260   : > { %v1764_v1 = vsel %vm1757_vm9, %v9458_v30, %v9454_v27  ;;  %v1566_v19 = vmul.f32 %v9437_v10, %v1542_v62 }
 0x261   : > { %2181 = vmatpush.msrb.mxu0 %v1576_v26  ;;  %v1793_v20 = vmul.f32 %v9408_v15, %v1764_v1 }
 0x263   : > { %2182 = vmatpush.msrb.mxu0 %v1574_v48  ;;  %2093 = vmatpush.msra.mxu1 %v1793_v20 }
 0x264   : > { %2080 = vmatmul.f32.gmra.mxu0 %v9472_v21 }
 0x265   : > { %2183 = vmatpush.msrb.mxu0 %v1572_v61 }
 0x266   : > { %v9489_v5 = vpop.permute.xlu1 %1735 }
 0x267   : > { %2184 = vmatpush.msrb.mxu0 %v1570_v14  ;;  %v1763_v6 = vsel %vm1757_vm9, %v9489_v5, %v9456_v60  ;;  %v9495_v53 = vpop.permute.xlu2 %1733  ;;  %v1894_v47 = vpop.permute.xlu0 %1893 }
 0x268   : > { %v1906_v3 = vsel %vm1901_vm8, %v1878_v39, %v1894_v47  ;;  %v1914_v26 = vsel %vm1901_vm8, %v1894_v47, %v1878_v39  ;;  %v1791_v24 = vmul.f32 %v9408_v15, %v1763_v6 }
 0x269   : > { %2185 = vmatpush.msrb.mxu0 %v1568_v0  ;;  %v1933_v42 = vmul.f32 %v9331_v13, %v1906_v3  ;;  %v1934_v1 = vmul.f32 %v9333_v23, %v1914_v26 }
 0x26a   : > { %2094 = vmatpush.msra.mxu1 %v1791_v24 }
 0x26b   : > { %2186 = vmatpush.msrb.mxu0 %v1566_v19  ;;  %2124 = vmatpush.msrb.mxu2 %v1933_v42 }
 0x26c   : > { %2269 = vmatpush.msra.mxu3 %v1934_v1  ;;  %2187 = vmatmul.f32.vlgmr.msrb.gmra.mxu0 %v9100_v12 }
 0x26e   : > { %v1892_v48 = vpop.permute.xlu1 %1891 }
 0x26f   : > { %v1876_v20 = vpop.permute.xlu0 %1875  ;;  %v1890_v11 = vpop.permute.xlu2 %1889 }
 0x270   : > { %v1905_v39 = vsel %vm1901_vm8, %v1876_v20, %v1892_v48  ;;  %v1913_v61 = vsel %vm1901_vm8, %v1892_v48, %v1876_v20 }
 0x271   : > { %v1931_v57 = vmul.f32 %v9331_v13, %v1905_v39  ;;  %v1932_v49 = vmul.f32 %v9333_v23, %v1913_v61 }
 0x273   : > { %2125 = vmatpush.msrb.mxu2 %v1931_v57  ;;  %2270 = vmatpush.msra.mxu3 %v1932_v49  ;;  %v1962_v57 = vld [vmem:[%s8173_s29 + $0x8] sm:$0xff] }
 0x274   : > { %2190 = vmatmul.f32.gmra.mxu0 %v9152_v46  ;;  %1972 = vperm.xlu2 %8072, %v1962_v57  }
 0x276   : > { %v1874_v14 = vpop.permute.xlu1 %1873 }
 0x277   : > { %v1904_v12 = vsel %vm1901_vm8, %v1874_v14, %v1890_v11  ;;  %v1912_v32 = vsel %vm1901_vm8, %v1890_v11, %v1874_v14  ;;  %v9518_v16 = vpop.permute.xlu0 %1749  ;;  %v1872_v0 = vpop.permute.xlu2 %1871  ;;  %v16231_v14 = vld [vmem:[#allocation69_spill] sm:$0xff] }
 0x278   : > { %v1762_v62 = vsel %vm1757_vm9, %v9495_v53, %v9518_v16  ;;  %v1929_v6 = vmul.f32 %v9331_v13, %v1904_v12  ;;  %v1930_v47 = vmul.f32 %v9333_v23, %v1912_v32  ;;  %v9557_v12 = vperm.slane %v16231_v14, 1 }
 0x279   : > { %v1789_v46 = vmul.f32 %v9408_v15, %v1762_v62  ;;  %v16233_v62 = vld [vmem:[#allocation73_spill] sm:$0xff]  ;;  %v1842_v14 = vsel %vm1829_vm5, %v9185_v52, %v9191_v18 }
 0x27a   : > { %2126 = vmatpush.msrb.mxu2 %v1929_v6  ;;  %2271 = vmatpush.msra.mxu3 %v1930_v47  ;;  %16232 = vst [vmem:[#allocation25_spill] sm:$0xff] %v9557_v12  ;;  %v16234_v6 = vld [vmem:[#allocation72_spill] sm:$0xff] }
 0x27b   : > { %2095 = vmatpush.msra.mxu1 %v1789_v46  ;;  %v1845_v47 = vsel %vm1829_vm5, %v16234_v6, %v16233_v62 }
 0x27c   : > { %2193 = vmatmul.f32.gmra.mxu0 %v9201_v36 }
 0x27e   : > { %v9528_v3 = vpop.permute.xlu1 %1747 }
 0x27f   : > { %v9530_v26 = vpop.permute.xlu0 %1731  ;;  %v9537_v42 = vpop.permute.xlu2 %1745 }
 0x280   : > { %v1761_v24 = vsel %vm1757_vm9, %v9530_v26, %v9528_v3 }
 0x281   : > { %v1787_v19 = vmul.f32 %v9408_v15, %v1761_v24 }
 0x283   : > { %2096 = vmatpush.msra.mxu1 %v1787_v19  ;;  %v16235_v19 = vld [vmem:[#allocation75_spill] sm:$0xff] }
 0x284   : > { %2196 = vmatmul.f32.gmra.mxu0 %v9252_v56 }
 0x287   : > { %v9540_v1 = vpop.permute.xlu1 %1729  ;;  %v9554_v49 = vpop.permute.xlu2 %1727 }
 0x288   : > { %v1760_v36 = vsel %vm1757_vm9, %v9540_v1, %v9537_v42  ;;  %v1888_v48 = vpop.permute.xlu0 %1887 }
 0x289   : > { %v1903_v20 = vsel %vm1901_vm8, %v1872_v0, %v1888_v48  ;;  %v1911_v11 = vsel %vm1901_vm8, %v1888_v48, %v1872_v0  ;;  %v1785_v39 = vmul.f32 %v9408_v15, %v1760_v36  ;;  %v16236_v36 = vld [vmem:[#allocation70_spill] sm:$0xff] }
 0x28a   : > { %v1927_v61 = vmul.f32 %v9331_v13, %v1903_v20  ;;  %v1928_v56 = vmul.f32 %v9333_v23, %v1911_v11  ;;  %v1844_v48 = vsel %vm1829_vm5, %v16236_v36, %v16235_v19  ;;  %v1950_v36 = vld [vmem:[%s8168_s25 + $0x48] sm:$0xff] }
 0x28b   : > { %2097 = vmatpush.msra.mxu1 %v1785_v39  ;;  %v1868_v39 = vmul.f32 %v9557_v12, %v1845_v47  ;;  %v1866_v57 = vmul.f32 %v9557_v12, %v1844_v48  ;;  %v1862_v47 = vmul.f32 %v9557_v12, %v1842_v14  ;;  %v16239_v48 = vld [vmem:[#allocation66_spill] sm:$0xff] }
 0x28c   : > { %2127 = vmatpush.msrb.mxu2 %v1927_v61  ;;  %2272 = vmatpush.msra.mxu3 %v1928_v56  ;;  %v1945_v61 = vld [vmem:[%s8168_s25 + $0x20] sm:$0xff]  ;;  %v1843_v56 = vsel %vm1829_vm5, %v9142_v55, %v9031_v9  ;;  %v1841_v55 = vsel %vm1829_vm5, %v9180_v38, %v9232_v17  ;;  %v1840_v38 = vsel %vm1829_vm5, %v9301_v7, %v9227_v25  ;;  %v9626_v7 = vld [vmem:[%s8168_s25 + $0x18] sm:$0xff] }
 0x28d   : > { %v1864_v9 = vmul.f32 %v9557_v12, %v1843_v56  ;;  %v1860_v19 = vmul.f32 %v9557_v12, %v1841_v55 }
 0x28f   : > { %v1886_v32 = vpop.permute.xlu1 %1885  ;;  %v9593_v62 = vpop.permute.xlu2 %1741 }
 0x290   : > { %v1870_v46 = vpop.permute.xlu0 %1869 }
 0x291   : > { %v1902_v0 = vsel %vm1901_vm8, %v1870_v46, %v1886_v32  ;;  %v1910_v24 = vsel %vm1901_vm8, %v1886_v32, %v1870_v46  ;;  %v16237_v46 = vld [vmem:[#allocation62_spill] sm:$0xff] }
 0x292   : > { %v1925_v20 = vmul.f32 %v9331_v13, %v1902_v0  ;;  %v1926_v11 = vmul.f32 %v9333_v23, %v1910_v24  ;;  %v16238_v0 = vld [vmem:[#allocation68_spill] sm:$0xff] }
 0x293   : > { %v1701_v24 = vsel %vm1685_vm4, %v16238_v0, %v16237_v46  ;;  %v16248_v46 = vld [vmem:[#allocation34_spill] sm:$0xff] }
 0x294   : > { %2128 = vmatpush.msrb.mxu2 %v1925_v20  ;;  %2273 = vmatpush.msra.mxu3 %v1926_v11  ;;  %v9618_v20 = vperm.slane %v16239_v48, 1  ;;  %v1839_v11 = vsel %vm1829_vm5, %v9313_v50, %v9316_v51  ;;  %v1838_v50 = vsel %vm1829_vm5, %v9311_v31, %v9335_v63  ;;  %v16243_v51 = vld [vmem:[#allocation67_spill] sm:$0xff]  ;;  %v1773_v31 = vsel %vm1757_vm9, %v9418_v59, %v9328_v22  ;;  %v16247_v59 = vld [vmem:[#allocation54_spill] sm:$0xff] }
 0x295   : > { %7913 = vmatmul.msk.f32.vlgmr.msra.gmra.mxu3 %vm1293_vm7, %v1945_v61  ;;  %7909 = vmatmul.msk.f32.vlgmr.msrb.gmra.mxu2 %vm1293_vm7, %v1945_v61  ;;  %v16242_v61 = vld [vmem:[#allocation48_spill] sm:$0xff]  ;;  %v1697_v0 = vsel %vm1685_vm4, %v16248_v46, %v16247_v59 }
 0x296   : > { %2229 = vmatpush.msra.mxu2 %v1868_v39  ;;  %16240 = vst [vmem:[#allocation40_spill] sm:$0xff] %v9618_v20  ;;  %v16241_v39 = vld [vmem:[#allocation59_spill] sm:$0xff]  ;;  %v1724_v14 = vmul.f32 %v9618_v20, %v1701_v24 }
 0x297   : > { %v9586_v32 = vpop.permute.xlu1 %1725  ;;  %v1700_v56 = vsel %vm1685_vm4, %v16242_v61, %v16241_v39  ;;  %v1954_v39 = vld [vmem:[%s8168_s25 + $0x68] sm:$0xff] }
 0x298   : > { %2230 = vmatpush.msra.mxu2 %v1866_v57  ;;  %v9595_v6 = vpop.permute.xlu0 %1743  ;;  %v1758_v52 = vsel %vm1757_vm9, %v9586_v32, %v9593_v62  ;;  %v1858_v57 = vmul.f32 %v9557_v12, %v1840_v38  ;;  %v1722_v63 = vmul.f32 %v9618_v20, %v1700_v56  ;;  %v8079_v56 = vld [vmem:[%s8422_s28 + $0x28] sm:$0xff] }
 0x299   : > { %v1759_v18 = vsel %vm1757_vm9, %v9554_v49, %v9595_v6  ;;  %v1781_v25 = vmul.f32 %v9408_v15, %v1758_v52  ;;  %v1856_v52 = vmul.f32 %v9557_v12, %v1839_v11  ;;  %v1770_v11 = vsel %vm1757_vm9, %v9518_v16, %v9495_v53 }
 0x29a   : > { %2231 = vmatpush.msra.mxu2 %v1864_v9  ;;  %v1783_v17 = vmul.f32 %v9408_v15, %v1759_v18  ;;  %v16244_v9 = vld [vmem:[#allocation76_spill] sm:$0xff]  ;;  %v9647_v18 = vperm.slane %v9397_v28, 1  ;;  %v1772_v28 = vsel %vm1757_vm9, %v9454_v27, %v9458_v30  ;;  %v1949_v30 = vld [vmem:[%s8168_s25 + $0x40] sm:$0xff]  ;;  %v1694_v16 = vsel %vm1685_vm4, %v9275_v35, %v9295_v44 }
 0x29b   : > { %v1699_v55 = vsel %vm1685_vm4, %v16244_v9, %v16243_v51  ;;  %v1767_v35 = vsel %vm1757_vm9, %v9595_v6, %v9554_v49  ;;  %v1710_v44 = vmul.f32 %v9618_v20, %v1694_v16  ;;  %v8078_v6 = vld [vmem:[%s8422_s28 + $0x38] sm:$0xff]  ;;  %v2014_v9 = vpop.f32.mrf.mxu2 }
 0x29c   : > { %2232 = vmatpush.msra.mxu2 %v1862_v47  ;;  %2098 = vmatpush.msra.mxu1 %v1783_v17  ;;  %16245 = vst [vmem:[#allocation38_spill] sm:$0xff] %v9647_v18  ;;  %v16246_v47 = vld [vmem:[#allocation35_spill] sm:$0xff]  ;;  %v1854_v17 = vmul.f32 %v9557_v12, %v1838_v50  ;;  %v1720_v22 = vmul.f32 %v9618_v20, %v1699_v55  ;;  %v8084_v51 = vld [vmem:[%s8364_s16 + $0x18] sm:$0xff]  ;;  %v9741_v55 = vpop.f32.mrf.mxu1 }
 0x29d   : > { %7914 = vmatmul.msk.f32.gmra.mxu3 %vm1293_vm7, %v1950_v36  ;;  %7910 = vmatmul.msk.f32.gmra.mxu2 %vm1293_vm7, %v1950_v36  ;;  %v1698_v38 = vsel %vm1685_vm4, %v16246_v47, %v9088_v58  ;;  %v1796_v24 = vmul.f32 %v9647_v18, %v1773_v31  ;;  %v1955_v58 = vld [vmem:[%s8168_s25 + $0x70] sm:$0xff]  ;;  %v1696_v36 = vsel %vm1685_vm4, %v9242_v54, %v9127_v8  ;;  %v8083_v50 = vld [vmem:[%s8364_s16 + $0x28] sm:$0xff] }
 0x29e   : > { %2233 = vmatpush.msra.mxu2 %v1860_v19  ;;  %2099 = vmatpush.msra.mxu1 %v1781_v25  ;;  %v1771_v19 = vsel %vm1757_vm9, %v9456_v60, %v9489_v5  ;;  %v1718_v27 = vmul.f32 %v9618_v20, %v1698_v38  ;;  %v1794_v48 = vmul.f32 %v9647_v18, %v1772_v28 }
 0x29f   : > { %2100 = vmatmul.f32.vlgmr.msra.gmra.mxu1 %v9626_v7  ;;  %v1716_v60 = vmul.f32 %v9618_v20, %v1697_v0  ;;  %v1695_v8 = vsel %vm1685_vm4, %v9278_v41, %v9280_v2  ;;  %v1792_v54 = vmul.f32 %v9647_v18, %v1771_v19  ;;  %v1769_v5 = vsel %vm1757_vm9, %v9528_v3, %v9530_v26  ;;  %v1960_v26 = vld [vmem:[%s8168_s25 + $0x98] sm:$0xff] }
 0x2a0   : > { %2234 = vmatpush.msra.mxu2 %v1858_v57  ;;  %2200 = vmatpush.msrb.mxu1 %v1724_v14  ;;  %v1714_v53 = vmul.f32 %v9618_v20, %v1696_v36  ;;  %v1790_v41 = vmul.f32 %v9647_v18, %v1770_v11  ;;  %v1768_v2 = vsel %vm1757_vm9, %v9537_v42, %v9540_v1  ;;  %v8081_v57 = vld [vmem:[%s8422_s28 + $0x8] sm:$0xff]  ;;  %v8082_v14 = vld [vmem:[%s8364_s16 + $0x38] sm:$0xff]  ;;  %s16326_s16 = sld [smem:[#allocation7_spill]] }
 0x2a1   : > { %v1712_v25 = vmul.f32 %v9618_v20, %v1695_v8  ;;  %v1788_v3 = vmul.f32 %v9647_v18, %v1769_v5  ;;  %v1786_v42 = vmul.f32 %v9647_v18, %v1768_v2  ;;  %v1766_v1 = vsel %vm1757_vm9, %v9593_v62, %v9586_v32  ;;  %v8080_v32 = vld [vmem:[%s8422_s28 + $0x18] sm:$0xff]  ;;  %v1959_v62 = vld [vmem:[%s8168_s25 + $0x90] sm:$0xff]  ;;  %16250 = vst [vmem:[#allocation32_spill] sm:$0xff] %v9741_v55  ;;  %s16327_s28 = sld [smem:[#allocation6_spill]] }
 0x2a2   : > { %2235 = vmatpush.msra.mxu2 %v1856_v52  ;;  %2201 = vmatpush.msrb.mxu1 %v1722_v63  ;;  %v1784_v49 = vmul.f32 %v9647_v18, %v1767_v35  ;;  %v1782_v61 = vmul.f32 %v9647_v18, %v1766_v1  ;;  %v2043_v63 = vpop.f32.mrf.mxu3 }
 0x2a3   : > { %v2017_v31 = vpop.f32.mrf.mxu2 }
 0x2a4   : > { %2236 = vmatpush.msra.mxu2 %v1854_v17  ;;  %2202 = vmatpush.msrb.mxu1 %v1720_v22 }
 0x2a5   : > { %7915 = vmatmul.msk.f32.gmra.mxu3 %vm1293_vm7, %v1955_v58  ;;  %7911 = vmatmul.msk.f32.gmra.mxu2 %vm1293_vm7, %v1955_v58 }
 0x2a6   : > { %2237 = vmatpush.msra.mxu2 %v1796_v24  ;;  %2203 = vmatpush.msrb.mxu1 %v1718_v27 }
 0x2a7   : > { %2103 = vmatmul.f32.gmra.mxu1 %v1949_v30 }
 0x2a8   : > { %2238 = vmatpush.msra.mxu2 %v1794_v48  ;;  %2204 = vmatpush.msrb.mxu1 %v1716_v60 }
 0x2aa   : > { %2239 = vmatpush.msra.mxu2 %v1792_v54  ;;  %2205 = vmatpush.msrb.mxu1 %v1714_v53 }
 0x2ab   : > { %v2020_v47 = vpop.f32.mrf.mxu2 }
 0x2ac   : > { %2240 = vmatpush.msra.mxu2 %v1790_v41  ;;  %2206 = vmatpush.msrb.mxu1 %v1712_v25 }
 0x2ad   : > { %7916 = vmatmul.msk.f32.gmra.mxu3 %vm1293_vm7, %v1960_v26  ;;  %7912 = vmatmul.msk.f32.gmra.mxu2 %vm1293_vm7, %v1960_v26 }
 0x2ae   : > { %2241 = vmatpush.msra.mxu2 %v1788_v3  ;;  %2207 = vmatpush.msrb.mxu1 %v1710_v44  ;;  %v9768_v3 = vpop.permute.xlu1 %1977 }
 0x2af   : > { %2106 = vmatmul.f32.gmra.mxu1 %v1954_v39  ;;  %v2021_v35 = vadd.f32 %v2020_v47, %v9768_v3 }
 0x2b0   : > { %2242 = vmatpush.msra.mxu2 %v1786_v42  ;;  %2208 = vmatpush.msrb.mxu1 %v8078_v6 }
 0x2b2   : > { %2243 = vmatpush.msra.mxu2 %v1784_v49  ;;  %2209 = vmatpush.msrb.mxu1 %v8079_v56 }
 0x2b3   : > { %v2023_v17 = vpop.f32.mrf.mxu2 }
 0x2b4   : > { %2244 = vmatpush.msra.mxu2 %v1782_v61  ;;  %2210 = vmatpush.msrb.mxu1 %v8080_v32 }
 0x2b5   : > { %2245 = vmatmul.f32.vlgmr.msra.gmra.mxu2 %v9626_v7  ;;  %v9739_v7 = vpop.f32.mrf.mxu0 }
 0x2b6   : > { %2211 = vmatpush.msrb.mxu1 %v8081_v57  ;;  %16249 = vst [vmem:[#allocation28_spill] sm:$0xff] %v9739_v7 }
 0x2b7   : > { %2109 = vmatmul.f32.gmra.mxu1 %v1959_v62 }
 0x2b8   : > { %2212 = vmatpush.msrb.mxu1 %v8082_v14 }
 0x2ba   : > { %2213 = vmatpush.msrb.mxu1 %v8083_v50 }
 0x2bc   : > { %2214 = vmatpush.msrb.mxu1 %v8084_v51 }
 0x2bd   : > { %2248 = vmatmul.f32.gmra.mxu2 %v1949_v30  ;;  %v9743_v52 = vpop.f32.mrf.mxu0 }
 0x2be   : > { %2215 = vmatpush.msrb.mxu1 %v9291_v33  ;;  %16251 = vst [vmem:[#allocation24_spill] sm:$0xff] %v9743_v52  ;;  %v9745_v33 = vpop.f32.mrf.mxu1 }
 0x2bf   : > { %2216 = vmatmul.f32.vlgmr.msrb.gmra.mxu1 %v9358_v29  ;;  %16252 = vst [vmem:[#allocation22_spill] sm:$0xff] %v9745_v33 }
 0x2c5   : > { %2251 = vmatmul.f32.gmra.mxu2 %v1954_v39  ;;  %v9747_v29 = vpop.f32.mrf.mxu0 }
 0x2c6   : > { %16253 = vst [vmem:[#allocation63_spill] sm:$0xff] %v9747_v29  ;;  %v9751_v38 = vpop.f32.mrf.mxu1 }
 0x2c7   : > { %2219 = vmatmul.f32.gmra.mxu1 %v9390_v4  ;;  %v9749_v4 = vpop.permute.xlu0 %1982  ;;  %16254 = vst [vmem:[#allocation60_spill] sm:$0xff] %v9751_v38 }
 0x2c8   : > { %v2024_v57 = vadd.f32 %v2023_v17, %v9749_v4 }
 0x2cd   : > { %2254 = vmatmul.f32.gmra.mxu2 %v1959_v62 }
 0x2ce   : > { %v9755_v22 = vpop.f32.mrf.mxu1  ;;  %v9757_v24 = vpop.permute.xlu2 %1972 }
 0x2cf   : > { %2222 = vmatmul.f32.gmra.mxu1 %v9434_v34  ;;  %v2046_v34 = vpop.f32.mrf.mxu3  ;;  %v1968_v28 = vpop.permute.xlu0 %1967  ;;  %16256 = vst [vmem:[#allocation44_spill] sm:$0xff] %v9755_v22  ;;  %v2018_v30 = vadd.f32 %v2017_v31, %v9757_v24 }
 0x2d0   : > { %v2015_v59 = vadd.f32 %v2014_v9, %v1968_v28 }
 0x2d1   : > { %v2047_v11 = vadd.f32 %v2046_v34, %v2018_v30 }
 0x2d2   : > { %v2044_v58 = vadd.f32 %v2043_v63, %v2015_v59 }
 0x2d7   : > { %2225 = vmatmul.f32.gmra.mxu1 %v9472_v21  ;;  %v9753_v21 = vpop.f32.mrf.mxu0  ;;  %v2049_v46 = vpop.f32.mrf.mxu3 }
 0x2d8   : > { %16255 = vst [vmem:[#allocation58_spill] sm:$0xff] %v9753_v21  ;;  %v2050_v42 = vadd.f32 %v2049_v46, %v2021_v35 }
 0x2df   : > { %v2072_v0 = vpop.f32.mrf.mxu0  ;;  %v2052_v8 = vpop.f32.mrf.mxu3 }
 0x2e0   : > { %v2073_v27 = vadd.f32 %v2072_v0, %v2044_v58  ;;  %v2053_v50 = vadd.f32 %v2052_v8, %v2024_v57 }
 0x2e7   : > { %v2075_v5 = vpop.f32.mrf.mxu0  ;;  %v2159_v44 = vpop.f32.mrf.mxu3 }
 0x2e8   : > { %v2076_v53 = vadd.f32 %v2075_v5, %v2047_v11  ;;  %v2160_v59 = vadd.f32 %v2159_v44, %v1968_v28 }
 0x2ef   : > { %v2078_v39 = vpop.f32.mrf.mxu0  ;;  %v2162_v56 = vpop.f32.mrf.mxu3 }
 0x2f0   : > { %v2079_v49 = vadd.f32 %v2078_v39, %v2050_v42 }
 0x2f7   : > { %v2081_v14 = vpop.f32.mrf.mxu0  ;;  %v2165_v9 = vpop.f32.mrf.mxu3 }
 0x2f8   : > { %v2082_v31 = vadd.f32 %v2081_v14, %v2053_v50  ;;  %v2166_v44 = vadd.f32 %v2165_v9, %v9768_v3 }
 0x2ff   : > { %v2188_v17 = vpop.f32.mrf.mxu0  ;;  %v2168_v46 = vpop.f32.mrf.mxu3 }
 0x300   : > { %v2169_v57 = vadd.f32 %v2168_v46, %v9749_v4 }
 0x307   : > { %v2191_v11 = vpop.f32.mrf.mxu0 }
 0x30f   : > { %v2194_v35 = vpop.f32.mrf.mxu0 }
 0x318   : > { %v2130_v19 = vpop.f32.mrf.mxu2  ;;  %v2275_v28 = vpop.f32.mrf.mxu3 }
 0x31c   : > { %v2101_v36 = vpop.f32.mrf.mxu1 }
 0x31d   : > { %v2102_v48 = vadd.f32 %v2101_v36, %v2073_v27  ;;  %v2163_v36 = vadd.f32 %v2162_v56, %v9757_v24 }
 0x31f   : > { %v2131_v60 = vadd.f32 %v2130_v19, %v2102_v48  ;;  %v2189_v19 = vadd.f32 %v2188_v17, %v2160_v59  ;;  %v2192_v8 = vadd.f32 %v2191_v11, %v2163_v36 }
 0x320   : > { %v2133_v41 = vpop.f32.mrf.mxu2 }
 0x321   : > { %v9760_v54 = vmax.f32 %v2131_v60, 0.0 }
 0x323   : > { %2327 = vrot.lane.b32.xlu1 %v9760_v54, %s15995_s22  ;;  %2359 = vrot.lane.b32.xlu0 %v9760_v54, %s16018_s26 }
 0x324   : > { %2391 = vrot.lane.b32.xlu2 %v9760_v54, %s16001_s23  ;;  %v2104_v16 = vpop.f32.mrf.mxu1 }
 0x325   : > { %v2105_v2 = vadd.f32 %v2104_v16, %v2076_v53 }
 0x327   : > { %v2134_v25 = vadd.f32 %v2133_v41, %v2105_v2  ;;  %v2278_v2 = vpop.f32.mrf.mxu3 }
 0x328   : > { %v2136_v61 = vpop.f32.mrf.mxu2 }
 0x329   : > { %v9770_v26 = vmax.f32 %v2134_v25, 0.0 }
 0x32b   : > { %2393 = vrot.lane.b32.xlu1 %v9770_v26, %s16001_s23  ;;  %2455 = vrot.lane.b32.xlu0 %v9760_v54, %s15999_s11 }
 0x32c   : > { %2487 = vrot.lane.b32.xlu2 %v9760_v54, %s15997_s2  ;;  %v2107_v1 = vpop.f32.mrf.mxu1 }
 0x32d   : > { %v2108_v6 = vadd.f32 %v2107_v1, %v2079_v49  ;;  %v2195_v1 = vadd.f32 %v2194_v35, %v2166_v44 }
 0x32f   : > { %v2137_v32 = vadd.f32 %v2136_v61, %v2108_v6  ;;  %v2281_v56 = vpop.f32.mrf.mxu3 }
 0x330   : > { %v2139_v47 = vpop.f32.mrf.mxu2 }
 0x331   : > { %v9785_v62 = vmax.f32 %v2137_v32, 0.0  ;;  %v2197_v32 = vpop.f32.mrf.mxu0 }
 0x333   : > { %2489 = vrot.lane.b32.xlu1 %v9770_v26, %s15997_s2  ;;  %2329 = vrot.lane.b32.xlu0 %v9770_v26, %s15995_s22 }
 0x334   : > { %2361 = vrot.lane.b32.xlu2 %v9770_v26, %s16018_s26  ;;  %v2110_v51 = vpop.f32.mrf.mxu1 }
 0x335   : > { %v2111_v63 = vadd.f32 %v2110_v51, %v2082_v31  ;;  %v2198_v51 = vadd.f32 %v2197_v32, %v2169_v57  ;;  %v1272_v57 = vld [vmem:[%s8193_s19 + $0x18] sm:$0xff] }
 0x337   : > { %v2140_v34 = vadd.f32 %v2139_v47, %v2111_v63  ;;  %v2284_v47 = vpop.f32.mrf.mxu3 }
 0x338   : > { %v2246_v30 = vpop.f32.mrf.mxu2 }
 0x339   : > { %v9800_v0 = vmax.f32 %v2140_v34, 0.0 }
 0x33b   : > { %2363 = vrot.lane.b32.xlu1 %v9785_v62, %s16018_s26  ;;  %2395 = vrot.lane.b32.xlu0 %v9785_v62, %s16001_s23 }
 0x33c   : > { %2457 = vrot.lane.b32.xlu2 %v9770_v26, %s15999_s11  ;;  %v2217_v58 = vpop.f32.mrf.mxu1 }
 0x33d   : > { %v2218_v27 = vadd.f32 %v2217_v58, %v2189_v19 }
 0x33f   : > { %v2247_v48 = vadd.f32 %v2246_v30, %v2218_v27 }
 0x340   : > { %v2249_v16 = vpop.f32.mrf.mxu2 }
 0x341   : > { %v2276_v5 = vadd.f32 %v2275_v28, %v2247_v48 }
 0x343   : > { %2459 = vrot.lane.b32.xlu1 %v9785_v62, %s15999_s11  ;;  %2491 = vrot.lane.b32.xlu0 %v9785_v62, %s15997_s2  ;;  %v9815_v41 = vmax.f32 %v2276_v5, 0.0 }
 0x344   : > { %2331 = vrot.lane.b32.xlu2 %v9785_v62, %s15995_s22  ;;  %v2220_v60 = vpop.f32.mrf.mxu1 }
 0x345   : > { %v2221_v53 = vadd.f32 %v2220_v60, %v2192_v8  ;;  %16257 = vst [vmem:[#allocation27_spill] sm:$0xff] %v9815_v41 }
 0x347   : > { %v2250_v24 = vadd.f32 %v2249_v16, %v2221_v53 }
 0x348   : > { %v2252_v6 = vpop.f32.mrf.mxu2 }
 0x349   : > { %v2279_v25 = vadd.f32 %v2278_v2, %v2250_v24 }
 0x34b   : > { %2397 = vrot.lane.b32.xlu1 %v9800_v0, %s16001_s23  ;;  %2365 = vrot.lane.b32.xlu0 %v9800_v0, %s16018_s26  ;;  %v9824_v39 = vmax.f32 %v2279_v25, 0.0 }
 0x34c   : > { %2427 = vrot.lane.b32.xlu2 %v9785_v62, %s15979_s1  ;;  %v2223_v42 = vpop.f32.mrf.mxu1 }
 0x34d   : > { %v2224_v49 = vadd.f32 %v2223_v42, %v2195_v1 }
 0x34f   : > { %v2253_v61 = vadd.f32 %v2252_v6, %v2224_v49  ;;  %v2565_v6 = vld [vmem:[%s16119_s8 + $0x10] sm:$0xff] }
 0x350   : > { %v2255_v31 = vpop.f32.mrf.mxu2 }
 0x351   : > { %v2282_v3 = vadd.f32 %v2281_v56, %v2253_v61  ;;  %v2566_v61 = vld [vmem:[%s16119_s8 + $0x18] sm:$0xff] }
 0x353   : > { %2333 = vrot.lane.b32.xlu1 %v9800_v0, %s15995_s22  ;;  %2461 = vrot.lane.b32.xlu0 %v9800_v0, %s15999_s11  ;;  %v9839_v14 = vmax.f32 %v2282_v3, 0.0 }
 0x354   : > { %2493 = vrot.lane.b32.xlu2 %v9800_v0, %s15997_s2  ;;  %v2226_v50 = vpop.f32.mrf.mxu1 }
 0x355   : > { %v2227_v9 = vadd.f32 %v2226_v50, %v2198_v51  ;;  %v1271_v50 = vld [vmem:[%s8193_s19 + $0x10] sm:$0xff]  ;;  %v2564_v51 = vld [vmem:[%s16119_s8 + $0x8] sm:$0xff] }
 0x357   : > { %v2256_v63 = vadd.f32 %v2255_v31, %v2227_v9 }
 0x359   : > { %v2285_v4 = vadd.f32 %v2284_v47, %v2256_v63  ;;  %v2563_v47 = vld [vmem:[%s16119_s8] sm:$0xff]  ;;  %s16398_s8 = sld [smem:[#allocation13_spill]] }
 0x35b   : > { %2429 = vrot.lane.b32.xlu1 %v9800_v0, %s15979_s1  ;;  %2399 = vrot.lane.b32.xlu0 %v9815_v41, %s16001_s23  ;;  %v9855_v17 = vmax.f32 %v2285_v4, 0.0  ;;  %v1269_v4 = vld [vmem:[%s8193_s19] sm:$0xff] }
 0x35c   : > { %2335 = vrot.lane.b32.xlu2 %v9815_v41, %s15995_s22 }
 0x363   : > { %2367 = vrot.lane.b32.xlu1 %v9815_v41, %s16018_s26  ;;  %2495 = vrot.lane.b32.xlu0 %v9815_v41, %s15997_s2 }
 0x364   : > { %2401 = vrot.lane.b32.xlu2 %v9824_v39, %s16001_s23 }
 0x36b   : > { %2463 = vrot.lane.b32.xlu1 %v9815_v41, %s15999_s11  ;;  %2369 = vrot.lane.b32.xlu0 %v9824_v39, %s16018_s26 }
 0x36c   : > { %2497 = vrot.lane.b32.xlu2 %v9824_v39, %s15997_s2 }
 0x373   : > { %2337 = vrot.lane.b32.xlu1 %v9824_v39, %s15995_s22  ;;  %2465 = vrot.lane.b32.xlu0 %v9824_v39, %s15999_s11 }
 0x374   : > { %2371 = vrot.lane.b32.xlu2 %v9839_v14, %s16018_s26 }
 0x37b   : > { %2403 = vrot.lane.b32.xlu1 %v9839_v14, %s16001_s23  ;;  %2339 = vrot.lane.b32.xlu0 %v9839_v14, %s15995_s22 }
 0x37c   : > { %2467 = vrot.lane.b32.xlu2 %v9839_v14, %s15999_s11 }
 0x37e   : > { %v9853_v34 = vpop.permute.xlu2 %2391 }
 0x383   : > { %2499 = vrot.lane.b32.xlu1 %v9839_v14, %s15997_s2  ;;  %2435 = vrot.lane.b32.xlu0 %v9839_v14, %s15979_s1 }
 0x384   : > { %2405 = vrot.lane.b32.xlu2 %v9855_v17, %s16001_s23 }
 0x386   : > { %v9863_v59 = vpop.permute.xlu2 %2487 }
 0x38b   : > { %2433 = vrot.lane.b32.xlu1 %v9824_v39, %s15979_s1  ;;  %2501 = vrot.lane.b32.xlu0 %v9855_v17, %s15997_s2 }
 0x38c   : > { %2301 = vrot.lane.b32.xlu2 %v9800_v0, %s15993_s18 }
 0x38e   : > { %v9871_v46 = vpop.permute.xlu2 %2361 }
 0x393   : > { %2373 = vrot.lane.b32.xlu1 %v9855_v17, %s16018_s26  ;;  %2425 = vrot.lane.b32.xlu0 %v9770_v26, %s15979_s1 }
 0x394   : > { %2431 = vrot.lane.b32.xlu2 %v9815_v41, %s15979_s1 }
 0x395   : > { %v9879_v58 = vpop.permute.xlu1 %2327  ;;  %v9881_v19 = vpop.permute.xlu0 %2359 }
 0x396   : > { %v9883_v27 = vpop.permute.xlu2 %2457 }
 0x39b   : > { %2469 = vrot.lane.b32.xlu1 %v9855_v17, %s15999_s11  ;;  %2299 = vrot.lane.b32.xlu0 %v9785_v62, %s15993_s18 }
 0x39c   : > { %2341 = vrot.lane.b32.xlu2 %v9855_v17, %s15995_s22 }
 0x39d   : > { %v9891_v30 = vpop.permute.xlu1 %2393  ;;  %v9893_v36 = vpop.permute.xlu0 %2455 }
 0x39e   : > { %v9895_v48 = vpop.permute.xlu2 %2331 }
 0x3a3   : > { %2423 = vrot.lane.b32.xlu1 %v9760_v54, %s15979_s1  ;;  %2309 = vrot.lane.b32.xlu0 %v9855_v17, %s15993_s18 }
 0x3a4   : > { %2437 = vrot.lane.b32.xlu2 %v9855_v17, %s15979_s1 }
 0x3a5   : > { %v9903_v28 = vpop.permute.xlu1 %2489  ;;  %v9905_v11 = vpop.permute.xlu0 %2329 }
 0x3a6   : > { %v9907_v60 = vpop.permute.xlu2 %2427 }
 0x3ab   : > { %2307 = vrot.lane.b32.xlu1 %v9839_v14, %s15993_s18  ;;  %2305 = vrot.lane.b32.xlu0 %v9824_v39, %s15993_s18 }
 0x3ac   : > { %2297 = vrot.lane.b32.xlu2 %v9770_v26, %s15993_s18 }
 0x3ad   : > { %v9915_v8 = vpop.permute.xlu1 %2363  ;;  %v2396_v5 = vpop.permute.xlu0 %2395 }
 0x3ae   : > { %v9917_v53 = vpop.permute.xlu2 %2493 }
 0x3b3   : > { %2295 = vrot.lane.b32.xlu1 %v9760_v54, %s15993_s18  ;;  %2525 = vrot.lane.b32.xlu0 %v9800_v0, %s15991_s10 }
 0x3b4   : > { %2303 = vrot.lane.b32.xlu2 %v9815_v41, %s15993_s18 }
 0x3b5   : > { %v9925_v16 = vpop.permute.xlu1 %2459  ;;  %v9927_v24 = vpop.permute.xlu0 %2491 }
 0x3b6   : > { %v9929_v2 = vpop.permute.xlu2 %2335 }
 0x3bb   : > { %2521 = vrot.lane.b32.xlu1 %v9770_v26, %s15991_s10  ;;  %2531 = vrot.lane.b32.xlu0 %v9839_v14, %s15991_s10 }
 0x3bc   : > { %2523 = vrot.lane.b32.xlu2 %v9785_v62, %s15991_s10 }
 0x3bd   : > { %v2398_v25 = vpop.permute.xlu1 %2397  ;;  %v9937_v35 = vpop.permute.xlu0 %2365 }
 0x3be   : > { %v2402_v44 = vpop.permute.xlu2 %2401 }
 0x3bf   : > { %v2408_v29 = vsel %vm1613_vm3, %v9891_v30, %v2402_v44 }
 0x3c3   : > { %2533 = vrot.lane.b32.xlu1 %v9855_v17, %s15991_s10  ;;  %2519 = vrot.lane.b32.xlu0 %v9760_v54, %s15991_s10 }
 0x3c4   : > { %2529 = vrot.lane.b32.xlu2 %v9824_v39, %s15991_s10 }
 0x3c5   : > { %v9945_v42 = vpop.permute.xlu1 %2333  ;;  %v9947_v1 = vpop.permute.xlu0 %2461 }
 0x3c6   : > { %v9949_v49 = vpop.permute.xlu2 %2497 }
 0x3cb   : > { %2527 = vrot.lane.b32.xlu1 %v9815_v41, %s15991_s10  ;;  %2579 = vperm.xlu0 %8070, %v2565_v6   ;;  %v1270_v6 = vld [vmem:[%s8193_s19 + $0x8] sm:$0xff] }
 0x3cc   : > { %2584 = vperm.xlu2 %8072, %v2566_v61  }
 0x3cd   : > { %v9955_v56 = vpop.permute.xlu1 %2429  ;;  %v2400_v3 = vpop.permute.xlu0 %2399 }
 0x3ce   : > { %v9957_v32 = vpop.permute.xlu2 %2371  ;;  %v2411_v52 = vsel %vm1613_vm3, %v2400_v3, %v9853_v34 }
 0x3d3   : > { %1290 = vperm.xlu1 %8071, %v1272_v57   ;;  %1285 = vperm.xlu0 %8070, %v1271_v50  }
 0x3d4   : > { %2574 = vperm.xlu2 %8072, %v2564_v51   ;;  %v16258_v51 = vld [vmem:[#allocation65_spill] sm:$0xff] }
 0x3d5   : > { %v9962_v9 = vpop.permute.xlu1 %2367  ;;  %v9964_v31 = vpop.permute.xlu0 %2495 }
 0x3d6   : > { %v9966_v63 = vpop.permute.xlu2 %2467 }
 0x3db   : > { %2569 = vperm.xlu1 %8071, %v2563_v47   ;;  %1275 = vperm.xlu0 %8070, %v1269_v4  }
 0x3dc   : > { %1280 = vperm.xlu2 %8072, %v1270_v6  }
 0x3dd   : > { %v9971_v61 = vpop.permute.xlu1 %2463  ;;  %v2370_v22 = vpop.permute.xlu0 %2369 }
 0x3de   : > { %v2406_v38 = vpop.permute.xlu2 %2405 }
 0x3df   : > { %v2410_v57 = vsel %vm1613_vm3, %v2398_v25, %v2406_v38  ;;  %v2414_v50 = vsel %vm1613_vm3, %v2406_v38, %v2398_v25  ;;  %v2412_v38 = vsel %vm1613_vm3, %v2402_v44, %v9891_v30  ;;  %v2418_v44 = vmul.f32 %v2408_v29, %v9353_v40 }
 0x3e0   : > { %v2421_v33 = vmul.f32 %v2414_v50, %v16258_v51  ;;  %v2422_v55 = vmul.f32 %v2410_v57, %v9353_v40  ;;  %v2407_v50 = vsel %vm1613_vm3, %v9853_v34, %v2400_v3  ;;  %v2417_v30 = vmul.f32 %v2412_v38, %v16258_v51 }
 0x3e2   : > { %2599 = vmatpush.msra.mxu0 %v2421_v33  ;;  %2686 = vmatpush.msrb.mxu3 %v2422_v55 }
 0x3e5   : > { %v9979_v21 = vpop.permute.xlu1 %2337  ;;  %v9981_v47 = vpop.permute.xlu0 %2465 }
 0x3e6   : > { %v10005_v7 = vpop.permute.xlu2 %2301 }
 0x3ed   : > { %v2404_v4 = vpop.permute.xlu1 %2403  ;;  %v9983_v6 = vpop.permute.xlu0 %2339 }
 0x3ee   : > { %v2409_v25 = vsel %vm1613_vm3, %v2396_v5, %v2404_v4  ;;  %v2413_v55 = vsel %vm1613_vm3, %v2404_v4, %v2396_v5  ;;  %v2415_v5 = vmul.f32 %v2411_v52, %v16258_v51  ;;  %v2416_v4 = vmul.f32 %v2407_v50, %v9353_v40  ;;  %v10013_v34 = vpop.permute.xlu2 %2431 }
 0x3ef   : > { %v2419_v33 = vmul.f32 %v2413_v55, %v16258_v51  ;;  %v2420_v57 = vmul.f32 %v2409_v25, %v9353_v40  ;;  %v2376_v51 = vsel %vm1541_vm6, %v9871_v46, %v2370_v22 }
 0x3f1   : > { %2600 = vmatpush.msra.mxu0 %v2419_v33  ;;  %2687 = vmatpush.msrb.mxu3 %v2420_v57  ;;  %v2504_v57 = vsel %vm1829_vm5, %v9903_v28, %v9949_v49 }
 0x3f3   : > { %2601 = vmatpush.msra.mxu0 %v2417_v30  ;;  %2688 = vmatpush.msrb.mxu3 %v2418_v44  ;;  %v2503_v30 = vsel %vm1829_vm5, %v9863_v59, %v9964_v31  ;;  %v2513_v44 = vmul.f32 %v2504_v57, %v8982_v43 }
 0x3f5   : > { %v10009_v25 = vpop.permute.xlu1 %2499  ;;  %v10011_v55 = vpop.permute.xlu0 %2435  ;;  %2602 = vmatpush.msra.mxu0 %v2415_v5  ;;  %2689 = vmatpush.msrb.mxu3 %v2416_v4 }
 0x3f6   : > { %v2505_v29 = vsel %vm1829_vm5, %v9927_v24, %v10009_v25  ;;  %v2342_v40 = vpop.permute.xlu2 %2341 }
 0x3f7   : > { %v2515_v50 = vmul.f32 %v2505_v29, %v8982_v43  ;;  %v2381_v29 = vsel %vm1541_vm6, %v9957_v32, %v9915_v8 }
 0x3fd   : > { %v10015_v3 = vpop.permute.xlu1 %2433  ;;  %v10017_v38 = vpop.permute.xlu0 %2501 }
 0x3fe   : > { %v2506_v52 = vsel %vm1829_vm5, %v9917_v53, %v10017_v38 }
 0x3ff   : > { %v2517_v33 = vmul.f32 %v2506_v52, %v8982_v43  ;;  %v2511_v52 = vmul.f32 %v2503_v30, %v8982_v43  ;;  %v16259_v30 = vld [vmem:[#allocation74_spill] sm:$0xff] }
 0x401   : > { %2628 = vmatpush.msra.mxu1 %v2517_v33  ;;  %v2377_v33 = vsel %vm1541_vm6, %v9915_v8, %v9957_v32  ;;  %v2380_v8 = vsel %vm1541_vm6, %v2370_v22, %v9871_v46  ;;  %v2387_v32 = vmul.f32 %v2381_v29, %v16259_v30  ;;  %v2350_v46 = vsel %vm1469_vm1, %v2342_v40, %v9945_v42 }
 0x402   : > { %v2388_v41 = vmul.f32 %v2377_v33, %v9437_v10  ;;  %v2385_v22 = vmul.f32 %v2380_v8, %v16259_v30  ;;  %v2348_v8 = vsel %vm1469_vm1, %v9979_v21, %v9905_v11 }
 0x403   : > { %2629 = vmatpush.msra.mxu1 %v2515_v50 }
 0x405   : > { %v2374_v5 = vpop.permute.xlu1 %2373  ;;  %v10038_v4 = vpop.permute.xlu0 %2425  ;;  %2630 = vmatpush.msra.mxu1 %v2513_v44 }
 0x406   : > { %v2378_v57 = vsel %vm1541_vm6, %v9937_v35, %v2374_v5  ;;  %v2382_v50 = vsel %vm1541_vm6, %v2374_v5, %v9937_v35  ;;  %v2375_v35 = vsel %vm1541_vm6, %v9881_v19, %v9962_v9  ;;  %v2379_v5 = vsel %vm1541_vm6, %v9962_v9, %v9881_v19 }
 0x407   : > { %2631 = vmatpush.msra.mxu1 %v2511_v52  ;;  %v2389_v44 = vmul.f32 %v2382_v50, %v16259_v30  ;;  %v2390_v43 = vmul.f32 %v2378_v57, %v9437_v10  ;;  %v2346_v52 = vsel %vm1469_vm1, %v9945_v42, %v2342_v40  ;;  %v2384_v19 = vmul.f32 %v2375_v35, %v9437_v10  ;;  %v16260_v57 = vld [vmem:[#allocation53_spill] sm:$0xff]  ;;  %v10113_v35 = vpop.permute.xlu2 %2437 }
 0x408   : > { %v2473_v9 = vsel %vm1757_vm9, %v9925_v16, %v9966_v63  ;;  %v2349_v40 = vsel %vm1469_vm1, %v9983_v6, %v9895_v48  ;;  %v2357_v50 = vmul.f32 %v2350_v46, %v16260_v57  ;;  %v2347_v46 = vsel %vm1469_vm1, %v9929_v2, %v9879_v58 }
 0x409   : > { %2603 = vmatpush.msra.mxu0 %v2389_v44  ;;  %2690 = vmatpush.msrb.mxu3 %v2390_v43  ;;  %v2386_v43 = vmul.f32 %v2376_v51, %v9437_v10  ;;  %v2345_v51 = vsel %vm1469_vm1, %v9895_v48, %v9983_v6  ;;  %v2344_v6 = vsel %vm1469_vm1, %v9905_v11, %v9979_v21 }
 0x40a   : > { %v2343_v21 = vsel %vm1469_vm1, %v9879_v58, %v9929_v2  ;;  %v2353_v11 = vmul.f32 %v2348_v8, %v16260_v57  ;;  %v2351_v58 = vmul.f32 %v2347_v46, %v16260_v57 }
 0x40b   : > { %2604 = vmatpush.msra.mxu0 %v2387_v32  ;;  %2691 = vmatpush.msrb.mxu3 %v2388_v41  ;;  %v2383_v41 = vmul.f32 %v2379_v5, %v16259_v30  ;;  %v2472_v32 = vsel %vm1757_vm9, %v9883_v27, %v9981_v47  ;;  %v16261_v5 = vld [vmem:[#allocation30_spill] sm:$0xff] }
 0x40c   : > { %v2358_v48 = vmul.f32 %v2346_v52, %v16261_v5  ;;  %v2471_v52 = vsel %vm1757_vm9, %v9893_v36, %v9971_v61 }
 0x40d   : > { %v10081_v33 = vpop.permute.xlu1 %2469  ;;  %v10083_v29 = vpop.permute.xlu0 %2299  ;;  %2605 = vmatpush.msra.mxu0 %v2385_v22  ;;  %2692 = vmatpush.msrb.mxu3 %v2386_v43  ;;  %v2355_v22 = vmul.f32 %v2349_v40, %v16260_v57  ;;  %v2483_v43 = vmul.f32 %v2473_v9, %v9408_v15  ;;  %v2442_v9 = vsel %vm1685_vm4, %v9955_v56, %v10113_v35 }
 0x40e   : > { %v2474_v42 = vsel %vm1757_vm9, %v9947_v1, %v10081_v33  ;;  %v2354_v40 = vmul.f32 %v2344_v6, %v16261_v5  ;;  %v2479_v2 = vmul.f32 %v2471_v52, %v9408_v15  ;;  %v2440_v52 = vsel %vm1685_vm4, %v10038_v4, %v10015_v3 }
 0x40f   : > { %2606 = vmatpush.msra.mxu0 %v2383_v41  ;;  %2693 = vmatpush.msrb.mxu3 %v2384_v19  ;;  %v2485_v44 = vmul.f32 %v2474_v42, %v9408_v15  ;;  %v2356_v41 = vmul.f32 %v2345_v51, %v16261_v5  ;;  %v2481_v19 = vmul.f32 %v2472_v32, %v9408_v15 }
 0x410   : > { %v2352_v32 = vmul.f32 %v2343_v21, %v16261_v5 }
 0x411   : > { %2607 = vmatpush.msra.mxu0 %v2357_v50  ;;  %2632 = vmatpush.msra.mxu1 %v2485_v44  ;;  %v2441_v50 = vsel %vm1685_vm4, %v9907_v60, %v10011_v55 }
 0x412   : > { %2694 = vmatpush.msrb.mxu3 %v2358_v48  ;;  %v16262_v48 = vld [vmem:[#allocation64_spill] sm:$0xff] }
 0x413   : > { %2608 = vmatpush.msra.mxu0 %v2355_v22  ;;  %2633 = vmatpush.msra.mxu1 %v2483_v43  ;;  %v2453_v22 = vmul.f32 %v2442_v9, %v8925_v45  ;;  %v16263_v43 = vld [vmem:[#allocation50_spill] sm:$0xff] }
 0x414   : > { %2695 = vmatpush.msrb.mxu3 %v2356_v41  ;;  %v2298_v41 = vpop.permute.xlu2 %2297 }
 0x415   : > { %v10142_v42 = vpop.permute.xlu1 %2423  ;;  %v2310_v51 = vpop.permute.xlu0 %2309  ;;  %2609 = vmatpush.msra.mxu0 %v2353_v11  ;;  %2634 = vmatpush.msra.mxu1 %v2481_v19  ;;  %v2449_v11 = vmul.f32 %v2440_v52, %v8925_v45 }
 0x416   : > { %v2314_v44 = vsel %vm1398_vm2, %v10005_v7, %v2310_v51  ;;  %v2318_v8 = vsel %vm1398_vm2, %v2310_v51, %v10005_v7  ;;  %2696 = vmatpush.msrb.mxu3 %v2354_v40  ;;  %v2451_v7 = vmul.f32 %v2441_v50, %v8925_v45  ;;  %v2439_v21 = vsel %vm1685_vm4, %v10142_v42, %v10013_v34 }
 0x417   : > { %2610 = vmatpush.msra.mxu0 %v2351_v58  ;;  %2635 = vmatpush.msra.mxu1 %v2479_v2  ;;  %v2325_v6 = vmul.f32 %v2318_v8, %v16262_v48  ;;  %v2326_v46 = vmul.f32 %v2314_v44, %v16263_v43  ;;  %v2447_v40 = vmul.f32 %v2439_v21, %v8925_v45 }
 0x418   : > { %2697 = vmatpush.msrb.mxu3 %v2352_v32  ;;  %v2509_v21 = vsel %vm1829_vm5, %v10009_v25, %v9927_v24  ;;  %v2507_v24 = vsel %vm1829_vm5, %v9964_v31, %v9863_v59  ;;  %v2477_v59 = vsel %vm1757_vm9, %v9966_v63, %v9925_v16 }
 0x419   : > { %2611 = vmatpush.msra.mxu0 %v2325_v6  ;;  %2636 = vmatpush.msra.mxu1 %v2453_v22  ;;  %v2484_v16 = vmul.f32 %v2477_v59, %v9647_v18 }
 0x41a   : > { %2698 = vmatpush.msrb.mxu3 %v2326_v46  ;;  %v10189_v46 = vld [vmem:[%s16121_s3 + $0x8] sm:$0xff] }
 0x41b   : > { %2637 = vmatpush.msra.mxu1 %v2451_v7 }
 0x41c   : > { %v2304_v6 = vpop.permute.xlu2 %2303 }
 0x41d   : > { %v2308_v19 = vpop.permute.xlu1 %2307  ;;  %v2306_v9 = vpop.permute.xlu0 %2305  ;;  %2638 = vmatpush.msra.mxu1 %v2449_v11  ;;  %v2516_v11 = vmul.f32 %v2509_v21, %v9557_v12 }
 0x41e   : > { %v2313_v51 = vsel %vm1398_vm2, %v10083_v29, %v2308_v19  ;;  %v2317_v58 = vsel %vm1398_vm2, %v2308_v19, %v10083_v29  ;;  %v2316_v2 = vsel %vm1398_vm2, %v2306_v9, %v2298_v41  ;;  %v2312_v50 = vsel %vm1398_vm2, %v2298_v41, %v2306_v9  ;;  %v10220_v9 = vld [vmem:[%s16121_s3 + $0x20] sm:$0xff] }
 0x41f   : > { %2639 = vmatpush.msra.mxu1 %v2447_v40  ;;  %v2323_v44 = vmul.f32 %v2317_v58, %v16262_v48  ;;  %v2324_v8 = vmul.f32 %v2313_v51, %v16263_v43  ;;  %v2321_v32 = vmul.f32 %v2316_v2, %v16262_v48  ;;  %v2322_v29 = vmul.f32 %v2312_v50, %v16263_v43  ;;  %v2554_v51 = vld [vmem:[%s16121_s3 + $0x18] sm:$0xff] }
 0x420   : > { %v2512_v40 = vmul.f32 %v2507_v24, %v9557_v12  ;;  %v10245_v50 = vld [vmem:[%s16121_s3 + $0x38] sm:$0xff] }
 0x421   : > { %2612 = vmatpush.msra.mxu0 %v2323_v44  ;;  %2640 = vmatpush.msra.mxu1 %v9800_v0  ;;  %v2510_v0 = vsel %vm1829_vm5, %v10017_v38, %v9917_v53 }
 0x422   : > { %2699 = vmatpush.msrb.mxu3 %v2324_v8  ;;  %v2518_v53 = vmul.f32 %v2510_v0, %v9557_v12 }
 0x423   : > { %2613 = vmatpush.msra.mxu0 %v2321_v32  ;;  %2641 = vmatpush.msra.mxu1 %v9785_v62 }
 0x424   : > { %2700 = vmatpush.msrb.mxu3 %v2322_v29 }
 0x425   : > { %v2296_v22 = vpop.permute.xlu1 %2295  ;;  %2642 = vmatpush.msra.mxu1 %v9770_v26  ;;  %v2551_v26 = vld [vmem:[%s16121_s3] sm:$0xff]  ;;  %v2526_v38 = vpop.permute.xlu0 %2525 }
 0x426   : > { %v2311_v52 = vsel %vm1398_vm2, %v2296_v22, %v2304_v6  ;;  %v2315_v7 = vsel %vm1398_vm2, %v2304_v6, %v2296_v22 }
 0x427   : > { %2643 = vmatpush.msra.mxu1 %v9760_v54  ;;  %v2319_v62 = vmul.f32 %v2315_v7, %v16262_v48  ;;  %v2320_v41 = vmul.f32 %v2311_v52, %v16263_v43  ;;  %v2508_v54 = vsel %vm1829_vm5, %v9949_v49, %v9903_v28  ;;  %v2478_v28 = vsel %vm1757_vm9, %v10081_v33, %v9947_v1  ;;  %v2524_v49 = vpop.permute.xlu2 %2523 }
 0x428   : > { %2644 = vmatmul.f32.vlgmr.msra.gmra.mxu1 %v10189_v46  ;;  %v2514_v19 = vmul.f32 %v2508_v54, %v9557_v12  ;;  %v2486_v31 = vmul.f32 %v2478_v28, %v9647_v18  ;;  %v2476_v1 = vsel %vm1757_vm9, %v9981_v47, %v9883_v27  ;;  %v2475_v33 = vsel %vm1757_vm9, %v9971_v61, %v9893_v36  ;;  %v2556_v28 = vld [vmem:[%s16121_s3 + $0x28] sm:$0xff] }
 0x429   : > { %2614 = vmatpush.msra.mxu0 %v2319_v62  ;;  %2701 = vmatpush.msrb.mxu3 %v2320_v41  ;;  %v2482_v2 = vmul.f32 %v2476_v1, %v9647_v18  ;;  %v2446_v27 = vsel %vm1685_vm4, %v10113_v35, %v9955_v56  ;;  %v2480_v61 = vmul.f32 %v2475_v33, %v9647_v18  ;;  %v2557_v56 = vld [vmem:[%s16121_s3 + $0x30] sm:$0xff] }
 0x42a   : > { %2615 = vmatmul.f32.vlgmr.msra.gmra.mxu0 %v2551_v26  ;;  %2702 = vmatmul.f32.vlgmr.msrb.gmra.mxu3 %v2551_v26  ;;  %v2445_v35 = vsel %vm1685_vm4, %v10011_v55, %v9907_v60  ;;  %v2454_v52 = vmul.f32 %v2446_v27, %v9618_v20  ;;  %v2444_v7 = vsel %vm1685_vm4, %v10015_v3, %v10038_v4 }
 0x42b   : > { %2715 = vmatpush.msrb.mxu0 %v2518_v53  ;;  %v2452_v62 = vmul.f32 %v2445_v35, %v9618_v20  ;;  %v2443_v41 = vsel %vm1685_vm4, %v10013_v34, %v10142_v42  ;;  %v2450_v53 = vmul.f32 %v2444_v7, %v9618_v20  ;;  %v16267_v35 = vld [vmem:[#allocation24_spill] sm:$0xff] }
 0x42c   : > { %v2448_v42 = vmul.f32 %v2443_v41, %v9618_v20 }
 0x42d   : > { %2716 = vmatpush.msrb.mxu0 %v2516_v11  ;;  %v2522_v25 = vpop.permute.xlu1 %2521  ;;  %v2532_v58 = vpop.permute.xlu0 %2531 }
 0x42e   : > { %v2537_v44 = vsel %vm1901_vm8, %v2524_v49, %v2532_v58  ;;  %v2541_v8 = vsel %vm1901_vm8, %v2532_v58, %v2524_v49  ;;  %v16264_v49 = vld [vmem:[#allocation27_spill] sm:$0xff] }
 0x42f   : > { %2717 = vmatpush.msrb.mxu0 %v2514_v19  ;;  %v2530_v6 = vpop.permute.xlu2 %2529  ;;  %v2547_v60 = vmul.f32 %v2537_v44, %v9331_v13  ;;  %v2548_v55 = vmul.f32 %v2541_v8, %v9333_v23  ;;  %v2553_v19 = vld [vmem:[%s16121_s3 + $0x10] sm:$0xff] }
 0x430   : > { %2647 = vmatmul.f32.gmra.mxu1 %v10220_v9  ;;  %v2536_v22 = vsel %vm1901_vm8, %v2522_v25, %v2530_v6  ;;  %v2540_v0 = vsel %vm1901_vm8, %v2530_v6, %v2522_v25  ;;  %v2560_v25 = vld [vmem:[%s16121_s3 + $0x48] sm:$0xff] }
 0x431   : > { %2718 = vmatpush.msrb.mxu0 %v2512_v40  ;;  %v2545_v3 = vmul.f32 %v2536_v22, %v9331_v13  ;;  %v2546_v4 = vmul.f32 %v2540_v0, %v9333_v23  ;;  %v2559_v40 = vld [vmem:[%s16121_s3 + $0x40] sm:$0xff] }
 0x432   : > { %2618 = vmatmul.f32.gmra.mxu0 %v2554_v51  ;;  %2705 = vmatmul.f32.gmra.mxu3 %v2554_v51 }
 0x433   : > { %2719 = vmatpush.msrb.mxu0 %v2486_v31 }
 0x435   : > { %2720 = vmatpush.msrb.mxu0 %v2484_v16  ;;  %v2534_v63 = vpop.permute.xlu1 %2533  ;;  %v2520_v26 = vpop.permute.xlu0 %2519 }
 0x436   : > { %v2538_v47 = vsel %vm1901_vm8, %v2526_v38, %v2534_v63  ;;  %v2542_v36 = vsel %vm1901_vm8, %v2534_v63, %v2526_v38  ;;  %v2561_v38 = vld [vmem:[%s16121_s3 + $0x50] sm:$0xff] }
 0x437   : > { %v2549_v32 = vmul.f32 %v2538_v47, %v9331_v13  ;;  %v2550_v29 = vmul.f32 %v2542_v36, %v9333_v23  ;;  %2721 = vmatpush.msrb.mxu0 %v2482_v2 }
 0x438   : > { %2650 = vmatmul.f32.gmra.mxu1 %v10245_v50 }
 0x439   : > { %2722 = vmatpush.msrb.mxu0 %v2480_v61  ;;  %2669 = vmatpush.msrb.mxu2 %v2549_v32 }
 0x43a   : > { %2756 = vmatpush.msrb.mxu1 %v2550_v29  ;;  %2621 = vmatmul.f32.gmra.mxu0 %v2557_v56 }
 0x43b   : > { %2708 = vmatmul.f32.gmra.mxu3 %v2557_v56  ;;  %2723 = vmatpush.msrb.mxu0 %v2454_v52 }
 0x43c   : > { %2670 = vmatpush.msrb.mxu2 %v2547_v60  ;;  %2757 = vmatpush.msrb.mxu1 %v2548_v55 }
 0x43d   : > { %2724 = vmatpush.msrb.mxu0 %v2452_v62  ;;  %v2528_v21 = vpop.permute.xlu1 %2527 }
 0x43e   : > { %v2535_v54 = vsel %vm1901_vm8, %v2520_v26, %v2528_v21  ;;  %v2539_v34 = vsel %vm1901_vm8, %v2528_v21, %v2520_v26  ;;  %2671 = vmatpush.msrb.mxu2 %v2545_v3  ;;  %2758 = vmatpush.msrb.mxu1 %v2546_v4  ;;  %v16269_v4 = vld [vmem:[#allocation63_spill] sm:$0xff] }
 0x43f   : > { %2725 = vmatpush.msrb.mxu0 %v2450_v53  ;;  %v2543_v11 = vmul.f32 %v2535_v54, %v9331_v13  ;;  %v2544_v24 = vmul.f32 %v2539_v34, %v9333_v23 }
 0x440   : > { %2653 = vmatmul.f32.gmra.mxu1 %v2561_v38 }
 0x441   : > { %2726 = vmatpush.msrb.mxu0 %v2448_v42  ;;  %2672 = vmatpush.msrb.mxu2 %v2543_v11 }
 0x442   : > { %2759 = vmatpush.msrb.mxu1 %v2544_v24  ;;  %2624 = vmatmul.f32.gmra.mxu0 %v2560_v25 }
 0x443   : > { %7917 = vmatmul.msk.f32.vlgmr.msrb.gmra.mxu2 %vm1096_vm0, %v2553_v19  ;;  %2711 = vmatmul.f32.gmra.mxu3 %v2560_v25  ;;  %v16271_v25 = vld [vmem:[#allocation58_spill] sm:$0xff] }
 0x444   : > { %2727 = vmatpush.msrb.mxu0 %v9855_v17  ;;  %v2562_v17 = vld [vmem:[%s16121_s3 + $0x58] sm:$0xff]  ;;  %s16390_s3 = smov 1  }
 0x446   : > { %2728 = vmatpush.msrb.mxu0 %v9839_v14  ;;  %v10317_v14 = vpop.permute.xlu1 %1290 }
 0x448   : > { %2729 = vmatpush.msrb.mxu0 %v9824_v39  ;;  %7921 = vmatmul.msk.f32.vlgmr.msrb.gmra.mxu1 %vm1096_vm0, %v2553_v19  ;;  %v10315_v39 = vpop.permute.xlu0 %2579  ;;  %v1333_v19 = vadd.f32 %v16271_v25, %v10317_v14 }
 0x44a   : > { %2730 = vmatpush.msrb.mxu0 %v16264_v49 }
 0x44b   : > { %7918 = vmatmul.msk.f32.gmra.mxu2 %vm1096_vm0, %v2556_v28  ;;  %2731 = vmatmul.f32.vlgmr.msrb.gmra.mxu0 %v10189_v46  ;;  %v10319_v46 = vpop.permute.xlu2 %2584 }
 0x450   : > { %7922 = vmatmul.msk.f32.gmra.mxu1 %vm1096_vm0, %v2556_v28  ;;  %v10321_v51 = vpop.permute.xlu0 %1285 }
 0x451   : > { %v1330_v26 = vadd.f32 %v16269_v4, %v10321_v51 }
 0x453   : > { %7919 = vmatmul.msk.f32.gmra.mxu2 %vm1096_vm0, %v2559_v40  ;;  %2734 = vmatmul.f32.gmra.mxu0 %v10220_v9  ;;  %v2570_v9 = vpop.permute.xlu1 %2569  ;;  %v10323_v33 = vpop.permute.xlu2 %2574 }
 0x458   : > { %7923 = vmatmul.msk.f32.gmra.mxu1 %vm1096_vm0, %v2559_v40  ;;  %v1276_v58 = vpop.permute.xlu0 %1275 }
 0x45b   : > { %7920 = vmatmul.msk.f32.gmra.mxu2 %vm1096_vm0, %v2562_v17  ;;  %2737 = vmatmul.f32.gmra.mxu0 %v10245_v50  ;;  %v16265_v50 = vld [vmem:[#allocation28_spill] sm:$0xff]  ;;  %v10329_v32 = vpop.permute.xlu2 %1280 }
 0x45c   : > { %v1324_v27 = vadd.f32 %v16265_v50, %v1276_v58  ;;  %v1327_v6 = vadd.f32 %v16267_v35, %v10329_v32 }
 0x460   : > { %7924 = vmatmul.msk.f32.gmra.mxu1 %vm1096_vm0, %v2562_v17 }
 0x463   : > { %2740 = vmatmul.f32.gmra.mxu0 %v2561_v38 }
 0x4a5   : > { %v2645_v31 = vpop.f32.mrf.mxu1 }
 0x4a7   : > { %v2616_v59 = vpop.f32.mrf.mxu0 }
 0x4a8   : > { %v2617_v1 = vadd.f32 %v2616_v59, %v2570_v9 }
 0x4aa   : > { %v2646_v16 = vadd.f32 %v2645_v31, %v2617_v1 }
 0x4ad   : > { %v2648_v44 = vpop.f32.mrf.mxu1  ;;  %v2703_v49 = vpop.f32.mrf.mxu3 }
 0x4ae   : > { %v2704_v59 = vadd.f32 %v2703_v49, %v2570_v9 }
 0x4af   : > { %v2619_v63 = vpop.f32.mrf.mxu0 }
 0x4b0   : > { %v2620_v36 = vadd.f32 %v2619_v63, %v10323_v33 }
 0x4b2   : > { %v2649_v29 = vadd.f32 %v2648_v44, %v2620_v36 }
 0x4b5   : > { %v2651_v55 = vpop.f32.mrf.mxu1 }
 0x4b7   : > { %v2622_v52 = vpop.f32.mrf.mxu0 }
 0x4b8   : > { %v2623_v60 = vadd.f32 %v2622_v52, %v10315_v39 }
 0x4ba   : > { %v2652_v41 = vadd.f32 %v2651_v55, %v2623_v60  ;;  %v16277_v55 = vld [vmem:[#allocation60_spill] sm:$0xff] }
 0x4bd   : > { %v2654_v34 = vpop.f32.mrf.mxu1 }
 0x4bf   : > { %v2625_v53 = vpop.f32.mrf.mxu0 }
 0x4c0   : > { %v2626_v54 = vadd.f32 %v2625_v53, %v10319_v46 }
 0x4c2   : > { %v2655_v11 = vadd.f32 %v2654_v34, %v2626_v54  ;;  %v16279_v54 = vld [vmem:[#allocation44_spill] sm:$0xff] }
 0x4c3   : > { %v1362_v34 = vadd.f32 %v16279_v54, %v10317_v14  ;;  %v16281_v54 = vld [vmem:[#allocation65_spill] sm:$0xff] }
 0x4c5   : > { %v2761_v1 = vpop.f32.mrf.mxu1 }
 0x4c6   : > { %v2674_v2 = vpop.f32.mrf.mxu2 }
 0x4c7   : > { %v2675_v47 = vadd.f32 %v2674_v2, %v2646_v16  ;;  %v2706_v16 = vpop.f32.mrf.mxu3  ;;  %v16273_v2 = vld [vmem:[#allocation32_spill] sm:$0xff] }
 0x4c8   : > { %v2732_v40 = vpop.f32.mrf.mxu0  ;;  %v1353_v50 = vadd.f32 %v16273_v2, %v1276_v58  ;;  %v2707_v9 = vadd.f32 %v2706_v16, %v10323_v33  ;;  %v16275_v58 = vld [vmem:[#allocation22_spill] sm:$0xff] }
 0x4c9   : > { %v2773_v61 = vadd.f32 %v2675_v47, %v1324_v27  ;;  %v2733_v31 = vadd.f32 %v2732_v40, %v2704_v59 }
 0x4cb   : > { %v10327_v8 = vmax.f32 %v2773_v61, 0.0  ;;  %v2762_v63 = vadd.f32 %v2761_v1, %v2733_v31 }
 0x4cd   : > { %16266 = vst [vmem:[#allocation26_spill] sm:$0xff] %v10327_v8  ;;  %2821 = vrot.lane.b32.xlu1 %v10327_v8, %s15995_s22  ;;  %2853 = vrot.lane.b32.xlu0 %v10327_v8, %s16018_s26  ;;  %v2774_v47 = vadd.f32 %v2762_v63, %v1353_v50  ;;  %v2764_v61 = vpop.f32.mrf.mxu1 }
 0x4ce   : > { %2885 = vrot.lane.b32.xlu2 %v10327_v8, %s16001_s23  ;;  %v2677_v56 = vpop.f32.mrf.mxu2 }
 0x4cf   : > { %v2678_v22 = vadd.f32 %v2677_v56, %v2649_v29  ;;  %v10389_v44 = vmax.f32 %v2774_v47, 0.0  ;;  %v1356_v56 = vadd.f32 %v16275_v58, %v10329_v32  ;;  %v2709_v35 = vpop.f32.mrf.mxu3 }
 0x4d0   : > { %v2735_v27 = vpop.f32.mrf.mxu0 }
 0x4d1   : > { %v2775_v0 = vadd.f32 %v2678_v22, %v1327_v6  ;;  %v2736_v36 = vadd.f32 %v2735_v27, %v2707_v9  ;;  %16274 = vst [vmem:[#allocation56_spill] sm:$0xff] %v10389_v44 }
 0x4d3   : > { %v10339_v7 = vmax.f32 %v2775_v0, 0.0  ;;  %v2765_v29 = vadd.f32 %v2764_v61, %v2736_v36  ;;  %v2710_v0 = vadd.f32 %v2709_v35, %v10315_v39  ;;  %v3059_v35 = vld [vmem:[%s8203_s30 + $0x10] sm:$0xff] }
 0x4d5   : > { %16268 = vst [vmem:[#allocation55_spill] sm:$0xff] %v10339_v7  ;;  %2949 = vrot.lane.b32.xlu0 %v10327_v8, %s15999_s11  ;;  %2887 = vrot.lane.b32.xlu1 %v10339_v7, %s16001_s23  ;;  %v2776_v33 = vadd.f32 %v2765_v29, %v1356_v56  ;;  %v2767_v52 = vpop.f32.mrf.mxu1 }
 0x4d6   : > { %2981 = vrot.lane.b32.xlu2 %v10327_v8, %s15997_s2  ;;  %v2680_v62 = vpop.f32.mrf.mxu2 }
 0x4d7   : > { %v2681_v3 = vadd.f32 %v2680_v62, %v2652_v41  ;;  %v10399_v6 = vmax.f32 %v2776_v33, 0.0  ;;  %v1359_v62 = vadd.f32 %v16277_v55, %v10321_v51  ;;  %v2712_v39 = vpop.f32.mrf.mxu3  ;;  %v3057_v55 = vld [vmem:[%s8203_s30] sm:$0xff] }
 0x4d8   : > { %v2738_v22 = vpop.f32.mrf.mxu0 }
 0x4d9   : > { %v2777_v21 = vadd.f32 %v2681_v3, %v1330_v26  ;;  %16276 = vst [vmem:[#allocation49_spill] sm:$0xff] %v10399_v6  ;;  %v2739_v32 = vadd.f32 %v2738_v22, %v2710_v0  ;;  %v2713_v26 = vadd.f32 %v2712_v39, %v10319_v46  ;;  %v3060_v22 = vld [vmem:[%s8203_s30 + $0x18] sm:$0xff] }
 0x4db   : > { %v10356_v38 = vmax.f32 %v2777_v21, 0.0  ;;  %v2768_v60 = vadd.f32 %v2767_v52, %v2739_v32 }
 0x4dd   : > { %2823 = vrot.lane.b32.xlu0 %v10339_v7, %s15995_s22  ;;  %2983 = vrot.lane.b32.xlu1 %v10339_v7, %s15997_s2  ;;  %16270 = vst [vmem:[#allocation61_spill] sm:$0xff] %v10356_v38  ;;  %v2778_v41 = vadd.f32 %v2768_v60, %v1359_v62  ;;  %v2770_v21 = vpop.f32.mrf.mxu1  ;;  %v3058_v60 = vld [vmem:[%s8203_s30 + $0x8] sm:$0xff] }
 0x4de   : > { %2855 = vrot.lane.b32.xlu2 %v10339_v7, %s16018_s26  ;;  %v2683_v42 = vpop.f32.mrf.mxu2 }
 0x4df   : > { %v2684_v24 = vadd.f32 %v2683_v42, %v2655_v11  ;;  %v10416_v3 = vmax.f32 %v2778_v41, 0.0 }
 0x4e0   : > { %v2741_v4 = vpop.f32.mrf.mxu0 }
 0x4e1   : > { %v2779_v28 = vadd.f32 %v2684_v24, %v1333_v19  ;;  %16278 = vst [vmem:[#allocation47_spill] sm:$0xff] %v10416_v3  ;;  %v2742_v51 = vadd.f32 %v2741_v4, %v2713_v26 }
 0x4e3   : > { %v10373_v17 = vmax.f32 %v2779_v28, 0.0  ;;  %v2771_v53 = vadd.f32 %v2770_v21, %v2742_v51 }
 0x4e5   : > { %2889 = vrot.lane.b32.xlu0 %v10356_v38, %s16001_s23  ;;  %2857 = vrot.lane.b32.xlu1 %v10356_v38, %s16018_s26  ;;  %16272 = vst [vmem:[#allocation57_spill] sm:$0xff] %v10373_v17  ;;  %v2780_v42 = vadd.f32 %v2771_v53, %v1362_v34 }
 0x4e6   : > { %2951 = vrot.lane.b32.xlu2 %v10339_v7, %s15999_s11 }
 0x4e7   : > { %v10435_v11 = vmax.f32 %v2780_v42, 0.0  ;;  %v16282_v42 = vld [vmem:[#allocation23_spill] sm:$0xff] }
 0x4e9   : > { %16280 = vst [vmem:[#allocation36_spill] sm:$0xff] %v10435_v11 }
 0x4ed   : > { %2985 = vrot.lane.b32.xlu0 %v10356_v38, %s15997_s2  ;;  %2953 = vrot.lane.b32.xlu1 %v10356_v38, %s15999_s11 }
 0x4ee   : > { %2825 = vrot.lane.b32.xlu2 %v10356_v38, %s15995_s22 }
 0x4f5   : > { %2859 = vrot.lane.b32.xlu0 %v10373_v17, %s16018_s26  ;;  %2891 = vrot.lane.b32.xlu1 %v10373_v17, %s16001_s23 }
 0x4f6   : > { %2921 = vrot.lane.b32.xlu2 %v10356_v38, %s15979_s1 }
 0x4fd   : > { %2955 = vrot.lane.b32.xlu0 %v10373_v17, %s15999_s11  ;;  %2827 = vrot.lane.b32.xlu1 %v10373_v17, %s15995_s22 }
 0x4fe   : > { %2987 = vrot.lane.b32.xlu2 %v10373_v17, %s15997_s2 }
 0x505   : > { %2893 = vrot.lane.b32.xlu0 %v10389_v44, %s16001_s23  ;;  %2923 = vrot.lane.b32.xlu1 %v10373_v17, %s15979_s1 }
 0x506   : > { %2829 = vrot.lane.b32.xlu2 %v10389_v44, %s15995_s22 }
 0x50d   : > { %2989 = vrot.lane.b32.xlu0 %v10389_v44, %s15997_s2  ;;  %2861 = vrot.lane.b32.xlu1 %v10389_v44, %s16018_s26 }
 0x50e   : > { %2895 = vrot.lane.b32.xlu2 %v10399_v6, %s16001_s23 }
 0x515   : > { %2863 = vrot.lane.b32.xlu0 %v10399_v6, %s16018_s26  ;;  %2957 = vrot.lane.b32.xlu1 %v10389_v44, %s15999_s11 }
 0x516   : > { %2991 = vrot.lane.b32.xlu2 %v10399_v6, %s15997_s2 }
 0x51d   : > { %2959 = vrot.lane.b32.xlu0 %v10399_v6, %s15999_s11  ;;  %2831 = vrot.lane.b32.xlu1 %v10399_v6, %s15995_s22 }
 0x51e   : > { %2865 = vrot.lane.b32.xlu2 %v10416_v3, %s16018_s26 }
 0x525   : > { %2833 = vrot.lane.b32.xlu0 %v10416_v3, %s15995_s22  ;;  %2897 = vrot.lane.b32.xlu1 %v10416_v3, %s16001_s23 }
 0x526   : > { %2961 = vrot.lane.b32.xlu2 %v10416_v3, %s15999_s11 }
 0x528   : > { %v10433_v46 = vpop.permute.xlu2 %2885 }
 0x52d   : > { %2929 = vrot.lane.b32.xlu0 %v10416_v3, %s15979_s1  ;;  %2993 = vrot.lane.b32.xlu1 %v10416_v3, %s15997_s2 }
 0x52e   : > { %2899 = vrot.lane.b32.xlu2 %v10435_v11, %s16001_s23 }
 0x530   : > { %v10443_v24 = vpop.permute.xlu2 %2981 }
 0x535   : > { %2995 = vrot.lane.b32.xlu0 %v10435_v11, %s15997_s2  ;;  %2927 = vrot.lane.b32.xlu1 %v10399_v6, %s15979_s1 }
 0x536   : > { %2795 = vrot.lane.b32.xlu2 %v10373_v17, %s15993_s18 }
 0x538   : > { %v10451_v14 = vpop.permute.xlu2 %2855 }
 0x53d   : > { %2919 = vrot.lane.b32.xlu0 %v10339_v7, %s15979_s1  ;;  %2867 = vrot.lane.b32.xlu1 %v10435_v11, %s16018_s26 }
 0x53e   : > { %2925 = vrot.lane.b32.xlu2 %v10389_v44, %s15979_s1 }
 0x53f   : > { %v10459_v25 = vpop.permute.xlu1 %2821  ;;  %v10461_v19 = vpop.permute.xlu0 %2853 }
 0x540   : > { %v10463_v28 = vpop.permute.xlu2 %2951 }
 0x545   : > { %2793 = vrot.lane.b32.xlu0 %v10356_v38, %s15993_s18  ;;  %2963 = vrot.lane.b32.xlu1 %v10435_v11, %s15999_s11 }
 0x546   : > { %2835 = vrot.lane.b32.xlu2 %v10435_v11, %s15995_s22 }
 0x547   : > { %v10471_v49 = vpop.permute.xlu0 %2949  ;;  %v2888_v40 = vpop.permute.xlu1 %2887 }
 0x548   : > { %v10473_v59 = vpop.permute.xlu2 %2825 }
 0x54d   : > { %2803 = vrot.lane.b32.xlu0 %v10435_v11, %s15993_s18  ;;  %2917 = vrot.lane.b32.xlu1 %v10327_v8, %s15979_s1 }
 0x54e   : > { %2931 = vrot.lane.b32.xlu2 %v10435_v11, %s15979_s1 }
 0x54f   : > { %v10481_v31 = vpop.permute.xlu0 %2823  ;;  %v10483_v1 = vpop.permute.xlu1 %2983 }
 0x550   : > { %v10485_v16 = vpop.permute.xlu2 %2921 }
 0x555   : > { %2799 = vrot.lane.b32.xlu0 %v10399_v6, %s15993_s18  ;;  %2801 = vrot.lane.b32.xlu1 %v10416_v3, %s15993_s18 }
 0x556   : > { %2791 = vrot.lane.b32.xlu2 %v10339_v7, %s15993_s18 }
 0x557   : > { %v2890_v63 = vpop.permute.xlu0 %2889  ;;  %v10493_v2 = vpop.permute.xlu1 %2857 }
 0x558   : > { %v10495_v50 = vpop.permute.xlu2 %2987 }
 0x55d   : > { %3019 = vrot.lane.b32.xlu0 %v10373_v17, %s15991_s10  ;;  %2789 = vrot.lane.b32.xlu1 %v10327_v8, %s15993_s18 }
 0x55e   : > { %2797 = vrot.lane.b32.xlu2 %v10389_v44, %s15993_s18 }
 0x55f   : > { %v10503_v27 = vpop.permute.xlu0 %2985  ;;  %v10505_v9 = vpop.permute.xlu1 %2953 }
 0x560   : > { %v10507_v47 = vpop.permute.xlu2 %2829 }
 0x565   : > { %3025 = vrot.lane.b32.xlu0 %v10416_v3, %s15991_s10  ;;  %3015 = vrot.lane.b32.xlu1 %v10339_v7, %s15991_s10 }
 0x566   : > { %3017 = vrot.lane.b32.xlu2 %v10356_v38, %s15991_s10 }
 0x567   : > { %v10515_v36 = vpop.permute.xlu0 %2859  ;;  %v2892_v61 = vpop.permute.xlu1 %2891 }
 0x568   : > { %v2896_v29 = vpop.permute.xlu2 %2895 }
 0x569   : > { %v2906_v3 = vsel %vm1613_vm3, %v2896_v29, %v2888_v40 }
 0x56d   : > { %3013 = vrot.lane.b32.xlu0 %v10327_v8, %s15991_s10  ;;  %3027 = vrot.lane.b32.xlu1 %v10435_v11, %s15991_s10 }
 0x56e   : > { %3023 = vrot.lane.b32.xlu2 %v10399_v6, %s15991_s10  ;;  %v2902_v6 = vsel %vm1613_vm3, %v2888_v40, %v2896_v29  ;;  %v2911_v40 = vmul.f32 %v2906_v3, %v16281_v54 }
 0x56f   : > { %v10523_v58 = vpop.permute.xlu0 %2955  ;;  %v10525_v56 = vpop.permute.xlu1 %2827  ;;  %v2912_v29 = vmul.f32 %v2902_v6, %v16282_v42 }
 0x570   : > { %v10527_v33 = vpop.permute.xlu2 %2991 }
 0x575   : > { %3073 = vperm.xlu0 %8070, %v3059_v35   ;;  %3021 = vrot.lane.b32.xlu1 %v10389_v44, %s15991_s10 }
 0x576   : > { %3078 = vperm.xlu2 %8072, %v3060_v22  }
 0x577   : > { %v2894_v0 = vpop.permute.xlu0 %2893  ;;  %v10533_v32 = vpop.permute.xlu1 %2923 }
 0x578   : > { %v2866_v52 = vpop.permute.xlu2 %2865 }
 0x57d   : > { %3068 = vperm.xlu1 %8071, %v3058_v60  }
 0x57e   : > { %3063 = vperm.xlu2 %8072, %v3057_v55  }
 0x57f   : > { %v10537_v62 = vpop.permute.xlu0 %2989  ;;  %v10539_v41 = vpop.permute.xlu1 %2861 }
 0x580   : > { %v10541_v39 = vpop.permute.xlu2 %2961 }
 0x587   : > { %v2864_v4 = vpop.permute.xlu0 %2863  ;;  %v10543_v26 = vpop.permute.xlu1 %2957 }
 0x588   : > { %v2900_v51 = vpop.permute.xlu2 %2899 }
 0x589   : > { %v2904_v21 = vsel %vm1613_vm3, %v2892_v61, %v2900_v51  ;;  %v2908_v53 = vsel %vm1613_vm3, %v2900_v51, %v2892_v61 }
 0x58a   : > { %v2915_v34 = vmul.f32 %v2908_v53, %v16281_v54  ;;  %v2916_v35 = vmul.f32 %v2904_v21, %v16282_v42 }
 0x58c   : > { %3093 = vmatpush.msra.mxu2 %v2915_v34  ;;  %3180 = vmatpush.msra.mxu1 %v2916_v35  ;;  %v2901_v34 = vsel %vm1613_vm3, %v10433_v46, %v2894_v0  ;;  %v2905_v35 = vsel %vm1613_vm3, %v2894_v0, %v10433_v46 }
 0x58f   : > { %v10551_v22 = vpop.permute.xlu0 %2959  ;;  %v10553_v60 = vpop.permute.xlu1 %2831 }
 0x590   : > { %v10575_v11 = vpop.permute.xlu2 %2795 }
 0x597   : > { %v10555_v55 = vpop.permute.xlu0 %2833  ;;  %v2898_v44 = vpop.permute.xlu1 %2897 }
 0x598   : > { %v2903_v61 = vsel %vm1613_vm3, %v2890_v63, %v2898_v44  ;;  %v2907_v51 = vsel %vm1613_vm3, %v2898_v44, %v2890_v63  ;;  %v2909_v44 = vmul.f32 %v2905_v35, %v16281_v54  ;;  %v2910_v63 = vmul.f32 %v2901_v34, %v16282_v42  ;;  %v10583_v46 = vpop.permute.xlu2 %2925 }
 0x599   : > { %v2913_v21 = vmul.f32 %v2907_v51, %v16281_v54  ;;  %v2914_v53 = vmul.f32 %v2903_v61, %v16282_v42  ;;  %v2998_v35 = vsel %vm1829_vm5, %v10483_v1, %v10527_v33 }
 0x59b   : > { %3094 = vmatpush.msra.mxu2 %v2913_v21  ;;  %3181 = vmatpush.msra.mxu1 %v2914_v53  ;;  %v16283_v53 = vld [vmem:[#allocation71_spill] sm:$0xff] }
 0x59d   : > { %3095 = vmatpush.msra.mxu2 %v2911_v40  ;;  %3182 = vmatpush.msra.mxu1 %v2912_v29  ;;  %v2997_v29 = vsel %vm1829_vm5, %v10443_v24, %v10537_v62 }
 0x59f   : > { %v10579_v61 = vpop.permute.xlu0 %2929  ;;  %v10581_v51 = vpop.permute.xlu1 %2993  ;;  %3096 = vmatpush.msra.mxu2 %v2909_v44  ;;  %3183 = vmatpush.msra.mxu1 %v2910_v63  ;;  %v3007_v44 = vmul.f32 %v2998_v35, %v16283_v53 }
 0x5a0   : > { %v2999_v6 = vsel %vm1829_vm5, %v10503_v27, %v10581_v51  ;;  %v2836_v54 = vpop.permute.xlu2 %2835 }
 0x5a1   : > { %v3009_v40 = vmul.f32 %v2999_v6, %v16283_v53  ;;  %v2875_v6 = vsel %vm1541_vm6, %v2866_v52, %v10493_v2 }
 0x5a7   : > { %v10585_v0 = vpop.permute.xlu0 %2995  ;;  %v10587_v3 = vpop.permute.xlu1 %2927 }
 0x5a8   : > { %v3000_v21 = vsel %vm1829_vm5, %v10495_v50, %v10585_v0 }
 0x5a9   : > { %v3011_v34 = vmul.f32 %v3000_v21, %v16283_v53  ;;  %v3005_v21 = vmul.f32 %v2997_v29, %v16283_v53  ;;  %v2870_v53 = vsel %vm1541_vm6, %v10451_v14, %v2864_v4 }
 0x5ab   : > { %3122 = vmatpush.msra.mxu3 %v3011_v34  ;;  %v2871_v34 = vsel %vm1541_vm6, %v10493_v2, %v2866_v52  ;;  %v2874_v2 = vsel %vm1541_vm6, %v2864_v4, %v10451_v14  ;;  %v2881_v52 = vmul.f32 %v2875_v6, %v16259_v30  ;;  %v2880_v4 = vmul.f32 %v2870_v53, %v9437_v10 }
 0x5ac   : > { %v2882_v20 = vmul.f32 %v2871_v34, %v9437_v10  ;;  %v2879_v14 = vmul.f32 %v2874_v2, %v16259_v30  ;;  %v2840_v34 = vsel %vm1469_vm1, %v10525_v56, %v2836_v54  ;;  %v2839_v53 = vsel %vm1469_vm1, %v10473_v59, %v10555_v55 }
 0x5ad   : > { %3123 = vmatpush.msra.mxu3 %v3009_v40  ;;  %v2842_v2 = vsel %vm1469_vm1, %v10553_v60, %v10481_v31 }
 0x5af   : > { %v10608_v63 = vpop.permute.xlu0 %2919  ;;  %v2868_v42 = vpop.permute.xlu1 %2867  ;;  %3124 = vmatpush.msra.mxu3 %v3007_v44 }
 0x5b0   : > { %v2872_v40 = vsel %vm1541_vm6, %v10515_v36, %v2868_v42  ;;  %v2876_v35 = vsel %vm1541_vm6, %v2868_v42, %v10515_v36  ;;  %v2869_v36 = vsel %vm1541_vm6, %v10461_v19, %v10539_v41  ;;  %v2873_v42 = vsel %vm1541_vm6, %v10539_v41, %v10461_v19 }
 0x5b1   : > { %3125 = vmatpush.msra.mxu3 %v3005_v21  ;;  %v2883_v29 = vmul.f32 %v2876_v35, %v16259_v30  ;;  %v2884_v44 = vmul.f32 %v2872_v40, %v9437_v10  ;;  %v2844_v21 = vsel %vm1469_vm1, %v2836_v54, %v10525_v56  ;;  %v2878_v19 = vmul.f32 %v2869_v36, %v9437_v10 }
 0x5b2   : > { %v2967_v41 = vsel %vm1757_vm9, %v10505_v9, %v10541_v39  ;;  %v2843_v56 = vsel %vm1469_vm1, %v10555_v55, %v10473_v59  ;;  %v2851_v35 = vmul.f32 %v2844_v21, %v16260_v57  ;;  %v2852_v59 = vmul.f32 %v2840_v34, %v16261_v5 }
 0x5b3   : > { %3097 = vmatpush.msra.mxu2 %v2883_v29  ;;  %3184 = vmatpush.msra.mxu1 %v2884_v44  ;;  %v2966_v44 = vsel %vm1757_vm9, %v10463_v28, %v10551_v22  ;;  %v2838_v55 = vsel %vm1469_vm1, %v10481_v31, %v10553_v60  ;;  %v2849_v36 = vmul.f32 %v2843_v56, %v16260_v57 }
 0x5b4   : > { %v2850_v21 = vmul.f32 %v2839_v53, %v16261_v5  ;;  %v2837_v31 = vsel %vm1469_vm1, %v10459_v25, %v10507_v47  ;;  %v2847_v60 = vmul.f32 %v2842_v2, %v16260_v57  ;;  %v2975_v34 = vmul.f32 %v2966_v44, %v9408_v15 }
 0x5b5   : > { %3098 = vmatpush.msra.mxu2 %v2881_v52  ;;  %3185 = vmatpush.msra.mxu1 %v2882_v20  ;;  %v2877_v20 = vmul.f32 %v2873_v42, %v16259_v30  ;;  %v10681_v52 = vpop.permute.xlu2 %2931  ;;  %v2977_v42 = vmul.f32 %v2967_v41, %v9408_v15 }
 0x5b7   : > { %v10649_v6 = vpop.permute.xlu0 %2793  ;;  %v10651_v40 = vpop.permute.xlu1 %2963  ;;  %3099 = vmatpush.msra.mxu2 %v2879_v14  ;;  %3186 = vmatpush.msra.mxu1 %v2880_v4  ;;  %v2841_v14 = vsel %vm1469_vm1, %v10507_v47, %v10459_v25  ;;  %v2965_v4 = vsel %vm1757_vm9, %v10471_v49, %v10543_v26 }
 0x5b8   : > { %v2968_v54 = vsel %vm1757_vm9, %v10523_v58, %v10651_v40  ;;  %v2845_v25 = vmul.f32 %v2841_v14, %v16260_v57  ;;  %v2973_v47 = vmul.f32 %v2965_v4, %v9408_v15 }
 0x5b9   : > { %3100 = vmatpush.msra.mxu2 %v2877_v20  ;;  %3187 = vmatpush.msra.mxu1 %v2878_v19  ;;  %v2979_v29 = vmul.f32 %v2968_v54, %v9408_v15  ;;  %v2936_v20 = vsel %vm1685_vm4, %v10533_v32, %v10681_v52  ;;  %v2848_v19 = vmul.f32 %v2838_v55, %v16261_v5 }
 0x5ba   : > { %v2935_v54 = vsel %vm1685_vm4, %v10485_v16, %v10579_v61  ;;  %v2947_v2 = vmul.f32 %v2936_v20, %v8925_v45  ;;  %v2934_v55 = vsel %vm1685_vm4, %v10608_v63, %v10587_v3 }
 0x5bb   : > { %3101 = vmatpush.msra.mxu2 %v2851_v35  ;;  %3126 = vmatpush.msra.mxu3 %v2979_v29  ;;  %v2846_v29 = vmul.f32 %v2837_v31, %v16261_v5  ;;  %v2943_v14 = vmul.f32 %v2934_v55, %v8925_v45 }
 0x5bc   : > { %3188 = vmatpush.msra.mxu1 %v2852_v59 }
 0x5bd   : > { %3102 = vmatpush.msra.mxu2 %v2849_v36  ;;  %3127 = vmatpush.msra.mxu3 %v2977_v42  ;;  %v2792_v36 = vpop.permute.xlu2 %2791 }
 0x5be   : > { %3189 = vmatpush.msra.mxu1 %v2850_v21 }
 0x5bf   : > { %v2804_v41 = vpop.permute.xlu0 %2803  ;;  %v10710_v56 = vpop.permute.xlu1 %2917  ;;  %3103 = vmatpush.msra.mxu2 %v2847_v60  ;;  %3128 = vmatpush.msra.mxu3 %v2975_v34 }
 0x5c0   : > { %v2808_v53 = vsel %vm1398_vm2, %v10575_v11, %v2804_v41  ;;  %v2812_v35 = vsel %vm1398_vm2, %v2804_v41, %v10575_v11  ;;  %3190 = vmatpush.msra.mxu1 %v2848_v19  ;;  %v2945_v11 = vmul.f32 %v2935_v54, %v8925_v45  ;;  %v2933_v42 = vsel %vm1685_vm4, %v10710_v56, %v10583_v46 }
 0x5c1   : > { %3104 = vmatpush.msra.mxu2 %v2845_v25  ;;  %3129 = vmatpush.msra.mxu3 %v2973_v47  ;;  %v2819_v44 = vmul.f32 %v2812_v35, %v16262_v48  ;;  %v2820_v59 = vmul.f32 %v2808_v53, %v16263_v43  ;;  %v2941_v31 = vmul.f32 %v2933_v42, %v8925_v45  ;;  %v10757_v35 = vld [vmem:[%s8198_s24 + $0x8] sm:$0xff] }
 0x5c2   : > { %3191 = vmatpush.msra.mxu1 %v2846_v29  ;;  %v3004_v29 = vsel %vm1829_vm5, %v10585_v0, %v10495_v50  ;;  %v3002_v42 = vsel %vm1829_vm5, %v10527_v33, %v10483_v1  ;;  %v2972_v1 = vsel %vm1757_vm9, %v10651_v40, %v10523_v58  ;;  %v2970_v58 = vsel %vm1757_vm9, %v10551_v22, %v10463_v28 }
 0x5c3   : > { %3105 = vmatpush.msra.mxu2 %v2819_v44  ;;  %3130 = vmatpush.msra.mxu3 %v2947_v2  ;;  %v3012_v50 = vmul.f32 %v3004_v29, %v9557_v12  ;;  %v2969_v40 = vsel %vm1757_vm9, %v10543_v26, %v10471_v49  ;;  %v2940_v28 = vsel %vm1685_vm4, %v10681_v52, %v10533_v32  ;;  %v3051_v32 = vld [vmem:[%s8198_s24 + $0x30] sm:$0xff] }
 0x5c4   : > { %3192 = vmatpush.msra.mxu1 %v2820_v59  ;;  %v2974_v26 = vmul.f32 %v2969_v40, %v9647_v18  ;;  %v2939_v52 = vsel %vm1685_vm4, %v10579_v61, %v10485_v16  ;;  %v3056_v40 = vld [vmem:[%s8198_s24 + $0x58] sm:$0xff] }
 0x5c5   : > { %3131 = vmatpush.msra.mxu3 %v2945_v11  ;;  %v3045_v11 = vld [vmem:[%s8198_s24] sm:$0xff] }
 0x5c7   : > { %v2800_v4 = vpop.permute.xlu0 %2799  ;;  %v2802_v21 = vpop.permute.xlu1 %2801  ;;  %3132 = vmatpush.msra.mxu3 %v2943_v14 }
 0x5c8   : > { %v2810_v60 = vsel %vm1398_vm2, %v2800_v4, %v2792_v36  ;;  %v2807_v34 = vsel %vm1398_vm2, %v10649_v6, %v2802_v21  ;;  %v2811_v20 = vsel %vm1398_vm2, %v2802_v21, %v10649_v6  ;;  %v2806_v19 = vsel %vm1398_vm2, %v2792_v36, %v2800_v4  ;;  %v2798_v6 = vpop.permute.xlu2 %2797  ;;  %v10788_v21 = vld [vmem:[%s8198_s24 + $0x20] sm:$0xff] }
 0x5c9   : > { %3133 = vmatpush.msra.mxu3 %v2941_v31  ;;  %v2817_v41 = vmul.f32 %v2811_v20, %v16262_v48  ;;  %v2818_v25 = vmul.f32 %v2807_v34, %v16263_v43  ;;  %v2815_v47 = vmul.f32 %v2810_v60, %v16262_v48  ;;  %v2816_v54 = vmul.f32 %v2806_v19, %v16263_v43  ;;  %v3048_v60 = vld [vmem:[%s8198_s24 + $0x18] sm:$0xff] }
 0x5ca   : > { %v3003_v36 = vsel %vm1829_vm5, %v10581_v51, %v10503_v27  ;;  %v3001_v27 = vsel %vm1829_vm5, %v10537_v62, %v10443_v24  ;;  %v3008_v4 = vmul.f32 %v3002_v42, %v9557_v12  ;;  %v2971_v24 = vsel %vm1757_vm9, %v10541_v39, %v10505_v9  ;;  %v10813_v19 = vld [vmem:[%s8198_s24 + $0x38] sm:$0xff]  ;;  %v3055_v42 = vld [vmem:[%s8198_s24 + $0x50] sm:$0xff] }
 0x5cb   : > { %3106 = vmatpush.msra.mxu2 %v2817_v41  ;;  %3134 = vmatpush.msra.mxu3 %v10373_v17  ;;  %v3010_v14 = vmul.f32 %v3003_v36, %v9557_v12  ;;  %v3006_v31 = vmul.f32 %v3001_v27, %v9557_v12  ;;  %v2980_v62 = vmul.f32 %v2972_v1, %v9647_v18  ;;  %v3047_v1 = vld [vmem:[%s8198_s24 + $0x10] sm:$0xff] }
 0x5cc   : > { %3193 = vmatpush.msra.mxu1 %v2818_v25  ;;  %v2978_v9 = vmul.f32 %v2971_v24, %v9647_v18  ;;  %v2976_v20 = vmul.f32 %v2970_v58, %v9647_v18  ;;  %v3050_v24 = vld [vmem:[%s8198_s24 + $0x28] sm:$0xff]  ;;  %v3053_v58 = vld [vmem:[%s8198_s24 + $0x40] sm:$0xff]  ;;  %v16296_v18 = vld [vmem:[#allocation65_spill] sm:$0xff] }
 0x5cd   : > { %3107 = vmatpush.msra.mxu2 %v2815_v47  ;;  %3135 = vmatpush.msra.mxu3 %v10356_v38 }
 0x5ce   : > { %3194 = vmatpush.msra.mxu1 %v2816_v54 }
 0x5cf   : > { %v2790_v53 = vpop.permute.xlu1 %2789  ;;  %3136 = vmatpush.msra.mxu3 %v10339_v7  ;;  %v3020_v0 = vpop.permute.xlu0 %3019 }
 0x5d0   : > { %v2805_v44 = vsel %vm1398_vm2, %v2790_v53, %v2798_v6  ;;  %v2809_v2 = vsel %vm1398_vm2, %v2798_v6, %v2790_v53  ;;  %v3018_v33 = vpop.permute.xlu2 %3017 }
 0x5d1   : > { %3137 = vmatpush.msra.mxu3 %v10327_v8  ;;  %v2813_v59 = vmul.f32 %v2809_v2, %v16262_v48  ;;  %v2814_v55 = vmul.f32 %v2805_v44, %v16263_v43  ;;  %v16284_v44 = vld [vmem:[#allocation40_spill] sm:$0xff] }
 0x5d2   : > { %3138 = vmatmul.f32.vlgmr.msra.gmra.mxu3 %v10757_v35  ;;  %v2948_v2 = vmul.f32 %v2940_v28, %v16284_v44 }
 0x5d3   : > { %3108 = vmatpush.msra.mxu2 %v2813_v59  ;;  %3195 = vmatpush.msra.mxu1 %v2814_v55  ;;  %v2938_v59 = vsel %vm1685_vm4, %v10587_v3, %v10608_v63  ;;  %v2946_v55 = vmul.f32 %v2939_v52, %v16284_v44 }
 0x5d4   : > { %3109 = vmatmul.f32.vlgmr.msra.gmra.mxu2 %v3045_v11  ;;  %3196 = vmatmul.f32.vlgmr.msra.gmra.mxu1 %v3045_v11  ;;  %v2937_v11 = vsel %vm1685_vm4, %v10583_v46, %v10710_v56 }
 0x5d5   : > { %3209 = vmatpush.msrb.mxu2 %v3012_v50  ;;  %v2942_v56 = vmul.f32 %v2937_v11, %v16284_v44 }
 0x5d7   : > { %3210 = vmatpush.msrb.mxu2 %v3010_v14  ;;  %v3016_v51 = vpop.permute.xlu1 %3015  ;;  %v3026_v34 = vpop.permute.xlu0 %3025 }
 0x5d8   : > { %v3031_v41 = vsel %vm1901_vm8, %v3018_v33, %v3026_v34  ;;  %v3035_v25 = vsel %vm1901_vm8, %v3026_v34, %v3018_v33  ;;  %v3024_v6 = vpop.permute.xlu2 %3023  ;;  %v16285_v33 = vld [vmem:[#allocation36_spill] sm:$0xff] }
 0x5d9   : > { %3211 = vmatpush.msrb.mxu2 %v3008_v4  ;;  %v3030_v53 = vsel %vm1901_vm8, %v3016_v51, %v3024_v6  ;;  %v3034_v29 = vsel %vm1901_vm8, %v3024_v6, %v3016_v51  ;;  %v3041_v16 = vmul.f32 %v3031_v41, %v9331_v13  ;;  %v3042_v61 = vmul.f32 %v3035_v25, %v9333_v23  ;;  %v3054_v4 = vld [vmem:[%s8198_s24 + $0x48] sm:$0xff] }
 0x5da   : > { %3141 = vmatmul.f32.gmra.mxu3 %v10788_v21  ;;  %v3039_v3 = vmul.f32 %v3030_v53, %v9331_v13  ;;  %v3040_v63 = vmul.f32 %v3034_v29, %v9333_v23 }
 0x5db   : > { %3212 = vmatpush.msrb.mxu2 %v3006_v31  ;;  %v16286_v31 = vld [vmem:[#allocation47_spill] sm:$0xff] }
 0x5dc   : > { %3112 = vmatmul.f32.gmra.mxu2 %v3048_v60  ;;  %3199 = vmatmul.f32.gmra.mxu1 %v3048_v60  ;;  %v16287_v60 = vld [vmem:[#allocation49_spill] sm:$0xff] }
 0x5dd   : > { %3213 = vmatpush.msrb.mxu2 %v2980_v62  ;;  %v16288_v62 = vld [vmem:[#allocation56_spill] sm:$0xff] }
 0x5df   : > { %3214 = vmatpush.msrb.mxu2 %v2978_v9  ;;  %v3028_v39 = vpop.permute.xlu1 %3027  ;;  %v3014_v36 = vpop.permute.xlu0 %3013 }
 0x5e0   : > { %v3032_v22 = vsel %vm1901_vm8, %v3020_v0, %v3028_v39  ;;  %v3036_v49 = vsel %vm1901_vm8, %v3028_v39, %v3020_v0  ;;  %v2944_v0 = vmul.f32 %v2938_v59, %v16284_v44  ;;  %v10883_v34 = vpop.permute.xlu2 %3078 }
 0x5e1   : > { %v3043_v47 = vmul.f32 %v3032_v22, %v9331_v13  ;;  %v3044_v54 = vmul.f32 %v3036_v49, %v9333_v23  ;;  %3215 = vmatpush.msrb.mxu2 %v2976_v20 }
 0x5e2   : > { %3144 = vmatmul.f32.gmra.mxu3 %v10813_v19 }
 0x5e3   : > { %3216 = vmatpush.msrb.mxu2 %v2974_v26  ;;  %3163 = vmatpush.msra.mxu0 %v3043_v47 }
 0x5e4   : > { %3250 = vmatpush.msrb.mxu3 %v3044_v54  ;;  %3115 = vmatmul.f32.gmra.mxu2 %v3051_v32 }
 0x5e5   : > { %3202 = vmatmul.f32.gmra.mxu1 %v3051_v32  ;;  %3217 = vmatpush.msrb.mxu2 %v2948_v2 }
 0x5e6   : > { %3164 = vmatpush.msra.mxu0 %v3041_v16  ;;  %3251 = vmatpush.msrb.mxu3 %v3042_v61 }
 0x5e7   : > { %3218 = vmatpush.msrb.mxu2 %v2946_v55  ;;  %v3022_v50 = vpop.permute.xlu1 %3021  ;;  %v3074_v53 = vpop.permute.xlu0 %3073 }
 0x5e8   : > { %v3029_v14 = vsel %vm1901_vm8, %v3014_v36, %v3022_v50  ;;  %v3033_v46 = vsel %vm1901_vm8, %v3022_v50, %v3014_v36  ;;  %3165 = vmatpush.msra.mxu0 %v3039_v3  ;;  %3252 = vmatpush.msrb.mxu3 %v3040_v63  ;;  %v3064_v9 = vpop.permute.xlu2 %3063 }
 0x5e9   : > { %3219 = vmatpush.msrb.mxu2 %v2944_v0  ;;  %v3037_v27 = vmul.f32 %v3029_v14, %v9331_v13  ;;  %v3038_v51 = vmul.f32 %v3033_v46, %v9333_v23 }
 0x5ea   : > { %3147 = vmatmul.f32.gmra.mxu3 %v3055_v42 }
 0x5eb   : > { %3220 = vmatpush.msrb.mxu2 %v2942_v56  ;;  %3166 = vmatpush.msra.mxu0 %v3037_v27 }
 0x5ec   : > { %3253 = vmatpush.msrb.mxu3 %v3038_v51  ;;  %3118 = vmatmul.f32.gmra.mxu2 %v3054_v4 }
 0x5ed   : > { %7925 = vmatmul.msk.f32.vlgmr.msra.gmra.mxu0 %vm1096_vm0, %v3047_v1  ;;  %3205 = vmatmul.f32.gmra.mxu1 %v3054_v4 }
 0x5ee   : > { %3221 = vmatpush.msrb.mxu2 %v16285_v33 }
 0x5ef   : > { %v3069_v26 = vpop.permute.xlu1 %3068 }
 0x5f0   : > { %3222 = vmatpush.msrb.mxu2 %v16286_v31 }
 0x5f2   : > { %3223 = vmatpush.msrb.mxu2 %v16287_v60  ;;  %7929 = vmatmul.msk.f32.vlgmr.msrb.gmra.mxu3 %vm1096_vm0, %v3047_v1 }
 0x5f4   : > { %3224 = vmatpush.msrb.mxu2 %v16288_v62  ;;  %v16295_v62 = vld [vmem:[#allocation71_spill] sm:$0xff] }
 0x5f5   : > { %7926 = vmatmul.msk.f32.gmra.mxu0 %vm1096_vm0, %v3050_v24  ;;  %3225 = vmatmul.f32.vlgmr.msrb.gmra.mxu2 %v10757_v35 }
 0x5fa   : > { %7930 = vmatmul.msk.f32.gmra.mxu3 %vm1096_vm0, %v3050_v24 }
 0x5fd   : > { %7927 = vmatmul.msk.f32.gmra.mxu0 %vm1096_vm0, %v3053_v58  ;;  %3228 = vmatmul.f32.gmra.mxu2 %v10788_v21 }
 0x602   : > { %7931 = vmatmul.msk.f32.gmra.mxu3 %vm1096_vm0, %v3053_v58 }
 0x605   : > { %7928 = vmatmul.msk.f32.gmra.mxu0 %vm1096_vm0, %v3056_v40  ;;  %3231 = vmatmul.f32.gmra.mxu2 %v10813_v19 }
 0x60a   : > { %7932 = vmatmul.msk.f32.gmra.mxu3 %vm1096_vm0, %v3056_v40 }
 0x60d   : > { %3234 = vmatmul.f32.gmra.mxu2 %v3055_v42 }
 0x651   : > { %v3197_v14 = vpop.f32.mrf.mxu1 }
 0x652   : > { %v3198_v56 = vadd.f32 %v3197_v14, %v3064_v9 }
 0x655   : > { %v3139_v39 = vpop.f32.mrf.mxu3 }
 0x657   : > { %v3110_v35 = vpop.f32.mrf.mxu2 }
 0x658   : > { %v3111_v20 = vadd.f32 %v3110_v35, %v3064_v9 }
 0x659   : > { %v3200_v4 = vpop.f32.mrf.mxu1 }
 0x65a   : > { %v3140_v28 = vadd.f32 %v3139_v39, %v3111_v20  ;;  %v3201_v58 = vadd.f32 %v3200_v4, %v3069_v26 }
 0x65d   : > { %v3142_v47 = vpop.f32.mrf.mxu3 }
 0x65f   : > { %v3113_v22 = vpop.f32.mrf.mxu2 }
 0x660   : > { %v3114_v41 = vadd.f32 %v3113_v22, %v3069_v26 }
 0x662   : > { %v3143_v19 = vadd.f32 %v3142_v47, %v3114_v41 }
 0x665   : > { %v3145_v2 = vpop.f32.mrf.mxu3 }
 0x667   : > { %v3116_v6 = vpop.f32.mrf.mxu2 }
 0x668   : > { %v3117_v29 = vadd.f32 %v3116_v6, %v3074_v53 }
 0x66a   : > { %v3168_v49 = vpop.f32.mrf.mxu0  ;;  %v3146_v16 = vadd.f32 %v3145_v2, %v3117_v29 }
 0x66b   : > { %v3169_v21 = vadd.f32 %v3168_v49, %v3140_v28  ;;  %v3203_v28 = vpop.f32.mrf.mxu1 }
 0x66c   : > { %v3204_v49 = vadd.f32 %v3203_v28, %v3074_v53 }
 0x66d   : > { %v10885_v25 = vmax.f32 %v3169_v21, 0.0  ;;  %v3148_v63 = vpop.f32.mrf.mxu3 }
 0x66f   : > { %3307 = vrot.lane.b32.xlu0 %v10885_v25, %s15995_s22  ;;  %3339 = vrot.lane.b32.xlu2 %v10885_v25, %s16018_s26  ;;  %v3119_v11 = vpop.f32.mrf.mxu2 }
 0x670   : > { %3371 = vrot.lane.b32.xlu1 %v10885_v25, %s16001_s23  ;;  %v3120_v3 = vadd.f32 %v3119_v11, %v10883_v34 }
 0x672   : > { %v3171_v54 = vpop.f32.mrf.mxu0  ;;  %v3149_v50 = vadd.f32 %v3148_v63, %v3120_v3 }
 0x673   : > { %v3172_v32 = vadd.f32 %v3171_v54, %v3143_v19  ;;  %v3206_v19 = vpop.f32.mrf.mxu1 }
 0x675   : > { %v10893_v52 = vmax.f32 %v3172_v32, 0.0  ;;  %v3255_v51 = vpop.f32.mrf.mxu3  ;;  %v3207_v32 = vadd.f32 %v3206_v19, %v10883_v34 }
 0x677   : > { %3373 = vrot.lane.b32.xlu0 %v10893_v52, %s16001_s23  ;;  %3435 = vrot.lane.b32.xlu2 %v10885_v25, %s15999_s11 }
 0x678   : > { %3467 = vrot.lane.b32.xlu1 %v10885_v25, %s15997_s2  ;;  %v3226_v46 = vpop.f32.mrf.mxu2 }
 0x679   : > { %v3227_v27 = vadd.f32 %v3226_v46, %v3198_v56 }
 0x67a   : > { %v3174_v59 = vpop.f32.mrf.mxu0 }
 0x67b   : > { %v3175_v61 = vadd.f32 %v3174_v59, %v3146_v16  ;;  %v3256_v1 = vadd.f32 %v3255_v51, %v3227_v27 }
 0x67d   : > { %v10907_v55 = vmax.f32 %v3175_v61, 0.0  ;;  %v10936_v40 = vmax.f32 %v3256_v1, 0.0  ;;  %v3258_v39 = vpop.f32.mrf.mxu3 }
 0x67f   : > { %3469 = vrot.lane.b32.xlu0 %v10893_v52, %s15997_s2  ;;  %3309 = vrot.lane.b32.xlu2 %v10893_v52, %s15995_s22  ;;  %16289 = vst [vmem:[#allocation42_spill] sm:$0xff] %v10936_v40 }
 0x680   : > { %3341 = vrot.lane.b32.xlu1 %v10893_v52, %s16018_s26  ;;  %v3229_v24 = vpop.f32.mrf.mxu2 }
 0x681   : > { %v3230_v35 = vadd.f32 %v3229_v24, %v3201_v58 }
 0x682   : > { %v3177_v36 = vpop.f32.mrf.mxu0 }
 0x683   : > { %v3178_v0 = vadd.f32 %v3177_v36, %v3149_v50  ;;  %v3259_v9 = vadd.f32 %v3258_v39, %v3230_v35 }
 0x685   : > { %v10922_v42 = vmax.f32 %v3178_v0, 0.0  ;;  %v10944_v20 = vmax.f32 %v3259_v9, 0.0  ;;  %v3261_v26 = vpop.f32.mrf.mxu3 }
 0x687   : > { %3343 = vrot.lane.b32.xlu0 %v10907_v55, %s16018_s26  ;;  %3375 = vrot.lane.b32.xlu2 %v10907_v55, %s16001_s23  ;;  %16290 = vst [vmem:[#allocation41_spill] sm:$0xff] %v10944_v20 }
 0x688   : > { %3437 = vrot.lane.b32.xlu1 %v10893_v52, %s15999_s11  ;;  %v3232_v22 = vpop.f32.mrf.mxu2 }
 0x689   : > { %v3233_v21 = vadd.f32 %v3232_v22, %v3204_v49  ;;  %v3545_v49 = vld [vmem:[%s8213_s12 + $0x10] sm:$0xff] }
 0x68b   : > { %v3262_v41 = vadd.f32 %v3261_v26, %v3233_v21  ;;  %v3546_v21 = vld [vmem:[%s8213_s12 + $0x18] sm:$0xff] }
 0x68d   : > { %v10958_v47 = vmax.f32 %v3262_v41, 0.0  ;;  %v3264_v53 = vpop.f32.mrf.mxu3 }
 0x68f   : > { %3439 = vrot.lane.b32.xlu0 %v10907_v55, %s15999_s11  ;;  %3471 = vrot.lane.b32.xlu2 %v10907_v55, %s15997_s2  ;;  %16291 = vst [vmem:[#allocation51_spill] sm:$0xff] %v10958_v47 }
 0x690   : > { %3311 = vrot.lane.b32.xlu1 %v10907_v55, %s15995_s22  ;;  %v3235_v54 = vpop.f32.mrf.mxu2 }
 0x691   : > { %v3236_v6 = vadd.f32 %v3235_v54, %v3207_v32  ;;  %v3544_v54 = vld [vmem:[%s8213_s12 + $0x8] sm:$0xff]  ;;  %v3543_v32 = vld [vmem:[%s8213_s12] sm:$0xff] }
 0x693   : > { %v3265_v2 = vadd.f32 %v3264_v53, %v3236_v6 }
 0x695   : > { %v10975_v59 = vmax.f32 %v3265_v2, 0.0 }
 0x697   : > { %3377 = vrot.lane.b32.xlu0 %v10922_v42, %s16001_s23  ;;  %3345 = vrot.lane.b32.xlu2 %v10922_v42, %s16018_s26  ;;  %16292 = vst [vmem:[#allocation39_spill] sm:$0xff] %v10975_v59 }
 0x698   : > { %3407 = vrot.lane.b32.xlu1 %v10907_v55, %s15979_s1 }
 0x69f   : > { %3313 = vrot.lane.b32.xlu0 %v10922_v42, %s15995_s22  ;;  %3441 = vrot.lane.b32.xlu2 %v10922_v42, %s15999_s11 }
 0x6a0   : > { %3473 = vrot.lane.b32.xlu1 %v10922_v42, %s15997_s2 }
 0x6a7   : > { %3409 = vrot.lane.b32.xlu0 %v10922_v42, %s15979_s1  ;;  %3379 = vrot.lane.b32.xlu2 %v10936_v40, %s16001_s23 }
 0x6a8   : > { %3315 = vrot.lane.b32.xlu1 %v10936_v40, %s15995_s22 }
 0x6af   : > { %3347 = vrot.lane.b32.xlu0 %v10936_v40, %s16018_s26  ;;  %3475 = vrot.lane.b32.xlu2 %v10936_v40, %s15997_s2 }
 0x6b0   : > { %3381 = vrot.lane.b32.xlu1 %v10944_v20, %s16001_s23 }
 0x6b7   : > { %3443 = vrot.lane.b32.xlu0 %v10936_v40, %s15999_s11  ;;  %3349 = vrot.lane.b32.xlu2 %v10944_v20, %s16018_s26 }
 0x6b8   : > { %3477 = vrot.lane.b32.xlu1 %v10944_v20, %s15997_s2 }
 0x6bf   : > { %3317 = vrot.lane.b32.xlu0 %v10944_v20, %s15995_s22  ;;  %3445 = vrot.lane.b32.xlu2 %v10944_v20, %s15999_s11 }
 0x6c0   : > { %3351 = vrot.lane.b32.xlu1 %v10958_v47, %s16018_s26 }
 0x6c7   : > { %3383 = vrot.lane.b32.xlu0 %v10958_v47, %s16001_s23  ;;  %3319 = vrot.lane.b32.xlu2 %v10958_v47, %s15995_s22 }
 0x6c8   : > { %3447 = vrot.lane.b32.xlu1 %v10958_v47, %s15999_s11 }
 0x6c9   : > { %v10973_v29 = vpop.permute.xlu2 %3339 }
 0x6cf   : > { %3479 = vrot.lane.b32.xlu0 %v10958_v47, %s15997_s2  ;;  %3415 = vrot.lane.b32.xlu2 %v10958_v47, %s15979_s1 }
 0x6d0   : > { %3385 = vrot.lane.b32.xlu1 %v10975_v59, %s16001_s23 }
 0x6d1   : > { %v10983_v34 = vpop.permute.xlu2 %3435 }
 0x6d7   : > { %3413 = vrot.lane.b32.xlu0 %v10944_v20, %s15979_s1  ;;  %3481 = vrot.lane.b32.xlu2 %v10975_v59, %s15997_s2 }
 0x6d8   : > { %3281 = vrot.lane.b32.xlu1 %v10922_v42, %s15993_s18 }
 0x6d9   : > { %v10991_v16 = vpop.permute.xlu2 %3309 }
 0x6df   : > { %3353 = vrot.lane.b32.xlu0 %v10975_v59, %s16018_s26  ;;  %3405 = vrot.lane.b32.xlu2 %v10893_v52, %s15979_s1 }
 0x6e0   : > { %3411 = vrot.lane.b32.xlu1 %v10936_v40, %s15979_s1 }
 0x6e1   : > { %v10999_v61 = vpop.permute.xlu0 %3307  ;;  %v11001_v11 = vpop.permute.xlu2 %3375 }
 0x6e2   : > { %v11003_v3 = vpop.permute.xlu1 %3371 }
 0x6e7   : > { %3449 = vrot.lane.b32.xlu0 %v10975_v59, %s15999_s11  ;;  %3279 = vrot.lane.b32.xlu2 %v10907_v55, %s15993_s18 }
 0x6e8   : > { %3321 = vrot.lane.b32.xlu1 %v10975_v59, %s15995_s22 }
 0x6e9   : > { %v11011_v63 = vpop.permute.xlu0 %3373  ;;  %v11013_v36 = vpop.permute.xlu2 %3471 }
 0x6ea   : > { %v11015_v50 = vpop.permute.xlu1 %3467 }
 0x6ef   : > { %3403 = vrot.lane.b32.xlu0 %v10885_v25, %s15979_s1  ;;  %3289 = vrot.lane.b32.xlu2 %v10975_v59, %s15993_s18 }
 0x6f0   : > { %3417 = vrot.lane.b32.xlu1 %v10975_v59, %s15979_s1 }
 0x6f1   : > { %v11023_v0 = vpop.permute.xlu0 %3469  ;;  %v11025_v14 = vpop.permute.xlu2 %3345 }
 0x6f2   : > { %16293 = vst [vmem:[#allocation45_spill] sm:$0xff] %v11023_v0  ;;  %v11027_v46 = vpop.permute.xlu1 %3341 }
 0x6f7   : > { %3287 = vrot.lane.b32.xlu0 %v10958_v47, %s15993_s18  ;;  %3285 = vrot.lane.b32.xlu2 %v10944_v20, %s15993_s18 }
 0x6f8   : > { %3277 = vrot.lane.b32.xlu1 %v10893_v52, %s15993_s18 }
 0x6f9   : > { %v11035_v56 = vpop.permute.xlu0 %3343  ;;  %v11037_v27 = vpop.permute.xlu2 %3441 }
 0x6fa   : > { %v11039_v51 = vpop.permute.xlu1 %3437 }
 0x6ff   : > { %3275 = vrot.lane.b32.xlu0 %v10885_v25, %s15993_s18  ;;  %3505 = vrot.lane.b32.xlu2 %v10922_v42, %s15991_s10 }
 0x700   : > { %3283 = vrot.lane.b32.xlu1 %v10936_v40, %s15993_s18 }
 0x701   : > { %v11047_v4 = vpop.permute.xlu0 %3439  ;;  %v3380_v1 = vpop.permute.xlu2 %3379 }
 0x702   : > { %v11049_v24 = vpop.permute.xlu1 %3311 }
 0x707   : > { %3501 = vrot.lane.b32.xlu0 %v10893_v52, %s15991_s10  ;;  %3511 = vrot.lane.b32.xlu2 %v10958_v47, %s15991_s10 }
 0x708   : > { %3503 = vrot.lane.b32.xlu1 %v10907_v55, %s15991_s10 }
 0x709   : > { %v3378_v58 = vpop.permute.xlu0 %3377  ;;  %v11057_v35 = vpop.permute.xlu2 %3475 }
 0x70a   : > { %v11059_v39 = vpop.permute.xlu1 %3407  ;;  %v3483_v13 = vsel %vm1829_vm5, %v11015_v50, %v11057_v35 }
 0x70f   : > { %3513 = vrot.lane.b32.xlu0 %v10975_v59, %s15991_s10  ;;  %3499 = vrot.lane.b32.xlu2 %v10885_v25, %s15991_s10 }
 0x710   : > { %3509 = vrot.lane.b32.xlu1 %v10944_v20, %s15991_s10 }
 0x711   : > { %v11067_v9 = vpop.permute.xlu0 %3313  ;;  %v11069_v28 = vpop.permute.xlu2 %3349 }
 0x712   : > { %v11071_v22 = vpop.permute.xlu1 %3473 }
 0x717   : > { %3507 = vrot.lane.b32.xlu0 %v10936_v40, %s15991_s10  ;;  %3559 = vperm.xlu2 %8072, %v3545_v49  }
 0x718   : > { %3564 = vperm.xlu1 %8071, %v3546_v21  }
 0x719   : > { %v11077_v26 = vpop.permute.xlu0 %3409  ;;  %v11079_v41 = vpop.permute.xlu2 %3445 }
 0x71a   : > { %v11081_v19 = vpop.permute.xlu1 %3315 }
 0x71f   : > { %3554 = vperm.xlu0 %8070, %v3544_v54  }
 0x720   : > { %3549 = vperm.xlu1 %8071, %v3543_v32  }
 0x721   : > { %v11085_v6 = vpop.permute.xlu0 %3347  ;;  %v11087_v53 = vpop.permute.xlu2 %3319 }
 0x722   : > { %v3382_v2 = vpop.permute.xlu1 %3381 }
 0x729   : > { %v11089_v33 = vpop.permute.xlu0 %3443  ;;  %v11091_v31 = vpop.permute.xlu2 %3415 }
 0x72a   : > { %v11093_v49 = vpop.permute.xlu1 %3477 }
 0x72b   : > { %16294 = vst [vmem:[#allocation43_spill] sm:$0xff] %v11093_v49  ;;  %v3484_v40 = vsel %vm1829_vm5, %v11023_v0, %v11093_v49  ;;  %v16297_v0 = vld [vmem:[#allocation23_spill] sm:$0xff] }
 0x731   : > { %v11095_v21 = vpop.permute.xlu0 %3317  ;;  %v11097_v60 = vpop.permute.xlu2 %3481 }
 0x732   : > { %v3486_v54 = vsel %vm1829_vm5, %v11071_v22, %v11097_v60  ;;  %v3352_v32 = vpop.permute.xlu1 %3351 }
 0x733   : > { %v3497_v17 = vmul.f32 %v3486_v54, %v16295_v62 }
 0x735   : > { %3608 = vmatpush.msrb.mxu1 %v3497_v17 }
 0x739   : > { %v3384_v38 = vpop.permute.xlu0 %3383 }
 0x73a   : > { %v11104_v7 = vpop.permute.xlu1 %3447  ;;  %v3389_v20 = vsel %vm1613_vm3, %v11001_v11, %v3384_v38  ;;  %v3393_v47 = vsel %vm1613_vm3, %v3384_v38, %v11001_v11  ;;  %v3388_v38 = vsel %vm1613_vm3, %v11011_v63, %v3382_v2  ;;  %v3392_v11 = vsel %vm1613_vm3, %v3382_v2, %v11011_v63 }
 0x73b   : > { %v3491_v63 = vmul.f32 %v3483_v13, %v16295_v62  ;;  %v3357_v2 = vsel %vm1541_vm6, %v11035_v56, %v3352_v32 }
 0x741   : > { %v11106_v8 = vpop.permute.xlu0 %3479 }
 0x742   : > { %v3485_v54 = vsel %vm1829_vm5, %v11013_v36, %v11106_v8  ;;  %v3386_v17 = vpop.permute.xlu1 %3385 }
 0x743   : > { %v3390_v59 = vsel %vm1613_vm3, %v3378_v58, %v3386_v17  ;;  %v3394_v44 = vsel %vm1613_vm3, %v3386_v17, %v3378_v58  ;;  %v3495_v23 = vmul.f32 %v3485_v54, %v16295_v62  ;;  %v3493_v58 = vmul.f32 %v3484_v40, %v16295_v62 }
 0x744   : > { %v3401_v49 = vmul.f32 %v3394_v44, %v16296_v18  ;;  %v3402_v12 = vmul.f32 %v3390_v59, %v16297_v0  ;;  %v3399_v54 = vmul.f32 %v3393_v47, %v16296_v18  ;;  %v3400_v17 = vmul.f32 %v3389_v20, %v16297_v0  ;;  %v11153_v20 = vpop.permute.xlu2 %3405 }
 0x745   : > { %3609 = vmatpush.msrb.mxu1 %v3495_v23  ;;  %v3387_v44 = vsel %vm1613_vm3, %v11003_v3, %v3380_v1  ;;  %v3391_v59 = vsel %vm1613_vm3, %v3380_v1, %v11003_v3  ;;  %v3397_v23 = vmul.f32 %v3392_v11, %v16296_v18 }
 0x746   : > { %3579 = vmatpush.msrb.mxu0 %v3401_v49  ;;  %3666 = vmatpush.msra.mxu3 %v3402_v12  ;;  %v3398_v12 = vmul.f32 %v3388_v38, %v16297_v0  ;;  %v3395_v3 = vmul.f32 %v3391_v59, %v16296_v18  ;;  %v3396_v1 = vmul.f32 %v3387_v44, %v16297_v0 }
 0x747   : > { %3610 = vmatpush.msrb.mxu1 %v3493_v58  ;;  %v3361_v49 = vsel %vm1541_vm6, %v3352_v32, %v11035_v56  ;;  %v3356_v44 = vsel %vm1541_vm6, %v11027_v46, %v11069_v28  ;;  %v3360_v56 = vsel %vm1541_vm6, %v11069_v28, %v11027_v46  ;;  %v3368_v59 = vmul.f32 %v3357_v2, %v9437_v10 }
 0x748   : > { %3580 = vmatpush.msrb.mxu0 %v3399_v54  ;;  %3667 = vmatpush.msra.mxu3 %v3400_v17  ;;  %v3365_v46 = vmul.f32 %v3360_v56, %v16259_v30  ;;  %v3366_v28 = vmul.f32 %v3356_v44, %v9437_v10  ;;  %v3324_v44 = vsel %vm1469_vm1, %v10991_v16, %v11095_v21 }
 0x749   : > { %v11151_v40 = vpop.permute.xlu0 %3413  ;;  %3611 = vmatpush.msrb.mxu1 %v3491_v63  ;;  %v3355_v63 = vsel %vm1541_vm6, %v10973_v29, %v11085_v6 }
 0x74a   : > { %3581 = vmatpush.msrb.mxu0 %v3397_v23  ;;  %3668 = vmatpush.msra.mxu3 %v3398_v12  ;;  %v11155_v47 = vpop.permute.xlu1 %3281  ;;  %v3359_v23 = vsel %vm1541_vm6, %v11085_v6, %v10973_v29  ;;  %v3329_v29 = vsel %vm1469_vm1, %v11087_v53, %v11049_v24  ;;  %v3453_v6 = vsel %vm1757_vm9, %v11047_v4, %v11104_v7 }
 0x74b   : > { %v3463_v56 = vmul.f32 %v3453_v6, %v9408_v15 }
 0x74c   : > { %3582 = vmatpush.msrb.mxu0 %v3395_v3  ;;  %3669 = vmatpush.msra.mxu3 %v3396_v1  ;;  %v11183_v32 = vpop.permute.xlu2 %3279  ;;  %v3363_v3 = vmul.f32 %v3359_v23, %v16259_v30  ;;  %v3364_v1 = vmul.f32 %v3355_v63, %v9437_v10  ;;  %v3335_v63 = vmul.f32 %v3329_v29, %v16260_v57 }
 0x751   : > { %v3354_v13 = vpop.permute.xlu0 %3353 }
 0x752   : > { %v3358_v38 = vsel %vm1541_vm6, %v11025_v14, %v3354_v13  ;;  %v3362_v11 = vsel %vm1541_vm6, %v3354_v13, %v11025_v14  ;;  %v11171_v58 = vpop.permute.xlu1 %3411  ;;  %v3367_v14 = vmul.f32 %v3361_v49, %v16259_v30  ;;  %v3325_v13 = vsel %vm1469_vm1, %v11049_v24, %v11087_v53 }
 0x753   : > { %v3369_v54 = vmul.f32 %v3362_v11, %v16259_v30  ;;  %v3370_v17 = vmul.f32 %v3358_v38, %v9437_v10  ;;  %v3452_v53 = vsel %vm1757_vm9, %v11039_v51, %v11079_v41  ;;  %v3336_v23 = vmul.f32 %v3325_v13, %v16261_v5 }
 0x755   : > { %3583 = vmatpush.msrb.mxu0 %v3369_v54  ;;  %3670 = vmatpush.msra.mxu3 %v3370_v17 }
 0x757   : > { %3584 = vmatpush.msrb.mxu0 %v3367_v14  ;;  %3671 = vmatpush.msra.mxu3 %v3368_v59  ;;  %v3451_v14 = vsel %vm1757_vm9, %v10983_v34, %v11089_v33  ;;  %v3290_v59 = vpop.permute.xlu2 %3289 }
 0x758   : > { %v3459_v29 = vmul.f32 %v3451_v14, %v9408_v15 }
 0x759   : > { %v11197_v12 = vpop.permute.xlu0 %3449  ;;  %3585 = vmatpush.msrb.mxu0 %v3365_v46  ;;  %3672 = vmatpush.msra.mxu3 %v3366_v28  ;;  %v3461_v46 = vmul.f32 %v3452_v53, %v9408_v15 }
 0x75a   : > { %v3454_v2 = vsel %vm1757_vm9, %v11037_v27, %v11197_v12  ;;  %v3322_v49 = vpop.permute.xlu1 %3321 }
 0x75b   : > { %v3326_v38 = vsel %vm1469_vm1, %v11067_v9, %v3322_v49  ;;  %v3330_v11 = vsel %vm1469_vm1, %v3322_v49, %v11067_v9  ;;  %3586 = vmatpush.msrb.mxu0 %v3363_v3  ;;  %3673 = vmatpush.msra.mxu3 %v3364_v1  ;;  %v3465_v24 = vmul.f32 %v3454_v2, %v9408_v15 }
 0x75c   : > { %v3337_v54 = vmul.f32 %v3330_v11, %v16260_v57  ;;  %v3338_v17 = vmul.f32 %v3326_v38, %v16261_v5  ;;  %v3328_v9 = vsel %vm1469_vm1, %v11095_v21, %v10991_v16  ;;  %v3323_v16 = vsel %vm1469_vm1, %v10999_v61, %v11081_v19 }
 0x75d   : > { %3612 = vmatpush.msrb.mxu1 %v3465_v24  ;;  %v3327_v21 = vsel %vm1469_vm1, %v11081_v19, %v10999_v61  ;;  %v3333_v28 = vmul.f32 %v3328_v9, %v16260_v57  ;;  %v3334_v3 = vmul.f32 %v3324_v44, %v16261_v5  ;;  %v3298_v1 = vsel %vm1398_vm2, %v3290_v59, %v11155_v47 }
 0x75e   : > { %3587 = vmatpush.msrb.mxu0 %v3337_v54  ;;  %3674 = vmatpush.msra.mxu3 %v3338_v17  ;;  %v3294_v61 = vsel %vm1398_vm2, %v11155_v47, %v3290_v59  ;;  %v3331_v6 = vmul.f32 %v3327_v21, %v16260_v57  ;;  %v3332_v2 = vmul.f32 %v3323_v16, %v16261_v5 }
 0x75f   : > { %3613 = vmatpush.msrb.mxu1 %v3463_v56  ;;  %v3421_v49 = vsel %vm1685_vm4, %v11059_v39, %v11091_v31  ;;  %v3305_v47 = vmul.f32 %v3298_v1, %v16262_v48  ;;  %v3420_v24 = vsel %vm1685_vm4, %v11153_v20, %v11151_v40  ;;  %v3306_v53 = vmul.f32 %v3294_v61, %v16263_v43  ;;  %v3286_v56 = vpop.permute.xlu2 %3285  ;;  %v11309_v61 = vld [vmem:[%s16298_s15 + $0x8] sm:$0xff] }
 0x760   : > { %3588 = vmatpush.msrb.mxu0 %v3335_v63  ;;  %3675 = vmatpush.msra.mxu3 %v3336_v23  ;;  %v3431_v54 = vmul.f32 %v3421_v49, %v8925_v45  ;;  %v3429_v44 = vmul.f32 %v3420_v24, %v8925_v45  ;;  %v3531_v49 = vld [vmem:[%s16298_s15] sm:$0xff] }
 0x761   : > { %v11259_v13 = vpop.permute.xlu0 %3403  ;;  %3614 = vmatpush.msrb.mxu1 %v3461_v46 }
 0x762   : > { %3589 = vmatpush.msrb.mxu0 %v3333_v28  ;;  %3676 = vmatpush.msra.mxu3 %v3334_v3  ;;  %v11265_v19 = vpop.permute.xlu1 %3417  ;;  %v3419_v17 = vsel %vm1685_vm4, %v11259_v13, %v11171_v58 }
 0x763   : > { %v3422_v38 = vsel %vm1685_vm4, %v11077_v26, %v11265_v19  ;;  %3615 = vmatpush.msrb.mxu1 %v3459_v29  ;;  %v3427_v23 = vmul.f32 %v3419_v17, %v8925_v45 }
 0x764   : > { %3590 = vmatpush.msrb.mxu0 %v3331_v6  ;;  %3677 = vmatpush.msra.mxu3 %v3332_v2  ;;  %v3433_v11 = vmul.f32 %v3422_v38, %v8925_v45  ;;  %v3490_v6 = vsel %vm1829_vm5, %v11097_v60, %v11071_v22  ;;  %v3489_v38 = vsel %vm1829_vm5, %v11106_v8, %v11013_v36  ;;  %v16299_v22 = vld [vmem:[#allocation25_spill] sm:$0xff] }
 0x765   : > { %v3487_v8 = vsel %vm1829_vm5, %v11057_v35, %v11015_v50  ;;  %v3457_v50 = vsel %vm1757_vm9, %v11104_v7, %v11047_v4  ;;  %v16302_v35 = vld [vmem:[#allocation38_spill] sm:$0xff]  ;;  %v3455_v7 = vsel %vm1757_vm9, %v11089_v33, %v10983_v34  ;;  %v16303_v33 = vld [vmem:[#allocation52_spill] sm:$0xff] }
 0x766   : > { %3591 = vmatpush.msrb.mxu0 %v3305_v47  ;;  %3616 = vmatpush.msrb.mxu1 %v3433_v11  ;;  %v3498_v47 = vmul.f32 %v3490_v6, %v16299_v22  ;;  %v16301_v11 = vld [vmem:[#allocation43_spill] sm:$0xff]  ;;  %v3537_v6 = vld [vmem:[%s16298_s15 + $0x30] sm:$0xff] }
 0x767   : > { %3678 = vmatpush.msra.mxu3 %v3306_v53  ;;  %v3506_v60 = vpop.permute.xlu2 %3505  ;;  %v3496_v53 = vmul.f32 %v3489_v38, %v16299_v22 }
 0x768   : > { %3617 = vmatpush.msrb.mxu1 %v3431_v54 }
 0x769   : > { %v3288_v9 = vpop.permute.xlu0 %3287 }
 0x76a   : > { %v3293_v14 = vsel %vm1398_vm2, %v11183_v32, %v3288_v9  ;;  %v3297_v59 = vsel %vm1398_vm2, %v3288_v9, %v11183_v32  ;;  %3618 = vmatpush.msrb.mxu1 %v3429_v44  ;;  %v3278_v63 = vpop.permute.xlu1 %3277  ;;  %v11340_v44 = vld [vmem:[%s16298_s15 + $0x20] sm:$0xff]  ;;  %v3458_v9 = vsel %vm1757_vm9, %v11197_v12, %v11037_v27  ;;  %v3464_v12 = vmul.f32 %v3457_v50, %v16302_v35 }
 0x76b   : > { %v3292_v16 = vsel %vm1398_vm2, %v3278_v63, %v3286_v56  ;;  %v3296_v21 = vsel %vm1398_vm2, %v3286_v56, %v3278_v63  ;;  %v3303_v46 = vmul.f32 %v3297_v59, %v16262_v48  ;;  %v3304_v28 = vmul.f32 %v3293_v14, %v16263_v43  ;;  %v3534_v14 = vld [vmem:[%s16298_s15 + $0x18] sm:$0xff]  ;;  %v16309_v50 = vld [vmem:[#allocation42_spill] sm:$0xff] }
 0x76c   : > { %3619 = vmatpush.msrb.mxu1 %v3427_v23  ;;  %v3301_v32 = vmul.f32 %v3296_v21, %v16262_v48  ;;  %v3302_v3 = vmul.f32 %v3292_v16, %v16263_v43  ;;  %v3492_v56 = vmul.f32 %v3487_v8, %v16299_v22  ;;  %v3466_v59 = vmul.f32 %v3458_v9, %v16302_v35  ;;  %v16307_v9 = vld [vmem:[#allocation51_spill] sm:$0xff] }
 0x76d   : > { %3592 = vmatpush.msrb.mxu0 %v3303_v46  ;;  %3679 = vmatpush.msra.mxu3 %v3304_v28  ;;  %v3456_v63 = vsel %vm1757_vm9, %v11079_v41, %v11039_v51  ;;  %v3426_v21 = vsel %vm1685_vm4, %v11265_v19, %v11077_v26  ;;  %v16304_v28 = vld [vmem:[#allocation46_spill] sm:$0xff]  ;;  %v3425_v26 = vsel %vm1685_vm4, %v11091_v31, %v11059_v39 }
 0x76e   : > { %3620 = vmatpush.msrb.mxu1 %v10922_v42  ;;  %v3462_v16 = vmul.f32 %v3456_v63, %v16302_v35  ;;  %v3542_v63 = vld [vmem:[%s16298_s15 + $0x58] sm:$0xff] }
 0x76f   : > { %3593 = vmatpush.msrb.mxu0 %v3301_v32  ;;  %3680 = vmatpush.msra.mxu3 %v3302_v3  ;;  %v3512_v27 = vpop.permute.xlu2 %3511  ;;  %v3538_v3 = vld [vmem:[%s16298_s15 + $0x38] sm:$0xff] }
 0x770   : > { %3621 = vmatpush.msrb.mxu1 %v10907_v55 }
 0x771   : > { %v3276_v1 = vpop.permute.xlu0 %3275 }
 0x772   : > { %3622 = vmatpush.msrb.mxu1 %v10893_v52  ;;  %v3284_v29 = vpop.permute.xlu1 %3283 }
 0x773   : > { %v3291_v2 = vsel %vm1398_vm2, %v3276_v1, %v3284_v29  ;;  %v3295_v42 = vsel %vm1398_vm2, %v3284_v29, %v3276_v1  ;;  %v3460_v29 = vmul.f32 %v3455_v7, %v16302_v35 }
 0x774   : > { %3623 = vmatpush.msrb.mxu1 %v10885_v25  ;;  %v3299_v55 = vmul.f32 %v3295_v42, %v16262_v48  ;;  %v3300_v52 = vmul.f32 %v3291_v2, %v16263_v43  ;;  %v16300_v25 = vld [vmem:[#allocation45_spill] sm:$0xff]  ;;  %v16305_v42 = vld [vmem:[#allocation40_spill] sm:$0xff] }
 0x775   : > { %3624 = vmatmul.f32.vlgmr.msrb.gmra.mxu1 %v11309_v61  ;;  %v3488_v24 = vsel %vm1829_vm5, %v16301_v11, %v16300_v25  ;;  %v3432_v39 = vmul.f32 %v3425_v26, %v16305_v42  ;;  %v16312_v26 = vld [vmem:[#allocation55_spill] sm:$0xff] }
 0x776   : > { %3594 = vmatpush.msrb.mxu0 %v3299_v55  ;;  %3681 = vmatpush.msra.mxu3 %v3300_v52  ;;  %v3494_v17 = vmul.f32 %v3488_v24, %v16299_v22  ;;  %v3434_v55 = vmul.f32 %v3426_v21, %v16305_v42 }
 0x777   : > { %3595 = vmatmul.f32.vlgmr.msrb.gmra.mxu0 %v3531_v49  ;;  %3682 = vmatmul.f32.vlgmr.msra.gmra.mxu3 %v3531_v49  ;;  %v3424_v49 = vsel %vm1685_vm4, %v11151_v40, %v11153_v20 }
 0x778   : > { %3695 = vmatpush.msra.mxu0 %v3498_v47  ;;  %v3500_v47 = vpop.permute.xlu2 %3499  ;;  %v3430_v24 = vmul.f32 %v3424_v49, %v16305_v42 }
 0x779   : > { %v3502_v36 = vpop.permute.xlu0 %3501 }
 0x77a   : > { %3696 = vmatpush.msra.mxu0 %v3496_v53  ;;  %v3504_v54 = vpop.permute.xlu1 %3503  ;;  %v3533_v53 = vld [vmem:[%s16298_s15 + $0x10] sm:$0xff] }
 0x77b   : > { %v3517_v46 = vsel %vm1901_vm8, %v3504_v54, %v3512_v27  ;;  %v3521_v1 = vsel %vm1901_vm8, %v3512_v27, %v3504_v54  ;;  %v3541_v54 = vld [vmem:[%s16298_s15 + $0x50] sm:$0xff] }
 0x77c   : > { %3697 = vmatpush.msra.mxu0 %v3494_v17  ;;  %v3527_v52 = vmul.f32 %v3517_v46, %v16303_v33  ;;  %v3528_v31 = vmul.f32 %v3521_v1, %v16304_v28  ;;  %v16306_v17 = vld [vmem:[#allocation39_spill] sm:$0xff]  ;;  %v16310_v46 = vld [vmem:[#allocation26_spill] sm:$0xff] }
 0x77d   : > { %3627 = vmatmul.f32.gmra.mxu1 %v11340_v44 }
 0x77e   : > { %3698 = vmatpush.msra.mxu0 %v3492_v56  ;;  %v3536_v56 = vld [vmem:[%s16298_s15 + $0x28] sm:$0xff] }
 0x77f   : > { %3598 = vmatmul.f32.gmra.mxu0 %v3534_v14  ;;  %3685 = vmatmul.f32.gmra.mxu3 %v3534_v14  ;;  %v16308_v14 = vld [vmem:[#allocation41_spill] sm:$0xff] }
 0x780   : > { %3699 = vmatpush.msra.mxu0 %v3466_v59  ;;  %v3539_v59 = vld [vmem:[%s16298_s15 + $0x40] sm:$0xff] }
 0x781   : > { %v3514_v4 = vpop.permute.xlu0 %3513 }
 0x782   : > { %3700 = vmatpush.msra.mxu0 %v3464_v12  ;;  %v3518_v23 = vsel %vm1901_vm8, %v3506_v60, %v3514_v4  ;;  %v3522_v51 = vsel %vm1901_vm8, %v3514_v4, %v3506_v60  ;;  %v3510_v41 = vpop.permute.xlu1 %3509  ;;  %v3423_v60 = vsel %vm1685_vm4, %v11171_v58, %v11259_v13 }
 0x783   : > { %v3529_v34 = vmul.f32 %v3518_v23, %v16303_v33  ;;  %v3530_v32 = vmul.f32 %v3522_v51, %v16304_v28  ;;  %v3516_v19 = vsel %vm1901_vm8, %v3502_v36, %v3510_v41  ;;  %v3520_v2 = vsel %vm1901_vm8, %v3510_v41, %v3502_v36  ;;  %v3540_v36 = vld [vmem:[%s16298_s15 + $0x48] sm:$0xff] }
 0x784   : > { %3701 = vmatpush.msra.mxu0 %v3462_v16  ;;  %v3525_v38 = vmul.f32 %v3516_v19, %v16303_v33  ;;  %v3526_v20 = vmul.f32 %v3520_v2, %v16304_v28  ;;  %v3428_v8 = vmul.f32 %v3423_v60, %v16305_v42 }
 0x785   : > { %3649 = vmatpush.msra.mxu2 %v3529_v34  ;;  %3736 = vmatpush.msra.mxu1 %v3530_v32 }
 0x786   : > { %3702 = vmatpush.msra.mxu0 %v3460_v29  ;;  %3630 = vmatmul.f32.gmra.mxu1 %v3538_v3 }
 0x787   : > { %3601 = vmatmul.f32.gmra.mxu0 %v3537_v6  ;;  %3688 = vmatmul.f32.gmra.mxu3 %v3537_v6 }
 0x788   : > { %3703 = vmatpush.msra.mxu0 %v3434_v55  ;;  %3650 = vmatpush.msra.mxu2 %v3527_v52  ;;  %v3560_v52 = vpop.permute.xlu2 %3559 }
 0x789   : > { %3737 = vmatpush.msra.mxu1 %v3528_v31  ;;  %v3508_v40 = vpop.permute.xlu0 %3507 }
 0x78a   : > { %3704 = vmatpush.msra.mxu0 %v3432_v39  ;;  %v3515_v25 = vsel %vm1901_vm8, %v3500_v47, %v3508_v40  ;;  %v3519_v11 = vsel %vm1901_vm8, %v3508_v40, %v3500_v47  ;;  %3651 = vmatpush.msra.mxu2 %v3525_v38  ;;  %v11431_v27 = vpop.permute.xlu1 %3564  ;;  %v16314_v47 = vld [vmem:[#allocation61_spill] sm:$0xff] }
 0x78b   : > { %3738 = vmatpush.msra.mxu1 %v3526_v20  ;;  %v3523_v58 = vmul.f32 %v3515_v25, %v16303_v33  ;;  %v3524_v13 = vmul.f32 %v3519_v11, %v16304_v28 }
 0x78c   : > { %3705 = vmatpush.msra.mxu0 %v3430_v24 }
 0x78d   : > { %3652 = vmatpush.msra.mxu2 %v3523_v58  ;;  %3739 = vmatpush.msra.mxu1 %v3524_v13 }
 0x78e   : > { %3706 = vmatpush.msra.mxu0 %v3428_v8  ;;  %7933 = vmatmul.msk.f32.vlgmr.msra.gmra.mxu2 %vm1096_vm0, %v3533_v53  ;;  %v16316_v8 = vld [vmem:[#allocation57_spill] sm:$0xff] }
 0x78f   : > { %3604 = vmatmul.f32.gmra.mxu0 %v3540_v36  ;;  %3691 = vmatmul.f32.gmra.mxu3 %v3540_v36 }
 0x790   : > { %3707 = vmatpush.msra.mxu0 %v16306_v17  ;;  %3633 = vmatmul.f32.gmra.mxu1 %v3541_v54 }
 0x791   : > { %v3555_v16 = vpop.permute.xlu0 %3554 }
 0x792   : > { %3708 = vmatpush.msra.mxu0 %v16307_v9  ;;  %v3550_v12 = vpop.permute.xlu1 %3549 }
 0x794   : > { %3709 = vmatpush.msra.mxu0 %v16308_v14 }
 0x796   : > { %3710 = vmatpush.msra.mxu0 %v16309_v50  ;;  %7934 = vmatmul.msk.f32.gmra.mxu2 %vm1096_vm0, %v3536_v56 }
 0x797   : > { %3711 = vmatmul.f32.vlgmr.msra.gmra.mxu0 %v11309_v61 }
 0x798   : > { %7937 = vmatmul.msk.f32.vlgmr.msra.gmra.mxu1 %vm1096_vm0, %v3533_v53 }
 0x79e   : > { %7935 = vmatmul.msk.f32.gmra.mxu2 %vm1096_vm0, %v3539_v59 }
 0x79f   : > { %3714 = vmatmul.f32.gmra.mxu0 %v11340_v44 }
 0x7a0   : > { %7938 = vmatmul.msk.f32.gmra.mxu1 %vm1096_vm0, %v3536_v56 }
 0x7a6   : > { %7936 = vmatmul.msk.f32.gmra.mxu2 %vm1096_vm0, %v3542_v63 }
 0x7a7   : > { %3717 = vmatmul.f32.gmra.mxu0 %v3538_v3 }
 0x7a8   : > { %7939 = vmatmul.msk.f32.gmra.mxu1 %vm1096_vm0, %v3539_v59 }
 0x7af   : > { %3720 = vmatmul.f32.gmra.mxu0 %v3541_v54 }
 0x7b0   : > { %7940 = vmatmul.msk.f32.gmra.mxu1 %vm1096_vm0, %v3542_v63 }
 0x7f2   : > { %v3625_v7 = vpop.f32.mrf.mxu1 }
 0x7f4   : > { %v3596_v61 = vpop.f32.mrf.mxu0 }
 0x7f5   : > { %v3597_v4 = vadd.f32 %v3596_v61, %v3550_v12 }
 0x7f7   : > { %v3626_v23 = vadd.f32 %v3625_v7, %v3597_v4  ;;  %v16318_v7 = vld [vmem:[#allocation56_spill] sm:$0xff] }
 0x7fa   : > { %v3628_v32 = vpop.f32.mrf.mxu1  ;;  %v3683_v54 = vpop.f32.mrf.mxu3 }
 0x7fb   : > { %v3684_v56 = vadd.f32 %v3683_v54, %v3550_v12 }
 0x7fc   : > { %v3599_v51 = vpop.f32.mrf.mxu0 }
 0x7fd   : > { %v3600_v21 = vadd.f32 %v3599_v51, %v3555_v16 }
 0x7ff   : > { %v3629_v1 = vadd.f32 %v3628_v32, %v3600_v21 }
 0x802   : > { %v3686_v59 = vpop.f32.mrf.mxu3 }
 0x803   : > { %v3631_v31 = vpop.f32.mrf.mxu1  ;;  %v3687_v12 = vadd.f32 %v3686_v59, %v3555_v16  ;;  %v16320_v16 = vld [vmem:[#allocation49_spill] sm:$0xff] }
 0x804   : > { %v3602_v2 = vpop.f32.mrf.mxu0 }
 0x805   : > { %v3603_v49 = vadd.f32 %v3602_v2, %v3560_v52 }
 0x807   : > { %v3632_v38 = vadd.f32 %v3631_v31, %v3603_v49 }
 0x80c   : > { %v3605_v20 = vpop.f32.mrf.mxu0 }
 0x80d   : > { %v3606_v11 = vadd.f32 %v3605_v20, %v11431_v27  ;;  %v3634_v24 = vpop.f32.mrf.mxu1  ;;  %v16324_v20 = vld [vmem:[#allocation36_spill] sm:$0xff] }
 0x80f   : > { %v3635_v13 = vadd.f32 %v3634_v24, %v3606_v11 }
 0x811   : > { %v3654_v44 = vpop.f32.mrf.mxu2 }
 0x812   : > { %v3655_v41 = vadd.f32 %v3654_v44, %v3626_v23 }
 0x814   : > { %v3753_v34 = vadd.f32 %v3655_v41, %v16310_v46  ;;  %v3712_v17 = vpop.f32.mrf.mxu0  ;;  %v3689_v46 = vpop.f32.mrf.mxu3 }
 0x815   : > { %v3713_v14 = vadd.f32 %v3712_v17, %v3684_v56  ;;  %v3741_v50 = vpop.f32.mrf.mxu1 }
 0x816   : > { %v11434_v3 = vmax.f32 %v3753_v34, 0.0 }
 0x817   : > { %v3742_v63 = vadd.f32 %v3741_v50, %v3713_v14 }
 0x818   : > { %16311 = vst [vmem:[#allocation33_spill] sm:$0xff] %v11434_v3  ;;  %3801 = vrot.lane.b32.xlu2 %v11434_v3, %s15995_s22  ;;  %3833 = vrot.lane.b32.xlu1 %v11434_v3, %s16018_s26 }
 0x819   : > { %3865 = vrot.lane.b32.xlu0 %v11434_v3, %s16001_s23  ;;  %v3657_v29 = vpop.f32.mrf.mxu2  ;;  %v3754_v4 = vadd.f32 %v3742_v63, %v16318_v7 }
 0x81a   : > { %v3658_v6 = vadd.f32 %v3657_v29, %v3629_v1  ;;  %v3690_v1 = vadd.f32 %v3689_v46, %v3560_v52 }
 0x81b   : > { %v11489_v44 = vmax.f32 %v3754_v4, 0.0 }
 0x81c   : > { %v3755_v19 = vadd.f32 %v3658_v6, %v16312_v26  ;;  %v3715_v61 = vpop.f32.mrf.mxu0  ;;  %v3692_v49 = vpop.f32.mrf.mxu3 }
 0x81d   : > { %v3716_v23 = vadd.f32 %v3715_v61, %v3687_v12  ;;  %v3744_v51 = vpop.f32.mrf.mxu1  ;;  %16319 = vst [vmem:[#allocation69_spill] sm:$0xff] %v11489_v44 }
 0x81e   : > { %v11443_v55 = vmax.f32 %v3755_v19, 0.0  ;;  %v16322_v19 = vld [vmem:[#allocation47_spill] sm:$0xff] }
 0x81f   : > { %v3745_v41 = vadd.f32 %v3744_v51, %v3716_v23 }
 0x820   : > { %16313 = vst [vmem:[#allocation37_spill] sm:$0xff] %v11443_v55  ;;  %3867 = vrot.lane.b32.xlu2 %v11443_v55, %s16001_s23  ;;  %3929 = vrot.lane.b32.xlu1 %v11434_v3, %s15999_s11 }
 0x821   : > { %3961 = vrot.lane.b32.xlu0 %v11434_v3, %s15997_s2  ;;  %v3660_v39 = vpop.f32.mrf.mxu2  ;;  %v3756_v21 = vadd.f32 %v3745_v41, %v16320_v16 }
 0x822   : > { %v3661_v60 = vadd.f32 %v3660_v39, %v3632_v38  ;;  %v3693_v39 = vadd.f32 %v3692_v49, %v11431_v27 }
 0x823   : > { %v11498_v34 = vmax.f32 %v3756_v21, 0.0 }
 0x824   : > { %v3757_v40 = vadd.f32 %v3661_v60, %v16314_v47  ;;  %v3718_v32 = vpop.f32.mrf.mxu0 }
 0x825   : > { %16321 = vst [vmem:[#allocation73_spill] sm:$0xff] %v11498_v34  ;;  %v3719_v29 = vadd.f32 %v3718_v32, %v3690_v1  ;;  %v3747_v6 = vpop.f32.mrf.mxu1  ;;  %v4039_v32 = vld [vmem:[%s16326_s16 + $0x10] sm:$0xff]  ;;  %v4040_v1 = vld [vmem:[%s16326_s16 + $0x18] sm:$0xff] }
 0x826   : > { %v11458_v25 = vmax.f32 %v3757_v40, 0.0 }
 0x827   : > { %v3748_v26 = vadd.f32 %v3747_v6, %v3719_v29 }
 0x828   : > { %3963 = vrot.lane.b32.xlu2 %v11443_v55, %s15997_s2  ;;  %3803 = vrot.lane.b32.xlu1 %v11443_v55, %s15995_s22  ;;  %16315 = vst [vmem:[#allocation29_spill] sm:$0xff] %v11458_v25 }
 0x829   : > { %3835 = vrot.lane.b32.xlu0 %v11443_v55, %s16018_s26  ;;  %v3663_v58 = vpop.f32.mrf.mxu2  ;;  %v3758_v2 = vadd.f32 %v3748_v26, %v16322_v19  ;;  %v4038_v19 = vld [vmem:[%s16326_s16 + $0x8] sm:$0xff] }
 0x82a   : > { %v3664_v53 = vadd.f32 %v3663_v58, %v3635_v13 }
 0x82b   : > { %v11513_v31 = vmax.f32 %v3758_v2, 0.0  ;;  %v4037_v2 = vld [vmem:[%s16326_s16] sm:$0xff] }
 0x82c   : > { %v3759_v36 = vadd.f32 %v3664_v53, %v16316_v8  ;;  %v3721_v52 = vpop.f32.mrf.mxu0 }
 0x82d   : > { %16323 = vst [vmem:[#allocation72_spill] sm:$0xff] %v11513_v31  ;;  %v3722_v38 = vadd.f32 %v3721_v52, %v3693_v39  ;;  %v3750_v60 = vpop.f32.mrf.mxu1 }
 0x82e   : > { %v11474_v9 = vmax.f32 %v3759_v36, 0.0 }
 0x82f   : > { %v3751_v47 = vadd.f32 %v3750_v60, %v3722_v38 }
 0x830   : > { %3837 = vrot.lane.b32.xlu2 %v11458_v25, %s16018_s26  ;;  %3869 = vrot.lane.b32.xlu1 %v11458_v25, %s16001_s23  ;;  %16317 = vst [vmem:[#allocation31_spill] sm:$0xff] %v11474_v9 }
 0x831   : > { %3931 = vrot.lane.b32.xlu0 %v11443_v55, %s15999_s11  ;;  %v3760_v11 = vadd.f32 %v3751_v47, %v16324_v20 }
 0x833   : > { %v11531_v27 = vmax.f32 %v3760_v11, 0.0 }
 0x835   : > { %16325 = vst [vmem:[#allocation75_spill] sm:$0xff] %v11531_v27 }
 0x838   : > { %3933 = vrot.lane.b32.xlu2 %v11458_v25, %s15999_s11  ;;  %3965 = vrot.lane.b32.xlu1 %v11458_v25, %s15997_s2 }
 0x839   : > { %3805 = vrot.lane.b32.xlu0 %v11458_v25, %s15995_s22 }
 0x840   : > { %3871 = vrot.lane.b32.xlu2 %v11474_v9, %s16001_s23  ;;  %3839 = vrot.lane.b32.xlu1 %v11474_v9, %s16018_s26 }
 0x841   : > { %3901 = vrot.lane.b32.xlu0 %v11458_v25, %s15979_s1 }
 0x848   : > { %3807 = vrot.lane.b32.xlu2 %v11474_v9, %s15995_s22  ;;  %3935 = vrot.lane.b32.xlu1 %v11474_v9, %s15999_s11 }
 0x849   : > { %3967 = vrot.lane.b32.xlu0 %v11474_v9, %s15997_s2 }
 0x850   : > { %3903 = vrot.lane.b32.xlu2 %v11474_v9, %s15979_s1  ;;  %3873 = vrot.lane.b32.xlu1 %v11489_v44, %s16001_s23 }
 0x851   : > { %3809 = vrot.lane.b32.xlu0 %v11489_v44, %s15995_s22 }
 0x858   : > { %3841 = vrot.lane.b32.xlu2 %v11489_v44, %s16018_s26  ;;  %3969 = vrot.lane.b32.xlu1 %v11489_v44, %s15997_s2 }
 0x859   : > { %3875 = vrot.lane.b32.xlu0 %v11498_v34, %s16001_s23 }
 0x860   : > { %3937 = vrot.lane.b32.xlu2 %v11489_v44, %s15999_s11  ;;  %3843 = vrot.lane.b32.xlu1 %v11498_v34, %s16018_s26 }
 0x861   : > { %3971 = vrot.lane.b32.xlu0 %v11498_v34, %s15997_s2 }
 0x868   : > { %3811 = vrot.lane.b32.xlu2 %v11498_v34, %s15995_s22  ;;  %3939 = vrot.lane.b32.xlu1 %v11498_v34, %s15999_s11 }
 0x869   : > { %3845 = vrot.lane.b32.xlu0 %v11513_v31, %s16018_s26 }
 0x870   : > { %3877 = vrot.lane.b32.xlu2 %v11513_v31, %s16001_s23  ;;  %3813 = vrot.lane.b32.xlu1 %v11513_v31, %s15995_s22 }
 0x871   : > { %3941 = vrot.lane.b32.xlu0 %v11513_v31, %s15999_s11 }
 0x872   : > { %v11528_v40 = vpop.permute.xlu2 %3801 }
 0x878   : > { %3973 = vrot.lane.b32.xlu2 %v11513_v31, %s15997_s2  ;;  %3909 = vrot.lane.b32.xlu1 %v11513_v31, %s15979_s1 }
 0x879   : > { %3879 = vrot.lane.b32.xlu0 %v11531_v27, %s16001_s23 }
 0x87a   : > { %v11539_v24 = vpop.permute.xlu2 %3867 }
 0x880   : > { %3907 = vrot.lane.b32.xlu2 %v11498_v34, %s15979_s1  ;;  %3975 = vrot.lane.b32.xlu1 %v11531_v27, %s15997_s2 }
 0x881   : > { %3775 = vrot.lane.b32.xlu0 %v11474_v9, %s15993_s18 }
 0x882   : > { %v11547_v58 = vpop.permute.xlu2 %3963 }
 0x888   : > { %3847 = vrot.lane.b32.xlu2 %v11531_v27, %s16018_s26  ;;  %3899 = vrot.lane.b32.xlu1 %v11443_v55, %s15979_s1 }
 0x889   : > { %3905 = vrot.lane.b32.xlu0 %v11489_v44, %s15979_s1 }
 0x88a   : > { %v11555_v13 = vpop.permute.xlu2 %3837  ;;  %v11557_v53 = vpop.permute.xlu1 %3833 }
 0x88b   : > { %v11559_v8 = vpop.permute.xlu0 %3865 }
 0x890   : > { %3943 = vrot.lane.b32.xlu2 %v11531_v27, %s15999_s11  ;;  %3773 = vrot.lane.b32.xlu1 %v11458_v25, %s15993_s18 }
 0x891   : > { %3815 = vrot.lane.b32.xlu0 %v11531_v27, %s15995_s22 }
 0x892   : > { %v11567_v36 = vpop.permute.xlu2 %3933  ;;  %v11569_v54 = vpop.permute.xlu1 %3929 }
 0x893   : > { %v11571_v17 = vpop.permute.xlu0 %3961 }
 0x898   : > { %3897 = vrot.lane.b32.xlu2 %v11434_v3, %s15979_s1  ;;  %3783 = vrot.lane.b32.xlu1 %v11531_v27, %s15993_s18 }
 0x899   : > { %3911 = vrot.lane.b32.xlu0 %v11531_v27, %s15979_s1 }
 0x89a   : > { %v3872_v56 = vpop.permute.xlu2 %3871  ;;  %v11579_v14 = vpop.permute.xlu1 %3803 }
 0x89b   : > { %v11581_v50 = vpop.permute.xlu0 %3835 }
 0x8a0   : > { %3781 = vrot.lane.b32.xlu2 %v11513_v31, %s15993_s18  ;;  %3779 = vrot.lane.b32.xlu1 %v11498_v34, %s15993_s18 }
 0x8a1   : > { %3771 = vrot.lane.b32.xlu0 %v11443_v55, %s15993_s18 }
 0x8a2   : > { %v11589_v59 = vpop.permute.xlu2 %3807  ;;  %v3870_v63 = vpop.permute.xlu1 %3869 }
 0x8a3   : > { %v11591_v61 = vpop.permute.xlu0 %3931 }
 0x8a8   : > { %3769 = vrot.lane.b32.xlu2 %v11434_v3, %s15993_s18  ;;  %3999 = vrot.lane.b32.xlu1 %v11474_v9, %s15991_s10 }
 0x8a9   : > { %3777 = vrot.lane.b32.xlu0 %v11489_v44, %s15993_s18 }
 0x8aa   : > { %v11599_v12 = vpop.permute.xlu2 %3903  ;;  %v11601_v7 = vpop.permute.xlu1 %3965 }
 0x8ab   : > { %v11603_v4 = vpop.permute.xlu0 %3805 }
 0x8b0   : > { %3995 = vrot.lane.b32.xlu2 %v11443_v55, %s15991_s10  ;;  %4005 = vrot.lane.b32.xlu1 %v11513_v31, %s15991_s10 }
 0x8b1   : > { %3997 = vrot.lane.b32.xlu0 %v11458_v25, %s15991_s10 }
 0x8b2   : > { %v11611_v23 = vpop.permute.xlu2 %3841  ;;  %v3840_v51 = vpop.permute.xlu1 %3839 }
 0x8b3   : > { %v11613_v41 = vpop.permute.xlu0 %3901 }
 0x8b8   : > { %4007 = vrot.lane.b32.xlu2 %v11531_v27, %s15991_s10  ;;  %3993 = vrot.lane.b32.xlu1 %v11434_v3, %s15991_s10 }
 0x8b9   : > { %4003 = vrot.lane.b32.xlu0 %v11498_v34, %s15991_s10 }
 0x8ba   : > { %v11621_v16 = vpop.permute.xlu2 %3937  ;;  %v11623_v21 = vpop.permute.xlu1 %3935 }
 0x8bb   : > { %v11625_v46 = vpop.permute.xlu0 %3967 }
 0x8c0   : > { %4001 = vrot.lane.b32.xlu2 %v11489_v44, %s15991_s10  ;;  %4053 = vperm.xlu1 %8071, %v4039_v32  }
 0x8c1   : > { %4058 = vperm.xlu0 %8070, %v4040_v1  }
 0x8c2   : > { %v11631_v29 = vpop.permute.xlu2 %3811  ;;  %v3874_v6 = vpop.permute.xlu1 %3873 }
 0x8c3   : > { %v11633_v26 = vpop.permute.xlu0 %3809 }
 0x8c8   : > { %4048 = vperm.xlu2 %8072, %v4038_v19  }
 0x8c9   : > { %4043 = vperm.xlu0 %8070, %v4037_v2  }
 0x8ca   : > { %v3878_v49 = vpop.permute.xlu2 %3877  ;;  %v11637_v52 = vpop.permute.xlu1 %3969 }
 0x8cb   : > { %v3876_v39 = vpop.permute.xlu0 %3875  ;;  %v3883_v27 = vsel %vm1613_vm3, %v3870_v63, %v3878_v49  ;;  %v3887_v42 = vsel %vm1613_vm3, %v3878_v49, %v3870_v63  ;;  %v3885_v63 = vsel %vm1613_vm3, %v3874_v6, %v11559_v8 }
 0x8cc   : > { %v3882_v33 = vsel %vm1613_vm3, %v11539_v24, %v3876_v39  ;;  %v3886_v55 = vsel %vm1613_vm3, %v3876_v39, %v11539_v24 }
 0x8cd   : > { %v3892_v24 = vmul.f32 %v3882_v33, %v16297_v0 }
 0x8d2   : > { %v11639_v38 = vpop.permute.xlu2 %3973  ;;  %v3844_v60 = vpop.permute.xlu1 %3843 }
 0x8d3   : > { %v11641_v47 = vpop.permute.xlu0 %3971 }
 0x8da   : > { %v11643_v20 = vpop.permute.xlu2 %3907  ;;  %v11645_v11 = vpop.permute.xlu1 %3939 }
 0x8db   : > { %v3846_v32 = vpop.permute.xlu0 %3845 }
 0x8dc   : > { %v3855_v39 = vsel %vm1541_vm6, %v3846_v32, %v11555_v13 }
 0x8e2   : > { %v3848_v1 = vpop.permute.xlu2 %3847  ;;  %v11647_v44 = vpop.permute.xlu1 %3813 }
 0x8e3   : > { %v11649_v34 = vpop.permute.xlu0 %3941  ;;  %v3852_v49 = vsel %vm1541_vm6, %v3840_v51, %v3848_v1 }
 0x8ea   : > { %v11651_v19 = vpop.permute.xlu2 %3943  ;;  %v11653_v2 = vpop.permute.xlu1 %3909 }
 0x8eb   : > { %v3880_v31 = vpop.permute.xlu0 %3879 }
 0x8ec   : > { %v3884_v35 = vsel %vm1613_vm3, %v3872_v56, %v3880_v31  ;;  %v3888_v22 = vsel %vm1613_vm3, %v3880_v31, %v3872_v56  ;;  %v3893_v31 = vmul.f32 %v3887_v42, %v16296_v18  ;;  %v3891_v56 = vmul.f32 %v3886_v55, %v16296_v18 }
 0x8ed   : > { %v3895_v3 = vmul.f32 %v3888_v22, %v16296_v18  ;;  %v3896_v28 = vmul.f32 %v3884_v35, %v16297_v0  ;;  %v3894_v22 = vmul.f32 %v3883_v27, %v16297_v0  ;;  %v3881_v35 = vsel %vm1613_vm3, %v11559_v8, %v3874_v6 }
 0x8ee   : > { %v3889_v27 = vmul.f32 %v3885_v63, %v16296_v18  ;;  %v3979_v8 = vsel %vm1829_vm5, %v11601_v7, %v11639_v38  ;;  %v3851_v6 = vsel %vm1541_vm6, %v11555_v13, %v3846_v32  ;;  %v3978_v63 = vsel %vm1829_vm5, %v11547_v58, %v11641_v47 }
 0x8ef   : > { %4073 = vmatpush.msrb.mxu2 %v3895_v3  ;;  %4160 = vmatpush.msrb.mxu1 %v3896_v28  ;;  %v3856_v28 = vsel %vm1541_vm6, %v3848_v1, %v3840_v51  ;;  %v3890_v51 = vmul.f32 %v3881_v35, %v16297_v0  ;;  %v3850_v35 = vsel %vm1541_vm6, %v11581_v50, %v3844_v60 }
 0x8f0   : > { %v3854_v13 = vsel %vm1541_vm6, %v3844_v60, %v11581_v50  ;;  %v3989_v32 = vmul.f32 %v3979_v8, %v16295_v62  ;;  %v3853_v50 = vsel %vm1541_vm6, %v11611_v23, %v11557_v53  ;;  %v3987_v60 = vmul.f32 %v3978_v63, %v16295_v62 }
 0x8f1   : > { %4074 = vmatpush.msrb.mxu2 %v3893_v31  ;;  %4161 = vmatpush.msrb.mxu1 %v3894_v22  ;;  %v3863_v31 = vmul.f32 %v3856_v28, %v16259_v30  ;;  %v3864_v22 = vmul.f32 %v3852_v49, %v9437_v10  ;;  %v3862_v49 = vmul.f32 %v3851_v6, %v9437_v10 }
 0x8f2   : > { %v11685_v3 = vpop.permute.xlu2 %3897  ;;  %v11687_v42 = vpop.permute.xlu1 %3975  ;;  %v3849_v28 = vsel %vm1541_vm6, %v11557_v53, %v11611_v23  ;;  %v3859_v8 = vmul.f32 %v3854_v13, %v16259_v30  ;;  %v3947_v53 = vsel %vm1757_vm9, %v11567_v36, %v11649_v34  ;;  %v3945_v13 = vsel %vm1757_vm9, %v11569_v54, %v11621_v16 }
 0x8f3   : > { %v3980_v33 = vsel %vm1829_vm5, %v11625_v46, %v11687_v42  ;;  %4075 = vmatpush.msrb.mxu2 %v3891_v56  ;;  %4162 = vmatpush.msrb.mxu1 %v3892_v24  ;;  %v11698_v55 = vpop.permute.xlu0 %3775  ;;  %v3977_v56 = vsel %vm1829_vm5, %v11571_v17, %v11637_v52  ;;  %v3861_v24 = vmul.f32 %v3855_v39, %v16259_v30 }
 0x8f4   : > { %v3991_v1 = vmul.f32 %v3980_v33, %v16295_v62  ;;  %v3860_v33 = vmul.f32 %v3850_v35, %v9437_v10  ;;  %v3985_v6 = vmul.f32 %v3977_v56, %v16295_v62  ;;  %v3857_v39 = vmul.f32 %v3853_v50, %v16259_v30 }
 0x8f5   : > { %4076 = vmatpush.msrb.mxu2 %v3889_v27  ;;  %4163 = vmatpush.msrb.mxu1 %v3890_v51  ;;  %v3948_v27 = vsel %vm1757_vm9, %v11623_v21, %v11651_v19  ;;  %v3957_v35 = vmul.f32 %v3947_v53, %v9408_v15  ;;  %v3823_v50 = vsel %vm1469_vm1, %v11647_v44, %v11603_v4 }
 0x8f6   : > { %4102 = vmatpush.msrb.mxu3 %v3991_v1  ;;  %v3858_v1 = vmul.f32 %v3849_v28, %v9437_v10  ;;  %v3819_v28 = vsel %vm1469_vm1, %v11603_v4, %v11647_v44  ;;  %v3822_v44 = vsel %vm1469_vm1, %v11631_v29, %v11579_v14  ;;  %v3821_v53 = vsel %vm1469_vm1, %v11633_v26, %v11528_v40 }
 0x8f7   : > { %4077 = vmatpush.msrb.mxu2 %v3863_v31  ;;  %4164 = vmatpush.msrb.mxu1 %v3864_v22  ;;  %v3959_v31 = vmul.f32 %v3948_v27, %v9408_v15  ;;  %v3946_v22 = vsel %vm1757_vm9, %v11591_v61, %v11645_v11 }
 0x8f8   : > { %4103 = vmatpush.msrb.mxu3 %v3989_v32  ;;  %v3955_v32 = vmul.f32 %v3946_v22, %v9408_v15  ;;  %v3825_v22 = vmul.f32 %v3821_v53, %v16260_v57 }
 0x8f9   : > { %4078 = vmatpush.msrb.mxu2 %v3861_v24  ;;  %4165 = vmatpush.msrb.mxu1 %v3862_v49  ;;  %v3953_v24 = vmul.f32 %v3945_v13, %v9408_v15 }
 0x8fa   : > { %v11742_v51 = vpop.permute.xlu1 %3899  ;;  %4104 = vmatpush.msrb.mxu3 %v3987_v60  ;;  %v3782_v63 = vpop.permute.xlu2 %3781 }
 0x8fb   : > { %4079 = vmatpush.msrb.mxu2 %v3859_v8  ;;  %4166 = vmatpush.msrb.mxu1 %v3860_v33  ;;  %v11749_v23 = vpop.permute.xlu0 %3905 }
 0x8fc   : > { %4105 = vmatpush.msrb.mxu3 %v3985_v6  ;;  %v3818_v6 = vsel %vm1469_vm1, %v11579_v14, %v11631_v29  ;;  %v3827_v14 = vmul.f32 %v3822_v44, %v16260_v57 }
 0x8fd   : > { %4080 = vmatpush.msrb.mxu2 %v3857_v39  ;;  %4167 = vmatpush.msrb.mxu1 %v3858_v1  ;;  %v3829_v39 = vmul.f32 %v3823_v50, %v16260_v57  ;;  %v3830_v1 = vmul.f32 %v3819_v28, %v16261_v5  ;;  %v3828_v29 = vmul.f32 %v3818_v6, %v16261_v5 }
 0x8fe   : > { %4106 = vmatpush.msrb.mxu3 %v3959_v31 }
 0x900   : > { %4107 = vmatpush.msrb.mxu3 %v3957_v35 }
 0x902   : > { %v3774_v56 = vpop.permute.xlu1 %3773  ;;  %4108 = vmatpush.msrb.mxu3 %v3955_v32  ;;  %v11793_v4 = vpop.permute.xlu2 %3769 }
 0x903   : > { %v3816_v49 = vpop.permute.xlu0 %3815 }
 0x904   : > { %v3820_v60 = vsel %vm1469_vm1, %v11589_v59, %v3816_v49  ;;  %v3824_v27 = vsel %vm1469_vm1, %v3816_v49, %v11589_v59  ;;  %4109 = vmatpush.msrb.mxu3 %v3953_v24  ;;  %v3817_v59 = vsel %vm1469_vm1, %v11528_v40, %v11633_v26  ;;  %v3915_v40 = vsel %vm1685_vm4, %v11613_v41, %v11653_v2 }
 0x905   : > { %v3831_v8 = vmul.f32 %v3824_v27, %v16260_v57  ;;  %v3832_v33 = vmul.f32 %v3820_v60, %v16261_v5  ;;  %v3826_v35 = vmul.f32 %v3817_v59, %v16261_v5  ;;  %v3791_v24 = vsel %vm1398_vm2, %v3782_v63, %v3774_v56 }
 0x906   : > { %v3787_v60 = vsel %vm1398_vm2, %v3774_v56, %v3782_v63  ;;  %v3914_v27 = vsel %vm1685_vm4, %v11742_v51, %v11643_v20  ;;  %v3913_v63 = vsel %vm1685_vm4, %v11685_v3, %v11749_v23 }
 0x907   : > { %4081 = vmatpush.msrb.mxu2 %v3831_v8  ;;  %4168 = vmatpush.msrb.mxu1 %v3832_v33  ;;  %v3797_v8 = vmul.f32 %v3791_v24, %v16262_v48  ;;  %v3925_v33 = vmul.f32 %v3915_v40, %v8925_v45  ;;  %v3798_v6 = vmul.f32 %v3787_v60, %v16263_v43  ;;  %v16328_v24 = vld [vmem:[#allocation37_spill] sm:$0xff]  ;;  %v16330_v60 = vld [vmem:[#allocation46_spill] sm:$0xff] }
 0x908   : > { %v3923_v44 = vmul.f32 %v3914_v27, %v8925_v45  ;;  %v3984_v40 = vsel %vm1829_vm5, %v11687_v42, %v11625_v46  ;;  %v16331_v42 = vld [vmem:[#allocation33_spill] sm:$0xff] }
 0x909   : > { %4082 = vmatpush.msrb.mxu2 %v3829_v39  ;;  %4169 = vmatpush.msrb.mxu1 %v3830_v1  ;;  %v3921_v39 = vmul.f32 %v3913_v63, %v8925_v45  ;;  %v4025_v63 = vld [vmem:[%s16327_s28] sm:$0xff] }
 0x90a   : > { %v3784_v31 = vpop.permute.xlu1 %3783  ;;  %v11838_v56 = vpop.permute.xlu2 %3995 }
 0x90b   : > { %v3788_v26 = vsel %vm1398_vm2, %v11698_v55, %v3784_v31  ;;  %v3792_v13 = vsel %vm1398_vm2, %v3784_v31, %v11698_v55  ;;  %4083 = vmatpush.msrb.mxu2 %v3827_v14  ;;  %4170 = vmatpush.msrb.mxu1 %v3828_v29  ;;  %v11815_v32 = vpop.permute.xlu0 %3911 }
 0x90c   : > { %v3916_v49 = vsel %vm1685_vm4, %v11599_v12, %v11815_v32  ;;  %v3799_v28 = vmul.f32 %v3792_v13, %v16262_v48  ;;  %v3800_v50 = vmul.f32 %v3788_v26, %v16263_v43 }
 0x90d   : > { %4084 = vmatpush.msrb.mxu2 %v3825_v22  ;;  %4171 = vmatpush.msrb.mxu1 %v3826_v35  ;;  %v3927_v55 = vmul.f32 %v3916_v49, %v8925_v45 }
 0x90f   : > { %4085 = vmatpush.msrb.mxu2 %v3799_v28  ;;  %4110 = vmatpush.msrb.mxu3 %v3927_v55  ;;  %v16329_v28 = vld [vmem:[#allocation52_spill] sm:$0xff] }
 0x910   : > { %4172 = vmatpush.msrb.mxu1 %v3800_v50 }
 0x911   : > { %4086 = vmatpush.msrb.mxu2 %v3797_v8  ;;  %4111 = vmatpush.msrb.mxu3 %v3925_v33 }
 0x912   : > { %4173 = vmatpush.msrb.mxu1 %v3798_v6  ;;  %v3780_v59 = vpop.permute.xlu1 %3779  ;;  %v4008_v22 = vpop.permute.xlu2 %4007  ;;  %v3983_v6 = vsel %vm1829_vm5, %v11639_v38, %v11601_v7  ;;  %v3981_v38 = vsel %vm1829_vm5, %v11637_v52, %v11571_v17 }
 0x913   : > { %4112 = vmatpush.msrb.mxu3 %v3923_v44  ;;  %v3772_v53 = vpop.permute.xlu0 %3771  ;;  %v11877_v44 = vld [vmem:[%s16327_s28 + $0x8] sm:$0xff] }
 0x914   : > { %v3786_v1 = vsel %vm1398_vm2, %v3772_v53, %v3780_v59  ;;  %v3790_v14 = vsel %vm1398_vm2, %v3780_v59, %v3772_v53  ;;  %v16332_v59 = vld [vmem:[#allocation25_spill] sm:$0xff] }
 0x915   : > { %4113 = vmatpush.msrb.mxu3 %v3921_v39  ;;  %v3795_v29 = vmul.f32 %v3790_v14, %v16262_v48  ;;  %v3796_v31 = vmul.f32 %v3786_v1, %v16263_v43  ;;  %v3992_v53 = vmul.f32 %v3984_v40, %v16332_v59  ;;  %v3990_v7 = vmul.f32 %v3983_v6, %v16332_v59  ;;  %v11909_v40 = vld [vmem:[%s16327_s28 + $0x20] sm:$0xff] }
 0x916   : > { %v3986_v17 = vmul.f32 %v3981_v38, %v16332_v59  ;;  %v3918_v38 = vsel %vm1685_vm4, %v11643_v20, %v11742_v51  ;;  %v4034_v51 = vld [vmem:[%s16327_s28 + $0x48] sm:$0xff] }
 0x917   : > { %4087 = vmatpush.msrb.mxu2 %v3795_v29  ;;  %4114 = vmatpush.msrb.mxu3 %v11474_v9 }
 0x918   : > { %4174 = vmatpush.msrb.mxu1 %v3796_v31 }
 0x919   : > { %4115 = vmatpush.msrb.mxu3 %v11458_v25 }
 0x91a   : > { %v4000_v35 = vpop.permute.xlu1 %3999 }
 0x91b   : > { %v4012_v26 = vsel %vm1901_vm8, %v4000_v35, %v4008_v22  ;;  %v4016_v13 = vsel %vm1901_vm8, %v4008_v22, %v4000_v35  ;;  %4116 = vmatpush.msrb.mxu3 %v16328_v24  ;;  %v3778_v49 = vpop.permute.xlu0 %3777  ;;  %v4028_v22 = vld [vmem:[%s16327_s28 + $0x18] sm:$0xff]  ;;  %v3951_v35 = vsel %vm1757_vm9, %v11649_v34, %v11567_v36 }
 0x91c   : > { %v4023_v50 = vmul.f32 %v4012_v26, %v16329_v28  ;;  %v4024_v55 = vmul.f32 %v4016_v13, %v16330_v60  ;;  %v3785_v27 = vsel %vm1398_vm2, %v11793_v4, %v3778_v49  ;;  %v3789_v46 = vsel %vm1398_vm2, %v3778_v49, %v11793_v4 }
 0x91d   : > { %4117 = vmatpush.msrb.mxu3 %v16331_v42  ;;  %v3793_v8 = vmul.f32 %v3789_v46, %v16262_v48  ;;  %v3794_v33 = vmul.f32 %v3785_v27, %v16263_v43  ;;  %v3982_v4 = vsel %vm1829_vm5, %v11641_v47, %v11547_v58  ;;  %v3952_v58 = vsel %vm1757_vm9, %v11651_v19, %v11623_v21  ;;  %v16333_v21 = vld [vmem:[#allocation38_spill] sm:$0xff] }
 0x91e   : > { %4143 = vmatpush.msrb.mxu0 %v4023_v50  ;;  %4118 = vmatmul.f32.vlgmr.msrb.gmra.mxu3 %v11877_v44  ;;  %v3988_v14 = vmul.f32 %v3982_v4, %v16332_v59  ;;  %v3960_v19 = vmul.f32 %v3952_v58, %v16333_v21  ;;  %v3950_v26 = vsel %vm1757_vm9, %v11645_v11, %v11591_v61  ;;  %v4002_v11 = vpop.permute.xlu2 %4001  ;;  %v4032_v4 = vld [vmem:[%s16327_s28 + $0x38] sm:$0xff]  ;;  %v16335_v58 = vld [vmem:[#allocation75_spill] sm:$0xff] }
 0x91f   : > { %4230 = vmatpush.msra.mxu3 %v4024_v55  ;;  %4088 = vmatpush.msrb.mxu2 %v3793_v8  ;;  %v3949_v13 = vsel %vm1757_vm9, %v11621_v16, %v11569_v54  ;;  %v3958_v34 = vmul.f32 %v3951_v35, %v16333_v21  ;;  %v3956_v50 = vmul.f32 %v3950_v26, %v16333_v21  ;;  %v4031_v8 = vld [vmem:[%s16327_s28 + $0x30] sm:$0xff] }
 0x920   : > { %4175 = vmatpush.msrb.mxu1 %v3794_v33  ;;  %4089 = vmatmul.f32.vlgmr.msrb.gmra.mxu2 %v4025_v63  ;;  %v3920_v61 = vsel %vm1685_vm4, %v11815_v32, %v11599_v12  ;;  %v3954_v55 = vmul.f32 %v3949_v13, %v16333_v21  ;;  %v16334_v33 = vld [vmem:[#allocation40_spill] sm:$0xff] }
 0x921   : > { %4176 = vmatmul.f32.vlgmr.msrb.gmra.mxu1 %v4025_v63  ;;  %4189 = vmatpush.msra.mxu2 %v3992_v53  ;;  %v3928_v63 = vmul.f32 %v3920_v61, %v16334_v33 }
 0x922   : > { %v4006_v39 = vpop.permute.xlu1 %4005 }
 0x923   : > { %4190 = vmatpush.msra.mxu2 %v3990_v7  ;;  %v3998_v1 = vpop.permute.xlu0 %3997  ;;  %v4027_v7 = vld [vmem:[%s16327_s28 + $0x10] sm:$0xff] }
 0x924   : > { %v4011_v47 = vsel %vm1901_vm8, %v3998_v1, %v4006_v39  ;;  %v4015_v29 = vsel %vm1901_vm8, %v4006_v39, %v3998_v1  ;;  %v3924_v39 = vmul.f32 %v3918_v38, %v16334_v33  ;;  %v4035_v1 = vld [vmem:[%s16327_s28 + $0x50] sm:$0xff] }
 0x925   : > { %4191 = vmatpush.msra.mxu2 %v3988_v14  ;;  %v4021_v52 = vmul.f32 %v4011_v47, %v16329_v28  ;;  %v4022_v31 = vmul.f32 %v4015_v29, %v16330_v60  ;;  %v4030_v14 = vld [vmem:[%s16327_s28 + $0x28] sm:$0xff]  ;;  %v16338_v47 = vld [vmem:[#allocation69_spill] sm:$0xff]  ;;  %v4033_v29 = vld [vmem:[%s16327_s28 + $0x40] sm:$0xff] }
 0x926   : > { %4121 = vmatmul.f32.gmra.mxu3 %v11909_v40 }
 0x927   : > { %4192 = vmatpush.msra.mxu2 %v3986_v17  ;;  %4144 = vmatpush.msrb.mxu0 %v4021_v52  ;;  %v4036_v17 = vld [vmem:[%s16327_s28 + $0x58] sm:$0xff] }
 0x928   : > { %4231 = vmatpush.msra.mxu3 %v4022_v31  ;;  %4092 = vmatmul.f32.gmra.mxu2 %v4028_v22 }
 0x929   : > { %4179 = vmatmul.f32.gmra.mxu1 %v4028_v22  ;;  %4193 = vmatpush.msra.mxu2 %v3960_v19 }
 0x92a   : > { %v3994_v36 = vpop.permute.xlu1 %3993 }
 0x92b   : > { %4194 = vmatpush.msra.mxu2 %v3958_v34  ;;  %v4004_v49 = vpop.permute.xlu0 %4003  ;;  %v4009_v27 = vsel %vm1901_vm8, %v3994_v36, %v4002_v11  ;;  %v4013_v46 = vsel %vm1901_vm8, %v4002_v11, %v3994_v36  ;;  %v4049_v34 = vpop.permute.xlu2 %4048 }
 0x92c   : > { %v4010_v54 = vsel %vm1901_vm8, %v11838_v56, %v4004_v49  ;;  %v4014_v16 = vsel %vm1901_vm8, %v4004_v49, %v11838_v56  ;;  %v3919_v56 = vsel %vm1685_vm4, %v11653_v2, %v11613_v41  ;;  %v4017_v6 = vmul.f32 %v4009_v27, %v16329_v28 }
 0x92d   : > { %4195 = vmatpush.msra.mxu2 %v3956_v50  ;;  %v4019_v12 = vmul.f32 %v4010_v54, %v16329_v28  ;;  %v4020_v32 = vmul.f32 %v4014_v16, %v16330_v60  ;;  %v4018_v53 = vmul.f32 %v4013_v46, %v16330_v60  ;;  %v3926_v41 = vmul.f32 %v3919_v56, %v16334_v33 }
 0x92e   : > { %v3917_v2 = vsel %vm1685_vm4, %v11749_v23, %v11685_v3  ;;  %4124 = vmatmul.f32.gmra.mxu3 %v4032_v4  ;;  %v16336_v3 = vld [vmem:[#allocation72_spill] sm:$0xff]  ;;  %v16337_v23 = vld [vmem:[#allocation73_spill] sm:$0xff] }
 0x92f   : > { %4196 = vmatpush.msra.mxu2 %v3954_v55  ;;  %4145 = vmatpush.msrb.mxu0 %v4019_v12  ;;  %v3922_v20 = vmul.f32 %v3917_v2, %v16334_v33 }
 0x930   : > { %4232 = vmatpush.msra.mxu3 %v4020_v32  ;;  %4095 = vmatmul.f32.gmra.mxu2 %v4031_v8 }
 0x931   : > { %4182 = vmatmul.f32.gmra.mxu1 %v4031_v8  ;;  %4197 = vmatpush.msra.mxu2 %v3928_v63 }
 0x932   : > { %4146 = vmatpush.msrb.mxu0 %v4017_v6  ;;  %4233 = vmatpush.msra.mxu3 %v4018_v53  ;;  %v4054_v27 = vpop.permute.xlu1 %4053 }
 0x933   : > { %7941 = vmatmul.msk.f32.vlgmr.msrb.gmra.mxu0 %vm1096_vm0, %v4027_v7  ;;  %4198 = vmatpush.msra.mxu2 %v3926_v41  ;;  %v11979_v52 = vpop.permute.xlu0 %4058 }
 0x935   : > { %4199 = vmatpush.msra.mxu2 %v3924_v39 }
 0x936   : > { %4127 = vmatmul.f32.gmra.mxu3 %v4035_v1 }
 0x937   : > { %4200 = vmatpush.msra.mxu2 %v3922_v20 }
 0x938   : > { %4098 = vmatmul.f32.gmra.mxu2 %v4034_v51 }
 0x939   : > { %4185 = vmatmul.f32.gmra.mxu1 %v4034_v51  ;;  %4201 = vmatpush.msra.mxu2 %v16335_v58 }
 0x93b   : > { %7942 = vmatmul.msk.f32.gmra.mxu0 %vm1096_vm0, %v4030_v14  ;;  %4202 = vmatpush.msra.mxu2 %v16336_v3  ;;  %v4044_v31 = vpop.permute.xlu0 %4043 }
 0x93d   : > { %4203 = vmatpush.msra.mxu2 %v16337_v23 }
 0x93e   : > { %7945 = vmatmul.msk.f32.vlgmr.msra.gmra.mxu3 %vm1096_vm0, %v4027_v7 }
 0x93f   : > { %4204 = vmatpush.msra.mxu2 %v16338_v47 }
 0x940   : > { %4205 = vmatmul.f32.vlgmr.msra.gmra.mxu2 %v11877_v44 }
 0x943   : > { %7943 = vmatmul.msk.f32.gmra.mxu0 %vm1096_vm0, %v4033_v29 }
 0x946   : > { %7946 = vmatmul.msk.f32.gmra.mxu3 %vm1096_vm0, %v4030_v14 }
 0x948   : > { %4208 = vmatmul.f32.gmra.mxu2 %v11909_v40 }
 0x94b   : > { %7944 = vmatmul.msk.f32.gmra.mxu0 %vm1096_vm0, %v4036_v17 }
 0x94e   : > { %7947 = vmatmul.msk.f32.gmra.mxu3 %vm1096_vm0, %v4033_v29 }
 0x950   : > { %4211 = vmatmul.f32.gmra.mxu2 %v4032_v4 }
 0x956   : > { %7948 = vmatmul.msk.f32.gmra.mxu3 %vm1096_vm0, %v4036_v17 }
 0x958   : > { %4214 = vmatmul.f32.gmra.mxu2 %v4035_v1 }
 0x99e   : > { %v4177_v39 = vpop.f32.mrf.mxu1 }
 0x99f   : > { %v4178_v51 = vadd.f32 %v4177_v39, %v4044_v31 }
 0x9a1   : > { %v4119_v22 = vpop.f32.mrf.mxu3 }
 0x9a3   : > { %v4090_v44 = vpop.f32.mrf.mxu2 }
 0x9a4   : > { %v4091_v35 = vadd.f32 %v4090_v44, %v4044_v31 }
 0x9a6   : > { %v4120_v19 = vadd.f32 %v4119_v22, %v4091_v35  ;;  %v4180_v29 = vpop.f32.mrf.mxu1 }
 0x9a7   : > { %v4181_v22 = vadd.f32 %v4180_v29, %v4049_v34 }
 0x9a9   : > { %v4122_v50 = vpop.f32.mrf.mxu3 }
 0x9ab   : > { %v4093_v26 = vpop.f32.mrf.mxu2 }
 0x9ac   : > { %v4094_v36 = vadd.f32 %v4093_v26, %v4049_v34 }
 0x9ae   : > { %v4123_v61 = vadd.f32 %v4122_v50, %v4094_v36 }
 0x9b0   : > { %v4148_v13 = vpop.f32.mrf.mxu0 }
 0x9b1   : > { %v4149_v40 = vadd.f32 %v4148_v13, %v4120_v19  ;;  %v4125_v12 = vpop.f32.mrf.mxu3 }
 0x9b3   : > { %v11981_v49 = vmax.f32 %v4149_v40, 0.0  ;;  %v4096_v55 = vpop.f32.mrf.mxu2  ;;  %v4183_v40 = vpop.f32.mrf.mxu1 }
 0x9b4   : > { %v4097_v46 = vadd.f32 %v4096_v55, %v4054_v27  ;;  %v4184_v36 = vadd.f32 %v4183_v40, %v4054_v27 }
 0x9b5   : > { %4287 = vrot.lane.b32.xlu1 %v11981_v49, %s15995_s22  ;;  %4319 = vrot.lane.b32.xlu0 %v11981_v49, %s16018_s26 }
 0x9b6   : > { %4351 = vrot.lane.b32.xlu2 %v11981_v49, %s16001_s23  ;;  %v4126_v8 = vadd.f32 %v4125_v12, %v4097_v46 }
 0x9b8   : > { %v4151_v11 = vpop.f32.mrf.mxu0 }
 0x9b9   : > { %v4152_v54 = vadd.f32 %v4151_v11, %v4123_v61  ;;  %v4128_v4 = vpop.f32.mrf.mxu3 }
 0x9bb   : > { %v11989_v16 = vmax.f32 %v4152_v54, 0.0  ;;  %v4099_v6 = vpop.f32.mrf.mxu2  ;;  %v4186_v55 = vpop.f32.mrf.mxu1 }
 0x9bc   : > { %v4100_v53 = vadd.f32 %v4099_v6, %v11979_v52  ;;  %v4187_v46 = vadd.f32 %v4186_v55, %v11979_v52 }
 0x9bd   : > { %4353 = vrot.lane.b32.xlu1 %v11989_v16, %s16001_s23  ;;  %4415 = vrot.lane.b32.xlu0 %v11981_v49, %s15999_s11 }
 0x9be   : > { %4447 = vrot.lane.b32.xlu2 %v11981_v49, %s15997_s2  ;;  %v4129_v38 = vadd.f32 %v4128_v4, %v4100_v53 }
 0x9c0   : > { %v4154_v32 = vpop.f32.mrf.mxu0 }
 0x9c1   : > { %v4155_v56 = vadd.f32 %v4154_v32, %v4126_v8  ;;  %v4235_v14 = vpop.f32.mrf.mxu3 }
 0x9c3   : > { %v12003_v63 = vmax.f32 %v4155_v56, 0.0  ;;  %v4206_v20 = vpop.f32.mrf.mxu2 }
 0x9c4   : > { %v4207_v1 = vadd.f32 %v4206_v20, %v4178_v51 }
 0x9c5   : > { %4449 = vrot.lane.b32.xlu1 %v11989_v16, %s15997_s2  ;;  %4289 = vrot.lane.b32.xlu0 %v11989_v16, %s15995_s22 }
 0x9c6   : > { %4321 = vrot.lane.b32.xlu2 %v11989_v16, %s16018_s26  ;;  %v4236_v17 = vadd.f32 %v4235_v14, %v4207_v1 }
 0x9c8   : > { %v4157_v7 = vpop.f32.mrf.mxu0  ;;  %v12032_v35 = vmax.f32 %v4236_v17, 0.0 }
 0x9c9   : > { %v4158_v41 = vadd.f32 %v4157_v7, %v4129_v38  ;;  %v4238_v26 = vpop.f32.mrf.mxu3 }
 0x9ca   : > { %16339 = vst [vmem:[#allocation70_spill] sm:$0xff] %v12032_v35 }
 0x9cb   : > { %v12018_v2 = vmax.f32 %v4158_v41, 0.0  ;;  %v4209_v44 = vpop.f32.mrf.mxu2 }
 0x9cc   : > { %v4210_v19 = vadd.f32 %v4209_v44, %v4181_v22 }
 0x9cd   : > { %4323 = vrot.lane.b32.xlu1 %v12003_v63, %s16018_s26  ;;  %4355 = vrot.lane.b32.xlu0 %v12003_v63, %s16001_s23 }
 0x9ce   : > { %4417 = vrot.lane.b32.xlu2 %v11989_v16, %s15999_s11  ;;  %v4239_v31 = vadd.f32 %v4238_v26, %v4210_v19 }
 0x9d0   : > { %v12040_v13 = vmax.f32 %v4239_v31, 0.0 }
 0x9d1   : > { %v4241_v61 = vpop.f32.mrf.mxu3 }
 0x9d2   : > { %16340 = vst [vmem:[#allocation62_spill] sm:$0xff] %v12040_v13 }
 0x9d3   : > { %v4212_v34 = vpop.f32.mrf.mxu2 }
 0x9d4   : > { %v4213_v50 = vadd.f32 %v4212_v34, %v4184_v36 }
 0x9d5   : > { %4419 = vrot.lane.b32.xlu1 %v12003_v63, %s15999_s11  ;;  %4451 = vrot.lane.b32.xlu0 %v12003_v63, %s15997_s2 }
 0x9d6   : > { %4291 = vrot.lane.b32.xlu2 %v12003_v63, %s15995_s22  ;;  %v4242_v11 = vadd.f32 %v4241_v61, %v4213_v50 }
 0x9d8   : > { %v12054_v54 = vmax.f32 %v4242_v11, 0.0 }
 0x9d9   : > { %v4244_v32 = vpop.f32.mrf.mxu3 }
 0x9da   : > { %16341 = vst [vmem:[#allocation68_spill] sm:$0xff] %v12054_v54 }
 0x9db   : > { %v4215_v27 = vpop.f32.mrf.mxu2 }
 0x9dc   : > { %v4216_v12 = vadd.f32 %v4215_v27, %v4187_v46 }
 0x9dd   : > { %4357 = vrot.lane.b32.xlu1 %v12018_v2, %s16001_s23  ;;  %4325 = vrot.lane.b32.xlu0 %v12018_v2, %s16018_s26 }
 0x9de   : > { %4387 = vrot.lane.b32.xlu2 %v12003_v63, %s15979_s1  ;;  %v4245_v8 = vadd.f32 %v4244_v32, %v4216_v12 }
 0x9e0   : > { %v12071_v6 = vmax.f32 %v4245_v8, 0.0 }
 0x9e2   : > { %16342 = vst [vmem:[#allocation66_spill] sm:$0xff] %v12071_v6 }
 0x9e5   : > { %4293 = vrot.lane.b32.xlu1 %v12018_v2, %s15995_s22  ;;  %4421 = vrot.lane.b32.xlu0 %v12018_v2, %s15999_s11 }
 0x9e6   : > { %4453 = vrot.lane.b32.xlu2 %v12018_v2, %s15997_s2 }
 0x9ed   : > { %4389 = vrot.lane.b32.xlu1 %v12018_v2, %s15979_s1  ;;  %4359 = vrot.lane.b32.xlu0 %v12032_v35, %s16001_s23 }
 0x9ee   : > { %4295 = vrot.lane.b32.xlu2 %v12032_v35, %s15995_s22 }
 0x9f5   : > { %4327 = vrot.lane.b32.xlu1 %v12032_v35, %s16018_s26  ;;  %4455 = vrot.lane.b32.xlu0 %v12032_v35, %s15997_s2 }
 0x9f6   : > { %4361 = vrot.lane.b32.xlu2 %v12040_v13, %s16001_s23 }
 0x9fd   : > { %4423 = vrot.lane.b32.xlu1 %v12032_v35, %s15999_s11  ;;  %4329 = vrot.lane.b32.xlu0 %v12040_v13, %s16018_s26 }
 0x9fe   : > { %4457 = vrot.lane.b32.xlu2 %v12040_v13, %s15997_s2 }
 0xa05   : > { %4297 = vrot.lane.b32.xlu1 %v12040_v13, %s15995_s22  ;;  %4425 = vrot.lane.b32.xlu0 %v12040_v13, %s15999_s11 }
 0xa06   : > { %4331 = vrot.lane.b32.xlu2 %v12054_v54, %s16018_s26 }
 0xa0d   : > { %4363 = vrot.lane.b32.xlu1 %v12054_v54, %s16001_s23  ;;  %4299 = vrot.lane.b32.xlu0 %v12054_v54, %s15995_s22 }
 0xa0e   : > { %4427 = vrot.lane.b32.xlu2 %v12054_v54, %s15999_s11 }
 0xa10   : > { %v12069_v56 = vpop.permute.xlu2 %4351 }
 0xa15   : > { %4459 = vrot.lane.b32.xlu1 %v12054_v54, %s15997_s2  ;;  %4395 = vrot.lane.b32.xlu0 %v12054_v54, %s15979_s1 }
 0xa16   : > { %4365 = vrot.lane.b32.xlu2 %v12071_v6, %s16001_s23 }
 0xa18   : > { %v12079_v52 = vpop.permute.xlu2 %4447 }
 0xa1d   : > { %4393 = vrot.lane.b32.xlu1 %v12040_v13, %s15979_s1  ;;  %4461 = vrot.lane.b32.xlu0 %v12071_v6, %s15997_s2 }
 0xa1e   : > { %4261 = vrot.lane.b32.xlu2 %v12018_v2, %s15993_s18 }
 0xa20   : > { %v12087_v53 = vpop.permute.xlu2 %4321 }
 0xa25   : > { %4333 = vrot.lane.b32.xlu1 %v12071_v6, %s16018_s26  ;;  %4385 = vrot.lane.b32.xlu0 %v11989_v16, %s15979_s1 }
 0xa26   : > { %4391 = vrot.lane.b32.xlu2 %v12032_v35, %s15979_s1 }
 0xa27   : > { %v12095_v4 = vpop.permute.xlu1 %4287  ;;  %v12097_v7 = vpop.permute.xlu0 %4319 }
 0xa28   : > { %v12099_v38 = vpop.permute.xlu2 %4417 }
 0xa2d   : > { %4429 = vrot.lane.b32.xlu1 %v12071_v6, %s15999_s11  ;;  %4259 = vrot.lane.b32.xlu0 %v12003_v63, %s15993_s18 }
 0xa2e   : > { %4301 = vrot.lane.b32.xlu2 %v12071_v6, %s15995_s22 }
 0xa2f   : > { %v12107_v41 = vpop.permute.xlu1 %4353  ;;  %v12109_v39 = vpop.permute.xlu0 %4415 }
 0xa30   : > { %v12111_v20 = vpop.permute.xlu2 %4291 }
 0xa35   : > { %4383 = vrot.lane.b32.xlu1 %v11981_v49, %s15979_s1  ;;  %4269 = vrot.lane.b32.xlu0 %v12071_v6, %s15993_s18 }
 0xa36   : > { %4397 = vrot.lane.b32.xlu2 %v12071_v6, %s15979_s1  ;;  %s16343_s1 = sld [smem:[#allocation9_spill]] }
 0xa37   : > { %v12119_v51 = vpop.permute.xlu1 %4449  ;;  %v12121_v1 = vpop.permute.xlu0 %4289 }
 0xa38   : > { %v12123_v14 = vpop.permute.xlu2 %4387 }
 0xa3c   : > { %v4525_v11 = vld [vmem:[%s16343_s1 + $0x10] sm:$0xff]  ;;  %v4526_v55 = vld [vmem:[%s16343_s1 + $0x18] sm:$0xff]  ;;  %v4524_v32 = vld [vmem:[%s16343_s1 + $0x8] sm:$0xff] }
 0xa3d   : > { %4267 = vrot.lane.b32.xlu1 %v12054_v54, %s15993_s18  ;;  %4265 = vrot.lane.b32.xlu0 %v12040_v13, %s15993_s18  ;;  %v4523_v8 = vld [vmem:[%s16343_s1] sm:$0xff]  ;;  %s16389_s1 = smov 15  }
 0xa3e   : > { %4257 = vrot.lane.b32.xlu2 %v11989_v16, %s15993_s18 }
 0xa3f   : > { %v12131_v29 = vpop.permute.xlu1 %4323  ;;  %v4356_v17 = vpop.permute.xlu0 %4355 }
 0xa40   : > { %v12133_v44 = vpop.permute.xlu2 %4453 }
 0xa45   : > { %4255 = vrot.lane.b32.xlu1 %v11981_v49, %s15993_s18  ;;  %4485 = vrot.lane.b32.xlu0 %v12018_v2, %s15991_s10 }
 0xa46   : > { %4263 = vrot.lane.b32.xlu2 %v12032_v35, %s15993_s18  ;;  %s16358_s18 = smov 127  }
 0xa47   : > { %v12141_v22 = vpop.permute.xlu1 %4419  ;;  %v12143_v19 = vpop.permute.xlu0 %4451 }
 0xa48   : > { %v12145_v26 = vpop.permute.xlu2 %4295 }
 0xa4d   : > { %4481 = vrot.lane.b32.xlu1 %v11989_v16, %s15991_s10  ;;  %4491 = vrot.lane.b32.xlu0 %v12054_v54, %s15991_s10 }
 0xa4e   : > { %4483 = vrot.lane.b32.xlu2 %v12003_v63, %s15991_s10 }
 0xa4f   : > { %v4358_v31 = vpop.permute.xlu1 %4357  ;;  %v12153_v40 = vpop.permute.xlu0 %4325 }
 0xa50   : > { %v4362_v34 = vpop.permute.xlu2 %4361 }
 0xa51   : > { %v4368_v54 = vsel %vm1613_vm3, %v12107_v41, %v4362_v34 }
 0xa55   : > { %4493 = vrot.lane.b32.xlu1 %v12071_v6, %s15991_s10  ;;  %4479 = vrot.lane.b32.xlu0 %v11981_v49, %s15991_s10 }
 0xa56   : > { %4489 = vrot.lane.b32.xlu2 %v12040_v13, %s15991_s10 }
 0xa57   : > { %v12161_v36 = vpop.permute.xlu1 %4293  ;;  %v12163_v50 = vpop.permute.xlu0 %4421 }
 0xa58   : > { %v12165_v61 = vpop.permute.xlu2 %4457 }
 0xa5d   : > { %4487 = vrot.lane.b32.xlu1 %v12032_v35, %s15991_s10  ;;  %4539 = vperm.xlu0 %8070, %v4525_v11   ;;  %s16344_s10 = sld [smem:[#allocation8_spill]] }
 0xa5e   : > { %4544 = vperm.xlu2 %8072, %v4526_v55  }
 0xa5f   : > { %v12171_v27 = vpop.permute.xlu1 %4389  ;;  %v4360_v46 = vpop.permute.xlu0 %4359 }
 0xa60   : > { %v4332_v12 = vpop.permute.xlu2 %4331  ;;  %v4371_v6 = vsel %vm1613_vm3, %v4360_v46, %v12069_v56 }
 0xa65   : > { %4534 = vperm.xlu1 %8071, %v4524_v32  }
 0xa66   : > { %4529 = vperm.xlu2 %8072, %v4523_v8  }
 0xa67   : > { %v12175_v58 = vpop.permute.xlu1 %4327  ;;  %v12177_v3 = vpop.permute.xlu0 %4455 }
 0xa68   : > { %v12179_v23 = vpop.permute.xlu2 %4427 }
 0xa6f   : > { %v12181_v47 = vpop.permute.xlu1 %4423  ;;  %v4330_v9 = vpop.permute.xlu0 %4329 }
 0xa70   : > { %v4366_v25 = vpop.permute.xlu2 %4365 }
 0xa71   : > { %v4370_v11 = vsel %vm1613_vm3, %v4358_v31, %v4366_v25  ;;  %v4374_v55 = vsel %vm1613_vm3, %v4366_v25, %v4358_v31  ;;  %v4372_v25 = vsel %vm1613_vm3, %v4362_v34, %v12107_v41  ;;  %v4378_v34 = vmul.f32 %v4368_v54, %v16297_v0 }
 0xa72   : > { %v4381_v24 = vmul.f32 %v4374_v55, %v16296_v18  ;;  %v4382_v32 = vmul.f32 %v4370_v11, %v16297_v0  ;;  %v4377_v41 = vmul.f32 %v4372_v25, %v16296_v18 }
 0xa74   : > { %4559 = vmatpush.msra.mxu0 %v4381_v24  ;;  %4646 = vmatpush.msrb.mxu3 %v4382_v32  ;;  %v4367_v32 = vsel %vm1613_vm3, %v12069_v56, %v4360_v46 }
 0xa77   : > { %v12189_v8 = vpop.permute.xlu1 %4297  ;;  %v12191_v42 = vpop.permute.xlu0 %4425 }
 0xa78   : > { %v12215_v33 = vpop.permute.xlu2 %4261 }
 0xa7f   : > { %v4364_v35 = vpop.permute.xlu1 %4363  ;;  %v12193_v13 = vpop.permute.xlu0 %4299 }
 0xa80   : > { %v4369_v31 = vsel %vm1613_vm3, %v4356_v17, %v4364_v35  ;;  %v4373_v24 = vsel %vm1613_vm3, %v4364_v35, %v4356_v17  ;;  %v4375_v35 = vmul.f32 %v4371_v6, %v16296_v18  ;;  %v4376_v17 = vmul.f32 %v4367_v32, %v16297_v0  ;;  %v12223_v56 = vpop.permute.xlu2 %4391 }
 0xa81   : > { %v4379_v11 = vmul.f32 %v4373_v24, %v16296_v18  ;;  %v4380_v55 = vmul.f32 %v4369_v31, %v16297_v0  ;;  %v4336_v18 = vsel %vm1541_vm6, %v12087_v53, %v4330_v9 }
 0xa83   : > { %4560 = vmatpush.msra.mxu0 %v4379_v11  ;;  %4647 = vmatpush.msrb.mxu3 %v4380_v55  ;;  %v4464_v55 = vsel %vm1829_vm5, %v12119_v51, %v12165_v61 }
 0xa85   : > { %4561 = vmatpush.msra.mxu0 %v4377_v41  ;;  %4648 = vmatpush.msrb.mxu3 %v4378_v34  ;;  %v4463_v41 = vsel %vm1829_vm5, %v12079_v52, %v12177_v3  ;;  %v4473_v34 = vmul.f32 %v4464_v55, %v16295_v62 }
 0xa87   : > { %v12219_v31 = vpop.permute.xlu1 %4459  ;;  %v12221_v24 = vpop.permute.xlu0 %4395  ;;  %4562 = vmatpush.msra.mxu0 %v4375_v35  ;;  %4649 = vmatpush.msrb.mxu3 %v4376_v17 }
 0xa88   : > { %v4465_v54 = vsel %vm1829_vm5, %v12143_v19, %v12219_v31  ;;  %v4302_v0 = vpop.permute.xlu2 %4301 }
 0xa89   : > { %v4475_v32 = vmul.f32 %v4465_v54, %v16295_v62  ;;  %v4341_v54 = vsel %vm1541_vm6, %v4332_v12, %v12131_v29 }
 0xa8f   : > { %v12225_v46 = vpop.permute.xlu1 %4393  ;;  %v12227_v25 = vpop.permute.xlu0 %4461 }
 0xa90   : > { %v4466_v6 = vsel %vm1829_vm5, %v12133_v44, %v12227_v25 }
 0xa91   : > { %v4477_v11 = vmul.f32 %v4466_v6, %v16295_v62  ;;  %v4471_v6 = vmul.f32 %v4463_v41, %v16295_v62 }
 0xa93   : > { %4588 = vmatpush.msra.mxu1 %v4477_v11  ;;  %v4337_v11 = vsel %vm1541_vm6, %v12131_v29, %v4332_v12  ;;  %v4340_v29 = vsel %vm1541_vm6, %v4330_v9, %v12087_v53  ;;  %v4347_v12 = vmul.f32 %v4341_v54, %v16259_v30  ;;  %v4346_v53 = vmul.f32 %v4336_v18, %v9437_v10 }
 0xa94   : > { %v4348_v62 = vmul.f32 %v4337_v11, %v9437_v10  ;;  %v4345_v9 = vmul.f32 %v4340_v29, %v16259_v30  ;;  %v4306_v11 = vsel %vm1469_vm1, %v12161_v36, %v4302_v0  ;;  %v4433_v18 = vsel %vm1757_vm9, %v12141_v22, %v12179_v23 }
 0xa95   : > { %4589 = vmatpush.msra.mxu1 %v4475_v32  ;;  %v4432_v29 = vsel %vm1757_vm9, %v12099_v38, %v12191_v42 }
 0xa97   : > { %v4334_v35 = vpop.permute.xlu1 %4333  ;;  %v12248_v17 = vpop.permute.xlu0 %4385  ;;  %4590 = vmatpush.msra.mxu1 %v4473_v34 }
 0xa98   : > { %v4338_v32 = vsel %vm1541_vm6, %v12153_v40, %v4334_v35  ;;  %v4342_v55 = vsel %vm1541_vm6, %v4334_v35, %v12153_v40  ;;  %v4335_v40 = vsel %vm1541_vm6, %v12097_v7, %v12175_v58  ;;  %v4339_v35 = vsel %vm1541_vm6, %v12175_v58, %v12097_v7 }
 0xa99   : > { %4591 = vmatpush.msra.mxu1 %v4471_v6  ;;  %v4349_v41 = vmul.f32 %v4342_v55, %v16259_v30  ;;  %v4350_v34 = vmul.f32 %v4338_v32, %v9437_v10  ;;  %v4310_v6 = vsel %vm1469_vm1, %v4302_v0, %v12161_v36  ;;  %v4344_v58 = vmul.f32 %v4335_v40, %v9437_v10 }
 0xa9a   : > { %v4309_v0 = vsel %vm1469_vm1, %v12193_v13, %v12111_v20  ;;  %v4305_v36 = vsel %vm1469_vm1, %v12111_v20, %v12193_v13  ;;  %v4317_v55 = vmul.f32 %v4310_v6, %v16260_v57  ;;  %v4318_v13 = vmul.f32 %v4306_v11, %v16261_v5 }
 0xa9b   : > { %4563 = vmatpush.msra.mxu0 %v4349_v41  ;;  %4650 = vmatpush.msrb.mxu3 %v4350_v34  ;;  %v4308_v34 = vsel %vm1469_vm1, %v12189_v8, %v12121_v1  ;;  %v4304_v20 = vsel %vm1469_vm1, %v12121_v1, %v12189_v8  ;;  %v4315_v40 = vmul.f32 %v4309_v0, %v16260_v57 }
 0xa9c   : > { %v4316_v6 = vmul.f32 %v4305_v36, %v16261_v5  ;;  %v4303_v1 = vsel %vm1469_vm1, %v12095_v4, %v12145_v26  ;;  %v4313_v8 = vmul.f32 %v4308_v34, %v16260_v57  ;;  %v4441_v11 = vmul.f32 %v4432_v29, %v9408_v15 }
 0xa9d   : > { %4564 = vmatpush.msra.mxu0 %v4347_v12  ;;  %4651 = vmatpush.msrb.mxu3 %v4348_v62  ;;  %v4343_v62 = vmul.f32 %v4339_v35, %v16259_v30  ;;  %v12321_v12 = vpop.permute.xlu2 %4397  ;;  %v4443_v35 = vmul.f32 %v4433_v18, %v9408_v15 }
 0xa9f   : > { %v12289_v54 = vpop.permute.xlu1 %4429  ;;  %v12291_v32 = vpop.permute.xlu0 %4259  ;;  %4565 = vmatpush.msra.mxu0 %v4345_v9  ;;  %4652 = vmatpush.msrb.mxu3 %v4346_v53  ;;  %v4307_v9 = vsel %vm1469_vm1, %v12145_v26, %v12095_v4  ;;  %v4431_v53 = vsel %vm1757_vm9, %v12109_v39, %v12181_v47 }
 0xaa0   : > { %v4434_v7 = vsel %vm1757_vm9, %v12163_v50, %v12289_v54  ;;  %v4311_v4 = vmul.f32 %v4307_v9, %v16260_v57  ;;  %v4439_v26 = vmul.f32 %v4431_v53, %v9408_v15 }
 0xaa1   : > { %4566 = vmatpush.msra.mxu0 %v4343_v62  ;;  %4653 = vmatpush.msrb.mxu3 %v4344_v58  ;;  %v4445_v41 = vmul.f32 %v4434_v7, %v9408_v15  ;;  %v4402_v62 = vsel %vm1685_vm4, %v12171_v27, %v12321_v12  ;;  %v4314_v58 = vmul.f32 %v4304_v20, %v16261_v5 }
 0xaa2   : > { %v4401_v7 = vsel %vm1685_vm4, %v12123_v14, %v12221_v24  ;;  %v4413_v29 = vmul.f32 %v4402_v62, %v8925_v45  ;;  %v4400_v20 = vsel %vm1685_vm4, %v12248_v17, %v12225_v46 }
 0xaa3   : > { %4567 = vmatpush.msra.mxu0 %v4317_v55  ;;  %4592 = vmatpush.msra.mxu1 %v4445_v41  ;;  %v4312_v41 = vmul.f32 %v4303_v1, %v16261_v5  ;;  %v4409_v9 = vmul.f32 %v4400_v20, %v8925_v45 }
 0xaa4   : > { %4654 = vmatpush.msrb.mxu3 %v4318_v13 }
 0xaa5   : > { %4568 = vmatpush.msra.mxu0 %v4315_v40  ;;  %4593 = vmatpush.msra.mxu1 %v4443_v35  ;;  %v4258_v40 = vpop.permute.xlu2 %4257 }
 0xaa6   : > { %4655 = vmatpush.msrb.mxu3 %v4316_v6 }
 0xaa7   : > { %v12350_v18 = vpop.permute.xlu1 %4383  ;;  %v4270_v0 = vpop.permute.xlu0 %4269  ;;  %4569 = vmatpush.msra.mxu0 %v4313_v8  ;;  %4594 = vmatpush.msra.mxu1 %v4441_v11 }
 0xaa8   : > { %v4274_v36 = vsel %vm1398_vm2, %v12215_v33, %v4270_v0  ;;  %v4278_v55 = vsel %vm1398_vm2, %v4270_v0, %v12215_v33  ;;  %4656 = vmatpush.msrb.mxu3 %v4314_v58  ;;  %v4411_v33 = vmul.f32 %v4401_v7, %v8925_v45  ;;  %v4399_v35 = vsel %vm1685_vm4, %v12350_v18, %v12223_v56 }
 0xaa9   : > { %4570 = vmatpush.msra.mxu0 %v4311_v4  ;;  %4595 = vmatpush.msra.mxu1 %v4439_v26  ;;  %v4285_v34 = vmul.f32 %v4278_v55, %v16262_v48  ;;  %v4286_v13 = vmul.f32 %v4274_v36, %v16263_v43  ;;  %v4407_v1 = vmul.f32 %v4399_v35, %v8925_v45  ;;  %v12397_v55 = vld [vmem:[%s16344_s10 + $0x8] sm:$0xff] }
 0xaaa   : > { %4657 = vmatpush.msrb.mxu3 %v4312_v41 }
 0xaab   : > { %4571 = vmatpush.msra.mxu0 %v4285_v34  ;;  %4596 = vmatpush.msra.mxu1 %v4413_v29 }
 0xaac   : > { %4658 = vmatpush.msrb.mxu3 %v4286_v13  ;;  %v4469_v13 = vsel %vm1829_vm5, %v12219_v31, %v12143_v19  ;;  %v4467_v19 = vsel %vm1829_vm5, %v12177_v3, %v12079_v52  ;;  %v4437_v3 = vsel %vm1757_vm9, %v12179_v23, %v12141_v22 }
 0xaad   : > { %4597 = vmatpush.msra.mxu1 %v4411_v33  ;;  %v4264_v7 = vpop.permute.xlu2 %4263  ;;  %v4476_v20 = vmul.f32 %v4469_v13, %v16332_v59  ;;  %v4472_v35 = vmul.f32 %v4467_v19, %v16332_v59  ;;  %v4444_v23 = vmul.f32 %v4437_v3, %v16333_v21  ;;  %v16346_v19 = vld [vmem:[#allocation66_spill] sm:$0xff] }
 0xaaf   : > { %v4268_v53 = vpop.permute.xlu1 %4267  ;;  %v4266_v6 = vpop.permute.xlu0 %4265  ;;  %4598 = vmatpush.msra.mxu1 %v4409_v9  ;;  %v4514_v9 = vld [vmem:[%s16344_s10 + $0x18] sm:$0xff] }
 0xab0   : > { %v4273_v8 = vsel %vm1398_vm2, %v12291_v32, %v4268_v53  ;;  %v4277_v11 = vsel %vm1398_vm2, %v4268_v53, %v12291_v32  ;;  %v4276_v62 = vsel %vm1398_vm2, %v4266_v6, %v4258_v40  ;;  %v4272_v58 = vsel %vm1398_vm2, %v4258_v40, %v4266_v6  ;;  %v12428_v40 = vld [vmem:[%s16344_s10 + $0x20] sm:$0xff] }
 0xab1   : > { %4599 = vmatpush.msra.mxu1 %v4407_v1  ;;  %v4283_v0 = vmul.f32 %v4277_v11, %v16262_v48  ;;  %v4284_v4 = vmul.f32 %v4273_v8, %v16263_v43  ;;  %v4281_v26 = vmul.f32 %v4276_v62, %v16262_v48  ;;  %v4282_v32 = vmul.f32 %v4272_v58, %v16263_v43  ;;  %v12453_v1 = vld [vmem:[%s16344_s10 + $0x38] sm:$0xff] }
 0xab3   : > { %4572 = vmatpush.msra.mxu0 %v4283_v0  ;;  %4600 = vmatpush.msra.mxu1 %v12018_v2  ;;  %v4470_v2 = vsel %vm1829_vm5, %v12227_v25, %v12133_v44 }
 0xab4   : > { %4659 = vmatpush.msrb.mxu3 %v4284_v4  ;;  %v4478_v44 = vmul.f32 %v4470_v2, %v16332_v59 }
 0xab5   : > { %4573 = vmatpush.msra.mxu0 %v4281_v26  ;;  %4601 = vmatpush.msra.mxu1 %v12003_v63 }
 0xab6   : > { %4660 = vmatpush.msrb.mxu3 %v4282_v32  ;;  %v16345_v32 = vld [vmem:[#allocation40_spill] sm:$0xff] }
 0xab7   : > { %v4256_v36 = vpop.permute.xlu1 %4255  ;;  %4602 = vmatpush.msra.mxu1 %v11989_v16  ;;  %v4511_v16 = vld [vmem:[%s16344_s10] sm:$0xff]  ;;  %v4486_v25 = vpop.permute.xlu0 %4485 }
 0xab8   : > { %v4271_v41 = vsel %vm1398_vm2, %v4256_v36, %v4264_v7  ;;  %v4275_v34 = vsel %vm1398_vm2, %v4264_v7, %v4256_v36  ;;  %v4404_v36 = vsel %vm1685_vm4, %v12225_v46, %v12248_v17 }
 0xab9   : > { %4603 = vmatpush.msra.mxu1 %v11981_v49  ;;  %v4279_v63 = vmul.f32 %v4275_v34, %v16262_v48  ;;  %v4280_v29 = vmul.f32 %v4271_v41, %v16263_v43  ;;  %v4468_v49 = vsel %vm1829_vm5, %v12165_v61, %v12119_v51  ;;  %v4438_v51 = vsel %vm1757_vm9, %v12289_v54, %v12163_v50  ;;  %v4484_v61 = vpop.permute.xlu2 %4483 }
 0xaba   : > { %4604 = vmatmul.f32.vlgmr.msra.gmra.mxu1 %v12397_v55  ;;  %v4474_v33 = vmul.f32 %v4468_v49, %v16332_v59  ;;  %v4446_v52 = vmul.f32 %v4438_v51, %v16333_v21  ;;  %v4436_v50 = vsel %vm1757_vm9, %v12191_v42, %v12099_v38  ;;  %v4435_v54 = vsel %vm1757_vm9, %v12181_v47, %v12109_v39  ;;  %v4520_v49 = vld [vmem:[%s16344_s10 + $0x48] sm:$0xff] }
 0xabb   : > { %4574 = vmatpush.msra.mxu0 %v4279_v63  ;;  %4661 = vmatpush.msrb.mxu3 %v4280_v29  ;;  %v4442_v6 = vmul.f32 %v4436_v50, %v16333_v21  ;;  %v4406_v42 = vsel %vm1685_vm4, %v12321_v12, %v12171_v27  ;;  %v4440_v39 = vmul.f32 %v4435_v54, %v16333_v21  ;;  %v4517_v27 = vld [vmem:[%s16344_s10 + $0x30] sm:$0xff]  ;;  %v4516_v51 = vld [vmem:[%s16344_s10 + $0x28] sm:$0xff]  ;;  %v16374_v21 = vld [vmem:[#allocation65_spill] sm:$0xff] }
 0xabc   : > { %4575 = vmatmul.f32.vlgmr.msra.gmra.mxu0 %v4511_v16  ;;  %4662 = vmatmul.f32.vlgmr.msrb.gmra.mxu3 %v4511_v16  ;;  %v4405_v12 = vsel %vm1685_vm4, %v12221_v24, %v12123_v14  ;;  %v4414_v7 = vmul.f32 %v4406_v42, %v16345_v32  ;;  %v4403_v41 = vsel %vm1685_vm4, %v12223_v56, %v12350_v18  ;;  %v4521_v16 = vld [vmem:[%s16344_s10 + $0x50] sm:$0xff] }
 0xabd   : > { %4675 = vmatpush.msrb.mxu0 %v4478_v44  ;;  %v4412_v2 = vmul.f32 %v4405_v12, %v16345_v32  ;;  %v4410_v29 = vmul.f32 %v4404_v36, %v16345_v32  ;;  %v4408_v18 = vmul.f32 %v4403_v41, %v16345_v32 }
 0xabf   : > { %4676 = vmatpush.msrb.mxu0 %v4476_v20  ;;  %v4482_v31 = vpop.permute.xlu1 %4481  ;;  %v4492_v53 = vpop.permute.xlu0 %4491  ;;  %v4513_v20 = vld [vmem:[%s16344_s10 + $0x10] sm:$0xff] }
 0xac0   : > { %v4497_v8 = vsel %vm1901_vm8, %v4484_v61, %v4492_v53  ;;  %v4501_v11 = vsel %vm1901_vm8, %v4492_v53, %v4484_v61  ;;  %v16349_v61 = vld [vmem:[#allocation70_spill] sm:$0xff] }
 0xac1   : > { %4677 = vmatpush.msrb.mxu0 %v4474_v33  ;;  %v4490_v0 = vpop.permute.xlu2 %4489  ;;  %v4507_v14 = vmul.f32 %v4497_v8, %v16329_v28  ;;  %v4508_v24 = vmul.f32 %v4501_v11, %v16330_v60  ;;  %v16348_v33 = vld [vmem:[#allocation62_spill] sm:$0xff] }
 0xac2   : > { %4607 = vmatmul.f32.gmra.mxu1 %v12428_v40  ;;  %v4496_v4 = vsel %vm1901_vm8, %v4482_v31, %v4490_v0  ;;  %v4500_v26 = vsel %vm1901_vm8, %v4490_v0, %v4482_v31  ;;  %v16347_v31 = vld [vmem:[#allocation68_spill] sm:$0xff] }
 0xac3   : > { %4678 = vmatpush.msrb.mxu0 %v4472_v35  ;;  %v4505_v46 = vmul.f32 %v4496_v4, %v16329_v28  ;;  %v4506_v17 = vmul.f32 %v4500_v26, %v16330_v60  ;;  %v4519_v35 = vld [vmem:[%s16344_s10 + $0x40] sm:$0xff] }
 0xac4   : > { %4578 = vmatmul.f32.gmra.mxu0 %v4514_v9  ;;  %4665 = vmatmul.f32.gmra.mxu3 %v4514_v9  ;;  %v4522_v9 = vld [vmem:[%s16344_s10 + $0x58] sm:$0xff] }
 0xac5   : > { %4679 = vmatpush.msrb.mxu0 %v4446_v52 }
 0xac7   : > { %4680 = vmatpush.msrb.mxu0 %v4444_v23  ;;  %v4494_v22 = vpop.permute.xlu1 %4493  ;;  %v4480_v34 = vpop.permute.xlu0 %4479 }
 0xac8   : > { %v4498_v38 = vsel %vm1901_vm8, %v4486_v25, %v4494_v22  ;;  %v4502_v47 = vsel %vm1901_vm8, %v4494_v22, %v4486_v25 }
 0xac9   : > { %v4509_v62 = vmul.f32 %v4498_v38, %v16329_v28  ;;  %v4510_v58 = vmul.f32 %v4502_v47, %v16330_v60  ;;  %4681 = vmatpush.msrb.mxu0 %v4442_v6  ;;  %v12523_v3 = vpop.permute.xlu2 %4544  ;;  %v16350_v38 = vld [vmem:[#allocation33_spill] sm:$0xff] }
 0xaca   : > { %4610 = vmatmul.f32.gmra.mxu1 %v12453_v1 }
 0xacb   : > { %4682 = vmatpush.msrb.mxu0 %v4440_v39  ;;  %4629 = vmatpush.msrb.mxu2 %v4509_v62 }
 0xacc   : > { %4716 = vmatpush.msrb.mxu1 %v4510_v58  ;;  %4581 = vmatmul.f32.gmra.mxu0 %v4517_v27  ;;  %v16352_v58 = vld [vmem:[#allocation37_spill] sm:$0xff] }
 0xacd   : > { %4668 = vmatmul.f32.gmra.mxu3 %v4517_v27  ;;  %4683 = vmatpush.msrb.mxu0 %v4414_v7 }
 0xace   : > { %4630 = vmatpush.msrb.mxu2 %v4507_v14  ;;  %4717 = vmatpush.msrb.mxu1 %v4508_v24 }
 0xacf   : > { %4684 = vmatpush.msrb.mxu0 %v4412_v2  ;;  %v4488_v63 = vpop.permute.xlu1 %4487  ;;  %v4540_v4 = vpop.permute.xlu0 %4539  ;;  %v16354_v2 = vld [vmem:[#allocation29_spill] sm:$0xff] }
 0xad0   : > { %v4495_v13 = vsel %vm1901_vm8, %v4480_v34, %v4488_v63  ;;  %v4499_v56 = vsel %vm1901_vm8, %v4488_v63, %v4480_v34  ;;  %4631 = vmatpush.msrb.mxu2 %v4505_v46  ;;  %4718 = vmatpush.msrb.mxu1 %v4506_v17 }
 0xad1   : > { %4685 = vmatpush.msrb.mxu0 %v4410_v29  ;;  %v4503_v44 = vmul.f32 %v4495_v13, %v16329_v28  ;;  %v4504_v25 = vmul.f32 %v4499_v56, %v16330_v60  ;;  %v4530_v52 = vpop.permute.xlu2 %4529  ;;  %v16356_v56 = vld [vmem:[#allocation31_spill] sm:$0xff] }
 0xad2   : > { %4613 = vmatmul.f32.gmra.mxu1 %v4521_v16 }
 0xad3   : > { %4686 = vmatpush.msrb.mxu0 %v4408_v18  ;;  %4632 = vmatpush.msrb.mxu2 %v4503_v44 }
 0xad4   : > { %4719 = vmatpush.msrb.mxu1 %v4504_v25  ;;  %4584 = vmatmul.f32.gmra.mxu0 %v4520_v49 }
 0xad5   : > { %7949 = vmatmul.msk.f32.vlgmr.msrb.gmra.mxu2 %vm1096_vm0, %v4513_v20  ;;  %4671 = vmatmul.f32.gmra.mxu3 %v4520_v49 }
 0xad6   : > { %4687 = vmatpush.msrb.mxu0 %v16346_v19 }
 0xad7   : > { %v4535_v6 = vpop.permute.xlu1 %4534 }
 0xad8   : > { %4688 = vmatpush.msrb.mxu0 %v16347_v31 }
 0xada   : > { %4689 = vmatpush.msrb.mxu0 %v16348_v33  ;;  %7953 = vmatmul.msk.f32.vlgmr.msrb.gmra.mxu1 %vm1096_vm0, %v4513_v20 }
 0xadc   : > { %4690 = vmatpush.msrb.mxu0 %v16349_v61 }
 0xadd   : > { %7950 = vmatmul.msk.f32.gmra.mxu2 %vm1096_vm0, %v4516_v51  ;;  %4691 = vmatmul.f32.vlgmr.msrb.gmra.mxu0 %v12397_v55 }
 0xae2   : > { %7954 = vmatmul.msk.f32.gmra.mxu1 %vm1096_vm0, %v4516_v51 }
 0xae5   : > { %7951 = vmatmul.msk.f32.gmra.mxu2 %vm1096_vm0, %v4519_v35  ;;  %4694 = vmatmul.f32.gmra.mxu0 %v12428_v40 }
 0xaea   : > { %7955 = vmatmul.msk.f32.gmra.mxu1 %vm1096_vm0, %v4519_v35 }
 0xaed   : > { %7952 = vmatmul.msk.f32.gmra.mxu2 %vm1096_vm0, %v4522_v9  ;;  %4697 = vmatmul.f32.gmra.mxu0 %v12453_v1 }
 0xaf2   : > { %7956 = vmatmul.msk.f32.gmra.mxu1 %vm1096_vm0, %v4522_v9  ;;  %v16359_v9 = vld [vmem:[#allocation69_spill] sm:$0xff] }
 0xaf5   : > { %4700 = vmatmul.f32.gmra.mxu0 %v4521_v16 }
 0xb37   : > { %v4605_v50 = vpop.f32.mrf.mxu1 }
 0xb39   : > { %v4576_v55 = vpop.f32.mrf.mxu0 }
 0xb3a   : > { %v4577_v54 = vadd.f32 %v4576_v55, %v4530_v52 }
 0xb3c   : > { %v4606_v53 = vadd.f32 %v4605_v50, %v4577_v54 }
 0xb3f   : > { %v4608_v39 = vpop.f32.mrf.mxu1  ;;  %v4663_v44 = vpop.f32.mrf.mxu3 }
 0xb40   : > { %v4664_v20 = vadd.f32 %v4663_v44, %v4530_v52 }
 0xb41   : > { %v4579_v23 = vpop.f32.mrf.mxu0 }
 0xb42   : > { %v4580_v42 = vadd.f32 %v4579_v23, %v4535_v6  ;;  %v16361_v23 = vld [vmem:[#allocation73_spill] sm:$0xff] }
 0xb44   : > { %v4609_v1 = vadd.f32 %v4608_v39, %v4580_v42 }
 0xb47   : > { %v4611_v7 = vpop.f32.mrf.mxu1  ;;  %v4666_v33 = vpop.f32.mrf.mxu3 }
 0xb48   : > { %v4667_v35 = vadd.f32 %v4666_v33, %v4535_v6 }
 0xb49   : > { %v4582_v12 = vpop.f32.mrf.mxu0 }
 0xb4a   : > { %v4583_v26 = vadd.f32 %v4582_v12, %v4540_v4 }
 0xb4c   : > { %v4612_v14 = vadd.f32 %v4611_v7, %v4583_v26 }
 0xb4f   : > { %v4614_v63 = vpop.f32.mrf.mxu1 }
 0xb51   : > { %v4585_v46 = vpop.f32.mrf.mxu0 }
 0xb52   : > { %v4586_v34 = vadd.f32 %v4585_v46, %v12523_v3 }
 0xb54   : > { %v4615_v16 = vadd.f32 %v4614_v63, %v4586_v34 }
 0xb57   : > { %v4721_v31 = vpop.f32.mrf.mxu1 }
 0xb58   : > { %v4634_v22 = vpop.f32.mrf.mxu2 }
 0xb59   : > { %v4635_v40 = vadd.f32 %v4634_v22, %v4606_v53 }
 0xb5a   : > { %v4692_v25 = vpop.f32.mrf.mxu0 }
 0xb5b   : > { %v4733_v47 = vadd.f32 %v4635_v40, %v16350_v38  ;;  %v4693_v19 = vadd.f32 %v4692_v25, %v4664_v20  ;;  %v4669_v40 = vpop.f32.mrf.mxu3 }
 0xb5c   : > { %v4670_v38 = vadd.f32 %v4669_v40, %v4540_v4 }
 0xb5d   : > { %v12526_v8 = vmax.f32 %v4733_v47, 0.0  ;;  %v4722_v51 = vadd.f32 %v4721_v31, %v4693_v19 }
 0xb5f   : > { %16351 = vst [vmem:[#allocation59_spill] sm:$0xff] %v12526_v8  ;;  %4781 = vrot.lane.b32.xlu0 %v12526_v8, %s15995_s22  ;;  %4813 = vrot.lane.b32.xlu2 %v12526_v8, %s16018_s26  ;;  %v4734_v55 = vadd.f32 %v4722_v51, %v16359_v9  ;;  %v4724_v50 = vpop.f32.mrf.mxu1 }
 0xb60   : > { %4845 = vrot.lane.b32.xlu1 %v12526_v8, %s16001_s23  ;;  %v4637_v11 = vpop.f32.mrf.mxu2 }
 0xb61   : > { %v4638_v62 = vadd.f32 %v4637_v11, %v4609_v1  ;;  %v12581_v54 = vmax.f32 %v4734_v55, 0.0  ;;  %v16363_v11 = vld [vmem:[#allocation72_spill] sm:$0xff] }
 0xb62   : > { %v4695_v61 = vpop.f32.mrf.mxu0 }
 0xb63   : > { %v4735_v27 = vadd.f32 %v4638_v62, %v16352_v58  ;;  %v4696_v52 = vadd.f32 %v4695_v61, %v4667_v35  ;;  %16360 = vst [vmem:[#allocation35_spill] sm:$0xff] %v12581_v54  ;;  %v4672_v58 = vpop.f32.mrf.mxu3 }
 0xb64   : > { %v4673_v4 = vadd.f32 %v4672_v58, %v12523_v3 }
 0xb65   : > { %v12535_v0 = vmax.f32 %v4735_v27, 0.0  ;;  %v4725_v53 = vadd.f32 %v4724_v50, %v4696_v52 }
 0xb67   : > { %16353 = vst [vmem:[#allocation48_spill] sm:$0xff] %v12535_v0  ;;  %4847 = vrot.lane.b32.xlu0 %v12535_v0, %s16001_s23  ;;  %4909 = vrot.lane.b32.xlu2 %v12526_v8, %s15999_s11  ;;  %v4736_v22 = vadd.f32 %v4725_v53, %v16361_v23  ;;  %v4727_v39 = vpop.f32.mrf.mxu1 }
 0xb68   : > { %4941 = vrot.lane.b32.xlu1 %v12526_v8, %s15997_s2  ;;  %v4640_v36 = vpop.f32.mrf.mxu2 }
 0xb69   : > { %v4641_v24 = vadd.f32 %v4640_v36, %v4612_v14  ;;  %v12590_v6 = vmax.f32 %v4736_v22, 0.0 }
 0xb6a   : > { %v4698_v42 = vpop.f32.mrf.mxu0 }
 0xb6b   : > { %v4737_v41 = vadd.f32 %v4641_v24, %v16354_v2  ;;  %16362 = vst [vmem:[#allocation54_spill] sm:$0xff] %v12590_v6  ;;  %v4699_v47 = vadd.f32 %v4698_v42, %v4670_v38  ;;  %v16365_v24 = vld [vmem:[#allocation75_spill] sm:$0xff] }
 0xb6d   : > { %v12550_v17 = vmax.f32 %v4737_v41, 0.0  ;;  %v4728_v1 = vadd.f32 %v4727_v39, %v4699_v47 }
 0xb6f   : > { %4943 = vrot.lane.b32.xlu0 %v12535_v0, %s15997_s2  ;;  %4783 = vrot.lane.b32.xlu2 %v12535_v0, %s15995_s22  ;;  %16355 = vst [vmem:[#allocation67_spill] sm:$0xff] %v12550_v17  ;;  %v4738_v62 = vadd.f32 %v4728_v1, %v16363_v11  ;;  %v4730_v7 = vpop.f32.mrf.mxu1 }
 0xb70   : > { %4815 = vrot.lane.b32.xlu1 %v12535_v0, %s16018_s26  ;;  %v4643_v29 = vpop.f32.mrf.mxu2 }
 0xb71   : > { %v4644_v13 = vadd.f32 %v4643_v29, %v4615_v16  ;;  %v12605_v27 = vmax.f32 %v4738_v62, 0.0 }
 0xb72   : > { %v4701_v12 = vpop.f32.mrf.mxu0 }
 0xb73   : > { %v4739_v18 = vadd.f32 %v4644_v13, %v16356_v56  ;;  %16364 = vst [vmem:[#allocation34_spill] sm:$0xff] %v12605_v27  ;;  %v4702_v26 = vadd.f32 %v4701_v12, %v4673_v4 }
 0xb75   : > { %v12566_v49 = vmax.f32 %v4739_v18, 0.0  ;;  %v4731_v36 = vadd.f32 %v4730_v7, %v4702_v26 }
 0xb77   : > { %4817 = vrot.lane.b32.xlu0 %v12550_v17, %s16018_s26  ;;  %4849 = vrot.lane.b32.xlu2 %v12550_v17, %s16001_s23  ;;  %16357 = vst [vmem:[#allocation76_spill] sm:$0xff] %v12566_v49  ;;  %v4740_v2 = vadd.f32 %v4731_v36, %v16365_v24 }
 0xb78   : > { %4911 = vrot.lane.b32.xlu1 %v12535_v0, %s15999_s11 }
 0xb79   : > { %v12623_v3 = vmax.f32 %v4740_v2, 0.0  ;;  %v16373_v2 = vld [vmem:[#allocation71_spill] sm:$0xff] }
 0xb7b   : > { %16366 = vst [vmem:[#allocation74_spill] sm:$0xff] %v12623_v3 }
 0xb7f   : > { %4913 = vrot.lane.b32.xlu0 %v12550_v17, %s15999_s11  ;;  %4945 = vrot.lane.b32.xlu2 %v12550_v17, %s15997_s2 }
 0xb80   : > { %4785 = vrot.lane.b32.xlu1 %v12550_v17, %s15995_s22 }
 0xb87   : > { %4851 = vrot.lane.b32.xlu0 %v12566_v49, %s16001_s23  ;;  %4819 = vrot.lane.b32.xlu2 %v12566_v49, %s16018_s26 }
 0xb88   : > { %4881 = vrot.lane.b32.xlu1 %v12550_v17, %s16358_s18 }
 0xb8f   : > { %4787 = vrot.lane.b32.xlu0 %v12566_v49, %s15995_s22  ;;  %4915 = vrot.lane.b32.xlu2 %v12566_v49, %s15999_s11 }
 0xb90   : > { %4947 = vrot.lane.b32.xlu1 %v12566_v49, %s15997_s2 }
 0xb97   : > { %4883 = vrot.lane.b32.xlu0 %v12566_v49, %s16358_s18  ;;  %4853 = vrot.lane.b32.xlu2 %v12581_v54, %s16001_s23 }
 0xb98   : > { %4789 = vrot.lane.b32.xlu1 %v12581_v54, %s15995_s22 }
 0xb9f   : > { %4821 = vrot.lane.b32.xlu0 %v12581_v54, %s16018_s26  ;;  %4949 = vrot.lane.b32.xlu2 %v12581_v54, %s15997_s2 }
 0xba0   : > { %4855 = vrot.lane.b32.xlu1 %v12590_v6, %s16001_s23 }
 0xba7   : > { %4917 = vrot.lane.b32.xlu0 %v12581_v54, %s15999_s11  ;;  %4823 = vrot.lane.b32.xlu2 %v12590_v6, %s16018_s26 }
 0xba8   : > { %4951 = vrot.lane.b32.xlu1 %v12590_v6, %s15997_s2 }
 0xbaf   : > { %4791 = vrot.lane.b32.xlu0 %v12590_v6, %s15995_s22  ;;  %4919 = vrot.lane.b32.xlu2 %v12590_v6, %s15999_s11 }
 0xbb0   : > { %4825 = vrot.lane.b32.xlu1 %v12605_v27, %s16018_s26 }
 0xbb7   : > { %4857 = vrot.lane.b32.xlu0 %v12605_v27, %s16001_s23  ;;  %4793 = vrot.lane.b32.xlu2 %v12605_v27, %s15995_s22  ;;  %s16367_s22 = smov 17  }
 0xbb8   : > { %4921 = vrot.lane.b32.xlu1 %v12605_v27, %s15999_s11 }
 0xbb9   : > { %v12620_v14 = vpop.permute.xlu2 %4813 }
 0xbbf   : > { %4953 = vrot.lane.b32.xlu0 %v12605_v27, %s15997_s2  ;;  %4889 = vrot.lane.b32.xlu2 %v12605_v27, %s16358_s18 }
 0xbc0   : > { %4859 = vrot.lane.b32.xlu1 %v12623_v3, %s16001_s23  ;;  %s16371_s23 = sld [smem:[#allocation11_spill]] }
 0xbc1   : > { %v12631_v41 = vpop.permute.xlu2 %4909 }
 0xbc6   : > { %v5019_v23 = vld [vmem:[%s16371_s23 + $0x10] sm:$0xff]  ;;  %v5020_v22 = vld [vmem:[%s16371_s23 + $0x18] sm:$0xff]  ;;  %v5018_v47 = vld [vmem:[%s16371_s23 + $0x8] sm:$0xff] }
 0xbc7   : > { %4887 = vrot.lane.b32.xlu0 %v12590_v6, %s16358_s18  ;;  %4955 = vrot.lane.b32.xlu2 %v12623_v3, %s15997_s2  ;;  %s16368_s2 = smov 16   ;;  %v5017_v39 = vld [vmem:[%s16371_s23] sm:$0xff] }
 0xbc8   : > { %4755 = vrot.lane.b32.xlu1 %v12566_v49, %s16367_s22 }
 0xbc9   : > { %v12639_v46 = vpop.permute.xlu2 %4783 }
 0xbcf   : > { %4827 = vrot.lane.b32.xlu0 %v12623_v3, %s16018_s26  ;;  %4879 = vrot.lane.b32.xlu2 %v12535_v0, %s16358_s18  ;;  %s16376_s26 = sld [smem:[#allocation10_spill]] }
 0xbd0   : > { %4885 = vrot.lane.b32.xlu1 %v12581_v54, %s16358_s18 }
 0xbd1   : > { %v12647_v34 = vpop.permute.xlu0 %4781  ;;  %v12649_v63 = vpop.permute.xlu2 %4849 }
 0xbd2   : > { %v12651_v29 = vpop.permute.xlu1 %4845 }
 0xbd7   : > { %4923 = vrot.lane.b32.xlu0 %v12623_v3, %s15999_s11  ;;  %4753 = vrot.lane.b32.xlu2 %v12550_v17, %s16367_s22  ;;  %s16370_s11 = smov 111  }
 0xbd8   : > { %4795 = vrot.lane.b32.xlu1 %v12623_v3, %s16368_s2 }
 0xbd9   : > { %v12659_v16 = vpop.permute.xlu0 %4847  ;;  %v12661_v13 = vpop.permute.xlu2 %4945 }
 0xbda   : > { %v12663_v56 = vpop.permute.xlu1 %4941 }
 0xbdf   : > { %4877 = vrot.lane.b32.xlu0 %v12526_v8, %s16358_s18  ;;  %4763 = vrot.lane.b32.xlu2 %v12623_v3, %s16367_s22 }
 0xbe0   : > { %4891 = vrot.lane.b32.xlu1 %v12623_v3, %s16358_s18 }
 0xbe1   : > { %v12671_v18 = vpop.permute.xlu0 %4943  ;;  %v12673_v44 = vpop.permute.xlu2 %4819 }
 0xbe2   : > { %16369 = vst [vmem:[#allocation53_spill] sm:$0xff] %v12671_v18  ;;  %v12675_v25 = vpop.permute.xlu1 %4815 }
 0xbe7   : > { %4761 = vrot.lane.b32.xlu0 %v12605_v27, %s16367_s22  ;;  %4759 = vrot.lane.b32.xlu2 %v12590_v6, %s16367_s22 }
 0xbe8   : > { %4751 = vrot.lane.b32.xlu1 %v12535_v0, %s16367_s22 }
 0xbe9   : > { %v12683_v20 = vpop.permute.xlu0 %4817  ;;  %v12685_v19 = vpop.permute.xlu2 %4915 }
 0xbea   : > { %v12687_v31 = vpop.permute.xlu1 %4911 }
 0xbef   : > { %4749 = vrot.lane.b32.xlu0 %v12526_v8, %s16367_s22  ;;  %4979 = vrot.lane.b32.xlu2 %v12566_v49, %s16370_s11 }
 0xbf0   : > { %4757 = vrot.lane.b32.xlu1 %v12581_v54, %s16367_s22 }
 0xbf1   : > { %v12695_v33 = vpop.permute.xlu0 %4913  ;;  %v4854_v51 = vpop.permute.xlu2 %4853 }
 0xbf2   : > { %v12697_v61 = vpop.permute.xlu1 %4785 }
 0xbf7   : > { %4975 = vrot.lane.b32.xlu0 %v12535_v0, %s16370_s11  ;;  %4985 = vrot.lane.b32.xlu2 %v12605_v27, %s16370_s11 }
 0xbf8   : > { %4977 = vrot.lane.b32.xlu1 %v12550_v17, %s16370_s11 }
 0xbf9   : > { %v4852_v35 = vpop.permute.xlu0 %4851  ;;  %v12705_v9 = vpop.permute.xlu2 %4949 }
 0xbfa   : > { %v12707_v55 = vpop.permute.xlu1 %4881  ;;  %v4957_v28 = vsel %vm1829_vm5, %v12663_v56, %v12705_v9 }
 0xbff   : > { %4987 = vrot.lane.b32.xlu0 %v12623_v3, %s16370_s11  ;;  %4973 = vrot.lane.b32.xlu2 %v12526_v8, %s16370_s11 }
 0xc00   : > { %4983 = vrot.lane.b32.xlu1 %v12590_v6, %s16370_s11 }
 0xc01   : > { %v12715_v52 = vpop.permute.xlu0 %4787  ;;  %v12717_v50 = vpop.permute.xlu2 %4823 }
 0xc02   : > { %v12719_v53 = vpop.permute.xlu1 %4947 }
 0xc07   : > { %4981 = vrot.lane.b32.xlu0 %v12581_v54, %s16370_s11  ;;  %5033 = vperm.xlu2 %8072, %v5019_v23  }
 0xc08   : > { %5038 = vperm.xlu1 %8071, %v5020_v22  }
 0xc09   : > { %v12725_v40 = vpop.permute.xlu0 %4883  ;;  %v12727_v42 = vpop.permute.xlu2 %4919 }
 0xc0a   : > { %v12729_v38 = vpop.permute.xlu1 %4789 }
 0xc0f   : > { %5028 = vperm.xlu0 %8070, %v5018_v47  }
 0xc10   : > { %5023 = vperm.xlu1 %8071, %v5017_v39  }
 0xc11   : > { %v12733_v1 = vpop.permute.xlu0 %4821  ;;  %v12735_v11 = vpop.permute.xlu2 %4793 }
 0xc12   : > { %v4856_v62 = vpop.permute.xlu1 %4855 }
 0xc19   : > { %v12737_v58 = vpop.permute.xlu0 %4917  ;;  %v12739_v12 = vpop.permute.xlu2 %4889 }
 0xc1a   : > { %v12741_v4 = vpop.permute.xlu1 %4951 }
 0xc1b   : > { %16372 = vst [vmem:[#allocation30_spill] sm:$0xff] %v12741_v4  ;;  %v4958_v54 = vsel %vm1829_vm5, %v12671_v18, %v12741_v4  ;;  %v16375_v18 = vld [vmem:[#allocation23_spill] sm:$0xff] }
 0xc21   : > { %v12743_v26 = vpop.permute.xlu0 %4791  ;;  %v12745_v7 = vpop.permute.xlu2 %4955 }
 0xc22   : > { %v4960_v36 = vsel %vm1829_vm5, %v12719_v53, %v12745_v7  ;;  %v4826_v24 = vpop.permute.xlu1 %4825 }
 0xc23   : > { %v4971_v23 = vmul.f32 %v4960_v36, %v16373_v2 }
 0xc25   : > { %5082 = vmatpush.msra.mxu3 %v4971_v23 }
 0xc29   : > { %v4858_v22 = vpop.permute.xlu0 %4857 }
 0xc2a   : > { %v12752_v47 = vpop.permute.xlu1 %4921  ;;  %v4863_v6 = vsel %vm1613_vm3, %v12649_v63, %v4858_v22  ;;  %v4867_v27 = vsel %vm1613_vm3, %v4858_v22, %v12649_v63  ;;  %v4862_v63 = vsel %vm1613_vm3, %v12659_v16, %v4856_v62  ;;  %v4866_v22 = vsel %vm1613_vm3, %v4856_v62, %v12659_v16 }
 0xc2b   : > { %v4965_v16 = vmul.f32 %v4957_v28, %v16373_v2  ;;  %v4831_v62 = vsel %vm1541_vm6, %v12683_v20, %v4826_v24 }
 0xc31   : > { %v12754_v39 = vpop.permute.xlu0 %4953 }
 0xc32   : > { %v4959_v36 = vsel %vm1829_vm5, %v12661_v13, %v12754_v39  ;;  %v4860_v23 = vpop.permute.xlu1 %4859 }
 0xc33   : > { %v4864_v3 = vsel %vm1613_vm3, %v4852_v35, %v4860_v23  ;;  %v4868_v32 = vsel %vm1613_vm3, %v4860_v23, %v4852_v35  ;;  %v4969_v60 = vmul.f32 %v4959_v36, %v16373_v2  ;;  %v4967_v35 = vmul.f32 %v4958_v54, %v16373_v2 }
 0xc34   : > { %v4875_v4 = vmul.f32 %v4868_v32, %v16374_v21  ;;  %v4876_v59 = vmul.f32 %v4864_v3, %v16375_v18  ;;  %v4873_v36 = vmul.f32 %v4867_v27, %v16374_v21  ;;  %v4874_v23 = vmul.f32 %v4863_v6, %v16375_v18  ;;  %v12801_v6 = vpop.permute.xlu2 %4879 }
 0xc35   : > { %5083 = vmatpush.msra.mxu3 %v4969_v60  ;;  %v4861_v32 = vsel %vm1613_vm3, %v12651_v29, %v4854_v51  ;;  %v4865_v3 = vsel %vm1613_vm3, %v4854_v51, %v12651_v29  ;;  %v4871_v60 = vmul.f32 %v4866_v22, %v16374_v21 }
 0xc36   : > { %5053 = vmatpush.msra.mxu2 %v4875_v4  ;;  %5140 = vmatpush.msra.mxu1 %v4876_v59  ;;  %v4872_v59 = vmul.f32 %v4862_v63, %v16375_v18  ;;  %v4869_v29 = vmul.f32 %v4865_v3, %v16374_v21  ;;  %v4870_v51 = vmul.f32 %v4861_v32, %v16375_v18 }
 0xc37   : > { %5084 = vmatpush.msra.mxu3 %v4967_v35  ;;  %v4835_v4 = vsel %vm1541_vm6, %v4826_v24, %v12683_v20  ;;  %v4830_v32 = vsel %vm1541_vm6, %v12675_v25, %v12717_v50  ;;  %v4834_v20 = vsel %vm1541_vm6, %v12717_v50, %v12675_v25  ;;  %v4842_v3 = vmul.f32 %v4831_v62, %v9437_v10 }
 0xc38   : > { %5054 = vmatpush.msra.mxu2 %v4873_v36  ;;  %5141 = vmatpush.msra.mxu1 %v4874_v23  ;;  %v4839_v25 = vmul.f32 %v4834_v20, %v16259_v30  ;;  %v4840_v50 = vmul.f32 %v4830_v32, %v9437_v10  ;;  %v4798_v32 = vsel %vm1469_vm1, %v12639_v46, %v12743_v26 }
 0xc39   : > { %v12799_v54 = vpop.permute.xlu0 %4887  ;;  %5085 = vmatpush.msra.mxu3 %v4965_v16  ;;  %v4829_v16 = vsel %vm1541_vm6, %v12620_v14, %v12733_v1 }
 0xc3a   : > { %5055 = vmatpush.msra.mxu2 %v4871_v60  ;;  %5142 = vmatpush.msra.mxu1 %v4872_v59  ;;  %v12803_v27 = vpop.permute.xlu1 %4755  ;;  %v4833_v60 = vsel %vm1541_vm6, %v12733_v1, %v12620_v14  ;;  %v4803_v14 = vsel %vm1469_vm1, %v12735_v11, %v12697_v61  ;;  %v4927_v1 = vsel %vm1757_vm9, %v12695_v33, %v12752_v47 }
 0xc3b   : > { %v4937_v20 = vmul.f32 %v4927_v1, %v9408_v15 }
 0xc3c   : > { %5056 = vmatpush.msra.mxu2 %v4869_v29  ;;  %5143 = vmatpush.msra.mxu1 %v4870_v51  ;;  %v12831_v24 = vpop.permute.xlu2 %4753  ;;  %v4837_v29 = vmul.f32 %v4833_v60, %v16259_v30  ;;  %v4838_v51 = vmul.f32 %v4829_v16, %v9437_v10  ;;  %v4809_v16 = vmul.f32 %v4803_v14, %v16260_v57 }
 0xc41   : > { %v4828_v28 = vpop.permute.xlu0 %4827 }
 0xc42   : > { %v4832_v63 = vsel %vm1541_vm6, %v12673_v44, %v4828_v28  ;;  %v4836_v22 = vsel %vm1541_vm6, %v4828_v28, %v12673_v44  ;;  %v12819_v35 = vpop.permute.xlu1 %4885  ;;  %v4841_v44 = vmul.f32 %v4835_v4, %v16259_v30  ;;  %v4799_v28 = vsel %vm1469_vm1, %v12697_v61, %v12735_v11 }
 0xc43   : > { %v4843_v36 = vmul.f32 %v4836_v22, %v16259_v30  ;;  %v4844_v23 = vmul.f32 %v4832_v63, %v9437_v10  ;;  %v4926_v11 = vsel %vm1757_vm9, %v12687_v31, %v12727_v42  ;;  %v4810_v60 = vmul.f32 %v4799_v28, %v16261_v5 }
 0xc45   : > { %5057 = vmatpush.msra.mxu2 %v4843_v36  ;;  %5144 = vmatpush.msra.mxu1 %v4844_v23 }
 0xc47   : > { %5058 = vmatpush.msra.mxu2 %v4841_v44  ;;  %5145 = vmatpush.msra.mxu1 %v4842_v3  ;;  %v4925_v44 = vsel %vm1757_vm9, %v12631_v41, %v12737_v58  ;;  %v4764_v3 = vpop.permute.xlu2 %4763 }
 0xc48   : > { %v4933_v14 = vmul.f32 %v4925_v44, %v9408_v15 }
 0xc49   : > { %v12845_v59 = vpop.permute.xlu0 %4923  ;;  %5059 = vmatpush.msra.mxu2 %v4839_v25  ;;  %5146 = vmatpush.msra.mxu1 %v4840_v50  ;;  %v4935_v25 = vmul.f32 %v4926_v11, %v9408_v15 }
 0xc4a   : > { %v4928_v62 = vsel %vm1757_vm9, %v12685_v19, %v12845_v59  ;;  %v4796_v4 = vpop.permute.xlu1 %4795 }
 0xc4b   : > { %v4800_v63 = vsel %vm1469_vm1, %v12715_v52, %v4796_v4  ;;  %v4804_v22 = vsel %vm1469_vm1, %v4796_v4, %v12715_v52  ;;  %5060 = vmatpush.msra.mxu2 %v4837_v29  ;;  %5147 = vmatpush.msra.mxu1 %v4838_v51  ;;  %v4939_v61 = vmul.f32 %v4928_v62, %v9408_v15 }
 0xc4c   : > { %v4811_v36 = vmul.f32 %v4804_v22, %v16260_v57  ;;  %v4812_v23 = vmul.f32 %v4800_v63, %v16261_v5  ;;  %v4802_v52 = vsel %vm1469_vm1, %v12743_v26, %v12639_v46  ;;  %v4797_v46 = vsel %vm1469_vm1, %v12647_v34, %v12729_v38 }
 0xc4d   : > { %5086 = vmatpush.msra.mxu3 %v4939_v61  ;;  %v4801_v26 = vsel %vm1469_vm1, %v12729_v38, %v12647_v34  ;;  %v4807_v50 = vmul.f32 %v4802_v52, %v16260_v57  ;;  %v4808_v29 = vmul.f32 %v4798_v32, %v16261_v5  ;;  %v4772_v51 = vsel %vm1398_vm2, %v4764_v3, %v12803_v27 }
 0xc4e   : > { %5061 = vmatpush.msra.mxu2 %v4811_v36  ;;  %5148 = vmatpush.msra.mxu1 %v4812_v23  ;;  %v4768_v34 = vsel %vm1398_vm2, %v12803_v27, %v4764_v3  ;;  %v4805_v1 = vmul.f32 %v4801_v26, %v16260_v57  ;;  %v4806_v62 = vmul.f32 %v4797_v46, %v16261_v5 }
 0xc4f   : > { %5087 = vmatpush.msra.mxu3 %v4937_v20  ;;  %v4895_v4 = vsel %vm1685_vm4, %v12707_v55, %v12739_v12  ;;  %v4779_v27 = vmul.f32 %v4772_v51, %v16262_v48  ;;  %v4894_v61 = vsel %vm1685_vm4, %v12801_v6, %v12799_v54  ;;  %v4780_v11 = vmul.f32 %v4768_v34, %v16263_v43  ;;  %v4760_v20 = vpop.permute.xlu2 %4759  ;;  %v12957_v34 = vld [vmem:[%s16376_s26 + $0x8] sm:$0xff] }
 0xc50   : > { %5062 = vmatpush.msra.mxu2 %v4809_v16  ;;  %5149 = vmatpush.msra.mxu1 %v4810_v60  ;;  %v4905_v36 = vmul.f32 %v4895_v4, %v8925_v45  ;;  %v4903_v32 = vmul.f32 %v4894_v61, %v8925_v45  ;;  %v4963_v61 = vsel %vm1829_vm5, %v12754_v39, %v12661_v13 }
 0xc51   : > { %v12907_v28 = vpop.permute.xlu0 %4877  ;;  %5088 = vmatpush.msra.mxu3 %v4935_v25  ;;  %v4961_v13 = vsel %vm1829_vm5, %v12705_v9, %v12663_v56  ;;  %v4931_v56 = vsel %vm1757_vm9, %v12752_v47, %v12695_v33  ;;  %v16380_v9 = vld [vmem:[#allocation38_spill] sm:$0xff]  ;;  %v4929_v33 = vsel %vm1757_vm9, %v12737_v58, %v12631_v41  ;;  %v16381_v41 = vld [vmem:[#allocation52_spill] sm:$0xff] }
 0xc52   : > { %5063 = vmatpush.msra.mxu2 %v4807_v50  ;;  %5150 = vmatpush.msra.mxu1 %v4808_v29  ;;  %v12913_v38 = vpop.permute.xlu1 %4891  ;;  %v4893_v23 = vsel %vm1685_vm4, %v12907_v28, %v12819_v35 }
 0xc53   : > { %v4896_v63 = vsel %vm1685_vm4, %v12725_v40, %v12913_v38  ;;  %5089 = vmatpush.msra.mxu3 %v4933_v14  ;;  %v4901_v60 = vmul.f32 %v4893_v23, %v8925_v45  ;;  %v16379_v23 = vld [vmem:[#allocation30_spill] sm:$0xff] }
 0xc54   : > { %5064 = vmatpush.msra.mxu2 %v4805_v1  ;;  %5151 = vmatpush.msra.mxu1 %v4806_v62  ;;  %v4907_v22 = vmul.f32 %v4896_v63, %v8925_v45  ;;  %v4964_v1 = vsel %vm1829_vm5, %v12745_v7, %v12719_v53  ;;  %v16377_v7 = vld [vmem:[#allocation25_spill] sm:$0xff] }
 0xc56   : > { %5065 = vmatpush.msra.mxu2 %v4779_v27  ;;  %5090 = vmatpush.msra.mxu3 %v4907_v22  ;;  %v5005_v22 = vld [vmem:[%s16376_s26] sm:$0xff] }
 0xc57   : > { %5152 = vmatpush.msra.mxu1 %v4780_v11  ;;  %v4980_v53 = vpop.permute.xlu2 %4979  ;;  %v4972_v11 = vmul.f32 %v4964_v1, %v16377_v7 }
 0xc58   : > { %5091 = vmatpush.msra.mxu3 %v4905_v36  ;;  %v16378_v36 = vld [vmem:[#allocation53_spill] sm:$0xff] }
 0xc59   : > { %v4762_v52 = vpop.permute.xlu0 %4761 }
 0xc5a   : > { %v4767_v44 = vsel %vm1398_vm2, %v12831_v24, %v4762_v52  ;;  %v4771_v3 = vsel %vm1398_vm2, %v4762_v52, %v12831_v24  ;;  %5092 = vmatpush.msra.mxu3 %v4903_v32  ;;  %v4752_v16 = vpop.permute.xlu1 %4751  ;;  %v4962_v32 = vsel %vm1829_vm5, %v16379_v23, %v16378_v36  ;;  %v4970_v52 = vmul.f32 %v4963_v61, %v16377_v7  ;;  %v16383_v61 = vld [vmem:[#allocation40_spill] sm:$0xff] }
 0xc5b   : > { %v4766_v46 = vsel %vm1398_vm2, %v4752_v16, %v4760_v20  ;;  %v4770_v26 = vsel %vm1398_vm2, %v4760_v20, %v4752_v16  ;;  %v4777_v25 = vmul.f32 %v4771_v3, %v16262_v48  ;;  %v4778_v50 = vmul.f32 %v4767_v44, %v16263_v43  ;;  %v12988_v3 = vld [vmem:[%s16376_s26 + $0x20] sm:$0xff] }
 0xc5c   : > { %5093 = vmatpush.msra.mxu3 %v4901_v60  ;;  %v4775_v24 = vmul.f32 %v4770_v26, %v16262_v48  ;;  %v4776_v29 = vmul.f32 %v4766_v46, %v16263_v43  ;;  %v4968_v44 = vmul.f32 %v4962_v32, %v16377_v7  ;;  %v4932_v16 = vsel %vm1757_vm9, %v12845_v59, %v12685_v19  ;;  %v5008_v46 = vld [vmem:[%s16376_s26 + $0x18] sm:$0xff] }
 0xc5d   : > { %5066 = vmatpush.msra.mxu2 %v4777_v25  ;;  %5153 = vmatpush.msra.mxu1 %v4778_v50  ;;  %v4966_v60 = vmul.f32 %v4961_v13, %v16377_v7  ;;  %v4940_v26 = vmul.f32 %v4932_v16, %v16380_v9  ;;  %v4930_v25 = vsel %vm1757_vm9, %v12727_v42, %v12687_v31 }
 0xc5e   : > { %5094 = vmatpush.msra.mxu3 %v12566_v49  ;;  %v4938_v59 = vmul.f32 %v4931_v56, %v16380_v9  ;;  %v4898_v36 = vsel %vm1685_vm4, %v12799_v54, %v12801_v6  ;;  %v4897_v32 = vsel %vm1685_vm4, %v12819_v35, %v12907_v28  ;;  %v16384_v56 = vld [vmem:[#allocation74_spill] sm:$0xff] }
 0xc5f   : > { %5067 = vmatpush.msra.mxu2 %v4775_v24  ;;  %5154 = vmatpush.msra.mxu1 %v4776_v29  ;;  %v4986_v19 = vpop.permute.xlu2 %4985  ;;  %v4936_v24 = vmul.f32 %v4930_v25, %v16380_v9  ;;  %v4900_v29 = vsel %vm1685_vm4, %v12913_v38, %v12725_v40  ;;  %v4899_v40 = vsel %vm1685_vm4, %v12739_v12, %v12707_v55  ;;  %v5010_v25 = vld [vmem:[%s16376_s26 + $0x28] sm:$0xff] }
 0xc60   : > { %5095 = vmatpush.msra.mxu3 %v12550_v17  ;;  %v4906_v12 = vmul.f32 %v4899_v40, %v16383_v61  ;;  %v4902_v16 = vmul.f32 %v4897_v32, %v16383_v61 }
 0xc61   : > { %v4750_v51 = vpop.permute.xlu0 %4749 }
 0xc62   : > { %5096 = vmatpush.msra.mxu3 %v12535_v0  ;;  %v4758_v14 = vpop.permute.xlu1 %4757 }
 0xc63   : > { %v4765_v62 = vsel %vm1398_vm2, %v4750_v51, %v4758_v14  ;;  %v4769_v4 = vsel %vm1398_vm2, %v4758_v14, %v4750_v51  ;;  %v16382_v14 = vld [vmem:[#allocation46_spill] sm:$0xff] }
 0xc64   : > { %5097 = vmatpush.msra.mxu3 %v12526_v8  ;;  %v4773_v63 = vmul.f32 %v4769_v4, %v16262_v48  ;;  %v4774_v27 = vmul.f32 %v4765_v62, %v16263_v43  ;;  %v5012_v62 = vld [vmem:[%s16376_s26 + $0x38] sm:$0xff] }
 0xc65   : > { %5098 = vmatmul.f32.vlgmr.msra.gmra.mxu3 %v12957_v34 }
 0xc66   : > { %5068 = vmatpush.msra.mxu2 %v4773_v63  ;;  %5155 = vmatpush.msra.mxu1 %v4774_v27  ;;  %v4934_v63 = vmul.f32 %v4929_v33, %v16380_v9  ;;  %v5011_v27 = vld [vmem:[%s16376_s26 + $0x30] sm:$0xff]  ;;  %v5013_v33 = vld [vmem:[%s16376_s26 + $0x40] sm:$0xff] }
 0xc67   : > { %5069 = vmatmul.f32.vlgmr.msra.gmra.mxu2 %v5005_v22  ;;  %5156 = vmatmul.f32.vlgmr.msra.gmra.mxu1 %v5005_v22 }
 0xc68   : > { %5169 = vmatpush.msrb.mxu2 %v4972_v11 }
 0xc69   : > { %v4976_v39 = vpop.permute.xlu0 %4975 }
 0xc6a   : > { %5170 = vmatpush.msrb.mxu2 %v4970_v52  ;;  %v4978_v20 = vpop.permute.xlu1 %4977  ;;  %v4974_v52 = vpop.permute.xlu2 %4973 }
 0xc6b   : > { %v4991_v51 = vsel %vm1901_vm8, %v4978_v20, %v4986_v19  ;;  %v4995_v4 = vsel %vm1901_vm8, %v4986_v19, %v4978_v20  ;;  %v4904_v20 = vmul.f32 %v4898_v36, %v16383_v61  ;;  %v16386_v19 = vld [vmem:[#allocation54_spill] sm:$0xff] }
 0xc6c   : > { %5171 = vmatpush.msrb.mxu2 %v4968_v44  ;;  %v5001_v11 = vmul.f32 %v4991_v51, %v16381_v41  ;;  %v5002_v55 = vmul.f32 %v4995_v4, %v16382_v14  ;;  %v5007_v44 = vld [vmem:[%s16376_s26 + $0x10] sm:$0xff] }
 0xc6d   : > { %5101 = vmatmul.f32.gmra.mxu3 %v12988_v3 }
 0xc6e   : > { %5172 = vmatpush.msrb.mxu2 %v4966_v60  ;;  %v5014_v60 = vld [vmem:[%s16376_s26 + $0x48] sm:$0xff] }
 0xc6f   : > { %5072 = vmatmul.f32.gmra.mxu2 %v5008_v46  ;;  %5159 = vmatmul.f32.gmra.mxu1 %v5008_v46  ;;  %v5015_v46 = vld [vmem:[%s16376_s26 + $0x50] sm:$0xff] }
 0xc70   : > { %5173 = vmatpush.msrb.mxu2 %v4940_v26  ;;  %v16385_v26 = vld [vmem:[#allocation34_spill] sm:$0xff] }
 0xc71   : > { %v4988_v47 = vpop.permute.xlu0 %4987 }
 0xc72   : > { %5174 = vmatpush.msrb.mxu2 %v4938_v59  ;;  %v4992_v50 = vsel %vm1901_vm8, %v4980_v53, %v4988_v47  ;;  %v4996_v31 = vsel %vm1901_vm8, %v4988_v47, %v4980_v53  ;;  %v4984_v42 = vpop.permute.xlu1 %4983  ;;  %v4908_v53 = vmul.f32 %v4900_v29, %v16383_v61  ;;  %v16387_v59 = vld [vmem:[#allocation35_spill] sm:$0xff]  ;;  %v5016_v47 = vld [vmem:[%s16376_s26 + $0x58] sm:$0xff] }
 0xc73   : > { %v5003_v58 = vmul.f32 %v4992_v50, %v16381_v41  ;;  %v5004_v1 = vmul.f32 %v4996_v31, %v16382_v14  ;;  %v4990_v38 = vsel %vm1901_vm8, %v4976_v39, %v4984_v42  ;;  %v4994_v22 = vsel %vm1901_vm8, %v4984_v42, %v4976_v39 }
 0xc74   : > { %5175 = vmatpush.msrb.mxu2 %v4936_v24  ;;  %v4999_v23 = vmul.f32 %v4990_v38, %v16381_v41  ;;  %v5000_v6 = vmul.f32 %v4994_v22, %v16382_v14 }
 0xc75   : > { %5123 = vmatpush.msra.mxu0 %v5003_v58  ;;  %5210 = vmatpush.msrb.mxu3 %v5004_v1 }
 0xc76   : > { %5176 = vmatpush.msrb.mxu2 %v4934_v63  ;;  %5104 = vmatmul.f32.gmra.mxu3 %v5012_v62 }
 0xc77   : > { %5075 = vmatmul.f32.gmra.mxu2 %v5011_v27  ;;  %5162 = vmatmul.f32.gmra.mxu1 %v5011_v27 }
 0xc78   : > { %5177 = vmatpush.msrb.mxu2 %v4908_v53  ;;  %5124 = vmatpush.msra.mxu0 %v5001_v11  ;;  %v5034_v11 = vpop.permute.xlu2 %5033 }
 0xc79   : > { %5211 = vmatpush.msrb.mxu3 %v5002_v55  ;;  %v4982_v54 = vpop.permute.xlu0 %4981 }
 0xc7a   : > { %5178 = vmatpush.msrb.mxu2 %v4906_v12  ;;  %v4989_v13 = vsel %vm1901_vm8, %v4974_v52, %v4982_v54  ;;  %v4993_v39 = vsel %vm1901_vm8, %v4982_v54, %v4974_v52  ;;  %5125 = vmatpush.msra.mxu0 %v4999_v23  ;;  %v13079_v50 = vpop.permute.xlu1 %5038 }
 0xc7b   : > { %5212 = vmatpush.msrb.mxu3 %v5000_v6  ;;  %v4997_v35 = vmul.f32 %v4989_v13, %v16381_v41  ;;  %v4998_v28 = vmul.f32 %v4993_v39, %v16382_v14 }
 0xc7c   : > { %5179 = vmatpush.msrb.mxu2 %v4904_v20 }
 0xc7d   : > { %5126 = vmatpush.msra.mxu0 %v4997_v35  ;;  %5213 = vmatpush.msrb.mxu3 %v4998_v28 }
 0xc7e   : > { %5180 = vmatpush.msrb.mxu2 %v4902_v16  ;;  %7957 = vmatmul.msk.f32.vlgmr.msra.gmra.mxu0 %vm1096_vm0, %v5007_v44 }
 0xc7f   : > { %5078 = vmatmul.f32.gmra.mxu2 %v5014_v60  ;;  %5165 = vmatmul.f32.gmra.mxu1 %v5014_v60 }
 0xc80   : > { %5181 = vmatpush.msrb.mxu2 %v16384_v56  ;;  %5107 = vmatmul.f32.gmra.mxu3 %v5015_v46 }
 0xc81   : > { %v5029_v1 = vpop.permute.xlu0 %5028 }
 0xc82   : > { %5182 = vmatpush.msrb.mxu2 %v16385_v26  ;;  %v5024_v31 = vpop.permute.xlu1 %5023 }
 0xc84   : > { %5183 = vmatpush.msrb.mxu2 %v16386_v19 }
 0xc86   : > { %5184 = vmatpush.msrb.mxu2 %v16387_v59  ;;  %7958 = vmatmul.msk.f32.gmra.mxu0 %vm1096_vm0, %v5010_v25 }
 0xc87   : > { %5185 = vmatmul.f32.vlgmr.msrb.gmra.mxu2 %v12957_v34 }
 0xc88   : > { %7961 = vmatmul.msk.f32.vlgmr.msrb.gmra.mxu3 %vm1096_vm0, %v5007_v44 }
 0xc8e   : > { %7959 = vmatmul.msk.f32.gmra.mxu0 %vm1096_vm0, %v5013_v33 }
 0xc8f   : > { %5188 = vmatmul.f32.gmra.mxu2 %v12988_v3 }
 0xc90   : > { %7962 = vmatmul.msk.f32.gmra.mxu3 %vm1096_vm0, %v5010_v25 }
 0xc96   : > { %7960 = vmatmul.msk.f32.gmra.mxu0 %vm1096_vm0, %v5016_v47 }
 0xc97   : > { %5191 = vmatmul.f32.gmra.mxu2 %v5012_v62 }
 0xc98   : > { %7963 = vmatmul.msk.f32.gmra.mxu3 %vm1096_vm0, %v5013_v33 }
 0xc9f   : > { %5194 = vmatmul.f32.gmra.mxu2 %v5015_v46 }
 0xca0   : > { %7964 = vmatmul.msk.f32.gmra.mxu3 %vm1096_vm0, %v5016_v47 }
 0xce4   : > { %v5157_v44 = vpop.f32.mrf.mxu1 }
 0xce5   : > { %v5158_v60 = vadd.f32 %v5157_v44, %v5024_v31 }
 0xce8   : > { %v5099_v42 = vpop.f32.mrf.mxu3 }
 0xcea   : > { %v5070_v34 = vpop.f32.mrf.mxu2 }
 0xceb   : > { %v5071_v24 = vadd.f32 %v5070_v34, %v5024_v31 }
 0xcec   : > { %v5160_v33 = vpop.f32.mrf.mxu1 }
 0xced   : > { %v5100_v29 = vadd.f32 %v5099_v42, %v5071_v24  ;;  %v5161_v42 = vadd.f32 %v5160_v33, %v5029_v1 }
 0xcf0   : > { %v5102_v62 = vpop.f32.mrf.mxu3 }
 0xcf2   : > { %v5073_v51 = vpop.f32.mrf.mxu2 }
 0xcf3   : > { %v5074_v4 = vadd.f32 %v5073_v51, %v5029_v1 }
 0xcf5   : > { %v5103_v27 = vadd.f32 %v5102_v62, %v5074_v4 }
 0xcf9   : > { %v5105_v55 = vpop.f32.mrf.mxu3 }
 0xcfa   : > { %v5076_v53 = vpop.f32.mrf.mxu2 }
 0xcfb   : > { %v5128_v3 = vpop.f32.mrf.mxu0  ;;  %v5077_v36 = vadd.f32 %v5076_v53, %v5034_v11 }
 0xcfc   : > { %v5129_v58 = vadd.f32 %v5128_v3, %v5100_v29 }
 0xcfd   : > { %v5106_v23 = vadd.f32 %v5105_v55, %v5077_v36 }
 0xcfe   : > { %v13081_v63 = vmax.f32 %v5129_v58, 0.0  ;;  %v5163_v58 = vpop.f32.mrf.mxu1 }
 0xcff   : > { %v5164_v4 = vadd.f32 %v5163_v58, %v5034_v11 }
 0xd00   : > { %16388 = vst [vmem:[#allocation64_spill] sm:$0xff] %v13081_v63  ;;  %5267 = vrot.lane.b32.xlu2 %v13081_v63, %s16368_s2  ;;  %5299 = vrot.lane.b32.xlu1 %v13081_v63, %s16389_s1 }
 0xd01   : > { %5331 = vrot.lane.b32.xlu0 %v13081_v63, %s16390_s3 }
 0xd02   : > { %v5079_v54 = vpop.f32.mrf.mxu2 }
 0xd03   : > { %v5131_v40 = vpop.f32.mrf.mxu0  ;;  %v5080_v6 = vadd.f32 %v5079_v54, %v13079_v50  ;;  %v5108_v13 = vpop.f32.mrf.mxu3 }
 0xd04   : > { %v5132_v38 = vadd.f32 %v5131_v40, %v5103_v27 }
 0xd05   : > { %v5109_v20 = vadd.f32 %v5108_v13, %v5080_v6 }
 0xd06   : > { %v13089_v22 = vmax.f32 %v5132_v38, 0.0  ;;  %v5166_v53 = vpop.f32.mrf.mxu1 }
 0xd07   : > { %v5167_v36 = vadd.f32 %v5166_v53, %v13079_v50  ;;  %v5506_v53 = vld [vmem:[%s16398_s8 + $0x18] sm:$0xff] }
 0xd08   : > { %16391 = vst [vmem:[#allocation50_spill] sm:$0xff] %v13089_v22  ;;  %5333 = vrot.lane.b32.xlu2 %v13089_v22, %s16390_s3  ;;  %5395 = vrot.lane.b32.xlu1 %v13081_v63, %s16392_s4 }
 0xd09   : > { %5427 = vrot.lane.b32.xlu0 %v13081_v63, %s16393_s5 }
 0xd0a   : > { %v5186_v16 = vpop.f32.mrf.mxu2 }
 0xd0b   : > { %v5134_v12 = vpop.f32.mrf.mxu0  ;;  %v5187_v46 = vadd.f32 %v5186_v16, %v5158_v60  ;;  %v5215_v25 = vpop.f32.mrf.mxu3 }
 0xd0c   : > { %v5135_v32 = vadd.f32 %v5134_v12, %v5106_v23 }
 0xd0d   : > { %v5216_v47 = vadd.f32 %v5215_v25, %v5187_v46 }
 0xd0e   : > { %v13103_v52 = vmax.f32 %v5135_v32, 0.0 }
 0xd0f   : > { %v13132_v24 = vmax.f32 %v5216_v47, 0.0 }
 0xd10   : > { %5429 = vrot.lane.b32.xlu2 %v13089_v22, %s16393_s5  ;;  %5269 = vrot.lane.b32.xlu1 %v13089_v22, %s16368_s2 }
 0xd11   : > { %5301 = vrot.lane.b32.xlu0 %v13089_v22, %s16389_s1  ;;  %16394 = vst [vmem:[#allocation27_spill] sm:$0xff] %v13132_v24 }
 0xd12   : > { %v5189_v34 = vpop.f32.mrf.mxu2 }
 0xd13   : > { %v5137_v39 = vpop.f32.mrf.mxu0  ;;  %v5190_v29 = vadd.f32 %v5189_v34, %v5161_v42  ;;  %v5218_v51 = vpop.f32.mrf.mxu3 }
 0xd14   : > { %v5138_v35 = vadd.f32 %v5137_v39, %v5109_v20 }
 0xd15   : > { %v5219_v31 = vadd.f32 %v5218_v51, %v5190_v29 }
 0xd16   : > { %v13118_v28 = vmax.f32 %v5138_v35, 0.0 }
 0xd17   : > { %v13140_v3 = vmax.f32 %v5219_v31, 0.0 }
 0xd18   : > { %5303 = vrot.lane.b32.xlu2 %v13103_v52, %s16389_s1  ;;  %5335 = vrot.lane.b32.xlu1 %v13103_v52, %s16390_s3 }
 0xd19   : > { %5397 = vrot.lane.b32.xlu0 %v13089_v22, %s16392_s4  ;;  %16395 = vst [vmem:[#allocation28_spill] sm:$0xff] %v13140_v3 }
 0xd1a   : > { %v5192_v1 = vpop.f32.mrf.mxu2 }
 0xd1b   : > { %v5193_v62 = vadd.f32 %v5192_v1, %v5164_v4  ;;  %v5221_v27 = vpop.f32.mrf.mxu3 }
 0xd1d   : > { %v5222_v40 = vadd.f32 %v5221_v27, %v5193_v62 }
 0xd1f   : > { %v13154_v38 = vmax.f32 %v5222_v40, 0.0  ;;  %v5505_v40 = vld [vmem:[%s16398_s8 + $0x10] sm:$0xff] }
 0xd20   : > { %5399 = vrot.lane.b32.xlu2 %v13103_v52, %s16392_s4  ;;  %5431 = vrot.lane.b32.xlu1 %v13103_v52, %s16393_s5 }
 0xd21   : > { %5271 = vrot.lane.b32.xlu0 %v13103_v52, %s16368_s2  ;;  %16396 = vst [vmem:[#allocation24_spill] sm:$0xff] %v13154_v38 }
 0xd22   : > { %v5195_v11 = vpop.f32.mrf.mxu2 }
 0xd23   : > { %v5196_v55 = vadd.f32 %v5195_v11, %v5167_v36  ;;  %v5224_v12 = vpop.f32.mrf.mxu3 }
 0xd25   : > { %v5225_v32 = vadd.f32 %v5224_v12, %v5196_v55  ;;  %v5504_v12 = vld [vmem:[%s16398_s8 + $0x8] sm:$0xff] }
 0xd27   : > { %v13171_v54 = vmax.f32 %v5225_v32, 0.0  ;;  %v5503_v32 = vld [vmem:[%s16398_s8] sm:$0xff]  ;;  %s16399_s8 = sld [smem:[#allocation12_spill]] }
 0xd28   : > { %5337 = vrot.lane.b32.xlu2 %v13118_v28, %s16390_s3  ;;  %5305 = vrot.lane.b32.xlu1 %v13118_v28, %s16389_s1 }
 0xd29   : > { %5367 = vrot.lane.b32.xlu0 %v13103_v52, %s16358_s18  ;;  %16397 = vst [vmem:[#allocation63_spill] sm:$0xff] %v13171_v54 }
 0xd30   : > { %5273 = vrot.lane.b32.xlu2 %v13118_v28, %s16368_s2  ;;  %5401 = vrot.lane.b32.xlu1 %v13118_v28, %s16392_s4 }
 0xd31   : > { %5433 = vrot.lane.b32.xlu0 %v13118_v28, %s16393_s5 }
 0xd38   : > { %5369 = vrot.lane.b32.xlu2 %v13118_v28, %s16358_s18  ;;  %5339 = vrot.lane.b32.xlu1 %v13132_v24, %s16390_s3 }
 0xd39   : > { %5275 = vrot.lane.b32.xlu0 %v13132_v24, %s16368_s2 }
 0xd40   : > { %5307 = vrot.lane.b32.xlu2 %v13132_v24, %s16389_s1  ;;  %5435 = vrot.lane.b32.xlu1 %v13132_v24, %s16393_s5 }
 0xd41   : > { %5341 = vrot.lane.b32.xlu0 %v13140_v3, %s16390_s3 }
 0xd48   : > { %5403 = vrot.lane.b32.xlu2 %v13132_v24, %s16392_s4  ;;  %5309 = vrot.lane.b32.xlu1 %v13140_v3, %s16389_s1 }
 0xd49   : > { %5437 = vrot.lane.b32.xlu0 %v13140_v3, %s16393_s5 }
 0xd50   : > { %5277 = vrot.lane.b32.xlu2 %v13140_v3, %s16368_s2  ;;  %5405 = vrot.lane.b32.xlu1 %v13140_v3, %s16392_s4 }
 0xd51   : > { %5311 = vrot.lane.b32.xlu0 %v13154_v38, %s16389_s1 }
 0xd58   : > { %5343 = vrot.lane.b32.xlu2 %v13154_v38, %s16390_s3  ;;  %5279 = vrot.lane.b32.xlu1 %v13154_v38, %s16368_s2 }
 0xd59   : > { %5407 = vrot.lane.b32.xlu0 %v13154_v38, %s16392_s4 }
 0xd5a   : > { %v13169_v23 = vpop.permute.xlu2 %5267 }
 0xd60   : > { %5439 = vrot.lane.b32.xlu2 %v13154_v38, %s16393_s5  ;;  %5375 = vrot.lane.b32.xlu1 %v13154_v38, %s16358_s18 }
 0xd61   : > { %5345 = vrot.lane.b32.xlu0 %v13171_v54, %s16390_s3 }
 0xd62   : > { %v13179_v50 = vpop.permute.xlu2 %5333 }
 0xd68   : > { %5373 = vrot.lane.b32.xlu2 %v13140_v3, %s16358_s18  ;;  %5441 = vrot.lane.b32.xlu1 %v13171_v54, %s16393_s5 }
 0xd69   : > { %5241 = vrot.lane.b32.xlu0 %v13118_v28, %s16367_s22 }
 0xd6a   : > { %v13187_v6 = vpop.permute.xlu2 %5429 }
 0xd70   : > { %5313 = vrot.lane.b32.xlu2 %v13171_v54, %s16389_s1  ;;  %5365 = vrot.lane.b32.xlu1 %v13089_v22, %s16358_s18 }
 0xd71   : > { %5371 = vrot.lane.b32.xlu0 %v13132_v24, %s16358_s18 }
 0xd72   : > { %v13195_v13 = vpop.permute.xlu2 %5303  ;;  %v13197_v39 = vpop.permute.xlu1 %5299 }
 0xd73   : > { %v13199_v20 = vpop.permute.xlu0 %5331 }
 0xd78   : > { %5409 = vrot.lane.b32.xlu2 %v13171_v54, %s16392_s4  ;;  %5239 = vrot.lane.b32.xlu1 %v13103_v52, %s16367_s22 }
 0xd79   : > { %5281 = vrot.lane.b32.xlu0 %v13171_v54, %s16368_s2 }
 0xd7a   : > { %v13207_v35 = vpop.permute.xlu2 %5399  ;;  %v13209_v44 = vpop.permute.xlu1 %5395 }
 0xd7b   : > { %v13211_v16 = vpop.permute.xlu0 %5427 }
 0xd80   : > { %5363 = vrot.lane.b32.xlu2 %v13081_v63, %s16358_s18  ;;  %5249 = vrot.lane.b32.xlu1 %v13171_v54, %s16367_s22 }
 0xd81   : > { %5377 = vrot.lane.b32.xlu0 %v13171_v54, %s16358_s18 }
 0xd82   : > { %v5338_v60 = vpop.permute.xlu2 %5337  ;;  %v13219_v46 = vpop.permute.xlu1 %5269 }
 0xd83   : > { %v13221_v25 = vpop.permute.xlu0 %5301 }
 0xd88   : > { %5247 = vrot.lane.b32.xlu2 %v13154_v38, %s16367_s22  ;;  %5245 = vrot.lane.b32.xlu1 %v13140_v3, %s16367_s22 }
 0xd89   : > { %5237 = vrot.lane.b32.xlu0 %v13089_v22, %s16367_s22 }
 0xd8a   : > { %v13229_v33 = vpop.permute.xlu2 %5273  ;;  %v5336_v47 = vpop.permute.xlu1 %5335 }
 0xd8b   : > { %v13231_v34 = vpop.permute.xlu0 %5397 }
 0xd90   : > { %5235 = vrot.lane.b32.xlu2 %v13081_v63, %s16367_s22  ;;  %5465 = vrot.lane.b32.xlu1 %v13118_v28, %s16370_s11 }
 0xd91   : > { %5243 = vrot.lane.b32.xlu0 %v13132_v24, %s16367_s22 }
 0xd92   : > { %v13239_v42 = vpop.permute.xlu2 %5369  ;;  %v13241_v29 = vpop.permute.xlu1 %5431 }
 0xd93   : > { %v13243_v51 = vpop.permute.xlu0 %5271 }
 0xd98   : > { %5461 = vrot.lane.b32.xlu2 %v13089_v22, %s16370_s11  ;;  %5471 = vrot.lane.b32.xlu1 %v13154_v38, %s16370_s11 }
 0xd99   : > { %5463 = vrot.lane.b32.xlu0 %v13103_v52, %s16370_s11 }
 0xd9a   : > { %v13251_v31 = vpop.permute.xlu2 %5307  ;;  %v5306_v58 = vpop.permute.xlu1 %5305 }
 0xd9b   : > { %v13253_v1 = vpop.permute.xlu0 %5367 }
 0xda0   : > { %5473 = vrot.lane.b32.xlu2 %v13171_v54, %s16370_s11  ;;  %5459 = vrot.lane.b32.xlu1 %v13081_v63, %s16370_s11 }
 0xda1   : > { %5469 = vrot.lane.b32.xlu0 %v13140_v3, %s16370_s11 }
 0xda2   : > { %v13261_v4 = vpop.permute.xlu2 %5403  ;;  %v13263_v62 = vpop.permute.xlu1 %5401 }
 0xda3   : > { %v13265_v27 = vpop.permute.xlu0 %5433 }
 0xda8   : > { %5467 = vrot.lane.b32.xlu2 %v13132_v24, %s16370_s11  ;;  %5519 = vperm.xlu1 %8071, %v5505_v40  }
 0xda9   : > { %5524 = vperm.xlu0 %8070, %v5506_v53  }
 0xdaa   : > { %v13271_v11 = vpop.permute.xlu2 %5277  ;;  %v5340_v36 = vpop.permute.xlu1 %5339 }
 0xdab   : > { %v13273_v55 = vpop.permute.xlu0 %5275 }
 0xdb0   : > { %5514 = vperm.xlu2 %8072, %v5504_v12  }
 0xdb1   : > { %5509 = vperm.xlu0 %8070, %v5503_v32  }
 0xdb2   : > { %v5344_v56 = vpop.permute.xlu2 %5343  ;;  %v13277_v26 = vpop.permute.xlu1 %5435 }
 0xdb3   : > { %v5342_v19 = vpop.permute.xlu0 %5341  ;;  %v5349_v54 = vsel %vm1613_vm3, %v5336_v47, %v5344_v56  ;;  %v5353_v61 = vsel %vm1613_vm3, %v5344_v56, %v5336_v47  ;;  %v5351_v56 = vsel %vm1613_vm3, %v5340_v36, %v13199_v20 }
 0xdb4   : > { %v5348_v41 = vsel %vm1613_vm3, %v13179_v50, %v5342_v19  ;;  %v5352_v22 = vsel %vm1613_vm3, %v5342_v19, %v13179_v50 }
 0xdb5   : > { %v5358_v19 = vmul.f32 %v5348_v41, %v16375_v18 }
 0xdba   : > { %v13279_v59 = vpop.permute.xlu2 %5439  ;;  %v5310_v49 = vpop.permute.xlu1 %5309 }
 0xdbb   : > { %v13281_v17 = vpop.permute.xlu0 %5437 }
 0xdc2   : > { %v13283_v40 = vpop.permute.xlu2 %5373  ;;  %v13285_v53 = vpop.permute.xlu1 %5405 }
 0xdc3   : > { %v5312_v0 = vpop.permute.xlu0 %5311 }
 0xdc4   : > { %v5317_v47 = vsel %vm1541_vm6, %v13195_v13, %v5312_v0 }
 0xdca   : > { %v5314_v8 = vpop.permute.xlu2 %5313  ;;  %v13287_v24 = vpop.permute.xlu1 %5279 }
 0xdcb   : > { %v13289_v3 = vpop.permute.xlu0 %5407  ;;  %v5318_v50 = vsel %vm1541_vm6, %v5306_v58, %v5314_v8 }
 0xdd2   : > { %v13291_v12 = vpop.permute.xlu2 %5409  ;;  %v13293_v32 = vpop.permute.xlu1 %5375 }
 0xdd3   : > { %v5346_v38 = vpop.permute.xlu0 %5345 }
 0xdd4   : > { %v5350_v9 = vsel %vm1613_vm3, %v5338_v60, %v5346_v38  ;;  %v5354_v7 = vsel %vm1613_vm3, %v5346_v38, %v5338_v60  ;;  %v5359_v38 = vmul.f32 %v5353_v61, %v16374_v21  ;;  %v5357_v60 = vmul.f32 %v5352_v22, %v16374_v21 }
 0xdd5   : > { %v5361_v63 = vmul.f32 %v5354_v7, %v16374_v21  ;;  %v5362_v14 = vmul.f32 %v5350_v9, %v16375_v18  ;;  %v5360_v7 = vmul.f32 %v5349_v54, %v16375_v18  ;;  %v5347_v9 = vsel %vm1613_vm3, %v13199_v20, %v5340_v36 }
 0xdd6   : > { %v5355_v54 = vmul.f32 %v5351_v56, %v16374_v21  ;;  %v5445_v20 = vsel %vm1829_vm5, %v13241_v29, %v13279_v59  ;;  %v5444_v56 = vsel %vm1829_vm5, %v13187_v6, %v13281_v17 }
 0xdd7   : > { %5539 = vmatpush.msrb.mxu0 %v5361_v63  ;;  %5626 = vmatpush.msra.mxu3 %v5362_v14  ;;  %v5322_v14 = vsel %vm1541_vm6, %v5314_v8, %v5306_v58  ;;  %v5356_v8 = vmul.f32 %v5347_v9, %v16375_v18  ;;  %v5321_v58 = vsel %vm1541_vm6, %v5312_v0, %v13195_v13 }
 0xdd8   : > { %v5316_v9 = vsel %vm1541_vm6, %v13221_v25, %v5310_v49  ;;  %v5320_v0 = vsel %vm1541_vm6, %v5310_v49, %v13221_v25  ;;  %v5455_v13 = vmul.f32 %v5445_v20, %v16373_v2  ;;  %v5319_v49 = vsel %vm1541_vm6, %v13251_v31, %v13197_v39 }
 0xdd9   : > { %5540 = vmatpush.msrb.mxu0 %v5359_v38  ;;  %5627 = vmatpush.msra.mxu3 %v5360_v7  ;;  %v5329_v38 = vmul.f32 %v5322_v14, %v16259_v30  ;;  %v5330_v7 = vmul.f32 %v5318_v50, %v9437_v10  ;;  %v5328_v50 = vmul.f32 %v5317_v47, %v9437_v10 }
 0xdda   : > { %v13325_v63 = vpop.permute.xlu2 %5363  ;;  %v13327_v61 = vpop.permute.xlu1 %5441  ;;  %v5315_v14 = vsel %vm1541_vm6, %v13197_v39, %v13251_v31  ;;  %v5453_v25 = vmul.f32 %v5444_v56, %v16373_v2  ;;  %v5325_v20 = vmul.f32 %v5320_v0, %v16259_v30  ;;  %v5413_v39 = vsel %vm1757_vm9, %v13207_v35, %v13289_v3 }
 0xddb   : > { %v5446_v41 = vsel %vm1829_vm5, %v13265_v27, %v13327_v61  ;;  %5541 = vmatpush.msrb.mxu0 %v5357_v60  ;;  %5628 = vmatpush.msra.mxu3 %v5358_v19  ;;  %v13338_v22 = vpop.permute.xlu0 %5241  ;;  %v5443_v60 = vsel %vm1829_vm5, %v13211_v16, %v13277_v26  ;;  %v5327_v19 = vmul.f32 %v5321_v58, %v16259_v30 }
 0xddc   : > { %v5457_v36 = vmul.f32 %v5446_v41, %v16373_v2  ;;  %v5326_v41 = vmul.f32 %v5316_v9, %v9437_v10  ;;  %v5451_v47 = vmul.f32 %v5443_v60, %v16373_v2  ;;  %v5323_v58 = vmul.f32 %v5319_v49, %v16259_v30 }
 0xddd   : > { %5542 = vmatpush.msrb.mxu0 %v5355_v54  ;;  %5629 = vmatpush.msra.mxu3 %v5356_v8  ;;  %v5414_v54 = vsel %vm1757_vm9, %v13263_v62, %v13291_v12  ;;  %v5423_v9 = vmul.f32 %v5413_v39, %v9408_v15  ;;  %v5411_v0 = vsel %vm1757_vm9, %v13209_v44, %v13261_v4 }
 0xdde   : > { %5568 = vmatpush.msrb.mxu1 %v5457_v36  ;;  %v5324_v36 = vmul.f32 %v5315_v14, %v9437_v10  ;;  %v5285_v14 = vsel %vm1469_vm1, %v13243_v51, %v13287_v24  ;;  %v5289_v49 = vsel %vm1469_vm1, %v13287_v24, %v13243_v51  ;;  %v5288_v24 = vsel %vm1469_vm1, %v13271_v11, %v13219_v46 }
 0xddf   : > { %5543 = vmatpush.msrb.mxu0 %v5329_v38  ;;  %5630 = vmatpush.msra.mxu3 %v5330_v7  ;;  %v5425_v38 = vmul.f32 %v5414_v54, %v9408_v15  ;;  %v5412_v7 = vsel %vm1757_vm9, %v13231_v34, %v13285_v53  ;;  %v5287_v39 = vsel %vm1469_vm1, %v13273_v55, %v13169_v23 }
 0xde0   : > { %5569 = vmatpush.msrb.mxu1 %v5455_v13  ;;  %v5421_v13 = vmul.f32 %v5412_v7, %v9408_v15  ;;  %v5291_v7 = vmul.f32 %v5287_v39, %v16260_v57 }
 0xde1   : > { %5544 = vmatpush.msrb.mxu0 %v5327_v19  ;;  %5631 = vmatpush.msra.mxu3 %v5328_v50  ;;  %v5419_v19 = vmul.f32 %v5411_v0, %v9408_v15 }
 0xde2   : > { %v13382_v8 = vpop.permute.xlu1 %5365  ;;  %5570 = vmatpush.msrb.mxu1 %v5453_v25  ;;  %v5248_v56 = vpop.permute.xlu2 %5247 }
 0xde3   : > { %5545 = vmatpush.msrb.mxu0 %v5325_v20  ;;  %5632 = vmatpush.msra.mxu3 %v5326_v41  ;;  %v13389_v31 = vpop.permute.xlu0 %5371 }
 0xde4   : > { %5571 = vmatpush.msrb.mxu1 %v5451_v47  ;;  %v5284_v47 = vsel %vm1469_vm1, %v13219_v46, %v13271_v11  ;;  %v5293_v46 = vmul.f32 %v5288_v24, %v16260_v57 }
 0xde5   : > { %5546 = vmatpush.msrb.mxu0 %v5323_v58  ;;  %5633 = vmatpush.msra.mxu3 %v5324_v36  ;;  %v5295_v58 = vmul.f32 %v5289_v49, %v16260_v57  ;;  %v5296_v36 = vmul.f32 %v5285_v14, %v16261_v5  ;;  %v5294_v11 = vmul.f32 %v5284_v47, %v16261_v5 }
 0xde6   : > { %5572 = vmatpush.msrb.mxu1 %v5425_v38 }
 0xde8   : > { %5573 = vmatpush.msrb.mxu1 %v5423_v9 }
 0xdea   : > { %v5240_v60 = vpop.permute.xlu1 %5239  ;;  %5574 = vmatpush.msrb.mxu1 %v5421_v13  ;;  %v13433_v51 = vpop.permute.xlu2 %5235 }
 0xdeb   : > { %v5282_v50 = vpop.permute.xlu0 %5281 }
 0xdec   : > { %v5286_v25 = vsel %vm1469_vm1, %v13229_v33, %v5282_v50  ;;  %v5290_v54 = vsel %vm1469_vm1, %v5282_v50, %v13229_v33  ;;  %5575 = vmatpush.msrb.mxu1 %v5419_v19  ;;  %v5283_v33 = vsel %vm1469_vm1, %v13169_v23, %v13273_v55  ;;  %v5381_v23 = vsel %vm1685_vm4, %v13253_v1, %v13293_v32 }
 0xded   : > { %v5297_v20 = vmul.f32 %v5290_v54, %v16260_v57  ;;  %v5298_v41 = vmul.f32 %v5286_v25, %v16261_v5  ;;  %v5292_v9 = vmul.f32 %v5283_v33, %v16261_v5  ;;  %v5257_v19 = vsel %vm1398_vm2, %v5248_v56, %v5240_v60 }
 0xdee   : > { %v5253_v25 = vsel %vm1398_vm2, %v5240_v60, %v5248_v56  ;;  %v5380_v54 = vsel %vm1685_vm4, %v13382_v8, %v13283_v40  ;;  %v5379_v56 = vsel %vm1685_vm4, %v13325_v63, %v13389_v31 }
 0xdef   : > { %5547 = vmatpush.msrb.mxu0 %v5297_v20  ;;  %5634 = vmatpush.msra.mxu3 %v5298_v41  ;;  %v5263_v20 = vmul.f32 %v5257_v19, %v16262_v48  ;;  %v5391_v41 = vmul.f32 %v5381_v23, %v8925_v45  ;;  %v5264_v47 = vmul.f32 %v5253_v25, %v16263_v43  ;;  %v16400_v19 = vld [vmem:[#allocation50_spill] sm:$0xff] }
 0xdf0   : > { %v5389_v24 = vmul.f32 %v5380_v54, %v8925_v45  ;;  %v5450_v23 = vsel %vm1829_vm5, %v13327_v61, %v13265_v27  ;;  %v16403_v61 = vld [vmem:[#allocation64_spill] sm:$0xff] }
 0xdf1   : > { %5548 = vmatpush.msrb.mxu0 %v5295_v58  ;;  %5635 = vmatpush.msra.mxu3 %v5296_v36  ;;  %v5387_v58 = vmul.f32 %v5379_v56, %v8925_v45  ;;  %v13517_v56 = vld [vmem:[%s16399_s8 + $0x8] sm:$0xff] }
 0xdf2   : > { %v5250_v38 = vpop.permute.xlu1 %5249  ;;  %v13478_v60 = vpop.permute.xlu2 %5461 }
 0xdf3   : > { %v5254_v55 = vsel %vm1398_vm2, %v13338_v22, %v5250_v38  ;;  %v5258_v0 = vsel %vm1398_vm2, %v5250_v38, %v13338_v22  ;;  %5549 = vmatpush.msrb.mxu0 %v5293_v46  ;;  %5636 = vmatpush.msra.mxu3 %v5294_v11  ;;  %v13455_v13 = vpop.permute.xlu0 %5377 }
 0xdf4   : > { %v5382_v50 = vsel %vm1685_vm4, %v13239_v42, %v13455_v13  ;;  %v5265_v14 = vmul.f32 %v5258_v0, %v16262_v48  ;;  %v5266_v49 = vmul.f32 %v5254_v55, %v16263_v43 }
 0xdf5   : > { %5550 = vmatpush.msrb.mxu0 %v5291_v7  ;;  %5637 = vmatpush.msra.mxu3 %v5292_v9  ;;  %v5393_v22 = vmul.f32 %v5382_v50, %v8925_v45  ;;  %v16401_v50 = vld [vmem:[#allocation52_spill] sm:$0xff] }
 0xdf7   : > { %5551 = vmatpush.msrb.mxu0 %v5265_v14  ;;  %5576 = vmatpush.msrb.mxu1 %v5393_v22 }
 0xdf8   : > { %5638 = vmatpush.msra.mxu3 %v5266_v49 }
 0xdf9   : > { %5552 = vmatpush.msrb.mxu0 %v5263_v20  ;;  %5577 = vmatpush.msrb.mxu1 %v5391_v41  ;;  %v5491_v20 = vld [vmem:[%s16399_s8] sm:$0xff]  ;;  %v5449_v41 = vsel %vm1829_vm5, %v13279_v59, %v13241_v29  ;;  %v5447_v29 = vsel %vm1829_vm5, %v13277_v26, %v13211_v16 }
 0xdfa   : > { %5639 = vmatpush.msra.mxu3 %v5264_v47  ;;  %v5246_v33 = vpop.permute.xlu1 %5245  ;;  %v5474_v7 = vpop.permute.xlu2 %5473  ;;  %v16404_v47 = vld [vmem:[#allocation25_spill] sm:$0xff] }
 0xdfb   : > { %5578 = vmatpush.msrb.mxu1 %v5389_v24  ;;  %v5238_v39 = vpop.permute.xlu0 %5237  ;;  %v5458_v24 = vmul.f32 %v5450_v23, %v16404_v47  ;;  %v5456_v59 = vmul.f32 %v5449_v41, %v16404_v47  ;;  %v5452_v26 = vmul.f32 %v5447_v29, %v16404_v47  ;;  %v5415_v23 = vsel %vm1757_vm9, %v13261_v4, %v13209_v44  ;;  %v16407_v29 = vld [vmem:[#allocation63_spill] sm:$0xff] }
 0xdfc   : > { %v5252_v36 = vsel %vm1398_vm2, %v5238_v39, %v5246_v33  ;;  %v5256_v46 = vsel %vm1398_vm2, %v5246_v33, %v5238_v39  ;;  %v5384_v41 = vsel %vm1685_vm4, %v13283_v40, %v13382_v8  ;;  %v5500_v8 = vld [vmem:[%s16399_s8 + $0x48] sm:$0xff] }
 0xdfd   : > { %5579 = vmatpush.msrb.mxu1 %v5387_v58  ;;  %v5261_v11 = vmul.f32 %v5256_v46, %v16262_v48  ;;  %v5262_v38 = vmul.f32 %v5252_v36, %v16263_v43 }
 0xdff   : > { %5553 = vmatpush.msrb.mxu0 %v5261_v11  ;;  %5580 = vmatpush.msrb.mxu1 %v13118_v28  ;;  %v5494_v11 = vld [vmem:[%s16399_s8 + $0x18] sm:$0xff] }
 0xe00   : > { %5640 = vmatpush.msra.mxu3 %v5262_v38  ;;  %v5417_v38 = vsel %vm1757_vm9, %v13289_v3, %v13207_v35 }
 0xe01   : > { %5581 = vmatpush.msrb.mxu1 %v13103_v52  ;;  %v16402_v52 = vld [vmem:[#allocation46_spill] sm:$0xff] }
 0xe02   : > { %v5466_v9 = vpop.permute.xlu1 %5465 }
 0xe03   : > { %v5478_v55 = vsel %vm1901_vm8, %v5466_v9, %v5474_v7  ;;  %v5482_v0 = vsel %vm1901_vm8, %v5474_v7, %v5466_v9  ;;  %5582 = vmatpush.msrb.mxu1 %v16400_v19  ;;  %v5244_v28 = vpop.permute.xlu0 %5243  ;;  %v13549_v7 = vld [vmem:[%s16399_s8 + $0x20] sm:$0xff]  ;;  %v5416_v9 = vsel %vm1757_vm9, %v13285_v53, %v13231_v34  ;;  %v5386_v34 = vsel %vm1685_vm4, %v13455_v13, %v13239_v42  ;;  %v5468_v53 = vpop.permute.xlu2 %5467 }
 0xe04   : > { %v5489_v14 = vmul.f32 %v5478_v55, %v16401_v50  ;;  %v5490_v49 = vmul.f32 %v5482_v0, %v16402_v52  ;;  %v5251_v25 = vsel %vm1398_vm2, %v13433_v51, %v5244_v28  ;;  %v5255_v27 = vsel %vm1398_vm2, %v5244_v28, %v13433_v51 }
 0xe05   : > { %5583 = vmatpush.msrb.mxu1 %v16403_v61  ;;  %v5259_v22 = vmul.f32 %v5255_v27, %v16262_v48  ;;  %v5260_v54 = vmul.f32 %v5251_v25, %v16263_v43  ;;  %v5448_v51 = vsel %vm1829_vm5, %v13281_v17, %v13187_v6  ;;  %v5418_v17 = vsel %vm1757_vm9, %v13291_v12, %v13263_v62  ;;  %v16405_v62 = vld [vmem:[#allocation38_spill] sm:$0xff]  ;;  %v16406_v25 = vld [vmem:[#allocation40_spill] sm:$0xff] }
 0xe06   : > { %5609 = vmatpush.msra.mxu2 %v5489_v14  ;;  %5584 = vmatmul.f32.vlgmr.msrb.gmra.mxu1 %v13517_v56  ;;  %v5454_v58 = vmul.f32 %v5448_v51, %v16404_v47  ;;  %v5426_v12 = vmul.f32 %v5418_v17, %v16405_v62  ;;  %v5424_v3 = vmul.f32 %v5417_v38, %v16405_v62  ;;  %v5501_v51 = vld [vmem:[%s16399_s8 + $0x50] sm:$0xff] }
 0xe07   : > { %5696 = vmatpush.msra.mxu1 %v5490_v49  ;;  %5554 = vmatpush.msrb.mxu0 %v5259_v22  ;;  %v5422_v0 = vmul.f32 %v5416_v9, %v16405_v62  ;;  %v5420_v19 = vmul.f32 %v5415_v23, %v16405_v62  ;;  %v5497_v49 = vld [vmem:[%s16399_s8 + $0x30] sm:$0xff]  ;;  %v5394_v27 = vmul.f32 %v5386_v34, %v16406_v25  ;;  %v16411_v9 = vld [vmem:[#allocation59_spill] sm:$0xff] }
 0xe08   : > { %5641 = vmatpush.msra.mxu3 %v5260_v54  ;;  %5555 = vmatmul.f32.vlgmr.msrb.gmra.mxu0 %v5491_v20  ;;  %v5498_v54 = vld [vmem:[%s16399_s8 + $0x38] sm:$0xff] }
 0xe09   : > { %5642 = vmatmul.f32.vlgmr.msra.gmra.mxu3 %v5491_v20  ;;  %5655 = vmatpush.msra.mxu0 %v5458_v24  ;;  %v5493_v20 = vld [vmem:[%s16399_s8 + $0x10] sm:$0xff]  ;;  %v5390_v24 = vmul.f32 %v5384_v41, %v16406_v25 }
 0xe0a   : > { %v5472_v33 = vpop.permute.xlu1 %5471 }
 0xe0b   : > { %5656 = vmatpush.msra.mxu0 %v5456_v59  ;;  %v5464_v39 = vpop.permute.xlu0 %5463  ;;  %v5496_v59 = vld [vmem:[%s16399_s8 + $0x28] sm:$0xff] }
 0xe0c   : > { %v5477_v6 = vsel %vm1901_vm8, %v5464_v39, %v5472_v33  ;;  %v5481_v36 = vsel %vm1901_vm8, %v5472_v33, %v5464_v39  ;;  %v16410_v33 = vld [vmem:[#allocation27_spill] sm:$0xff]  ;;  %v5499_v39 = vld [vmem:[%s16399_s8 + $0x40] sm:$0xff] }
 0xe0d   : > { %5657 = vmatpush.msra.mxu0 %v5454_v58  ;;  %v5487_v16 = vmul.f32 %v5477_v6, %v16401_v50  ;;  %v5488_v46 = vmul.f32 %v5481_v36, %v16402_v52  ;;  %v5502_v58 = vld [vmem:[%s16399_s8 + $0x58] sm:$0xff]  ;;  %s16427_s8 = sld [smem:[#allocation15_spill]] }
 0xe0e   : > { %5587 = vmatmul.f32.gmra.mxu1 %v13549_v7 }
 0xe0f   : > { %5658 = vmatpush.msra.mxu0 %v5452_v26  ;;  %5610 = vmatpush.msra.mxu2 %v5487_v16 }
 0xe10   : > { %5697 = vmatpush.msra.mxu1 %v5488_v46  ;;  %5558 = vmatmul.f32.gmra.mxu0 %v5494_v11 }
 0xe11   : > { %5645 = vmatmul.f32.gmra.mxu3 %v5494_v11  ;;  %5659 = vmatpush.msra.mxu0 %v5426_v12  ;;  %v5515_v12 = vpop.permute.xlu2 %5514 }
 0xe12   : > { %v5460_v35 = vpop.permute.xlu1 %5459 }
 0xe13   : > { %5660 = vmatpush.msra.mxu0 %v5424_v3  ;;  %v5470_v55 = vpop.permute.xlu0 %5469  ;;  %v5475_v28 = vsel %vm1901_vm8, %v5460_v35, %v5468_v53  ;;  %v5479_v14 = vsel %vm1901_vm8, %v5468_v53, %v5460_v35  ;;  %v16413_v53 = vld [vmem:[#allocation48_spill] sm:$0xff] }
 0xe14   : > { %v5476_v44 = vsel %vm1901_vm8, %v13478_v60, %v5470_v55  ;;  %v5480_v4 = vsel %vm1901_vm8, %v5470_v55, %v13478_v60  ;;  %v5385_v60 = vsel %vm1685_vm4, %v13293_v32, %v13253_v1  ;;  %v5483_v61 = vmul.f32 %v5475_v28, %v16401_v50 }
 0xe15   : > { %5661 = vmatpush.msra.mxu0 %v5422_v0  ;;  %v5485_v42 = vmul.f32 %v5476_v44, %v16401_v50  ;;  %v5486_v13 = vmul.f32 %v5480_v4, %v16402_v52  ;;  %v5484_v22 = vmul.f32 %v5479_v14, %v16402_v52  ;;  %v5392_v1 = vmul.f32 %v5385_v60, %v16406_v25 }
 0xe16   : > { %v5383_v32 = vsel %vm1685_vm4, %v13389_v31, %v13325_v63  ;;  %5590 = vmatmul.f32.gmra.mxu1 %v5498_v54  ;;  %v16408_v63 = vld [vmem:[#allocation24_spill] sm:$0xff] }
 0xe17   : > { %5662 = vmatpush.msra.mxu0 %v5420_v19  ;;  %5611 = vmatpush.msra.mxu2 %v5485_v42  ;;  %v5388_v40 = vmul.f32 %v5383_v32, %v16406_v25  ;;  %v16409_v31 = vld [vmem:[#allocation28_spill] sm:$0xff] }
 0xe18   : > { %5698 = vmatpush.msra.mxu1 %v5486_v13  ;;  %5561 = vmatmul.f32.gmra.mxu0 %v5497_v49 }
 0xe19   : > { %5648 = vmatmul.f32.gmra.mxu3 %v5497_v49  ;;  %5663 = vmatpush.msra.mxu0 %v5394_v27  ;;  %v16415_v27 = vld [vmem:[#allocation67_spill] sm:$0xff] }
 0xe1a   : > { %5612 = vmatpush.msra.mxu2 %v5483_v61  ;;  %5699 = vmatpush.msra.mxu1 %v5484_v22  ;;  %v5520_v28 = vpop.permute.xlu1 %5519 }
 0xe1b   : > { %7965 = vmatmul.msk.f32.vlgmr.msra.gmra.mxu2 %vm1096_vm0, %v5493_v20  ;;  %5664 = vmatpush.msra.mxu0 %v5392_v1  ;;  %v13619_v17 = vpop.permute.xlu0 %5524 }
 0xe1d   : > { %5665 = vmatpush.msra.mxu0 %v5390_v24 }
 0xe1e   : > { %5593 = vmatmul.f32.gmra.mxu1 %v5501_v51 }
 0xe1f   : > { %5666 = vmatpush.msra.mxu0 %v5388_v40  ;;  %v16417_v40 = vld [vmem:[#allocation76_spill] sm:$0xff] }
 0xe20   : > { %5564 = vmatmul.f32.gmra.mxu0 %v5500_v8 }
 0xe21   : > { %5651 = vmatmul.f32.gmra.mxu3 %v5500_v8  ;;  %5667 = vmatpush.msra.mxu0 %v16407_v29 }
 0xe23   : > { %7966 = vmatmul.msk.f32.gmra.mxu2 %vm1096_vm0, %v5496_v59  ;;  %5668 = vmatpush.msra.mxu0 %v16408_v63  ;;  %v5510_v6 = vpop.permute.xlu0 %5509 }
 0xe25   : > { %5669 = vmatpush.msra.mxu0 %v16409_v31 }
 0xe26   : > { %7969 = vmatmul.msk.f32.vlgmr.msra.gmra.mxu1 %vm1096_vm0, %v5493_v20 }
 0xe27   : > { %5670 = vmatpush.msra.mxu0 %v16410_v33 }
 0xe28   : > { %5671 = vmatmul.f32.vlgmr.msra.gmra.mxu0 %v13517_v56 }
 0xe2b   : > { %7967 = vmatmul.msk.f32.gmra.mxu2 %vm1096_vm0, %v5499_v39 }
 0xe2e   : > { %7970 = vmatmul.msk.f32.gmra.mxu1 %vm1096_vm0, %v5496_v59 }
 0xe30   : > { %5674 = vmatmul.f32.gmra.mxu0 %v13549_v7 }
 0xe33   : > { %7968 = vmatmul.msk.f32.gmra.mxu2 %vm1096_vm0, %v5502_v58 }
 0xe36   : > { %7971 = vmatmul.msk.f32.gmra.mxu1 %vm1096_vm0, %v5499_v39 }
 0xe38   : > { %5677 = vmatmul.f32.gmra.mxu0 %v5498_v54 }
 0xe3e   : > { %7972 = vmatmul.msk.f32.gmra.mxu1 %vm1096_vm0, %v5502_v58 }
 0xe40   : > { %5680 = vmatmul.f32.gmra.mxu0 %v5501_v51 }
 0xe83   : > { %v5585_v36 = vpop.f32.mrf.mxu1 }
 0xe85   : > { %v5556_v56 = vpop.f32.mrf.mxu0 }
 0xe86   : > { %v5557_v26 = vadd.f32 %v5556_v56, %v5510_v6 }
 0xe88   : > { %v5586_v16 = vadd.f32 %v5585_v36, %v5557_v26  ;;  %v16419_v36 = vld [vmem:[#allocation35_spill] sm:$0xff] }
 0xe8b   : > { %v5588_v3 = vpop.f32.mrf.mxu1 }
 0xe8c   : > { %v5643_v51 = vpop.f32.mrf.mxu3 }
 0xe8d   : > { %v5559_v46 = vpop.f32.mrf.mxu0  ;;  %v5644_v63 = vadd.f32 %v5643_v51, %v5510_v6 }
 0xe8e   : > { %v5560_v7 = vadd.f32 %v5559_v46, %v5515_v12 }
 0xe90   : > { %v5589_v55 = vadd.f32 %v5588_v3, %v5560_v7 }
 0xe93   : > { %v5591_v42 = vpop.f32.mrf.mxu1 }
 0xe94   : > { %v5646_v39 = vpop.f32.mrf.mxu3 }
 0xe95   : > { %v5562_v4 = vpop.f32.mrf.mxu0  ;;  %v5647_v6 = vadd.f32 %v5646_v39, %v5515_v12  ;;  %v16421_v12 = vld [vmem:[#allocation54_spill] sm:$0xff] }
 0xe96   : > { %v5563_v14 = vadd.f32 %v5562_v4, %v5520_v28 }
 0xe98   : > { %v5592_v49 = vadd.f32 %v5591_v42, %v5563_v14 }
 0xe9b   : > { %v5594_v41 = vpop.f32.mrf.mxu1 }
 0xe9d   : > { %v5565_v22 = vpop.f32.mrf.mxu0 }
 0xe9e   : > { %v5614_v11 = vpop.f32.mrf.mxu2  ;;  %v5566_v20 = vadd.f32 %v5565_v22, %v13619_v17 }
 0xe9f   : > { %v5615_v38 = vadd.f32 %v5614_v11, %v5586_v16 }
 0xea0   : > { %v5595_v32 = vadd.f32 %v5594_v41, %v5566_v20 }
 0xea1   : > { %v5713_v23 = vadd.f32 %v5615_v38, %v16411_v9  ;;  %v5649_v9 = vpop.f32.mrf.mxu3 }
 0xea3   : > { %v13622_v35 = vmax.f32 %v5713_v23, 0.0  ;;  %v5701_v33 = vpop.f32.mrf.mxu1 }
 0xea5   : > { %16412 = vst [vmem:[#allocation58_spill] sm:$0xff] %v13622_v35  ;;  %5761 = vrot.lane.b32.xlu1 %v13622_v35, %s16368_s2  ;;  %5793 = vrot.lane.b32.xlu0 %v13622_v35, %s16389_s1  ;;  %v5672_v59 = vpop.f32.mrf.mxu0 }
 0xea6   : > { %5825 = vrot.lane.b32.xlu2 %v13622_v35, %s16390_s3  ;;  %v5617_v0 = vpop.f32.mrf.mxu2  ;;  %v5673_v31 = vadd.f32 %v5672_v59, %v5644_v63 }
 0xea7   : > { %v5618_v34 = vadd.f32 %v5617_v0, %v5589_v55  ;;  %v5650_v55 = vadd.f32 %v5649_v9, %v5520_v28 }
 0xea8   : > { %v5702_v58 = vadd.f32 %v5701_v33, %v5673_v31 }
 0xea9   : > { %v5715_v44 = vadd.f32 %v5618_v34, %v16413_v53  ;;  %v5652_v14 = vpop.f32.mrf.mxu3 }
 0xeaa   : > { %v5714_v26 = vadd.f32 %v5702_v58, %v16419_v36 }
 0xeab   : > { %v13631_v19 = vmax.f32 %v5715_v44, 0.0  ;;  %v5704_v46 = vpop.f32.mrf.mxu1  ;;  %v16423_v44 = vld [vmem:[#allocation34_spill] sm:$0xff] }
 0xeac   : > { %v13677_v11 = vmax.f32 %v5714_v26, 0.0 }
 0xead   : > { %16414 = vst [vmem:[#allocation32_spill] sm:$0xff] %v13631_v19  ;;  %5827 = vrot.lane.b32.xlu1 %v13631_v19, %s16390_s3  ;;  %5889 = vrot.lane.b32.xlu0 %v13622_v35, %s16392_s4  ;;  %v5675_v56 = vpop.f32.mrf.mxu0 }
 0xeae   : > { %5921 = vrot.lane.b32.xlu2 %v13622_v35, %s16393_s5  ;;  %v5620_v13 = vpop.f32.mrf.mxu2  ;;  %v5676_v16 = vadd.f32 %v5675_v56, %v5647_v6  ;;  %16420 = vst [vmem:[#allocation44_spill] sm:$0xff] %v13677_v11 }
 0xeaf   : > { %v5621_v60 = vadd.f32 %v5620_v13, %v5592_v49  ;;  %v5653_v13 = vadd.f32 %v5652_v14, %v13619_v17 }
 0xeb0   : > { %v5705_v38 = vadd.f32 %v5704_v46, %v5676_v16 }
 0xeb1   : > { %v5717_v61 = vadd.f32 %v5621_v60, %v16415_v27 }
 0xeb2   : > { %v5716_v7 = vadd.f32 %v5705_v38, %v16421_v12 }
 0xeb3   : > { %v13646_v54 = vmax.f32 %v5717_v61, 0.0  ;;  %v5707_v34 = vpop.f32.mrf.mxu1  ;;  %v16425_v61 = vld [vmem:[#allocation74_spill] sm:$0xff] }
 0xeb4   : > { %v13686_v23 = vmax.f32 %v5716_v7, 0.0 }
 0xeb5   : > { %5923 = vrot.lane.b32.xlu1 %v13631_v19, %s16393_s5  ;;  %5763 = vrot.lane.b32.xlu0 %v13631_v19, %s16368_s2  ;;  %16416 = vst [vmem:[#allocation22_spill] sm:$0xff] %v13646_v54  ;;  %v5678_v3 = vpop.f32.mrf.mxu0 }
 0xeb6   : > { %5795 = vrot.lane.b32.xlu2 %v13631_v19, %s16389_s1  ;;  %v5623_v1 = vpop.f32.mrf.mxu2  ;;  %16422 = vst [vmem:[#allocation45_spill] sm:$0xff] %v13686_v23  ;;  %v5679_v0 = vadd.f32 %v5678_v3, %v5650_v55  ;;  %v5999_v3 = vld [vmem:[%s16427_s8 + $0x10] sm:$0xff]  ;;  %v6000_v55 = vld [vmem:[%s16427_s8 + $0x18] sm:$0xff] }
 0xeb7   : > { %v5624_v24 = vadd.f32 %v5623_v1, %v5595_v32 }
 0xeb8   : > { %v5708_v53 = vadd.f32 %v5707_v34, %v5679_v0 }
 0xeb9   : > { %v5719_v8 = vadd.f32 %v5624_v24, %v16417_v40 }
 0xeba   : > { %v5718_v4 = vadd.f32 %v5708_v53, %v16423_v44  ;;  %v5998_v44 = vld [vmem:[%s16427_s8 + $0x8] sm:$0xff] }
 0xebb   : > { %v13662_v29 = vmax.f32 %v5719_v8, 0.0  ;;  %v5710_v60 = vpop.f32.mrf.mxu1 }
 0xebc   : > { %v13701_v42 = vmax.f32 %v5718_v4, 0.0  ;;  %v5997_v4 = vld [vmem:[%s16427_s8] sm:$0xff]  ;;  %s16428_s8 = sld [smem:[#allocation14_spill]] }
 0xebd   : > { %5797 = vrot.lane.b32.xlu1 %v13646_v54, %s16389_s1  ;;  %5829 = vrot.lane.b32.xlu0 %v13646_v54, %s16390_s3  ;;  %16418 = vst [vmem:[#allocation60_spill] sm:$0xff] %v13662_v29  ;;  %v5681_v28 = vpop.f32.mrf.mxu0 }
 0xebe   : > { %5891 = vrot.lane.b32.xlu2 %v13631_v19, %s16392_s4  ;;  %16424 = vst [vmem:[#allocation43_spill] sm:$0xff] %v13701_v42  ;;  %v5682_v49 = vadd.f32 %v5681_v28, %v5653_v13 }
 0xec0   : > { %v5711_v27 = vadd.f32 %v5710_v60, %v5682_v49 }
 0xec2   : > { %v5720_v22 = vadd.f32 %v5711_v27, %v16425_v61 }
 0xec4   : > { %v13719_v17 = vmax.f32 %v5720_v22, 0.0 }
 0xec5   : > { %5893 = vrot.lane.b32.xlu1 %v13646_v54, %s16392_s4  ;;  %5925 = vrot.lane.b32.xlu0 %v13646_v54, %s16393_s5 }
 0xec6   : > { %5765 = vrot.lane.b32.xlu2 %v13646_v54, %s16368_s2  ;;  %16426 = vst [vmem:[#allocation39_spill] sm:$0xff] %v13719_v17 }
 0xecd   : > { %5831 = vrot.lane.b32.xlu1 %v13662_v29, %s16390_s3  ;;  %5799 = vrot.lane.b32.xlu0 %v13662_v29, %s16389_s1 }
 0xece   : > { %5861 = vrot.lane.b32.xlu2 %v13646_v54, %s16358_s18 }
 0xed5   : > { %5767 = vrot.lane.b32.xlu1 %v13662_v29, %s16368_s2  ;;  %5895 = vrot.lane.b32.xlu0 %v13662_v29, %s16392_s4 }
 0xed6   : > { %5927 = vrot.lane.b32.xlu2 %v13662_v29, %s16393_s5 }
 0xedd   : > { %5863 = vrot.lane.b32.xlu1 %v13662_v29, %s16358_s18  ;;  %5833 = vrot.lane.b32.xlu0 %v13677_v11, %s16390_s3 }
 0xede   : > { %5769 = vrot.lane.b32.xlu2 %v13677_v11, %s16368_s2 }
 0xee5   : > { %5801 = vrot.lane.b32.xlu1 %v13677_v11, %s16389_s1  ;;  %5929 = vrot.lane.b32.xlu0 %v13677_v11, %s16393_s5 }
 0xee6   : > { %5835 = vrot.lane.b32.xlu2 %v13686_v23, %s16390_s3 }
 0xeed   : > { %5897 = vrot.lane.b32.xlu1 %v13677_v11, %s16392_s4  ;;  %5803 = vrot.lane.b32.xlu0 %v13686_v23, %s16389_s1 }
 0xeee   : > { %5931 = vrot.lane.b32.xlu2 %v13686_v23, %s16393_s5 }
 0xef5   : > { %5771 = vrot.lane.b32.xlu1 %v13686_v23, %s16368_s2  ;;  %5899 = vrot.lane.b32.xlu0 %v13686_v23, %s16392_s4 }
 0xef6   : > { %5805 = vrot.lane.b32.xlu2 %v13701_v42, %s16389_s1 }
 0xefd   : > { %5837 = vrot.lane.b32.xlu1 %v13701_v42, %s16390_s3  ;;  %5773 = vrot.lane.b32.xlu0 %v13701_v42, %s16368_s2 }
 0xefe   : > { %5901 = vrot.lane.b32.xlu2 %v13701_v42, %s16392_s4 }
 0xf00   : > { %v13717_v20 = vpop.permute.xlu2 %5825 }
 0xf05   : > { %5933 = vrot.lane.b32.xlu1 %v13701_v42, %s16393_s5  ;;  %5869 = vrot.lane.b32.xlu0 %v13701_v42, %s16358_s18 }
 0xf06   : > { %5839 = vrot.lane.b32.xlu2 %v13719_v17, %s16390_s3 }
 0xf08   : > { %v13727_v41 = vpop.permute.xlu2 %5921 }
 0xf0d   : > { %5867 = vrot.lane.b32.xlu1 %v13686_v23, %s16358_s18  ;;  %5935 = vrot.lane.b32.xlu0 %v13719_v17, %s16393_s5 }
 0xf0e   : > { %5735 = vrot.lane.b32.xlu2 %v13662_v29, %s16367_s22 }
 0xf10   : > { %v13735_v1 = vpop.permute.xlu2 %5795 }
 0xf15   : > { %5807 = vrot.lane.b32.xlu1 %v13719_v17, %s16389_s1  ;;  %5859 = vrot.lane.b32.xlu0 %v13631_v19, %s16358_s18 }
 0xf16   : > { %5865 = vrot.lane.b32.xlu2 %v13677_v11, %s16358_s18 }
 0xf17   : > { %v13743_v32 = vpop.permute.xlu1 %5761  ;;  %v13745_v24 = vpop.permute.xlu0 %5793 }
 0xf18   : > { %v13747_v40 = vpop.permute.xlu2 %5891 }
 0xf1d   : > { %5903 = vrot.lane.b32.xlu1 %v13719_v17, %s16392_s4  ;;  %5733 = vrot.lane.b32.xlu0 %v13646_v54, %s16367_s22 }
 0xf1e   : > { %5775 = vrot.lane.b32.xlu2 %v13719_v17, %s16368_s2 }
 0xf1f   : > { %v13755_v8 = vpop.permute.xlu1 %5827  ;;  %v13757_v51 = vpop.permute.xlu0 %5889 }
 0xf20   : > { %v13759_v59 = vpop.permute.xlu2 %5765 }
 0xf25   : > { %5857 = vrot.lane.b32.xlu1 %v13622_v35, %s16358_s18  ;;  %5743 = vrot.lane.b32.xlu0 %v13719_v17, %s16367_s22 }
 0xf26   : > { %5871 = vrot.lane.b32.xlu2 %v13719_v17, %s16358_s18 }
 0xf27   : > { %v13767_v63 = vpop.permute.xlu1 %5923  ;;  %v13769_v31 = vpop.permute.xlu0 %5763 }
 0xf28   : > { %v13771_v33 = vpop.permute.xlu2 %5861 }
 0xf2d   : > { %5741 = vrot.lane.b32.xlu1 %v13701_v42, %s16367_s22  ;;  %5739 = vrot.lane.b32.xlu0 %v13686_v23, %s16367_s22 }
 0xf2e   : > { %5731 = vrot.lane.b32.xlu2 %v13631_v19, %s16367_s22 }
 0xf2f   : > { %v13779_v39 = vpop.permute.xlu1 %5797  ;;  %v5830_v58 = vpop.permute.xlu0 %5829 }
 0xf30   : > { %v13781_v56 = vpop.permute.xlu2 %5927 }
 0xf35   : > { %5729 = vrot.lane.b32.xlu1 %v13622_v35, %s16367_s22  ;;  %5959 = vrot.lane.b32.xlu0 %v13662_v29, %s16370_s11 }
 0xf36   : > { %5737 = vrot.lane.b32.xlu2 %v13677_v11, %s16367_s22 }
 0xf37   : > { %v13789_v6 = vpop.permute.xlu1 %5893  ;;  %v13791_v36 = vpop.permute.xlu0 %5925 }
 0xf38   : > { %v13793_v26 = vpop.permute.xlu2 %5769 }
 0xf3d   : > { %5955 = vrot.lane.b32.xlu1 %v13631_v19, %s16370_s11  ;;  %5965 = vrot.lane.b32.xlu0 %v13701_v42, %s16370_s11 }
 0xf3e   : > { %5957 = vrot.lane.b32.xlu2 %v13646_v54, %s16370_s11 }
 0xf3f   : > { %v5832_v16 = vpop.permute.xlu1 %5831  ;;  %v13801_v46 = vpop.permute.xlu0 %5799 }
 0xf40   : > { %v5836_v38 = vpop.permute.xlu2 %5835 }
 0xf41   : > { %v5842_v42 = vsel %vm1613_vm3, %v13755_v8, %v5836_v38 }
 0xf45   : > { %5967 = vrot.lane.b32.xlu1 %v13719_v17, %s16370_s11  ;;  %5953 = vrot.lane.b32.xlu0 %v13622_v35, %s16370_s11 }
 0xf46   : > { %5963 = vrot.lane.b32.xlu2 %v13686_v23, %s16370_s11 }
 0xf47   : > { %v13809_v12 = vpop.permute.xlu1 %5767  ;;  %v13811_v7 = vpop.permute.xlu0 %5895 }
 0xf48   : > { %v13813_v9 = vpop.permute.xlu2 %5931 }
 0xf4d   : > { %5961 = vrot.lane.b32.xlu1 %v13677_v11, %s16370_s11  ;;  %6013 = vperm.xlu0 %8070, %v5999_v3  }
 0xf4e   : > { %6018 = vperm.xlu2 %8072, %v6000_v55  }
 0xf4f   : > { %v13819_v0 = vpop.permute.xlu1 %5863  ;;  %v5834_v34 = vpop.permute.xlu0 %5833 }
 0xf50   : > { %v5806_v53 = vpop.permute.xlu2 %5805  ;;  %v5845_v17 = vsel %vm1613_vm3, %v5834_v34, %v13717_v20 }
 0xf55   : > { %6008 = vperm.xlu1 %8071, %v5998_v44  }
 0xf56   : > { %6003 = vperm.xlu2 %8072, %v5997_v4  }
 0xf57   : > { %v13823_v14 = vpop.permute.xlu1 %5801  ;;  %v13825_v28 = vpop.permute.xlu0 %5929 }
 0xf58   : > { %v13827_v13 = vpop.permute.xlu2 %5901 }
 0xf5f   : > { %v13829_v49 = vpop.permute.xlu1 %5897  ;;  %v5804_v60 = vpop.permute.xlu0 %5803 }
 0xf60   : > { %v5840_v27 = vpop.permute.xlu2 %5839 }
 0xf61   : > { %v5844_v61 = vsel %vm1613_vm3, %v5832_v16, %v5840_v27  ;;  %v5848_v22 = vsel %vm1613_vm3, %v5840_v27, %v5832_v16  ;;  %v5846_v16 = vsel %vm1613_vm3, %v5836_v38, %v13755_v8  ;;  %v5852_v38 = vmul.f32 %v5842_v42, %v16375_v18 }
 0xf62   : > { %v5855_v3 = vmul.f32 %v5848_v22, %v16374_v21  ;;  %v5856_v55 = vmul.f32 %v5844_v61, %v16375_v18  ;;  %v5851_v8 = vmul.f32 %v5846_v16, %v16374_v21 }
 0xf64   : > { %6033 = vmatpush.msrb.mxu2 %v5855_v3  ;;  %6120 = vmatpush.msrb.mxu1 %v5856_v55  ;;  %v5841_v55 = vsel %vm1613_vm3, %v13717_v20, %v5834_v34 }
 0xf67   : > { %v13837_v44 = vpop.permute.xlu1 %5771  ;;  %v13839_v4 = vpop.permute.xlu0 %5899 }
 0xf68   : > { %v13863_v25 = vpop.permute.xlu2 %5735 }
 0xf6f   : > { %v5838_v11 = vpop.permute.xlu1 %5837  ;;  %v13841_v23 = vpop.permute.xlu0 %5773 }
 0xf70   : > { %v5843_v27 = vsel %vm1613_vm3, %v5830_v58, %v5838_v11  ;;  %v5847_v61 = vsel %vm1613_vm3, %v5838_v11, %v5830_v58  ;;  %v5849_v11 = vmul.f32 %v5845_v17, %v16374_v21  ;;  %v5850_v58 = vmul.f32 %v5841_v55, %v16375_v18  ;;  %v13871_v20 = vpop.permute.xlu2 %5865 }
 0xf71   : > { %v5853_v22 = vmul.f32 %v5847_v61, %v16374_v21  ;;  %v5854_v3 = vmul.f32 %v5843_v27, %v16375_v18  ;;  %v5810_v21 = vsel %vm1541_vm6, %v13735_v1, %v5804_v60 }
 0xf73   : > { %6034 = vmatpush.msrb.mxu2 %v5853_v22  ;;  %6121 = vmatpush.msrb.mxu1 %v5854_v3  ;;  %v5938_v3 = vsel %vm1829_vm5, %v13767_v63, %v13813_v9 }
 0xf75   : > { %6035 = vmatpush.msrb.mxu2 %v5851_v8  ;;  %6122 = vmatpush.msrb.mxu1 %v5852_v38  ;;  %v5937_v8 = vsel %vm1829_vm5, %v13727_v41, %v13825_v28  ;;  %v5947_v38 = vmul.f32 %v5938_v3, %v16373_v2 }
 0xf77   : > { %v13867_v27 = vpop.permute.xlu1 %5933  ;;  %v13869_v61 = vpop.permute.xlu0 %5869  ;;  %6036 = vmatpush.msrb.mxu2 %v5849_v11  ;;  %6123 = vmatpush.msrb.mxu1 %v5850_v58 }
 0xf78   : > { %v5939_v42 = vsel %vm1829_vm5, %v13791_v36, %v13867_v27  ;;  %v5776_v18 = vpop.permute.xlu2 %5775 }
 0xf79   : > { %v5949_v55 = vmul.f32 %v5939_v42, %v16373_v2  ;;  %v5815_v42 = vsel %vm1541_vm6, %v5806_v53, %v13779_v39 }
 0xf7f   : > { %v13873_v34 = vpop.permute.xlu1 %5867  ;;  %v13875_v16 = vpop.permute.xlu0 %5935 }
 0xf80   : > { %v5940_v17 = vsel %vm1829_vm5, %v13781_v56, %v13875_v16 }
 0xf81   : > { %v5951_v22 = vmul.f32 %v5940_v17, %v16373_v2  ;;  %v5945_v17 = vmul.f32 %v5937_v8, %v16373_v2 }
 0xf83   : > { %6062 = vmatpush.msrb.mxu3 %v5951_v22  ;;  %v5811_v22 = vsel %vm1541_vm6, %v13779_v39, %v5806_v53  ;;  %v5814_v39 = vsel %vm1541_vm6, %v5804_v60, %v13735_v1  ;;  %v5821_v53 = vmul.f32 %v5815_v42, %v16259_v30  ;;  %v5820_v60 = vmul.f32 %v5810_v21, %v9437_v10 }
 0xf84   : > { %v5822_v2 = vmul.f32 %v5811_v22, %v9437_v10  ;;  %v5819_v1 = vmul.f32 %v5814_v39, %v16259_v30  ;;  %v5780_v22 = vsel %vm1469_vm1, %v13809_v12, %v5776_v18  ;;  %v5907_v21 = vsel %vm1757_vm9, %v13789_v6, %v13827_v13 }
 0xf85   : > { %6063 = vmatpush.msrb.mxu3 %v5949_v55  ;;  %v5906_v39 = vsel %vm1757_vm9, %v13747_v40, %v13839_v4 }
 0xf87   : > { %v5808_v11 = vpop.permute.xlu1 %5807  ;;  %v13896_v58 = vpop.permute.xlu0 %5859  ;;  %6064 = vmatpush.msrb.mxu3 %v5947_v38 }
 0xf88   : > { %v5812_v55 = vsel %vm1541_vm6, %v13801_v46, %v5808_v11  ;;  %v5816_v3 = vsel %vm1541_vm6, %v5808_v11, %v13801_v46  ;;  %v5809_v46 = vsel %vm1541_vm6, %v13745_v24, %v13823_v14  ;;  %v5813_v11 = vsel %vm1541_vm6, %v13823_v14, %v13745_v24 }
 0xf89   : > { %6065 = vmatpush.msrb.mxu3 %v5945_v17  ;;  %v5823_v8 = vmul.f32 %v5816_v3, %v16259_v30  ;;  %v5824_v38 = vmul.f32 %v5812_v55, %v9437_v10  ;;  %v5784_v17 = vsel %vm1469_vm1, %v5776_v18, %v13809_v12  ;;  %v5818_v24 = vmul.f32 %v5809_v46, %v9437_v10 }
 0xf8a   : > { %v5783_v18 = vsel %vm1469_vm1, %v13841_v23, %v13759_v59  ;;  %v5779_v14 = vsel %vm1469_vm1, %v13759_v59, %v13841_v23  ;;  %v5791_v3 = vmul.f32 %v5784_v17, %v16260_v57  ;;  %v5792_v23 = vmul.f32 %v5780_v22, %v16261_v5 }
 0xf8b   : > { %6037 = vmatpush.msrb.mxu2 %v5823_v8  ;;  %6124 = vmatpush.msrb.mxu1 %v5824_v38  ;;  %v5782_v38 = vsel %vm1469_vm1, %v13837_v44, %v13769_v31  ;;  %v5778_v59 = vsel %vm1469_vm1, %v13769_v31, %v13837_v44  ;;  %v5789_v46 = vmul.f32 %v5783_v18, %v16260_v57 }
 0xf8c   : > { %v5790_v17 = vmul.f32 %v5779_v14, %v16261_v5  ;;  %v5777_v31 = vsel %vm1469_vm1, %v13743_v32, %v13793_v26  ;;  %v5787_v44 = vmul.f32 %v5782_v38, %v16260_v57  ;;  %v5915_v22 = vmul.f32 %v5906_v39, %v9408_v15 }
 0xf8d   : > { %6038 = vmatpush.msrb.mxu2 %v5821_v53  ;;  %6125 = vmatpush.msrb.mxu1 %v5822_v2  ;;  %v5817_v2 = vmul.f32 %v5813_v11, %v16259_v30  ;;  %v13969_v53 = vpop.permute.xlu2 %5871  ;;  %v5917_v11 = vmul.f32 %v5907_v21, %v9408_v15 }
 0xf8f   : > { %v13937_v42 = vpop.permute.xlu1 %5903  ;;  %v13939_v55 = vpop.permute.xlu0 %5733  ;;  %6039 = vmatpush.msrb.mxu2 %v5819_v1  ;;  %6126 = vmatpush.msrb.mxu1 %v5820_v60  ;;  %v5781_v1 = vsel %vm1469_vm1, %v13793_v26, %v13743_v32  ;;  %v5905_v60 = vsel %vm1757_vm9, %v13757_v51, %v13829_v49 }
 0xf90   : > { %v5908_v12 = vsel %vm1757_vm9, %v13811_v7, %v13937_v42  ;;  %v5785_v32 = vmul.f32 %v5781_v1, %v16260_v57  ;;  %v5913_v26 = vmul.f32 %v5905_v60, %v9408_v15 }
 0xf91   : > { %6040 = vmatpush.msrb.mxu2 %v5817_v2  ;;  %6127 = vmatpush.msrb.mxu1 %v5818_v24  ;;  %v5919_v8 = vmul.f32 %v5908_v12, %v9408_v15  ;;  %v5876_v2 = vsel %vm1685_vm4, %v13819_v0, %v13969_v53  ;;  %v5788_v24 = vmul.f32 %v5778_v59, %v16261_v5 }
 0xf92   : > { %v5875_v12 = vsel %vm1685_vm4, %v13771_v33, %v13869_v61  ;;  %v5887_v39 = vmul.f32 %v5876_v2, %v8925_v45  ;;  %v5874_v59 = vsel %vm1685_vm4, %v13896_v58, %v13873_v34 }
 0xf93   : > { %6041 = vmatpush.msrb.mxu2 %v5791_v3  ;;  %6066 = vmatpush.msrb.mxu3 %v5919_v8  ;;  %v5786_v8 = vmul.f32 %v5777_v31, %v16261_v5  ;;  %v5883_v1 = vmul.f32 %v5874_v59, %v8925_v45 }
 0xf94   : > { %6128 = vmatpush.msrb.mxu1 %v5792_v23 }
 0xf95   : > { %6042 = vmatpush.msrb.mxu2 %v5789_v46  ;;  %6067 = vmatpush.msrb.mxu3 %v5917_v11  ;;  %v5732_v46 = vpop.permute.xlu2 %5731 }
 0xf96   : > { %6129 = vmatpush.msrb.mxu1 %v5790_v17 }
 0xf97   : > { %v13998_v21 = vpop.permute.xlu1 %5857  ;;  %v5744_v18 = vpop.permute.xlu0 %5743  ;;  %6043 = vmatpush.msrb.mxu2 %v5787_v44  ;;  %6068 = vmatpush.msrb.mxu3 %v5915_v22 }
 0xf98   : > { %v5748_v14 = vsel %vm1398_vm2, %v13863_v25, %v5744_v18  ;;  %v5752_v3 = vsel %vm1398_vm2, %v5744_v18, %v13863_v25  ;;  %6130 = vmatpush.msrb.mxu1 %v5788_v24  ;;  %v5885_v25 = vmul.f32 %v5875_v12, %v8925_v45  ;;  %v5873_v11 = vsel %vm1685_vm4, %v13998_v21, %v13871_v20 }
 0xf99   : > { %6044 = vmatpush.msrb.mxu2 %v5785_v32  ;;  %6069 = vmatpush.msrb.mxu3 %v5913_v26  ;;  %v5759_v38 = vmul.f32 %v5752_v3, %v16262_v48  ;;  %v5760_v23 = vmul.f32 %v5748_v14, %v16263_v43  ;;  %v5881_v31 = vmul.f32 %v5873_v11, %v8925_v45  ;;  %v14045_v3 = vld [vmem:[%s16428_s8 + $0x8] sm:$0xff] }
 0xf9a   : > { %6131 = vmatpush.msrb.mxu1 %v5786_v8  ;;  %v5944_v8 = vsel %vm1829_vm5, %v13875_v16, %v13781_v56  ;;  %v5942_v11 = vsel %vm1829_vm5, %v13813_v9, %v13767_v63  ;;  %v5912_v63 = vsel %vm1757_vm9, %v13937_v42, %v13811_v7  ;;  %v5910_v7 = vsel %vm1757_vm9, %v13839_v4, %v13747_v40 }
 0xf9b   : > { %6045 = vmatpush.msrb.mxu2 %v5759_v38  ;;  %6070 = vmatpush.msrb.mxu3 %v5887_v39  ;;  %v5952_v56 = vmul.f32 %v5944_v8, %v16404_v47  ;;  %v5909_v42 = vsel %vm1757_vm9, %v13829_v49, %v13757_v51  ;;  %v5880_v40 = vsel %vm1685_vm4, %v13969_v53, %v13819_v0  ;;  %v5991_v0 = vld [vmem:[%s16428_s8 + $0x30] sm:$0xff] }
 0xf9c   : > { %6132 = vmatpush.msrb.mxu1 %v5760_v23  ;;  %v5914_v49 = vmul.f32 %v5909_v42, %v16405_v62  ;;  %v5879_v53 = vsel %vm1685_vm4, %v13869_v61, %v13771_v33  ;;  %v5996_v42 = vld [vmem:[%s16428_s8 + $0x58] sm:$0xff] }
 0xf9d   : > { %6071 = vmatpush.msrb.mxu3 %v5885_v25  ;;  %v5738_v12 = vpop.permute.xlu2 %5737  ;;  %v5985_v25 = vld [vmem:[%s16428_s8] sm:$0xff] }
 0xf9f   : > { %v5742_v60 = vpop.permute.xlu1 %5741  ;;  %v5740_v17 = vpop.permute.xlu0 %5739  ;;  %6072 = vmatpush.msrb.mxu3 %v5883_v1 }
 0xfa0   : > { %v5747_v44 = vsel %vm1398_vm2, %v13939_v55, %v5742_v60  ;;  %v5751_v22 = vsel %vm1398_vm2, %v5742_v60, %v13939_v55  ;;  %v5750_v2 = vsel %vm1398_vm2, %v5740_v17, %v5732_v46  ;;  %v5746_v24 = vsel %vm1398_vm2, %v5732_v46, %v5740_v17  ;;  %v14076_v17 = vld [vmem:[%s16428_s8 + $0x20] sm:$0xff] }
 0xfa1   : > { %6073 = vmatpush.msrb.mxu3 %v5881_v31  ;;  %v5757_v18 = vmul.f32 %v5751_v22, %v16262_v48  ;;  %v5758_v32 = vmul.f32 %v5747_v44, %v16263_v43  ;;  %v5755_v26 = vmul.f32 %v5750_v2, %v16262_v48  ;;  %v5756_v55 = vmul.f32 %v5746_v24, %v16263_v43  ;;  %v5988_v44 = vld [vmem:[%s16428_s8 + $0x18] sm:$0xff] }
 0xfa2   : > { %v5943_v46 = vsel %vm1829_vm5, %v13867_v27, %v13791_v36  ;;  %v5941_v36 = vsel %vm1829_vm5, %v13825_v28, %v13727_v41  ;;  %v5948_v60 = vmul.f32 %v5942_v11, %v16404_v47  ;;  %v5911_v41 = vsel %vm1757_vm9, %v13827_v13, %v13789_v6  ;;  %v14101_v24 = vld [vmem:[%s16428_s8 + $0x38] sm:$0xff]  ;;  %v5995_v11 = vld [vmem:[%s16428_s8 + $0x50] sm:$0xff] }
 0xfa3   : > { %6046 = vmatpush.msrb.mxu2 %v5757_v18  ;;  %6074 = vmatpush.msrb.mxu3 %v13662_v29  ;;  %v5950_v1 = vmul.f32 %v5943_v46, %v16404_v47  ;;  %v5946_v31 = vmul.f32 %v5941_v36, %v16404_v47  ;;  %v5920_v28 = vmul.f32 %v5912_v63, %v16405_v62  ;;  %v5987_v63 = vld [vmem:[%s16428_s8 + $0x10] sm:$0xff] }
 0xfa4   : > { %6133 = vmatpush.msrb.mxu1 %v5758_v32  ;;  %v5918_v6 = vmul.f32 %v5911_v41, %v16405_v62  ;;  %v5916_v2 = vmul.f32 %v5910_v7, %v16405_v62  ;;  %v5990_v41 = vld [vmem:[%s16428_s8 + $0x28] sm:$0xff]  ;;  %v5993_v7 = vld [vmem:[%s16428_s8 + $0x40] sm:$0xff]  ;;  %v16442_v62 = vld [vmem:[#allocation65_spill] sm:$0xff] }
 0xfa5   : > { %6047 = vmatpush.msrb.mxu2 %v5755_v26  ;;  %6075 = vmatpush.msrb.mxu3 %v13646_v54  ;;  %v5958_v9 = vpop.permute.xlu2 %5957 }
 0xfa6   : > { %6134 = vmatpush.msrb.mxu1 %v5756_v55 }
 0xfa7   : > { %v5730_v14 = vpop.permute.xlu1 %5729  ;;  %6076 = vmatpush.msrb.mxu3 %v13631_v19  ;;  %v5960_v16 = vpop.permute.xlu0 %5959 }
 0xfa8   : > { %v5745_v38 = vsel %vm1398_vm2, %v5730_v14, %v5738_v12  ;;  %v5749_v39 = vsel %vm1398_vm2, %v5738_v12, %v5730_v14 }
 0xfa9   : > { %6077 = vmatpush.msrb.mxu3 %v13622_v35  ;;  %v5753_v23 = vmul.f32 %v5749_v39, %v16262_v48  ;;  %v5754_v59 = vmul.f32 %v5745_v38, %v16263_v43  ;;  %v16429_v38 = vld [vmem:[#allocation40_spill] sm:$0xff] }
 0xfaa   : > { %6078 = vmatmul.f32.vlgmr.msrb.gmra.mxu3 %v14045_v3  ;;  %v5888_v39 = vmul.f32 %v5880_v40, %v16429_v38 }
 0xfab   : > { %6048 = vmatpush.msrb.mxu2 %v5753_v23  ;;  %6135 = vmatpush.msrb.mxu1 %v5754_v59  ;;  %v5878_v23 = vsel %vm1685_vm4, %v13873_v34, %v13896_v58  ;;  %v5886_v59 = vmul.f32 %v5879_v53, %v16429_v38 }
 0xfac   : > { %6049 = vmatmul.f32.vlgmr.msrb.gmra.mxu2 %v5985_v25  ;;  %6136 = vmatmul.f32.vlgmr.msrb.gmra.mxu1 %v5985_v25  ;;  %v5877_v25 = vsel %vm1685_vm4, %v13871_v20, %v13998_v21 }
 0xfad   : > { %6149 = vmatpush.msra.mxu2 %v5952_v56  ;;  %v5964_v12 = vpop.permute.xlu2 %5963  ;;  %v5882_v21 = vmul.f32 %v5877_v25, %v16429_v38 }
 0xfaf   : > { %6150 = vmatpush.msra.mxu2 %v5950_v1  ;;  %v5956_v27 = vpop.permute.xlu1 %5955  ;;  %v5966_v22 = vpop.permute.xlu0 %5965 }
 0xfb0   : > { %v5971_v18 = vsel %vm1901_vm8, %v5958_v9, %v5966_v22  ;;  %v5975_v32 = vsel %vm1901_vm8, %v5966_v22, %v5958_v9  ;;  %v5970_v14 = vsel %vm1901_vm8, %v5956_v27, %v5964_v12  ;;  %v5974_v8 = vsel %vm1901_vm8, %v5964_v12, %v5956_v27  ;;  %v16430_v9 = vld [vmem:[#allocation39_spill] sm:$0xff] }
 0xfb1   : > { %6151 = vmatpush.msra.mxu2 %v5948_v60  ;;  %v5981_v33 = vmul.f32 %v5971_v18, %v16401_v50  ;;  %v5982_v61 = vmul.f32 %v5975_v32, %v16402_v52  ;;  %v5979_v34 = vmul.f32 %v5970_v14, %v16401_v50  ;;  %v5980_v58 = vmul.f32 %v5974_v8, %v16402_v52  ;;  %v5994_v60 = vld [vmem:[%s16428_s8 + $0x48] sm:$0xff]  ;;  %s16439_s8 = sld [smem:[#allocation17_spill]] }
 0xfb2   : > { %6081 = vmatmul.f32.gmra.mxu3 %v14076_v17 }
 0xfb3   : > { %6152 = vmatpush.msra.mxu2 %v5946_v31  ;;  %v16431_v31 = vld [vmem:[#allocation43_spill] sm:$0xff] }
 0xfb4   : > { %6052 = vmatmul.f32.gmra.mxu2 %v5988_v44  ;;  %6139 = vmatmul.f32.gmra.mxu1 %v5988_v44  ;;  %v16432_v44 = vld [vmem:[#allocation45_spill] sm:$0xff] }
 0xfb5   : > { %6153 = vmatpush.msra.mxu2 %v5920_v28  ;;  %v16433_v28 = vld [vmem:[#allocation44_spill] sm:$0xff]  ;;  %v14171_v22 = vpop.permute.xlu2 %6018 }
 0xfb7   : > { %6154 = vmatpush.msra.mxu2 %v5918_v6  ;;  %v5968_v13 = vpop.permute.xlu1 %5967  ;;  %v5954_v46 = vpop.permute.xlu0 %5953 }
 0xfb8   : > { %v5972_v4 = vsel %vm1901_vm8, %v5960_v16, %v5968_v13  ;;  %v5976_v51 = vsel %vm1901_vm8, %v5968_v13, %v5960_v16  ;;  %v5884_v16 = vmul.f32 %v5878_v23, %v16429_v38 }
 0xfb9   : > { %v5983_v26 = vmul.f32 %v5972_v4, %v16401_v50  ;;  %v5984_v55 = vmul.f32 %v5976_v51, %v16402_v52  ;;  %6155 = vmatpush.msra.mxu2 %v5916_v2 }
 0xfba   : > { %6084 = vmatmul.f32.gmra.mxu3 %v14101_v24 }
 0xfbb   : > { %6156 = vmatpush.msra.mxu2 %v5914_v49  ;;  %6103 = vmatpush.msrb.mxu0 %v5983_v26 }
 0xfbc   : > { %6190 = vmatpush.msra.mxu3 %v5984_v55  ;;  %6055 = vmatmul.f32.gmra.mxu2 %v5991_v0 }
 0xfbd   : > { %6142 = vmatmul.f32.gmra.mxu1 %v5991_v0  ;;  %6157 = vmatpush.msra.mxu2 %v5888_v39  ;;  %v6004_v6 = vpop.permute.xlu2 %6003 }
 0xfbe   : > { %6104 = vmatpush.msrb.mxu0 %v5981_v33  ;;  %6191 = vmatpush.msra.mxu3 %v5982_v61 }
 0xfbf   : > { %6158 = vmatpush.msra.mxu2 %v5886_v59  ;;  %v5962_v56 = vpop.permute.xlu1 %5961  ;;  %v6014_v14 = vpop.permute.xlu0 %6013 }
 0xfc0   : > { %v5969_v1 = vsel %vm1901_vm8, %v5954_v46, %v5962_v56  ;;  %v5973_v20 = vsel %vm1901_vm8, %v5962_v56, %v5954_v46  ;;  %6105 = vmatpush.msrb.mxu0 %v5979_v34  ;;  %6192 = vmatpush.msra.mxu3 %v5980_v58 }
 0xfc1   : > { %6159 = vmatpush.msra.mxu2 %v5884_v16  ;;  %v5977_v36 = vmul.f32 %v5969_v1, %v16401_v50  ;;  %v5978_v27 = vmul.f32 %v5973_v20, %v16402_v52 }
 0xfc2   : > { %6087 = vmatmul.f32.gmra.mxu3 %v5995_v11 }
 0xfc3   : > { %6160 = vmatpush.msra.mxu2 %v5882_v21  ;;  %6106 = vmatpush.msrb.mxu0 %v5977_v36 }
 0xfc4   : > { %6193 = vmatpush.msra.mxu3 %v5978_v27  ;;  %6058 = vmatmul.f32.gmra.mxu2 %v5994_v60 }
 0xfc5   : > { %7973 = vmatmul.msk.f32.vlgmr.msrb.gmra.mxu0 %vm1096_vm0, %v5987_v63  ;;  %6145 = vmatmul.f32.gmra.mxu1 %v5994_v60 }
 0xfc6   : > { %6161 = vmatpush.msra.mxu2 %v16430_v9 }
 0xfc7   : > { %v6009_v49 = vpop.permute.xlu1 %6008 }
 0xfc8   : > { %6162 = vmatpush.msra.mxu2 %v16431_v31 }
 0xfca   : > { %6163 = vmatpush.msra.mxu2 %v16432_v44  ;;  %7977 = vmatmul.msk.f32.vlgmr.msra.gmra.mxu3 %vm1096_vm0, %v5987_v63 }
 0xfcc   : > { %6164 = vmatpush.msra.mxu2 %v16433_v28  ;;  %v16441_v28 = vld [vmem:[#allocation71_spill] sm:$0xff] }
 0xfcd   : > { %7974 = vmatmul.msk.f32.gmra.mxu0 %vm1096_vm0, %v5990_v41  ;;  %6165 = vmatmul.f32.vlgmr.msra.gmra.mxu2 %v14045_v3 }
 0xfd2   : > { %7978 = vmatmul.msk.f32.gmra.mxu3 %vm1096_vm0, %v5990_v41 }
 0xfd5   : > { %7975 = vmatmul.msk.f32.gmra.mxu0 %vm1096_vm0, %v5993_v7  ;;  %6168 = vmatmul.f32.gmra.mxu2 %v14076_v17 }
 0xfda   : > { %7979 = vmatmul.msk.f32.gmra.mxu3 %vm1096_vm0, %v5993_v7 }
 0xfdd   : > { %7976 = vmatmul.msk.f32.gmra.mxu0 %vm1096_vm0, %v5996_v42  ;;  %6171 = vmatmul.f32.gmra.mxu2 %v14101_v24 }
 0xfe2   : > { %7980 = vmatmul.msk.f32.gmra.mxu3 %vm1096_vm0, %v5996_v42 }
 0xfe5   : > { %6174 = vmatmul.f32.gmra.mxu2 %v5995_v11 }
0x1029   : > { %v6137_v1 = vpop.f32.mrf.mxu1 }
0x102a   : > { %v6138_v21 = vadd.f32 %v6137_v1, %v6004_v6 }
0x102d   : > { %v6079_v13 = vpop.f32.mrf.mxu3 }
0x102f   : > { %v6050_v3 = vpop.f32.mrf.mxu2 }
0x1030   : > { %v6051_v2 = vadd.f32 %v6050_v3, %v6004_v6 }
0x1031   : > { %v6140_v60 = vpop.f32.mrf.mxu1 }
0x1032   : > { %v6080_v40 = vadd.f32 %v6079_v13, %v6051_v2  ;;  %v6141_v7 = vadd.f32 %v6140_v60, %v6009_v49 }
0x1035   : > { %v6082_v26 = vpop.f32.mrf.mxu3 }
0x1037   : > { %v6053_v4 = vpop.f32.mrf.mxu2 }
0x1038   : > { %v6054_v18 = vadd.f32 %v6053_v4, %v6009_v49 }
0x103a   : > { %v6083_v24 = vadd.f32 %v6082_v26, %v6054_v18 }
0x103d   : > { %v6085_v39 = vpop.f32.mrf.mxu3 }
0x103f   : > { %v6056_v12 = vpop.f32.mrf.mxu2 }
0x1040   : > { %v6057_v8 = vadd.f32 %v6056_v12, %v6014_v14 }
0x1042   : > { %v6108_v51 = vpop.f32.mrf.mxu0  ;;  %v6086_v33 = vadd.f32 %v6085_v39, %v6057_v8 }
0x1043   : > { %v6109_v17 = vadd.f32 %v6108_v51, %v6080_v40  ;;  %v6143_v40 = vpop.f32.mrf.mxu1 }
0x1044   : > { %v6144_v51 = vadd.f32 %v6143_v40, %v6014_v14 }
0x1045   : > { %v14173_v32 = vmax.f32 %v6109_v17, 0.0  ;;  %v6088_v58 = vpop.f32.mrf.mxu3 }
0x1047   : > { %6247 = vrot.lane.b32.xlu0 %v14173_v32, %s16368_s2  ;;  %6279 = vrot.lane.b32.xlu2 %v14173_v32, %s16389_s1  ;;  %v6059_v25 = vpop.f32.mrf.mxu2 }
0x1048   : > { %6311 = vrot.lane.b32.xlu1 %v14173_v32, %s16390_s3  ;;  %v6060_v34 = vadd.f32 %v6059_v25, %v14171_v22 }
0x104a   : > { %v6111_v55 = vpop.f32.mrf.mxu0  ;;  %v6089_v56 = vadd.f32 %v6088_v58, %v6060_v34 }
0x104b   : > { %v6112_v0 = vadd.f32 %v6111_v55, %v6083_v24  ;;  %v6146_v24 = vpop.f32.mrf.mxu1 }
0x104d   : > { %v14181_v53 = vmax.f32 %v6112_v0, 0.0  ;;  %v6195_v27 = vpop.f32.mrf.mxu3  ;;  %v6147_v0 = vadd.f32 %v6146_v24, %v14171_v22 }
0x104f   : > { %6313 = vrot.lane.b32.xlu0 %v14181_v53, %s16390_s3  ;;  %6375 = vrot.lane.b32.xlu2 %v14173_v32, %s16392_s4 }
0x1050   : > { %6407 = vrot.lane.b32.xlu1 %v14173_v32, %s16393_s5  ;;  %v6166_v20 = vpop.f32.mrf.mxu2 }
0x1051   : > { %v6167_v36 = vadd.f32 %v6166_v20, %v6138_v21 }
0x1052   : > { %v6114_v23 = vpop.f32.mrf.mxu0 }
0x1053   : > { %v6115_v61 = vadd.f32 %v6114_v23, %v6086_v33  ;;  %v6196_v63 = vadd.f32 %v6195_v27, %v6167_v36 }
0x1055   : > { %v14195_v59 = vmax.f32 %v6115_v61, 0.0  ;;  %v14224_v42 = vmax.f32 %v6196_v63, 0.0  ;;  %v6198_v13 = vpop.f32.mrf.mxu3 }
0x1057   : > { %6409 = vrot.lane.b32.xlu0 %v14181_v53, %s16393_s5  ;;  %6249 = vrot.lane.b32.xlu2 %v14181_v53, %s16368_s2  ;;  %16434 = vst [vmem:[#allocation51_spill] sm:$0xff] %v14224_v42 }
0x1058   : > { %6281 = vrot.lane.b32.xlu1 %v14181_v53, %s16389_s1  ;;  %v6169_v41 = vpop.f32.mrf.mxu2 }
0x1059   : > { %v6170_v3 = vadd.f32 %v6169_v41, %v6141_v7 }
0x105a   : > { %v6117_v46 = vpop.f32.mrf.mxu0 }
0x105b   : > { %v6118_v16 = vadd.f32 %v6117_v46, %v6089_v56  ;;  %v6199_v6 = vadd.f32 %v6198_v13, %v6170_v3 }
0x105d   : > { %v14210_v11 = vmax.f32 %v6118_v16, 0.0  ;;  %v14232_v2 = vmax.f32 %v6199_v6, 0.0  ;;  %v6201_v49 = vpop.f32.mrf.mxu3 }
0x105f   : > { %6283 = vrot.lane.b32.xlu0 %v14195_v59, %s16389_s1  ;;  %6315 = vrot.lane.b32.xlu2 %v14195_v59, %s16390_s3  ;;  %16435 = vst [vmem:[#allocation41_spill] sm:$0xff] %v14232_v2 }
0x1060   : > { %6377 = vrot.lane.b32.xlu1 %v14181_v53, %s16392_s4  ;;  %v6172_v4 = vpop.f32.mrf.mxu2 }
0x1061   : > { %v6173_v17 = vadd.f32 %v6172_v4, %v6144_v51  ;;  %v6485_v51 = vld [vmem:[%s16439_s8 + $0x10] sm:$0xff] }
0x1063   : > { %v6202_v18 = vadd.f32 %v6201_v49, %v6173_v17  ;;  %v6486_v17 = vld [vmem:[%s16439_s8 + $0x18] sm:$0xff] }
0x1065   : > { %v14246_v26 = vmax.f32 %v6202_v18, 0.0  ;;  %v6204_v14 = vpop.f32.mrf.mxu3 }
0x1067   : > { %6379 = vrot.lane.b32.xlu0 %v14195_v59, %s16392_s4  ;;  %6411 = vrot.lane.b32.xlu2 %v14195_v59, %s16393_s5  ;;  %16436 = vst [vmem:[#allocation42_spill] sm:$0xff] %v14246_v26 }
0x1068   : > { %6251 = vrot.lane.b32.xlu1 %v14195_v59, %s16368_s2  ;;  %v6175_v55 = vpop.f32.mrf.mxu2 }
0x1069   : > { %v6176_v12 = vadd.f32 %v6175_v55, %v6147_v0  ;;  %v6484_v55 = vld [vmem:[%s16439_s8 + $0x8] sm:$0xff]  ;;  %v6483_v0 = vld [vmem:[%s16439_s8] sm:$0xff]  ;;  %s16444_s8 = sld [smem:[#allocation16_spill]] }
0x106b   : > { %v6205_v39 = vadd.f32 %v6204_v14, %v6176_v12 }
0x106d   : > { %v14263_v23 = vmax.f32 %v6205_v39, 0.0 }
0x106f   : > { %6317 = vrot.lane.b32.xlu0 %v14210_v11, %s16390_s3  ;;  %6285 = vrot.lane.b32.xlu2 %v14210_v11, %s16389_s1  ;;  %16437 = vst [vmem:[#allocation26_spill] sm:$0xff] %v14263_v23 }
0x1070   : > { %6347 = vrot.lane.b32.xlu1 %v14195_v59, %s16358_s18 }
0x1077   : > { %6253 = vrot.lane.b32.xlu0 %v14210_v11, %s16368_s2  ;;  %6381 = vrot.lane.b32.xlu2 %v14210_v11, %s16392_s4 }
0x1078   : > { %6413 = vrot.lane.b32.xlu1 %v14210_v11, %s16393_s5 }
0x107f   : > { %6349 = vrot.lane.b32.xlu0 %v14210_v11, %s16358_s18  ;;  %6319 = vrot.lane.b32.xlu2 %v14224_v42, %s16390_s3 }
0x1080   : > { %6255 = vrot.lane.b32.xlu1 %v14224_v42, %s16368_s2 }
0x1087   : > { %6287 = vrot.lane.b32.xlu0 %v14224_v42, %s16389_s1  ;;  %6415 = vrot.lane.b32.xlu2 %v14224_v42, %s16393_s5 }
0x1088   : > { %6321 = vrot.lane.b32.xlu1 %v14232_v2, %s16390_s3 }
0x108f   : > { %6383 = vrot.lane.b32.xlu0 %v14224_v42, %s16392_s4  ;;  %6289 = vrot.lane.b32.xlu2 %v14232_v2, %s16389_s1 }
0x1090   : > { %6417 = vrot.lane.b32.xlu1 %v14232_v2, %s16393_s5 }
0x1097   : > { %6257 = vrot.lane.b32.xlu0 %v14232_v2, %s16368_s2  ;;  %6385 = vrot.lane.b32.xlu2 %v14232_v2, %s16392_s4 }
0x1098   : > { %6291 = vrot.lane.b32.xlu1 %v14246_v26, %s16389_s1 }
0x109f   : > { %6323 = vrot.lane.b32.xlu0 %v14246_v26, %s16390_s3  ;;  %6259 = vrot.lane.b32.xlu2 %v14246_v26, %s16368_s2 }
0x10a0   : > { %6387 = vrot.lane.b32.xlu1 %v14246_v26, %s16392_s4 }
0x10a1   : > { %v14261_v8 = vpop.permute.xlu2 %6279 }
0x10a7   : > { %6419 = vrot.lane.b32.xlu0 %v14246_v26, %s16393_s5  ;;  %6355 = vrot.lane.b32.xlu2 %v14246_v26, %s16358_s18 }
0x10a8   : > { %6325 = vrot.lane.b32.xlu1 %v14263_v23, %s16390_s3 }
0x10a9   : > { %v14271_v22 = vpop.permute.xlu2 %6375 }
0x10af   : > { %6353 = vrot.lane.b32.xlu0 %v14232_v2, %s16358_s18  ;;  %6421 = vrot.lane.b32.xlu2 %v14263_v23, %s16393_s5 }
0x10b0   : > { %6221 = vrot.lane.b32.xlu1 %v14210_v11, %s16367_s22 }
0x10b1   : > { %v14279_v33 = vpop.permute.xlu2 %6249 }
0x10b7   : > { %6293 = vrot.lane.b32.xlu0 %v14263_v23, %s16389_s1  ;;  %6345 = vrot.lane.b32.xlu2 %v14181_v53, %s16358_s18 }
0x10b8   : > { %6351 = vrot.lane.b32.xlu1 %v14224_v42, %s16358_s18 }
0x10b9   : > { %v14287_v61 = vpop.permute.xlu0 %6247  ;;  %v14289_v25 = vpop.permute.xlu2 %6315 }
0x10ba   : > { %v14291_v34 = vpop.permute.xlu1 %6311 }
0x10bf   : > { %6389 = vrot.lane.b32.xlu0 %v14263_v23, %s16392_s4  ;;  %6219 = vrot.lane.b32.xlu2 %v14195_v59, %s16367_s22 }
0x10c0   : > { %6261 = vrot.lane.b32.xlu1 %v14263_v23, %s16368_s2 }
0x10c1   : > { %v14299_v58 = vpop.permute.xlu0 %6313  ;;  %v14301_v46 = vpop.permute.xlu2 %6411 }
0x10c2   : > { %v14303_v56 = vpop.permute.xlu1 %6407 }
0x10c7   : > { %6343 = vrot.lane.b32.xlu0 %v14173_v32, %s16358_s18  ;;  %6229 = vrot.lane.b32.xlu2 %v14263_v23, %s16367_s22 }
0x10c8   : > { %6357 = vrot.lane.b32.xlu1 %v14263_v23, %s16358_s18 }
0x10c9   : > { %v14311_v16 = vpop.permute.xlu0 %6409  ;;  %v14313_v1 = vpop.permute.xlu2 %6285 }
0x10ca   : > { %16438 = vst [vmem:[#allocation55_spill] sm:$0xff] %v14311_v16  ;;  %v14315_v20 = vpop.permute.xlu1 %6281 }
0x10cf   : > { %6227 = vrot.lane.b32.xlu0 %v14246_v26, %s16367_s22  ;;  %6225 = vrot.lane.b32.xlu2 %v14232_v2, %s16367_s22 }
0x10d0   : > { %6217 = vrot.lane.b32.xlu1 %v14181_v53, %s16367_s22 }
0x10d1   : > { %v14323_v21 = vpop.permute.xlu0 %6283  ;;  %v14325_v36 = vpop.permute.xlu2 %6381 }
0x10d2   : > { %v14327_v27 = vpop.permute.xlu1 %6377 }
0x10d7   : > { %6215 = vrot.lane.b32.xlu0 %v14173_v32, %s16367_s22  ;;  %6445 = vrot.lane.b32.xlu2 %v14210_v11, %s16370_s11 }
0x10d8   : > { %6223 = vrot.lane.b32.xlu1 %v14224_v42, %s16367_s22 }
0x10d9   : > { %v14335_v60 = vpop.permute.xlu0 %6379  ;;  %v6320_v63 = vpop.permute.xlu2 %6319 }
0x10da   : > { %v14337_v41 = vpop.permute.xlu1 %6251 }
0x10df   : > { %6441 = vrot.lane.b32.xlu0 %v14181_v53, %s16370_s11  ;;  %6451 = vrot.lane.b32.xlu2 %v14246_v26, %s16370_s11 }
0x10e0   : > { %6443 = vrot.lane.b32.xlu1 %v14195_v59, %s16370_s11 }
0x10e1   : > { %v6318_v7 = vpop.permute.xlu0 %6317  ;;  %v14345_v3 = vpop.permute.xlu2 %6415 }
0x10e2   : > { %v14347_v13 = vpop.permute.xlu1 %6347  ;;  %v6423_v50 = vsel %vm1829_vm5, %v14303_v56, %v14345_v3 }
0x10e7   : > { %6453 = vrot.lane.b32.xlu0 %v14263_v23, %s16370_s11  ;;  %6439 = vrot.lane.b32.xlu2 %v14173_v32, %s16370_s11 }
0x10e8   : > { %6449 = vrot.lane.b32.xlu1 %v14232_v2, %s16370_s11 }
0x10e9   : > { %v14355_v6 = vpop.permute.xlu0 %6253  ;;  %v14357_v40 = vpop.permute.xlu2 %6289 }
0x10ea   : > { %v14359_v4 = vpop.permute.xlu1 %6413 }
0x10ef   : > { %6447 = vrot.lane.b32.xlu0 %v14224_v42, %s16370_s11  ;;  %6499 = vperm.xlu2 %8072, %v6485_v51  }
0x10f0   : > { %6504 = vperm.xlu1 %8071, %v6486_v17  }
0x10f1   : > { %v14365_v49 = vpop.permute.xlu0 %6349  ;;  %v14367_v18 = vpop.permute.xlu2 %6385 }
0x10f2   : > { %v14369_v24 = vpop.permute.xlu1 %6255 }
0x10f7   : > { %6494 = vperm.xlu0 %8070, %v6484_v55  }
0x10f8   : > { %6489 = vperm.xlu1 %8071, %v6483_v0  }
0x10f9   : > { %v14373_v12 = vpop.permute.xlu0 %6287  ;;  %v14375_v14 = vpop.permute.xlu2 %6259 }
0x10fa   : > { %v6322_v39 = vpop.permute.xlu1 %6321 }
0x1101   : > { %v14377_v9 = vpop.permute.xlu0 %6383  ;;  %v14379_v31 = vpop.permute.xlu2 %6355 }
0x1102   : > { %v14381_v51 = vpop.permute.xlu1 %6417 }
0x1103   : > { %16440 = vst [vmem:[#allocation61_spill] sm:$0xff] %v14381_v51  ;;  %v6424_v42 = vsel %vm1829_vm5, %v14311_v16, %v14381_v51  ;;  %v16443_v16 = vld [vmem:[#allocation23_spill] sm:$0xff] }
0x1109   : > { %v14383_v17 = vpop.permute.xlu0 %6257  ;;  %v14385_v44 = vpop.permute.xlu2 %6421 }
0x110a   : > { %v6426_v55 = vsel %vm1829_vm5, %v14359_v4, %v14385_v44  ;;  %v6292_v0 = vpop.permute.xlu1 %6291 }
0x110b   : > { %v6437_v29 = vmul.f32 %v6426_v55, %v16441_v28 }
0x110d   : > { %6548 = vmatpush.msra.mxu1 %v6437_v29 }
0x1111   : > { %v6324_v54 = vpop.permute.xlu0 %6323 }
0x1112   : > { %v14392_v19 = vpop.permute.xlu1 %6387  ;;  %v6329_v2 = vsel %vm1613_vm3, %v14289_v25, %v6324_v54  ;;  %v6333_v26 = vsel %vm1613_vm3, %v6324_v54, %v14289_v25  ;;  %v6328_v54 = vsel %vm1613_vm3, %v14299_v58, %v6322_v39  ;;  %v6332_v25 = vsel %vm1613_vm3, %v6322_v39, %v14299_v58 }
0x1113   : > { %v6431_v58 = vmul.f32 %v6423_v50, %v16441_v28  ;;  %v6297_v39 = vsel %vm1541_vm6, %v14323_v21, %v6292_v0 }
0x1119   : > { %v14394_v35 = vpop.permute.xlu0 %6419 }
0x111a   : > { %v6425_v55 = vsel %vm1829_vm5, %v14301_v46, %v14394_v35  ;;  %v6326_v29 = vpop.permute.xlu1 %6325 }
0x111b   : > { %v6330_v23 = vsel %vm1613_vm3, %v6318_v7, %v6326_v29  ;;  %v6334_v38 = vsel %vm1613_vm3, %v6326_v29, %v6318_v7  ;;  %v6435_v52 = vmul.f32 %v6425_v55, %v16441_v28  ;;  %v6433_v7 = vmul.f32 %v6424_v42, %v16441_v28 }
0x111c   : > { %v6341_v51 = vmul.f32 %v6334_v38, %v16442_v62  ;;  %v6342_v47 = vmul.f32 %v6330_v23, %v16443_v16  ;;  %v6339_v55 = vmul.f32 %v6333_v26, %v16442_v62  ;;  %v6340_v29 = vmul.f32 %v6329_v2, %v16443_v16  ;;  %v14441_v2 = vpop.permute.xlu2 %6345 }
0x111d   : > { %6549 = vmatpush.msra.mxu1 %v6435_v52  ;;  %v6327_v38 = vsel %vm1613_vm3, %v14291_v34, %v6320_v63  ;;  %v6331_v23 = vsel %vm1613_vm3, %v6320_v63, %v14291_v34  ;;  %v6337_v52 = vmul.f32 %v6332_v25, %v16442_v62 }
0x111e   : > { %6519 = vmatpush.msra.mxu0 %v6341_v51  ;;  %6606 = vmatpush.msrb.mxu3 %v6342_v47  ;;  %v6338_v47 = vmul.f32 %v6328_v54, %v16443_v16  ;;  %v6335_v34 = vmul.f32 %v6331_v23, %v16442_v62  ;;  %v6336_v63 = vmul.f32 %v6327_v38, %v16443_v16 }
0x111f   : > { %6550 = vmatpush.msra.mxu1 %v6433_v7  ;;  %v6301_v51 = vsel %vm1541_vm6, %v6292_v0, %v14323_v21  ;;  %v6296_v38 = vsel %vm1541_vm6, %v14315_v20, %v14357_v40  ;;  %v6300_v21 = vsel %vm1541_vm6, %v14357_v40, %v14315_v20  ;;  %v6308_v23 = vmul.f32 %v6297_v39, %v9437_v10 }
0x1120   : > { %6520 = vmatpush.msra.mxu0 %v6339_v55  ;;  %6607 = vmatpush.msrb.mxu3 %v6340_v29  ;;  %v6305_v20 = vmul.f32 %v6300_v21, %v16259_v30  ;;  %v6306_v40 = vmul.f32 %v6296_v38, %v9437_v10  ;;  %v6264_v38 = vsel %vm1469_vm1, %v14279_v33, %v14383_v17 }
0x1121   : > { %v14439_v42 = vpop.permute.xlu0 %6353  ;;  %6551 = vmatpush.msra.mxu1 %v6431_v58  ;;  %v6295_v58 = vsel %vm1541_vm6, %v14261_v8, %v14373_v12 }
0x1122   : > { %6521 = vmatpush.msra.mxu0 %v6337_v52  ;;  %6608 = vmatpush.msrb.mxu3 %v6338_v47  ;;  %v14443_v26 = vpop.permute.xlu1 %6221  ;;  %v6299_v52 = vsel %vm1541_vm6, %v14373_v12, %v14261_v8  ;;  %v6269_v8 = vsel %vm1469_vm1, %v14375_v14, %v14337_v41  ;;  %v6393_v12 = vsel %vm1757_vm9, %v14335_v60, %v14392_v19 }
0x1123   : > { %v6403_v21 = vmul.f32 %v6393_v12, %v9408_v15 }
0x1124   : > { %6522 = vmatpush.msra.mxu0 %v6335_v34  ;;  %6609 = vmatpush.msrb.mxu3 %v6336_v63  ;;  %v14471_v0 = vpop.permute.xlu2 %6219  ;;  %v6303_v34 = vmul.f32 %v6299_v52, %v16259_v30  ;;  %v6304_v63 = vmul.f32 %v6295_v58, %v9437_v10  ;;  %v6275_v58 = vmul.f32 %v6269_v8, %v16260_v57 }
0x1129   : > { %v6294_v50 = vpop.permute.xlu0 %6293 }
0x112a   : > { %v6298_v54 = vsel %vm1541_vm6, %v14313_v1, %v6294_v50  ;;  %v6302_v25 = vsel %vm1541_vm6, %v6294_v50, %v14313_v1  ;;  %v14459_v7 = vpop.permute.xlu1 %6351  ;;  %v6307_v1 = vmul.f32 %v6301_v51, %v16259_v30  ;;  %v6265_v50 = vsel %vm1469_vm1, %v14337_v41, %v14375_v14 }
0x112b   : > { %v6309_v55 = vmul.f32 %v6302_v25, %v16259_v30  ;;  %v6310_v29 = vmul.f32 %v6298_v54, %v9437_v10  ;;  %v6392_v14 = vsel %vm1757_vm9, %v14327_v27, %v14367_v18  ;;  %v6276_v52 = vmul.f32 %v6265_v50, %v16261_v5 }
0x112d   : > { %6523 = vmatpush.msra.mxu0 %v6309_v55  ;;  %6610 = vmatpush.msrb.mxu3 %v6310_v29 }
0x112f   : > { %6524 = vmatpush.msra.mxu0 %v6307_v1  ;;  %6611 = vmatpush.msrb.mxu3 %v6308_v23  ;;  %v6391_v1 = vsel %vm1757_vm9, %v14271_v22, %v14377_v9  ;;  %v6230_v23 = vpop.permute.xlu2 %6229 }
0x1130   : > { %v6399_v8 = vmul.f32 %v6391_v1, %v9408_v15 }
0x1131   : > { %v14485_v47 = vpop.permute.xlu0 %6389  ;;  %6525 = vmatpush.msra.mxu0 %v6305_v20  ;;  %6612 = vmatpush.msrb.mxu3 %v6306_v40  ;;  %v6401_v20 = vmul.f32 %v6392_v14, %v9408_v15 }
0x1132   : > { %v6394_v39 = vsel %vm1757_vm9, %v14325_v36, %v14485_v47  ;;  %v6262_v51 = vpop.permute.xlu1 %6261 }
0x1133   : > { %v6266_v54 = vsel %vm1469_vm1, %v14355_v6, %v6262_v51  ;;  %v6270_v25 = vsel %vm1469_vm1, %v6262_v51, %v14355_v6  ;;  %6526 = vmatpush.msra.mxu0 %v6303_v34  ;;  %6613 = vmatpush.msrb.mxu3 %v6304_v63  ;;  %v6405_v41 = vmul.f32 %v6394_v39, %v9408_v15 }
0x1134   : > { %v6277_v55 = vmul.f32 %v6270_v25, %v16260_v57  ;;  %v6278_v29 = vmul.f32 %v6266_v54, %v16261_v5  ;;  %v6268_v6 = vsel %vm1469_vm1, %v14383_v17, %v14279_v33  ;;  %v6263_v33 = vsel %vm1469_vm1, %v14287_v61, %v14369_v24 }
0x1135   : > { %6552 = vmatpush.msra.mxu1 %v6405_v41  ;;  %v6267_v17 = vsel %vm1469_vm1, %v14369_v24, %v14287_v61  ;;  %v6273_v40 = vmul.f32 %v6268_v6, %v16260_v57  ;;  %v6274_v34 = vmul.f32 %v6264_v38, %v16261_v5  ;;  %v6238_v63 = vsel %vm1398_vm2, %v6230_v23, %v14443_v26 }
0x1136   : > { %6527 = vmatpush.msra.mxu0 %v6277_v55  ;;  %6614 = vmatpush.msrb.mxu3 %v6278_v29  ;;  %v6234_v61 = vsel %vm1398_vm2, %v14443_v26, %v6230_v23  ;;  %v6271_v12 = vmul.f32 %v6267_v17, %v16260_v57  ;;  %v6272_v39 = vmul.f32 %v6263_v33, %v16261_v5 }
0x1137   : > { %6553 = vmatpush.msra.mxu1 %v6403_v21  ;;  %v6361_v51 = vsel %vm1685_vm4, %v14347_v13, %v14379_v31  ;;  %v6245_v26 = vmul.f32 %v6238_v63, %v16262_v48  ;;  %v6360_v41 = vsel %vm1685_vm4, %v14441_v2, %v14439_v42  ;;  %v6246_v14 = vmul.f32 %v6234_v61, %v16263_v43  ;;  %v6226_v21 = vpop.permute.xlu2 %6225  ;;  %v14597_v61 = vld [vmem:[%s16444_s8 + $0x8] sm:$0xff] }
0x1138   : > { %6528 = vmatpush.msra.mxu0 %v6275_v58  ;;  %6615 = vmatpush.msrb.mxu3 %v6276_v52  ;;  %v6371_v55 = vmul.f32 %v6361_v51, %v8925_v45  ;;  %v6369_v38 = vmul.f32 %v6360_v41, %v8925_v45  ;;  %v6471_v51 = vld [vmem:[%s16444_s8] sm:$0xff] }
0x1139   : > { %v14547_v50 = vpop.permute.xlu0 %6343  ;;  %6554 = vmatpush.msra.mxu1 %v6401_v20 }
0x113a   : > { %6529 = vmatpush.msra.mxu0 %v6273_v40  ;;  %6616 = vmatpush.msrb.mxu3 %v6274_v34  ;;  %v14553_v24 = vpop.permute.xlu1 %6357  ;;  %v6359_v29 = vsel %vm1685_vm4, %v14547_v50, %v14459_v7 }
0x113b   : > { %v6362_v54 = vsel %vm1685_vm4, %v14365_v49, %v14553_v24  ;;  %6555 = vmatpush.msra.mxu1 %v6399_v8  ;;  %v6367_v52 = vmul.f32 %v6359_v29, %v8925_v45 }
0x113c   : > { %6530 = vmatpush.msra.mxu0 %v6271_v12  ;;  %6617 = vmatpush.msrb.mxu3 %v6272_v39  ;;  %v6373_v25 = vmul.f32 %v6362_v54, %v8925_v45  ;;  %v6430_v12 = vsel %vm1829_vm5, %v14385_v44, %v14359_v4  ;;  %v6429_v54 = vsel %vm1829_vm5, %v14394_v35, %v14301_v46  ;;  %v16445_v4 = vld [vmem:[#allocation25_spill] sm:$0xff] }
0x113d   : > { %v6427_v35 = vsel %vm1829_vm5, %v14345_v3, %v14303_v56  ;;  %v6397_v56 = vsel %vm1757_vm9, %v14392_v19, %v14335_v60  ;;  %v16448_v3 = vld [vmem:[#allocation38_spill] sm:$0xff]  ;;  %v6395_v19 = vsel %vm1757_vm9, %v14377_v9, %v14271_v22  ;;  %v16449_v9 = vld [vmem:[#allocation52_spill] sm:$0xff] }
0x113e   : > { %6531 = vmatpush.msra.mxu0 %v6245_v26  ;;  %6556 = vmatpush.msra.mxu1 %v6373_v25  ;;  %v6438_v26 = vmul.f32 %v6430_v12, %v16445_v4  ;;  %v16447_v25 = vld [vmem:[#allocation61_spill] sm:$0xff]  ;;  %v6477_v12 = vld [vmem:[%s16444_s8 + $0x30] sm:$0xff] }
0x113f   : > { %6618 = vmatpush.msrb.mxu3 %v6246_v14  ;;  %v6446_v44 = vpop.permute.xlu2 %6445  ;;  %v6436_v14 = vmul.f32 %v6429_v54, %v16445_v4 }
0x1140   : > { %6557 = vmatpush.msra.mxu1 %v6371_v55 }
0x1141   : > { %v6228_v6 = vpop.permute.xlu0 %6227 }
0x1142   : > { %v6233_v1 = vsel %vm1398_vm2, %v14471_v0, %v6228_v6  ;;  %v6237_v23 = vsel %vm1398_vm2, %v6228_v6, %v14471_v0  ;;  %6558 = vmatpush.msra.mxu1 %v6369_v38  ;;  %v6218_v58 = vpop.permute.xlu1 %6217  ;;  %v14628_v38 = vld [vmem:[%s16444_s8 + $0x20] sm:$0xff]  ;;  %v6398_v6 = vsel %vm1757_vm9, %v14485_v47, %v14325_v36  ;;  %v6404_v47 = vmul.f32 %v6397_v56, %v16448_v3  ;;  %v16455_v56 = vld [vmem:[#allocation51_spill] sm:$0xff] }
0x1143   : > { %v6232_v33 = vsel %vm1398_vm2, %v6218_v58, %v6226_v21  ;;  %v6236_v17 = vsel %vm1398_vm2, %v6226_v21, %v6218_v58  ;;  %v6243_v20 = vmul.f32 %v6237_v23, %v16262_v48  ;;  %v6244_v40 = vmul.f32 %v6233_v1, %v16263_v43  ;;  %v6474_v1 = vld [vmem:[%s16444_s8 + $0x18] sm:$0xff] }
0x1144   : > { %6559 = vmatpush.msra.mxu1 %v6367_v52  ;;  %v6241_v0 = vmul.f32 %v6236_v17, %v16262_v48  ;;  %v6242_v34 = vmul.f32 %v6232_v33, %v16263_v43  ;;  %v6432_v21 = vmul.f32 %v6427_v35, %v16445_v4  ;;  %v6406_v23 = vmul.f32 %v6398_v6, %v16448_v3  ;;  %v16453_v6 = vld [vmem:[#allocation42_spill] sm:$0xff] }
0x1145   : > { %6532 = vmatpush.msra.mxu0 %v6243_v20  ;;  %6619 = vmatpush.msrb.mxu3 %v6244_v40  ;;  %v6396_v58 = vsel %vm1757_vm9, %v14367_v18, %v14327_v27  ;;  %v6366_v17 = vsel %vm1685_vm4, %v14553_v24, %v14365_v49  ;;  %v16450_v40 = vld [vmem:[#allocation46_spill] sm:$0xff]  ;;  %v6365_v49 = vsel %vm1685_vm4, %v14379_v31, %v14347_v13 }
0x1146   : > { %6560 = vmatpush.msra.mxu1 %v14210_v11  ;;  %v6402_v33 = vmul.f32 %v6396_v58, %v16448_v3  ;;  %v6482_v58 = vld [vmem:[%s16444_s8 + $0x58] sm:$0xff] }
0x1147   : > { %6533 = vmatpush.msra.mxu0 %v6241_v0  ;;  %6620 = vmatpush.msrb.mxu3 %v6242_v34  ;;  %v6452_v36 = vpop.permute.xlu2 %6451  ;;  %v6478_v34 = vld [vmem:[%s16444_s8 + $0x38] sm:$0xff] }
0x1148   : > { %6561 = vmatpush.msra.mxu1 %v14195_v59 }
0x1149   : > { %v6216_v63 = vpop.permute.xlu0 %6215 }
0x114a   : > { %6562 = vmatpush.msra.mxu1 %v14181_v53  ;;  %v6224_v8 = vpop.permute.xlu1 %6223 }
0x114b   : > { %v6231_v39 = vsel %vm1398_vm2, %v6216_v63, %v6224_v8  ;;  %v6235_v11 = vsel %vm1398_vm2, %v6224_v8, %v6216_v63  ;;  %v6400_v8 = vmul.f32 %v6395_v19, %v16448_v3 }
0x114c   : > { %6563 = vmatpush.msra.mxu1 %v14173_v32  ;;  %v6239_v59 = vmul.f32 %v6235_v11, %v16262_v48  ;;  %v6240_v53 = vmul.f32 %v6231_v39, %v16263_v43  ;;  %v16446_v32 = vld [vmem:[#allocation55_spill] sm:$0xff] }
0x114d   : > { %6564 = vmatmul.f32.vlgmr.msra.gmra.mxu1 %v14597_v61  ;;  %v6428_v41 = vsel %vm1829_vm5, %v16447_v25, %v16446_v32 }
0x114e   : > { %6534 = vmatpush.msra.mxu0 %v6239_v59  ;;  %6621 = vmatpush.msrb.mxu3 %v6240_v53  ;;  %v6434_v29 = vmul.f32 %v6428_v41, %v16445_v4  ;;  %v16451_v59 = vld [vmem:[#allocation40_spill] sm:$0xff] }
0x114f   : > { %6535 = vmatmul.f32.vlgmr.msra.gmra.mxu0 %v6471_v51  ;;  %6622 = vmatmul.f32.vlgmr.msrb.gmra.mxu3 %v6471_v51  ;;  %v6374_v53 = vmul.f32 %v6366_v17, %v16451_v59  ;;  %v6364_v51 = vsel %vm1685_vm4, %v14439_v42, %v14441_v2  ;;  %v6372_v54 = vmul.f32 %v6365_v49, %v16451_v59  ;;  %v16458_v49 = vld [vmem:[#allocation32_spill] sm:$0xff] }
0x1150   : > { %6635 = vmatpush.msrb.mxu0 %v6438_v26  ;;  %v6440_v26 = vpop.permute.xlu2 %6439  ;;  %v6370_v41 = vmul.f32 %v6364_v51, %v16451_v59 }
0x1151   : > { %v6442_v46 = vpop.permute.xlu0 %6441 }
0x1152   : > { %6636 = vmatpush.msrb.mxu0 %v6436_v14  ;;  %v6444_v55 = vpop.permute.xlu1 %6443 }
0x1153   : > { %v6457_v20 = vsel %vm1901_vm8, %v6444_v55, %v6452_v36  ;;  %v6461_v63 = vsel %vm1901_vm8, %v6452_v36, %v6444_v55  ;;  %v6481_v55 = vld [vmem:[%s16444_s8 + $0x50] sm:$0xff] }
0x1154   : > { %6637 = vmatpush.msrb.mxu0 %v6434_v29  ;;  %v6467_v39 = vmul.f32 %v6457_v20, %v16449_v9  ;;  %v6468_v31 = vmul.f32 %v6461_v63, %v16450_v40  ;;  %v16452_v29 = vld [vmem:[#allocation26_spill] sm:$0xff] }
0x1155   : > { %6567 = vmatmul.f32.gmra.mxu1 %v14628_v38  ;;  %v16456_v20 = vld [vmem:[#allocation58_spill] sm:$0xff] }
0x1156   : > { %6638 = vmatpush.msrb.mxu0 %v6432_v21  ;;  %v6476_v21 = vld [vmem:[%s16444_s8 + $0x28] sm:$0xff] }
0x1157   : > { %6538 = vmatmul.f32.gmra.mxu0 %v6474_v1  ;;  %6625 = vmatmul.f32.gmra.mxu3 %v6474_v1  ;;  %v16454_v1 = vld [vmem:[#allocation41_spill] sm:$0xff] }
0x1158   : > { %6639 = vmatpush.msrb.mxu0 %v6406_v23  ;;  %v6479_v23 = vld [vmem:[%s16444_s8 + $0x40] sm:$0xff] }
0x1159   : > { %v6454_v60 = vpop.permute.xlu0 %6453 }
0x115a   : > { %6640 = vmatpush.msrb.mxu0 %v6404_v47  ;;  %v6458_v52 = vsel %vm1901_vm8, %v6446_v44, %v6454_v60  ;;  %v6462_v27 = vsel %vm1901_vm8, %v6454_v60, %v6446_v44  ;;  %v6450_v18 = vpop.permute.xlu1 %6449  ;;  %v6363_v44 = vsel %vm1685_vm4, %v14459_v7, %v14547_v50  ;;  %v6473_v50 = vld [vmem:[%s16444_s8 + $0x10] sm:$0xff] }
0x115b   : > { %v6469_v22 = vmul.f32 %v6458_v52, %v16449_v9  ;;  %v6470_v0 = vmul.f32 %v6462_v27, %v16450_v40  ;;  %v6456_v24 = vsel %vm1901_vm8, %v6442_v46, %v6450_v18  ;;  %v6460_v11 = vsel %vm1901_vm8, %v6450_v18, %v6442_v46  ;;  %v6480_v46 = vld [vmem:[%s16444_s8 + $0x48] sm:$0xff]  ;;  %s16472_s8 = sld [smem:[#allocation19_spill]] }
0x115c   : > { %6641 = vmatpush.msrb.mxu0 %v6402_v33  ;;  %v6465_v13 = vmul.f32 %v6456_v24, %v16449_v9  ;;  %v6466_v42 = vmul.f32 %v6460_v11, %v16450_v40  ;;  %v6368_v35 = vmul.f32 %v6363_v44, %v16451_v59 }
0x115d   : > { %6589 = vmatpush.msrb.mxu2 %v6469_v22  ;;  %6676 = vmatpush.msrb.mxu1 %v6470_v0 }
0x115e   : > { %6642 = vmatpush.msrb.mxu0 %v6400_v8  ;;  %6570 = vmatmul.f32.gmra.mxu1 %v6478_v34 }
0x115f   : > { %6541 = vmatmul.f32.gmra.mxu0 %v6477_v12  ;;  %6628 = vmatmul.f32.gmra.mxu3 %v6477_v12 }
0x1160   : > { %6643 = vmatpush.msrb.mxu0 %v6374_v53  ;;  %6590 = vmatpush.msrb.mxu2 %v6467_v39  ;;  %v6500_v53 = vpop.permute.xlu2 %6499 }
0x1161   : > { %6677 = vmatpush.msrb.mxu1 %v6468_v31  ;;  %v6448_v2 = vpop.permute.xlu0 %6447 }
0x1162   : > { %6644 = vmatpush.msrb.mxu0 %v6372_v54  ;;  %v6455_v32 = vsel %vm1901_vm8, %v6440_v26, %v6448_v2  ;;  %v6459_v25 = vsel %vm1901_vm8, %v6448_v2, %v6440_v26  ;;  %6591 = vmatpush.msrb.mxu2 %v6465_v13  ;;  %v14719_v36 = vpop.permute.xlu1 %6504  ;;  %v16460_v26 = vld [vmem:[#allocation22_spill] sm:$0xff] }
0x1163   : > { %v6463_v14 = vmul.f32 %v6455_v32, %v16449_v9  ;;  %v6464_v7 = vmul.f32 %v6459_v25, %v16450_v40  ;;  %6678 = vmatpush.msrb.mxu1 %v6466_v42 }
0x1164   : > { %6645 = vmatpush.msrb.mxu0 %v6370_v41 }
0x1165   : > { %6592 = vmatpush.msrb.mxu2 %v6463_v14  ;;  %6679 = vmatpush.msrb.mxu1 %v6464_v7 }
0x1166   : > { %6646 = vmatpush.msrb.mxu0 %v6368_v35  ;;  %7981 = vmatmul.msk.f32.vlgmr.msrb.gmra.mxu2 %vm1096_vm0, %v6473_v50  ;;  %v16462_v35 = vld [vmem:[#allocation60_spill] sm:$0xff] }
0x1167   : > { %6544 = vmatmul.f32.gmra.mxu0 %v6480_v46  ;;  %6631 = vmatmul.f32.gmra.mxu3 %v6480_v46 }
0x1168   : > { %6647 = vmatpush.msrb.mxu0 %v16452_v29  ;;  %6573 = vmatmul.f32.gmra.mxu1 %v6481_v55 }
0x1169   : > { %v6495_v33 = vpop.permute.xlu0 %6494 }
0x116a   : > { %6648 = vmatpush.msrb.mxu0 %v16453_v6  ;;  %v6490_v47 = vpop.permute.xlu1 %6489 }
0x116c   : > { %6649 = vmatpush.msrb.mxu0 %v16454_v1 }
0x116e   : > { %6650 = vmatpush.msrb.mxu0 %v16455_v56  ;;  %7982 = vmatmul.msk.f32.gmra.mxu2 %vm1096_vm0, %v6476_v21 }
0x116f   : > { %6651 = vmatmul.f32.vlgmr.msrb.gmra.mxu0 %v14597_v61 }
0x1170   : > { %7985 = vmatmul.msk.f32.vlgmr.msrb.gmra.mxu1 %vm1096_vm0, %v6473_v50 }
0x1176   : > { %7983 = vmatmul.msk.f32.gmra.mxu2 %vm1096_vm0, %v6479_v23 }
0x1177   : > { %6654 = vmatmul.f32.gmra.mxu0 %v14628_v38 }
0x1178   : > { %7986 = vmatmul.msk.f32.gmra.mxu1 %vm1096_vm0, %v6476_v21 }
0x117e   : > { %7984 = vmatmul.msk.f32.gmra.mxu2 %vm1096_vm0, %v6482_v58 }
0x117f   : > { %6657 = vmatmul.f32.gmra.mxu0 %v6478_v34 }
0x1180   : > { %7987 = vmatmul.msk.f32.gmra.mxu1 %vm1096_vm0, %v6479_v23 }
0x1187   : > { %6660 = vmatmul.f32.gmra.mxu0 %v6481_v55 }
0x1188   : > { %7988 = vmatmul.msk.f32.gmra.mxu1 %vm1096_vm0, %v6482_v58 }
0x11ca   : > { %v6565_v19 = vpop.f32.mrf.mxu1 }
0x11cc   : > { %v6536_v61 = vpop.f32.mrf.mxu0 }
0x11cd   : > { %v6537_v60 = vadd.f32 %v6536_v61, %v6490_v47 }
0x11cf   : > { %v6566_v52 = vadd.f32 %v6565_v19, %v6537_v60  ;;  %v16464_v19 = vld [vmem:[#allocation44_spill] sm:$0xff] }
0x11d2   : > { %v6568_v0 = vpop.f32.mrf.mxu1  ;;  %v6623_v55 = vpop.f32.mrf.mxu3 }
0x11d3   : > { %v6624_v21 = vadd.f32 %v6623_v55, %v6490_v47 }
0x11d4   : > { %v6539_v27 = vpop.f32.mrf.mxu0 }
0x11d5   : > { %v6540_v17 = vadd.f32 %v6539_v27, %v6495_v33 }
0x11d7   : > { %v6569_v63 = vadd.f32 %v6568_v0, %v6540_v17 }
0x11da   : > { %v6626_v23 = vpop.f32.mrf.mxu3 }
0x11db   : > { %v6571_v31 = vpop.f32.mrf.mxu1  ;;  %v6627_v47 = vadd.f32 %v6626_v23, %v6495_v33  ;;  %v16466_v33 = vld [vmem:[#allocation45_spill] sm:$0xff] }
0x11dc   : > { %v6542_v39 = vpop.f32.mrf.mxu0 }
0x11dd   : > { %v6543_v51 = vadd.f32 %v6542_v39, %v6500_v53 }
0x11df   : > { %v6572_v54 = vadd.f32 %v6571_v31, %v6543_v51 }
0x11e4   : > { %v6545_v2 = vpop.f32.mrf.mxu0 }
0x11e5   : > { %v6546_v25 = vadd.f32 %v6545_v2, %v14719_v36  ;;  %v6574_v41 = vpop.f32.mrf.mxu1  ;;  %v16470_v2 = vld [vmem:[#allocation39_spill] sm:$0xff] }
0x11e7   : > { %v6575_v7 = vadd.f32 %v6574_v41, %v6546_v25 }
0x11e9   : > { %v6594_v38 = vpop.f32.mrf.mxu2 }
0x11ea   : > { %v6595_v18 = vadd.f32 %v6594_v38, %v6566_v52 }
0x11ec   : > { %v6693_v22 = vadd.f32 %v6595_v18, %v16456_v20  ;;  %v6652_v29 = vpop.f32.mrf.mxu0  ;;  %v6629_v20 = vpop.f32.mrf.mxu3 }
0x11ed   : > { %v6653_v1 = vadd.f32 %v6652_v29, %v6624_v21  ;;  %v6681_v56 = vpop.f32.mrf.mxu1 }
0x11ee   : > { %v14722_v34 = vmax.f32 %v6693_v22, 0.0 }
0x11ef   : > { %v6682_v58 = vadd.f32 %v6681_v56, %v6653_v1 }
0x11f0   : > { %16457 = vst [vmem:[#allocation57_spill] sm:$0xff] %v14722_v34  ;;  %6741 = vrot.lane.b32.xlu2 %v14722_v34, %s16368_s2  ;;  %6773 = vrot.lane.b32.xlu1 %v14722_v34, %s16389_s1 }
0x11f1   : > { %6805 = vrot.lane.b32.xlu0 %v14722_v34, %s16390_s3  ;;  %v6597_v8 = vpop.f32.mrf.mxu2  ;;  %v6694_v60 = vadd.f32 %v6682_v58, %v16464_v19 }
0x11f2   : > { %v6598_v12 = vadd.f32 %v6597_v8, %v6569_v63  ;;  %v6630_v63 = vadd.f32 %v6629_v20, %v6500_v53 }
0x11f3   : > { %v14777_v38 = vmax.f32 %v6694_v60, 0.0 }
0x11f4   : > { %v6695_v24 = vadd.f32 %v6598_v12, %v16458_v49  ;;  %v6655_v61 = vpop.f32.mrf.mxu0  ;;  %v6632_v51 = vpop.f32.mrf.mxu3 }
0x11f5   : > { %v6656_v52 = vadd.f32 %v6655_v61, %v6627_v47  ;;  %v6684_v27 = vpop.f32.mrf.mxu1  ;;  %16465 = vst [vmem:[#allocation36_spill] sm:$0xff] %v14777_v38 }
0x11f6   : > { %v14731_v11 = vmax.f32 %v6695_v24, 0.0  ;;  %v16468_v24 = vld [vmem:[#allocation43_spill] sm:$0xff] }
0x11f7   : > { %v6685_v18 = vadd.f32 %v6684_v27, %v6656_v52 }
0x11f8   : > { %16459 = vst [vmem:[#allocation56_spill] sm:$0xff] %v14731_v11  ;;  %6807 = vrot.lane.b32.xlu2 %v14731_v11, %s16390_s3  ;;  %6869 = vrot.lane.b32.xlu1 %v14722_v34, %s16392_s4 }
0x11f9   : > { %6901 = vrot.lane.b32.xlu0 %v14722_v34, %s16393_s5  ;;  %v6600_v13 = vpop.f32.mrf.mxu2  ;;  %v6696_v17 = vadd.f32 %v6685_v18, %v16466_v33 }
0x11fa   : > { %v6601_v44 = vadd.f32 %v6600_v13, %v6572_v54  ;;  %v6633_v13 = vadd.f32 %v6632_v51, %v14719_v36 }
0x11fb   : > { %v14786_v22 = vmax.f32 %v6696_v17, 0.0 }
0x11fc   : > { %v6697_v42 = vadd.f32 %v6601_v44, %v16460_v26  ;;  %v6658_v0 = vpop.f32.mrf.mxu0 }
0x11fd   : > { %16467 = vst [vmem:[#allocation66_spill] sm:$0xff] %v14786_v22  ;;  %v6659_v8 = vadd.f32 %v6658_v0, %v6630_v63  ;;  %v6687_v12 = vpop.f32.mrf.mxu1 }
0x11fe   : > { %v14746_v32 = vmax.f32 %v6697_v42, 0.0 }
0x11ff   : > { %v6688_v49 = vadd.f32 %v6687_v12, %v6659_v8  ;;  %v6979_v12 = vld [vmem:[%s16472_s8 + $0x10] sm:$0xff] }
0x1200   : > { %6903 = vrot.lane.b32.xlu2 %v14731_v11, %s16393_s5  ;;  %6743 = vrot.lane.b32.xlu1 %v14731_v11, %s16368_s2  ;;  %16461 = vst [vmem:[#allocation49_spill] sm:$0xff] %v14746_v32 }
0x1201   : > { %6775 = vrot.lane.b32.xlu0 %v14731_v11, %s16389_s1  ;;  %v6603_v14 = vpop.f32.mrf.mxu2  ;;  %v6698_v39 = vadd.f32 %v6688_v49, %v16468_v24  ;;  %v6980_v49 = vld [vmem:[%s16472_s8 + $0x18] sm:$0xff] }
0x1202   : > { %v6604_v50 = vadd.f32 %v6603_v14, %v6575_v7 }
0x1203   : > { %v14801_v31 = vmax.f32 %v6698_v39, 0.0 }
0x1204   : > { %v6699_v46 = vadd.f32 %v6604_v50, %v16462_v35  ;;  %v6661_v53 = vpop.f32.mrf.mxu0 }
0x1205   : > { %16469 = vst [vmem:[#allocation68_spill] sm:$0xff] %v14801_v31  ;;  %v6662_v54 = vadd.f32 %v6661_v53, %v6633_v13  ;;  %v6690_v44 = vpop.f32.mrf.mxu1  ;;  %v6978_v53 = vld [vmem:[%s16472_s8 + $0x8] sm:$0xff]  ;;  %v6977_v13 = vld [vmem:[%s16472_s8] sm:$0xff]  ;;  %s16478_s8 = sld [smem:[#allocation18_spill]] }
0x1206   : > { %v14762_v6 = vmax.f32 %v6699_v46, 0.0 }
0x1207   : > { %v6691_v26 = vadd.f32 %v6690_v44, %v6662_v54 }
0x1208   : > { %6777 = vrot.lane.b32.xlu2 %v14746_v32, %s16389_s1  ;;  %6809 = vrot.lane.b32.xlu1 %v14746_v32, %s16390_s3  ;;  %16463 = vst [vmem:[#allocation47_spill] sm:$0xff] %v14762_v6 }
0x1209   : > { %6871 = vrot.lane.b32.xlu0 %v14731_v11, %s16392_s4  ;;  %v6700_v25 = vadd.f32 %v6691_v26, %v16470_v2 }
0x120b   : > { %v14819_v36 = vmax.f32 %v6700_v25, 0.0 }
0x120d   : > { %16471 = vst [vmem:[#allocation62_spill] sm:$0xff] %v14819_v36 }
0x1210   : > { %6873 = vrot.lane.b32.xlu2 %v14746_v32, %s16392_s4  ;;  %6905 = vrot.lane.b32.xlu1 %v14746_v32, %s16393_s5 }
0x1211   : > { %6745 = vrot.lane.b32.xlu0 %v14746_v32, %s16368_s2 }
0x1218   : > { %6811 = vrot.lane.b32.xlu2 %v14762_v6, %s16390_s3  ;;  %6779 = vrot.lane.b32.xlu1 %v14762_v6, %s16389_s1 }
0x1219   : > { %6841 = vrot.lane.b32.xlu0 %v14746_v32, %s16358_s18 }
0x1220   : > { %6747 = vrot.lane.b32.xlu2 %v14762_v6, %s16368_s2  ;;  %6875 = vrot.lane.b32.xlu1 %v14762_v6, %s16392_s4 }
0x1221   : > { %6907 = vrot.lane.b32.xlu0 %v14762_v6, %s16393_s5 }
0x1228   : > { %6843 = vrot.lane.b32.xlu2 %v14762_v6, %s16358_s18  ;;  %6813 = vrot.lane.b32.xlu1 %v14777_v38, %s16390_s3 }
0x1229   : > { %6749 = vrot.lane.b32.xlu0 %v14777_v38, %s16368_s2 }
0x1230   : > { %6781 = vrot.lane.b32.xlu2 %v14777_v38, %s16389_s1  ;;  %6909 = vrot.lane.b32.xlu1 %v14777_v38, %s16393_s5 }
0x1231   : > { %6815 = vrot.lane.b32.xlu0 %v14786_v22, %s16390_s3 }
0x1238   : > { %6877 = vrot.lane.b32.xlu2 %v14777_v38, %s16392_s4  ;;  %6783 = vrot.lane.b32.xlu1 %v14786_v22, %s16389_s1 }
0x1239   : > { %6911 = vrot.lane.b32.xlu0 %v14786_v22, %s16393_s5 }
0x1240   : > { %6751 = vrot.lane.b32.xlu2 %v14786_v22, %s16368_s2  ;;  %6879 = vrot.lane.b32.xlu1 %v14786_v22, %s16392_s4 }
0x1241   : > { %6785 = vrot.lane.b32.xlu0 %v14801_v31, %s16389_s1 }
0x1248   : > { %6817 = vrot.lane.b32.xlu2 %v14801_v31, %s16390_s3  ;;  %6753 = vrot.lane.b32.xlu1 %v14801_v31, %s16368_s2 }
0x1249   : > { %6881 = vrot.lane.b32.xlu0 %v14801_v31, %s16392_s4 }
0x124a   : > { %v14816_v42 = vpop.permute.xlu2 %6741 }
0x1250   : > { %6913 = vrot.lane.b32.xlu2 %v14801_v31, %s16393_s5  ;;  %6849 = vrot.lane.b32.xlu1 %v14801_v31, %s16358_s18 }
0x1251   : > { %6819 = vrot.lane.b32.xlu0 %v14819_v36, %s16390_s3 }
0x1252   : > { %v14827_v41 = vpop.permute.xlu2 %6807 }
0x1258   : > { %6847 = vrot.lane.b32.xlu2 %v14786_v22, %s16358_s18  ;;  %6915 = vrot.lane.b32.xlu1 %v14819_v36, %s16393_s5 }
0x1259   : > { %6715 = vrot.lane.b32.xlu0 %v14762_v6, %s16367_s22 }
0x125a   : > { %v14835_v14 = vpop.permute.xlu2 %6903 }
0x1260   : > { %6787 = vrot.lane.b32.xlu2 %v14819_v36, %s16389_s1  ;;  %6839 = vrot.lane.b32.xlu1 %v14731_v11, %s16358_s18 }
0x1261   : > { %6845 = vrot.lane.b32.xlu0 %v14777_v38, %s16358_s18 }
0x1262   : > { %v14843_v7 = vpop.permute.xlu2 %6777  ;;  %v6774_v50 = vpop.permute.xlu1 %6773 }
0x1263   : > { %v14845_v35 = vpop.permute.xlu0 %6805 }
0x1268   : > { %6883 = vrot.lane.b32.xlu2 %v14819_v36, %s16392_s4  ;;  %6713 = vrot.lane.b32.xlu1 %v14746_v32, %s16367_s22 }
0x1269   : > { %6755 = vrot.lane.b32.xlu0 %v14819_v36, %s16368_s2 }
0x126a   : > { %v14853_v46 = vpop.permute.xlu2 %6873  ;;  %v14855_v55 = vpop.permute.xlu1 %6869 }
0x126b   : > { %v14857_v29 = vpop.permute.xlu0 %6901 }
0x1270   : > { %6837 = vrot.lane.b32.xlu2 %v14722_v34, %s16358_s18  ;;  %6723 = vrot.lane.b32.xlu1 %v14819_v36, %s16367_s22 }
0x1271   : > { %6851 = vrot.lane.b32.xlu0 %v14819_v36, %s16358_s18 }
0x1272   : > { %v14865_v21 = vpop.permute.xlu2 %6811  ;;  %v14867_v1 = vpop.permute.xlu1 %6743 }
0x1273   : > { %v14869_v56 = vpop.permute.xlu0 %6775 }
0x1278   : > { %6721 = vrot.lane.b32.xlu2 %v14801_v31, %s16367_s22  ;;  %6719 = vrot.lane.b32.xlu1 %v14786_v22, %s16367_s22 }
0x1279   : > { %6711 = vrot.lane.b32.xlu0 %v14731_v11, %s16367_s22 }
0x127a   : > { %v14877_v23 = vpop.permute.xlu2 %6747  ;;  %v6810_v58 = vpop.permute.xlu1 %6809 }
0x127b   : > { %v14879_v61 = vpop.permute.xlu0 %6871 }
0x1280   : > { %6709 = vrot.lane.b32.xlu2 %v14722_v34, %s16367_s22  ;;  %6939 = vrot.lane.b32.xlu1 %v14762_v6, %s16370_s11 }
0x1281   : > { %6717 = vrot.lane.b32.xlu0 %v14777_v38, %s16367_s22 }
0x1282   : > { %v14887_v47 = vpop.permute.xlu2 %6843  ;;  %v14889_v19 = vpop.permute.xlu1 %6905 }
0x1283   : > { %v14891_v60 = vpop.permute.xlu0 %6745 }
0x1288   : > { %6935 = vrot.lane.b32.xlu2 %v14731_v11, %s16370_s11  ;;  %6945 = vrot.lane.b32.xlu1 %v14801_v31, %s16370_s11 }
0x1289   : > { %6937 = vrot.lane.b32.xlu0 %v14746_v32, %s16370_s11 }
0x128a   : > { %v6782_v52 = vpop.permute.xlu2 %6781  ;;  %v14899_v27 = vpop.permute.xlu1 %6779 }
0x128b   : > { %v14903_v18 = vsel %vm1541_vm6, %v6774_v50, %v6782_v52  ;;  %v14907_v33 = vsel %vm1541_vm6, %v6782_v52, %v6774_v50  ;;  %v14909_v17 = vpop.permute.xlu0 %6841 }
0x1290   : > { %6947 = vrot.lane.b32.xlu2 %v14819_v36, %s16370_s11  ;;  %6933 = vrot.lane.b32.xlu1 %v14722_v34, %s16370_s11 }
0x1291   : > { %6943 = vrot.lane.b32.xlu0 %v14786_v22, %s16370_s11 }
0x1292   : > { %v14917_v20 = vpop.permute.xlu2 %6877  ;;  %v14919_v0 = vpop.permute.xlu1 %6875 }
0x1293   : > { %v14925_v63 = vsel %vm1757_vm9, %v14917_v20, %v14855_v55  ;;  %v14927_v8 = vpop.permute.xlu0 %6907 }
0x1294   : > { %16473 = vst [vmem:[#allocation70_spill] sm:$0xff] %v14925_v63 }
0x1298   : > { %6941 = vrot.lane.b32.xlu2 %v14777_v38, %s16370_s11  ;;  %6993 = vperm.xlu1 %8071, %v6979_v12  }
0x1299   : > { %6998 = vperm.xlu0 %8070, %v6980_v49  }
0x129a   : > { %v14933_v24 = vpop.permute.xlu2 %6751  ;;  %v6814_v39 = vpop.permute.xlu1 %6813 }
0x129b   : > { %v14935_v51 = vpop.permute.xlu0 %6749 }
0x12a0   : > { %6988 = vperm.xlu2 %8072, %v6978_v53  }
0x12a1   : > { %6983 = vperm.xlu0 %8070, %v6977_v13  }
0x12a2   : > { %v6818_v54 = vpop.permute.xlu2 %6817  ;;  %v6910_v44 = vpop.permute.xlu1 %6909 }
0x12a3   : > { %v14942_v26 = vsel %vm1829_vm5, %v6910_v44, %v14857_v29  ;;  %v6816_v2 = vpop.permute.xlu0 %6815 }
0x12a4   : > { %16474 = vst [vmem:[#allocation33_spill] sm:$0xff] %v14942_v26 }
0x12aa   : > { %v6914_v25 = vpop.permute.xlu2 %6913  ;;  %v6784_v50 = vpop.permute.xlu1 %6783 }
0x12ab   : > { %v14947_v52 = vsel %vm1829_vm5, %v6914_v25, %v14889_v19  ;;  %v14949_v12 = vpop.permute.xlu0 %6911 }
0x12ac   : > { %16475 = vst [vmem:[#allocation37_spill] sm:$0xff] %v14947_v52  ;;  %v6827_v52 = vsel %vm1613_vm3, %v6818_v54, %v6810_v58 }
0x12ad   : > { %v6833_v11 = vmul.f32 %v6827_v52, %v16442_v62 }
0x12b2   : > { %v14951_v49 = vpop.permute.xlu2 %6847  ;;  %v14953_v53 = vpop.permute.xlu1 %6879 }
0x12b3   : > { %v14959_v13 = vsel %vm1757_vm9, %v14953_v53, %v14879_v61  ;;  %v6786_v38 = vpop.permute.xlu0 %6785 }
0x12b4   : > { %16476 = vst [vmem:[#allocation29_spill] sm:$0xff] %v14959_v13  ;;  %v6823_v13 = vsel %vm1613_vm3, %v6810_v58, %v6818_v54  ;;  %v6826_v58 = vsel %vm1613_vm3, %v6816_v2, %v14827_v41  ;;  %v6825_v54 = vsel %vm1613_vm3, %v6814_v39, %v14845_v35 }
0x12b5   : > { %v6829_v52 = vmul.f32 %v6825_v54, %v16442_v62 }
0x12ba   : > { %v6788_v22 = vpop.permute.xlu2 %6787  ;;  %v14961_v31 = vpop.permute.xlu1 %6753 }
0x12bb   : > { %v14963_v36 = vpop.permute.xlu0 %6881 }
0x12c2   : > { %v14965_v59 = vpop.permute.xlu2 %6883  ;;  %v14967_v63 = vpop.permute.xlu1 %6849 }
0x12c3   : > { %v14973_v3 = vsel %vm1685_vm4, %v14967_v63, %v14909_v17  ;;  %v6820_v26 = vpop.permute.xlu0 %6819 }
0x12c4   : > { %16477 = vst [vmem:[#allocation31_spill] sm:$0xff] %v14973_v3  ;;  %v6824_v4 = vsel %vm1613_vm3, %v14865_v21, %v6820_v26  ;;  %v6828_v34 = vsel %vm1613_vm3, %v6820_v26, %v14865_v21  ;;  %v6822_v3 = vsel %vm1613_vm3, %v14827_v41, %v6816_v2  ;;  %v6834_v21 = vmul.f32 %v6823_v13, %v16443_v16 }
0x12c5   : > { %v6835_v40 = vmul.f32 %v6828_v34, %v16442_v62  ;;  %v6836_v9 = vmul.f32 %v6824_v4, %v16443_v16  ;;  %v6821_v4 = vsel %vm1613_vm3, %v14845_v35, %v6814_v39  ;;  %v6831_v34 = vmul.f32 %v6826_v58, %v16442_v62 }
0x12c6   : > { %v6832_v26 = vmul.f32 %v6822_v3, %v16443_v16  ;;  %v6830_v35 = vmul.f32 %v6821_v4, %v16443_v16  ;;  %v6919_v39 = vsel %vm1829_vm5, %v14889_v19, %v6914_v25  ;;  %v6918_v58 = vsel %vm1829_vm5, %v14835_v14, %v14949_v12 }
0x12c7   : > { %7013 = vmatpush.msra.mxu2 %v6835_v40  ;;  %7100 = vmatpush.msra.mxu1 %v6836_v9  ;;  %v6792_v9 = vsel %vm1541_vm6, %v14899_v27, %v6788_v22  ;;  %v6796_v40 = vsel %vm1541_vm6, %v6788_v22, %v14899_v27  ;;  %v6791_v22 = vsel %vm1541_vm6, %v14843_v7, %v6786_v38 }
0x12c8   : > { %v6795_v27 = vsel %vm1541_vm6, %v6786_v38, %v14843_v7  ;;  %v6803_v54 = vmul.f32 %v6796_v40, %v16259_v30  ;;  %v6804_v19 = vmul.f32 %v6792_v9, %v9437_v10  ;;  %v6929_v25 = vmul.f32 %v6919_v39, %v16441_v28 }
0x12c9   : > { %7014 = vmatpush.msra.mxu2 %v6833_v11  ;;  %7101 = vmatpush.msra.mxu1 %v6834_v21  ;;  %v6790_v21 = vsel %vm1541_vm6, %v14869_v56, %v6784_v50  ;;  %v6794_v38 = vsel %vm1541_vm6, %v6784_v50, %v14869_v56  ;;  %v6917_v7 = vsel %vm1829_vm5, %v14857_v29, %v6910_v44 }
0x12ca   : > { %v15003_v41 = vpop.permute.xlu2 %6837  ;;  %v15005_v2 = vpop.permute.xlu1 %6915  ;;  %v6801_v4 = vmul.f32 %v6795_v27, %v16259_v30  ;;  %v6800_v9 = vmul.f32 %v6790_v21, %v9437_v10  ;;  %v6888_v56 = vsel %vm1757_vm9, %v14919_v0, %v14965_v59  ;;  %v6925_v44 = vmul.f32 %v6917_v7, %v16441_v28 }
0x12cb   : > { %v6920_v3 = vsel %vm1829_vm5, %v14927_v8, %v15005_v2  ;;  %v15018_v11 = vpop.permute.xlu0 %6715  ;;  %7015 = vmatpush.msra.mxu2 %v6831_v34  ;;  %7102 = vmatpush.msra.mxu1 %v6832_v26  ;;  %v6802_v34 = vmul.f32 %v6791_v22, %v9437_v10  ;;  %v6927_v26 = vmul.f32 %v6918_v58, %v16441_v28 }
0x12cc   : > { %v6931_v13 = vmul.f32 %v6920_v3, %v16441_v28  ;;  %v6797_v40 = vmul.f32 %v14907_v33, %v16259_v30  ;;  %v6798_v3 = vmul.f32 %v14903_v18, %v9437_v10  ;;  %v6886_v22 = vsel %vm1757_vm9, %v14879_v61, %v14953_v53 }
0x12cd   : > { %7016 = vmatpush.msra.mxu2 %v6829_v52  ;;  %7103 = vmatpush.msra.mxu1 %v6830_v35  ;;  %v6799_v52 = vmul.f32 %v6794_v38, %v16259_v30  ;;  %v6887_v35 = vsel %vm1757_vm9, %v14853_v46, %v14963_v36  ;;  %v6885_v33 = vsel %vm1757_vm9, %v14855_v55, %v14917_v20 }
0x12ce   : > { %7042 = vmatpush.msra.mxu3 %v6931_v13  ;;  %v6899_v13 = vmul.f32 %v6888_v56, %v9408_v15  ;;  %v6897_v18 = vmul.f32 %v6887_v35, %v9408_v15  ;;  %v6895_v27 = vmul.f32 %v6886_v22, %v9408_v15  ;;  %v6759_v61 = vsel %vm1469_vm1, %v14891_v60, %v14961_v31 }
0x12cf   : > { %7017 = vmatpush.msra.mxu2 %v6803_v54  ;;  %7104 = vmatpush.msra.mxu1 %v6804_v19  ;;  %v6893_v54 = vmul.f32 %v6885_v33, %v9408_v15  ;;  %v6763_v53 = vsel %vm1469_vm1, %v14961_v31, %v14891_v60  ;;  %v6758_v38 = vsel %vm1469_vm1, %v14867_v1, %v14933_v24 }
0x12d0   : > { %7043 = vmatpush.msra.mxu3 %v6929_v25  ;;  %v6762_v31 = vsel %vm1469_vm1, %v14933_v24, %v14867_v1  ;;  %v6761_v7 = vsel %vm1469_vm1, %v14935_v51, %v14816_v42  ;;  %v6768_v24 = vmul.f32 %v6758_v38, %v16261_v5 }
0x12d1   : > { %7018 = vmatpush.msra.mxu2 %v6801_v4  ;;  %7105 = vmatpush.msra.mxu1 %v6802_v34  ;;  %v6769_v4 = vmul.f32 %v6763_v53, %v16260_v57  ;;  %v6770_v34 = vmul.f32 %v6759_v61, %v16261_v5  ;;  %v6767_v1 = vmul.f32 %v6762_v31, %v16260_v57 }
0x12d2   : > { %v15056_v29 = vpop.permute.xlu1 %6839  ;;  %7044 = vmatpush.msra.mxu3 %v6927_v26  ;;  %v6722_v39 = vpop.permute.xlu2 %6721  ;;  %v6765_v26 = vmul.f32 %v6761_v7, %v16260_v57  ;;  %v6924_v31 = vsel %vm1829_vm5, %v15005_v2, %v14927_v8 }
0x12d3   : > { %v15059_v50 = vpop.permute.xlu0 %6845  ;;  %7019 = vmatpush.msra.mxu2 %v6799_v52  ;;  %7106 = vmatpush.msra.mxu1 %v6800_v9 }
0x12d4   : > { %7045 = vmatpush.msra.mxu3 %v6925_v44 }
0x12d5   : > { %7020 = vmatpush.msra.mxu2 %v6797_v40  ;;  %7107 = vmatpush.msra.mxu1 %v6798_v3 }
0x12d6   : > { %7046 = vmatpush.msra.mxu3 %v6899_v13  ;;  %v6854_v13 = vsel %vm1685_vm4, %v15056_v29, %v14951_v49 }
0x12d8   : > { %7047 = vmatpush.msra.mxu3 %v6897_v18 }
0x12da   : > { %v6714_v58 = vpop.permute.xlu1 %6713  ;;  %7048 = vmatpush.msra.mxu3 %v6895_v27  ;;  %v15109_v60 = vpop.permute.xlu2 %6709 }
0x12db   : > { %v6756_v19 = vpop.permute.xlu0 %6755  ;;  %v6731_v40 = vsel %vm1398_vm2, %v6722_v39, %v6714_v58 }
0x12dc   : > { %v6760_v55 = vsel %vm1469_vm1, %v14877_v23, %v6756_v19  ;;  %v6764_v20 = vsel %vm1469_vm1, %v6756_v19, %v14877_v23  ;;  %7049 = vmatpush.msra.mxu3 %v6893_v54  ;;  %v6757_v23 = vsel %vm1469_vm1, %v14816_v42, %v14935_v51  ;;  %v6855_v42 = vsel %vm1685_vm4, %v14909_v17, %v14967_v63 }
0x12dd   : > { %v6771_v25 = vmul.f32 %v6764_v20, %v16260_v57  ;;  %v6772_v21 = vmul.f32 %v6760_v55, %v16261_v5  ;;  %v6766_v52 = vmul.f32 %v6757_v23, %v16261_v5  ;;  %v6727_v63 = vsel %vm1398_vm2, %v6714_v58, %v6722_v39 }
0x12de   : > { %v6865_v22 = vmul.f32 %v6855_v42, %v8925_v45  ;;  %v6737_v18 = vmul.f32 %v6731_v40, %v16262_v48  ;;  %v6853_v39 = vsel %vm1685_vm4, %v15003_v41, %v15059_v50  ;;  %v6738_v33 = vmul.f32 %v6727_v63, %v16263_v43  ;;  %v15189_v40 = vld [vmem:[%s16478_s8 + $0x8] sm:$0xff] }
0x12df   : > { %7021 = vmatpush.msra.mxu2 %v6771_v25  ;;  %7108 = vmatpush.msra.mxu1 %v6772_v21  ;;  %v6863_v58 = vmul.f32 %v6854_v13, %v8925_v45  ;;  %v6861_v19 = vmul.f32 %v6853_v39, %v8925_v45  ;;  %v16485_v39 = vld [vmem:[#allocation33_spill] sm:$0xff] }
0x12e1   : > { %7022 = vmatpush.msra.mxu2 %v6769_v4  ;;  %7109 = vmatpush.msra.mxu1 %v6770_v34  ;;  %v16479_v4 = vld [vmem:[#allocation56_spill] sm:$0xff] }
0x12e2   : > { %v6724_v9 = vpop.permute.xlu1 %6723  ;;  %v15155_v27 = vpop.permute.xlu2 %6935 }
0x12e3   : > { %v6728_v51 = vsel %vm1398_vm2, %v15018_v11, %v6724_v9  ;;  %v6732_v56 = vsel %vm1398_vm2, %v6724_v9, %v15018_v11  ;;  %7023 = vmatpush.msra.mxu2 %v6767_v1  ;;  %7110 = vmatpush.msra.mxu1 %v6768_v24  ;;  %v15131_v44 = vpop.permute.xlu0 %6851  ;;  %v16480_v1 = vld [vmem:[#allocation52_spill] sm:$0xff] }
0x12e4   : > { %v6739_v3 = vmul.f32 %v6732_v56, %v16262_v48  ;;  %v6740_v35 = vmul.f32 %v6728_v51, %v16263_v43  ;;  %v6856_v17 = vsel %vm1685_vm4, %v14887_v47, %v15131_v44  ;;  %v16482_v51 = vld [vmem:[#allocation57_spill] sm:$0xff]  ;;  %v6965_v56 = vld [vmem:[%s16478_s8] sm:$0xff] }
0x12e5   : > { %v6867_v11 = vmul.f32 %v6856_v17, %v8925_v45  ;;  %7024 = vmatpush.msra.mxu2 %v6765_v26  ;;  %7111 = vmatpush.msra.mxu1 %v6766_v52  ;;  %v16481_v26 = vld [vmem:[#allocation46_spill] sm:$0xff]  ;;  %v16484_v17 = vld [vmem:[#allocation37_spill] sm:$0xff] }
0x12e7   : > { %7025 = vmatpush.msra.mxu2 %v6739_v3  ;;  %7050 = vmatpush.msra.mxu3 %v6867_v11  ;;  %v16483_v3 = vld [vmem:[#allocation25_spill] sm:$0xff] }
0x12e8   : > { %7112 = vmatpush.msra.mxu1 %v6740_v35  ;;  %v6932_v35 = vmul.f32 %v6924_v31, %v16483_v3  ;;  %v6930_v63 = vmul.f32 %v16484_v17, %v16483_v3  ;;  %v6860_v31 = vsel %vm1685_vm4, %v15131_v44, %v14887_v47  ;;  %v6971_v44 = vld [vmem:[%s16478_s8 + $0x30] sm:$0xff]  ;;  %v16490_v17 = vld [vmem:[#allocation31_spill] sm:$0xff] }
0x12e9   : > { %7026 = vmatpush.msra.mxu2 %v6737_v18  ;;  %7051 = vmatpush.msra.mxu3 %v6865_v22 }
0x12ea   : > { %7113 = vmatpush.msra.mxu1 %v6738_v33  ;;  %v6720_v54 = vpop.permute.xlu1 %6719  ;;  %v6948_v21 = vpop.permute.xlu2 %6947  ;;  %v6926_v33 = vmul.f32 %v16485_v39, %v16483_v3  ;;  %v6973_v39 = vld [vmem:[%s16478_s8 + $0x40] sm:$0xff] }
0x12eb   : > { %7052 = vmatpush.msra.mxu3 %v6863_v58  ;;  %v6712_v61 = vpop.permute.xlu0 %6711 }
0x12ec   : > { %v6726_v53 = vsel %vm1398_vm2, %v6712_v61, %v6720_v54  ;;  %v6730_v55 = vsel %vm1398_vm2, %v6720_v54, %v6712_v61 }
0x12ed   : > { %v6735_v20 = vmul.f32 %v6730_v55, %v16262_v48  ;;  %v6736_v25 = vmul.f32 %v6726_v53, %v16263_v43  ;;  %7053 = vmatpush.msra.mxu3 %v6861_v19  ;;  %v6968_v19 = vld [vmem:[%s16478_s8 + $0x18] sm:$0xff]  ;;  %v6969_v53 = vld [vmem:[%s16478_s8 + $0x20] sm:$0xff] }
0x12ef   : > { %7027 = vmatpush.msra.mxu2 %v6735_v20  ;;  %7054 = vmatpush.msra.mxu3 %v14762_v6 }
0x12f0   : > { %7114 = vmatpush.msra.mxu1 %v6736_v25  ;;  %v16487_v25 = vld [vmem:[#allocation29_spill] sm:$0xff] }
0x12f1   : > { %7055 = vmatpush.msra.mxu3 %v14746_v32 }
0x12f2   : > { %v6940_v38 = vpop.permute.xlu1 %6939 }
0x12f3   : > { %v6952_v23 = vsel %vm1901_vm8, %v6940_v38, %v6948_v21  ;;  %v6956_v7 = vsel %vm1901_vm8, %v6948_v21, %v6940_v38  ;;  %7056 = vmatpush.msra.mxu3 %v16479_v4  ;;  %v6718_v34 = vpop.permute.xlu0 %6717 }
0x12f4   : > { %v6963_v24 = vmul.f32 %v6952_v23, %v16480_v1  ;;  %v6964_v52 = vmul.f32 %v6956_v7, %v16481_v26  ;;  %v6725_v9 = vsel %vm1398_vm2, %v15109_v60, %v6718_v34  ;;  %v6729_v8 = vsel %vm1398_vm2, %v6718_v34, %v15109_v60  ;;  %v6942_v23 = vpop.permute.xlu2 %6941 }
0x12f5   : > { %v6733_v2 = vmul.f32 %v6729_v8, %v16262_v48  ;;  %v6734_v42 = vmul.f32 %v6725_v9, %v16263_v43  ;;  %7057 = vmatpush.msra.mxu3 %v16482_v51  ;;  %v6922_v60 = vsel %vm1829_vm5, %v14949_v12, %v14835_v14  ;;  %v6892_v14 = vsel %vm1757_vm9, %v14965_v59, %v14919_v0  ;;  %v16486_v0 = vld [vmem:[#allocation38_spill] sm:$0xff]  ;;  %v16489_v8 = vld [vmem:[#allocation40_spill] sm:$0xff] }
0x12f6   : > { %7083 = vmatpush.msra.mxu0 %v6963_v24  ;;  %7058 = vmatmul.f32.vlgmr.msra.gmra.mxu3 %v15189_v40  ;;  %v6928_v13 = vmul.f32 %v6922_v60, %v16483_v3  ;;  %v6891_v59 = vsel %vm1757_vm9, %v14963_v36, %v14853_v46  ;;  %v6900_v61 = vmul.f32 %v6892_v14, %v16486_v0  ;;  %v16488_v36 = vld [vmem:[#allocation70_spill] sm:$0xff]  ;;  %v6970_v14 = vld [vmem:[%s16478_s8 + $0x28] sm:$0xff] }
0x12f7   : > { %7170 = vmatpush.msrb.mxu3 %v6964_v52  ;;  %7028 = vmatpush.msra.mxu2 %v6733_v2  ;;  %v6898_v55 = vmul.f32 %v6891_v59, %v16486_v0  ;;  %v6896_v21 = vmul.f32 %v16487_v25, %v16486_v0  ;;  %v6894_v46 = vmul.f32 %v16488_v36, %v16486_v0 }
0x12f8   : > { %7115 = vmatpush.msra.mxu1 %v6734_v42  ;;  %7029 = vmatmul.f32.vlgmr.msra.gmra.mxu2 %v6965_v56  ;;  %v6868_v2 = vmul.f32 %v6860_v31, %v16489_v8  ;;  %v6858_v60 = vsel %vm1685_vm4, %v14951_v49, %v15056_v29  ;;  %v6974_v29 = vld [vmem:[%s16478_s8 + $0x48] sm:$0xff] }
0x12f9   : > { %7116 = vmatmul.f32.vlgmr.msra.gmra.mxu1 %v6965_v56  ;;  %7129 = vmatpush.msrb.mxu2 %v6932_v35  ;;  %v6972_v56 = vld [vmem:[%s16478_s8 + $0x38] sm:$0xff]  ;;  %v6967_v35 = vld [vmem:[%s16478_s8 + $0x10] sm:$0xff] }
0x12fa   : > { %v6946_v11 = vpop.permute.xlu1 %6945 }
0x12fb   : > { %7130 = vmatpush.msrb.mxu2 %v6930_v63  ;;  %v6938_v22 = vpop.permute.xlu0 %6937  ;;  %v6866_v63 = vmul.f32 %v16490_v17, %v16489_v8 }
0x12fc   : > { %v6951_v12 = vsel %vm1901_vm8, %v6938_v22, %v6946_v11  ;;  %v6955_v18 = vsel %vm1901_vm8, %v6946_v11, %v6938_v22  ;;  %v6857_v11 = vsel %vm1685_vm4, %v15059_v50, %v15003_v41  ;;  %v6975_v22 = vld [vmem:[%s16478_s8 + $0x50] sm:$0xff]  ;;  %v16493_v50 = vld [vmem:[#allocation66_spill] sm:$0xff]  ;;  %v6989_v25 = vpop.permute.xlu2 %6988 }
0x12fd   : > { %v6961_v58 = vmul.f32 %v6951_v12, %v16480_v1  ;;  %v6962_v54 = vmul.f32 %v6955_v18, %v16481_v26  ;;  %7131 = vmatpush.msrb.mxu2 %v6928_v13  ;;  %v6864_v13 = vmul.f32 %v6858_v60, %v16489_v8  ;;  %v6862_v49 = vmul.f32 %v6857_v11, %v16489_v8  ;;  %v16491_v12 = vld [vmem:[#allocation62_spill] sm:$0xff]  ;;  %v16492_v41 = vld [vmem:[#allocation68_spill] sm:$0xff] }
0x12fe   : > { %7061 = vmatmul.f32.gmra.mxu3 %v6969_v53  ;;  %v16494_v18 = vld [vmem:[#allocation36_spill] sm:$0xff] }
0x12ff   : > { %7132 = vmatpush.msrb.mxu2 %v6926_v33  ;;  %7084 = vmatpush.msra.mxu0 %v6961_v58  ;;  %v6976_v33 = vld [vmem:[%s16478_s8 + $0x58] sm:$0xff] }
0x1300   : > { %7171 = vmatpush.msrb.mxu3 %v6962_v54  ;;  %7032 = vmatmul.f32.gmra.mxu2 %v6968_v19 }
0x1301   : > { %7119 = vmatmul.f32.gmra.mxu1 %v6968_v19  ;;  %7133 = vmatpush.msrb.mxu2 %v6900_v61 }
0x1302   : > { %v6934_v20 = vpop.permute.xlu1 %6933 }
0x1303   : > { %7134 = vmatpush.msrb.mxu2 %v6898_v55  ;;  %v6944_v38 = vpop.permute.xlu0 %6943  ;;  %v6949_v24 = vsel %vm1901_vm8, %v6934_v20, %v6942_v23  ;;  %v6953_v52 = vsel %vm1901_vm8, %v6942_v23, %v6934_v20 }
0x1304   : > { %v6950_v7 = vsel %vm1901_vm8, %v15155_v27, %v6944_v38  ;;  %v6954_v34 = vsel %vm1901_vm8, %v6944_v38, %v15155_v27  ;;  %v6957_v42 = vmul.f32 %v6949_v24, %v16480_v1  ;;  %v6958_v27 = vmul.f32 %v6953_v52, %v16481_v26 }
0x1305   : > { %v6959_v9 = vmul.f32 %v6950_v7, %v16480_v1  ;;  %v6960_v47 = vmul.f32 %v6954_v34, %v16481_v26  ;;  %7135 = vmatpush.msrb.mxu2 %v6896_v21 }
0x1306   : > { %7064 = vmatmul.f32.gmra.mxu3 %v6972_v56 }
0x1307   : > { %7136 = vmatpush.msrb.mxu2 %v6894_v46  ;;  %7085 = vmatpush.msra.mxu0 %v6959_v9 }
0x1308   : > { %7172 = vmatpush.msrb.mxu3 %v6960_v47  ;;  %7035 = vmatmul.f32.gmra.mxu2 %v6971_v44 }
0x1309   : > { %7122 = vmatmul.f32.gmra.mxu1 %v6971_v44  ;;  %7137 = vmatpush.msrb.mxu2 %v6868_v2 }
0x130a   : > { %7086 = vmatpush.msra.mxu0 %v6957_v42  ;;  %7173 = vmatpush.msrb.mxu3 %v6958_v27  ;;  %v6994_v24 = vpop.permute.xlu1 %6993 }
0x130b   : > { %7989 = vmatmul.msk.f32.vlgmr.msra.gmra.mxu0 %vm1096_vm0, %v6967_v35  ;;  %7138 = vmatpush.msrb.mxu2 %v6866_v63  ;;  %v15276_v58 = vpop.permute.xlu0 %6998 }
0x130d   : > { %7139 = vmatpush.msrb.mxu2 %v6864_v13 }
0x130e   : > { %7067 = vmatmul.f32.gmra.mxu3 %v6975_v22 }
0x130f   : > { %7140 = vmatpush.msrb.mxu2 %v6862_v49 }
0x1310   : > { %7038 = vmatmul.f32.gmra.mxu2 %v6974_v29 }
0x1311   : > { %7125 = vmatmul.f32.gmra.mxu1 %v6974_v29  ;;  %7141 = vmatpush.msrb.mxu2 %v16491_v12  ;;  %v7466_v12 = vld [vmem:[%s8293_s6 + $0x18] sm:$0xff] }
0x1313   : > { %7990 = vmatmul.msk.f32.gmra.mxu0 %vm1096_vm0, %v6970_v14  ;;  %7142 = vmatpush.msrb.mxu2 %v16492_v41 }
0x1315   : > { %7143 = vmatpush.msrb.mxu2 %v16493_v50 }
0x1316   : > { %7993 = vmatmul.msk.f32.vlgmr.msrb.gmra.mxu3 %vm1096_vm0, %v6967_v35 }
0x1317   : > { %7144 = vmatpush.msrb.mxu2 %v16494_v18 }
0x1318   : > { %7145 = vmatmul.f32.vlgmr.msrb.gmra.mxu2 %v15189_v40  ;;  %v6984_v40 = vpop.permute.xlu0 %6983 }
0x131b   : > { %7991 = vmatmul.msk.f32.gmra.mxu0 %vm1096_vm0, %v6973_v39 }
0x131e   : > { %7994 = vmatmul.msk.f32.gmra.mxu3 %vm1096_vm0, %v6970_v14 }
0x1320   : > { %7148 = vmatmul.f32.gmra.mxu2 %v6969_v53 }
0x1323   : > { %7992 = vmatmul.msk.f32.gmra.mxu0 %vm1096_vm0, %v6976_v33 }
0x1326   : > { %7995 = vmatmul.msk.f32.gmra.mxu3 %vm1096_vm0, %v6973_v39 }
0x1328   : > { %7151 = vmatmul.f32.gmra.mxu2 %v6972_v56 }
0x132e   : > { %7996 = vmatmul.msk.f32.gmra.mxu3 %vm1096_vm0, %v6976_v33 }
0x1330   : > { %7154 = vmatmul.f32.gmra.mxu2 %v6975_v22 }
0x1376   : > { %v7117_v13 = vpop.f32.mrf.mxu1 }
0x1377   : > { %v7118_v29 = vadd.f32 %v7117_v13, %v6984_v40 }
0x1379   : > { %v7059_v19 = vpop.f32.mrf.mxu3 }
0x137b   : > { %v7030_v54 = vpop.f32.mrf.mxu2 }
0x137c   : > { %v7031_v59 = vadd.f32 %v7030_v54, %v6984_v40 }
0x137e   : > { %v7060_v61 = vadd.f32 %v7059_v19, %v7031_v59  ;;  %v7120_v39 = vpop.f32.mrf.mxu1 }
0x137f   : > { %v7121_v19 = vadd.f32 %v7120_v39, %v6989_v25 }
0x1381   : > { %v7062_v36 = vpop.f32.mrf.mxu3 }
0x1383   : > { %v7033_v55 = vpop.f32.mrf.mxu2 }
0x1384   : > { %v7034_v21 = vadd.f32 %v7033_v55, %v6989_v25 }
0x1386   : > { %v7063_v46 = vadd.f32 %v7062_v36, %v7034_v21 }
0x1388   : > { %v7088_v20 = vpop.f32.mrf.mxu0 }
0x1389   : > { %v7089_v53 = vadd.f32 %v7088_v20, %v7060_v61  ;;  %v7065_v9 = vpop.f32.mrf.mxu3 }
0x138b   : > { %v15278_v38 = vmax.f32 %v7089_v53, 0.0  ;;  %v7036_v34 = vpop.f32.mrf.mxu2  ;;  %v7123_v53 = vpop.f32.mrf.mxu1 }
0x138c   : > { %v7037_v52 = vadd.f32 %v7036_v34, %v6994_v24  ;;  %v7124_v21 = vadd.f32 %v7123_v53, %v6994_v24 }
0x138d   : > { %7227 = vrot.lane.b32.xlu1 %v15278_v38, %s16368_s2  ;;  %7259 = vrot.lane.b32.xlu0 %v15278_v38, %s16389_s1 }
0x138e   : > { %7291 = vrot.lane.b32.xlu2 %v15278_v38, %s16390_s3  ;;  %v7066_v44 = vadd.f32 %v7065_v9, %v7037_v52 }
0x1390   : > { %v7091_v31 = vpop.f32.mrf.mxu0 }
0x1391   : > { %v7092_v23 = vadd.f32 %v7091_v31, %v7063_v46  ;;  %v7068_v35 = vpop.f32.mrf.mxu3 }
0x1393   : > { %v15286_v7 = vmax.f32 %v7092_v23, 0.0  ;;  %v7039_v27 = vpop.f32.mrf.mxu2  ;;  %v7126_v34 = vpop.f32.mrf.mxu1 }
0x1394   : > { %v7040_v56 = vadd.f32 %v7039_v27, %v15276_v58  ;;  %v7127_v52 = vadd.f32 %v7126_v34, %v15276_v58 }
0x1395   : > { %7293 = vrot.lane.b32.xlu1 %v15286_v7, %s16390_s3  ;;  %7355 = vrot.lane.b32.xlu0 %v15278_v38, %s16392_s4 }
0x1396   : > { %7387 = vrot.lane.b32.xlu2 %v15278_v38, %s16393_s5  ;;  %v7069_v17 = vadd.f32 %v7068_v35, %v7040_v56 }
0x1398   : > { %v7094_v47 = vpop.f32.mrf.mxu0 }
0x1399   : > { %v7095_v2 = vadd.f32 %v7094_v47, %v7066_v44  ;;  %v7175_v14 = vpop.f32.mrf.mxu3 }
0x139b   : > { %v15300_v42 = vmax.f32 %v7095_v2, 0.0  ;;  %v7146_v49 = vpop.f32.mrf.mxu2 }
0x139c   : > { %v7147_v22 = vadd.f32 %v7146_v49, %v7118_v29 }
0x139d   : > { %7389 = vrot.lane.b32.xlu1 %v15286_v7, %s16393_s5  ;;  %7229 = vrot.lane.b32.xlu0 %v15286_v7, %s16368_s2 }
0x139e   : > { %7261 = vrot.lane.b32.xlu2 %v15286_v7, %s16389_s1  ;;  %v7176_v33 = vadd.f32 %v7175_v14, %v7147_v22 }
0x13a0   : > { %v7097_v60 = vpop.f32.mrf.mxu0  ;;  %v15329_v59 = vmax.f32 %v7176_v33, 0.0 }
0x13a1   : > { %v7098_v63 = vadd.f32 %v7097_v60, %v7069_v17  ;;  %v7178_v55 = vpop.f32.mrf.mxu3 }
0x13a2   : > { %16495 = vst [vmem:[#allocation69_spill] sm:$0xff] %v15329_v59 }
0x13a3   : > { %v15315_v11 = vmax.f32 %v7098_v63, 0.0  ;;  %v7149_v54 = vpop.f32.mrf.mxu2 }
0x13a4   : > { %v7150_v61 = vadd.f32 %v7149_v54, %v7121_v19 }
0x13a5   : > { %7263 = vrot.lane.b32.xlu1 %v15300_v42, %s16389_s1  ;;  %7295 = vrot.lane.b32.xlu0 %v15300_v42, %s16390_s3 }
0x13a6   : > { %7357 = vrot.lane.b32.xlu2 %v15286_v7, %s16392_s4  ;;  %v7179_v40 = vadd.f32 %v7178_v55, %v7150_v61 }
0x13a8   : > { %v15337_v20 = vmax.f32 %v7179_v40, 0.0 }
0x13a9   : > { %v7181_v46 = vpop.f32.mrf.mxu3 }
0x13aa   : > { %16496 = vst [vmem:[#allocation73_spill] sm:$0xff] %v15337_v20 }
0x13ab   : > { %v7152_v25 = vpop.f32.mrf.mxu2 }
0x13ac   : > { %v7153_v36 = vadd.f32 %v7152_v25, %v7124_v21 }
0x13ad   : > { %7359 = vrot.lane.b32.xlu1 %v15300_v42, %s16392_s4  ;;  %7391 = vrot.lane.b32.xlu0 %v15300_v42, %s16393_s5 }
0x13ae   : > { %7231 = vrot.lane.b32.xlu2 %v15300_v42, %s16368_s2  ;;  %v7182_v31 = vadd.f32 %v7181_v46, %v7153_v36 }
0x13b0   : > { %v15351_v23 = vmax.f32 %v7182_v31, 0.0 }
0x13b1   : > { %v7184_v47 = vpop.f32.mrf.mxu3 }
0x13b2   : > { %16497 = vst [vmem:[#allocation72_spill] sm:$0xff] %v15351_v23 }
0x13b3   : > { %v7155_v24 = vpop.f32.mrf.mxu2 }
0x13b4   : > { %v7156_v9 = vadd.f32 %v7155_v24, %v7127_v52  ;;  %v7464_v52 = vld [vmem:[%s8293_s6 + $0x8] sm:$0xff] }
0x13b5   : > { %7297 = vrot.lane.b32.xlu1 %v15315_v11, %s16390_s3  ;;  %7265 = vrot.lane.b32.xlu0 %v15315_v11, %s16389_s1 }
0x13b6   : > { %7327 = vrot.lane.b32.xlu2 %v15300_v42, %s16358_s18  ;;  %v7185_v44 = vadd.f32 %v7184_v47, %v7156_v9  ;;  %v7463_v9 = vld [vmem:[%s8293_s6] sm:$0xff] }
0x13b8   : > { %v15368_v27 = vmax.f32 %v7185_v44, 0.0 }
0x13ba   : > { %16498 = vst [vmem:[#allocation75_spill] sm:$0xff] %v15368_v27 }
0x13bd   : > { %7233 = vrot.lane.b32.xlu1 %v15315_v11, %s16368_s2  ;;  %7361 = vrot.lane.b32.xlu0 %v15315_v11, %s16392_s4 }
0x13be   : > { %7393 = vrot.lane.b32.xlu2 %v15315_v11, %s16393_s5 }
0x13c1   : > { %v16505_v37 = vld [vmem:[#allocation75_spill] sm:$0xff] }
0x13c5   : > { %7329 = vrot.lane.b32.xlu1 %v15315_v11, %s16358_s18  ;;  %7299 = vrot.lane.b32.xlu0 %v15329_v59, %s16390_s3 }
0x13c6   : > { %7235 = vrot.lane.b32.xlu2 %v15329_v59, %s16368_s2 }
0x13cd   : > { %7267 = vrot.lane.b32.xlu1 %v15329_v59, %s16389_s1  ;;  %7395 = vrot.lane.b32.xlu0 %v15329_v59, %s16393_s5 }
0x13ce   : > { %7301 = vrot.lane.b32.xlu2 %v15337_v20, %s16390_s3 }
0x13d5   : > { %7363 = vrot.lane.b32.xlu1 %v15329_v59, %s16392_s4  ;;  %7269 = vrot.lane.b32.xlu0 %v15337_v20, %s16389_s1 }
0x13d6   : > { %7397 = vrot.lane.b32.xlu2 %v15337_v20, %s16393_s5 }
0x13dd   : > { %7237 = vrot.lane.b32.xlu1 %v15337_v20, %s16368_s2  ;;  %7365 = vrot.lane.b32.xlu0 %v15337_v20, %s16392_s4 }
0x13de   : > { %7271 = vrot.lane.b32.xlu2 %v15351_v23, %s16389_s1 }
0x13e5   : > { %7303 = vrot.lane.b32.xlu1 %v15351_v23, %s16390_s3  ;;  %7239 = vrot.lane.b32.xlu0 %v15351_v23, %s16368_s2 }
0x13e6   : > { %7367 = vrot.lane.b32.xlu2 %v15351_v23, %s16392_s4 }
0x13e8   : > { %v15366_v2 = vpop.permute.xlu2 %7291 }
0x13ed   : > { %7399 = vrot.lane.b32.xlu1 %v15351_v23, %s16393_s5  ;;  %7335 = vrot.lane.b32.xlu0 %v15351_v23, %s16358_s18 }
0x13ee   : > { %7305 = vrot.lane.b32.xlu2 %v15368_v27, %s16390_s3  ;;  %s15818_s3 = scalar_lea.vmem %s8298_s20, %s8320_s0 }
0x13f0   : > { %v15376_v58 = vpop.permute.xlu2 %7387 }
0x13f5   : > { %7333 = vrot.lane.b32.xlu1 %v15337_v20, %s16358_s18  ;;  %7401 = vrot.lane.b32.xlu0 %v15368_v27, %s16393_s5  ;;  %s16500_s5 = sld [smem:[#allocation20_spill]] }
0x13f6   : > { %7201 = vrot.lane.b32.xlu2 %v15315_v11, %s16367_s22 }
0x13f8   : > { %v15384_v56 = vpop.permute.xlu2 %7261 }
0x13fd   : > { %7273 = vrot.lane.b32.xlu1 %v15368_v27, %s16389_s1  ;;  %7325 = vrot.lane.b32.xlu0 %v15286_v7, %s16358_s18 }
0x13fe   : > { %7331 = vrot.lane.b32.xlu2 %v15329_v59, %s16358_s18 }
0x13ff   : > { %v7228_v35 = vpop.permute.xlu1 %7227  ;;  %v15392_v60 = vpop.permute.xlu0 %7259 }
0x1400   : > { %v15394_v17 = vpop.permute.xlu2 %7357 }
0x1405   : > { %7369 = vrot.lane.b32.xlu1 %v15368_v27, %s16392_s4  ;;  %7199 = vrot.lane.b32.xlu0 %v15300_v42, %s16367_s22 }
0x1406   : > { %7241 = vrot.lane.b32.xlu2 %v15368_v27, %s16368_s2 }
0x1407   : > { %v15402_v63 = vpop.permute.xlu1 %7293  ;;  %v15404_v13 = vpop.permute.xlu0 %7355 }
0x1408   : > { %v15406_v49 = vpop.permute.xlu2 %7231 }
0x140d   : > { %7323 = vrot.lane.b32.xlu1 %v15278_v38, %s16358_s18  ;;  %7209 = vrot.lane.b32.xlu0 %v15368_v27, %s16367_s22 }
0x140e   : > { %7337 = vrot.lane.b32.xlu2 %v15368_v27, %s16358_s18 }
0x140f   : > { %v15414_v29 = vpop.permute.xlu1 %7389  ;;  %v15416_v22 = vpop.permute.xlu0 %7229 }
0x1410   : > { %v15418_v14 = vpop.permute.xlu2 %7327 }
0x1415   : > { %7207 = vrot.lane.b32.xlu1 %v15351_v23, %s16367_s22  ;;  %7205 = vrot.lane.b32.xlu0 %v15337_v20, %s16367_s22 }
0x1416   : > { %7197 = vrot.lane.b32.xlu2 %v15286_v7, %s16367_s22 }
0x1417   : > { %v15426_v39 = vpop.permute.xlu1 %7263  ;;  %v7296_v33 = vpop.permute.xlu0 %7295 }
0x1418   : > { %v15428_v54 = vpop.permute.xlu2 %7393 }
0x141d   : > { %7195 = vrot.lane.b32.xlu1 %v15278_v38, %s16367_s22  ;;  %7425 = vrot.lane.b32.xlu0 %v15315_v11, %s16370_s11 }
0x141e   : > { %7203 = vrot.lane.b32.xlu2 %v15329_v59, %s16367_s22 }
0x141f   : > { %v15436_v19 = vpop.permute.xlu1 %7359  ;;  %v15438_v61 = vpop.permute.xlu0 %7391 }
0x1420   : > { %v7236_v55 = vpop.permute.xlu2 %7235 }
0x1421   : > { %v15442_v40 = vsel %vm1469_vm1, %v7228_v35, %v7236_v55  ;;  %v15446_v53 = vsel %vm1469_vm1, %v7236_v55, %v7228_v35  ;;  %v7465_v55 = vld [vmem:[%s8293_s6 + $0x10] sm:$0xff] }
0x1425   : > { %7421 = vrot.lane.b32.xlu1 %v15286_v7, %s16370_s11  ;;  %7431 = vrot.lane.b32.xlu0 %v15351_v23, %s16370_s11 }
0x1426   : > { %7423 = vrot.lane.b32.xlu2 %v15300_v42, %s16370_s11 }
0x1427   : > { %v7298_v25 = vpop.permute.xlu1 %7297  ;;  %v15454_v21 = vpop.permute.xlu0 %7265 }
0x1428   : > { %v7302_v36 = vpop.permute.xlu2 %7301 }
0x1429   : > { %v7308_v26 = vsel %vm1613_vm3, %v15402_v63, %v7302_v36 }
0x142d   : > { %7433 = vrot.lane.b32.xlu1 %v15368_v27, %s16370_s11  ;;  %7419 = vrot.lane.b32.xlu0 %v15278_v38, %s16370_s11 }
0x142e   : > { %7429 = vrot.lane.b32.xlu2 %v15337_v20, %s16370_s11 }
0x142f   : > { %v15462_v46 = vpop.permute.xlu1 %7233  ;;  %v15464_v31 = vpop.permute.xlu0 %7361 }
0x1430   : > { %v7398_v34 = vpop.permute.xlu2 %7397 }
0x1431   : > { %v15469_v24 = vsel %vm1829_vm5, %v7398_v34, %v15414_v29 }
0x1435   : > { %7427 = vrot.lane.b32.xlu1 %v15329_v59, %s16370_s11  ;;  %7474 = vperm.xlu0 %8070, %v7464_v52  }
0x1436   : > { %7469 = vperm.xlu2 %8072, %v7463_v9  }
0x1437   : > { %v15475_v47 = vpop.permute.xlu1 %7329  ;;  %v7300_v44 = vpop.permute.xlu0 %7299 }
0x1438   : > { %v7272_v35 = vpop.permute.xlu2 %7271  ;;  %v7311_v1 = vsel %vm1613_vm3, %v7300_v44, %v15366_v2 }
0x143d   : > { %7479 = vperm.xlu1 %8071, %v7465_v55  }
0x143e   : > { %7484 = vperm.xlu2 %8072, %v7466_v12  }
0x143f   : > { %v15479_v6 = vpop.permute.xlu1 %7267  ;;  %v15481_v41 = vpop.permute.xlu0 %7395 }
0x1440   : > { %v15483_v32 = vpop.permute.xlu2 %7367 }
0x1441   : > { %v15489_v52 = vsel %vm1757_vm9, %v15483_v32, %v15436_v19 }
0x1447   : > { %v15491_v9 = vpop.permute.xlu1 %7363  ;;  %v7270_v50 = vpop.permute.xlu0 %7269 }
0x1448   : > { %v15497_v12 = vsel %vm1757_vm9, %v15491_v9, %v15404_v13  ;;  %v7306_v55 = vpop.permute.xlu2 %7305 }
0x1449   : > { %16499 = vst [vmem:[#allocation53_spill] sm:$0xff] %v15497_v12  ;;  %v7310_v4 = vsel %vm1613_vm3, %v7298_v25, %v7306_v55  ;;  %v7314_v18 = vsel %vm1613_vm3, %v7306_v55, %v7298_v25  ;;  %v7312_v25 = vsel %vm1613_vm3, %v7302_v36, %v15402_v63  ;;  %v7307_v55 = vsel %vm1613_vm3, %v15366_v2, %v7300_v44 }
0x144a   : > { %v7321_v51 = vmul.f32 %v7314_v18, %v16442_v62  ;;  %v7322_v59 = vmul.f32 %v7310_v4, %v16443_v16  ;;  %v7317_v63 = vmul.f32 %v7312_v25, %v16442_v62  ;;  %v7318_v36 = vmul.f32 %v7308_v26, %v16443_v16 }
0x144b   : > { %v7404_v25 = vsel %vm1829_vm5, %v15414_v29, %v7398_v34  ;;  %v7277_v29 = vsel %vm1541_vm6, %v15426_v39, %v7272_v35  ;;  %v7281_v34 = vsel %vm1541_vm6, %v7272_v35, %v15426_v39  ;;  %v7280_v39 = vsel %vm1541_vm6, %v7270_v50, %v15384_v56 }
0x144c   : > { %7499 = vmatpush.msrb.mxu0 %v7321_v51  ;;  %7586 = vmatpush.msra.mxu3 %v7322_v59  ;;  %v7287_v35 = vmul.f32 %v7281_v34, %v16259_v30 }
0x144f   : > { %v15505_v20 = vpop.permute.xlu1 %7237  ;;  %v15507_v23 = vpop.permute.xlu0 %7365 }
0x1450   : > { %v15531_v12 = vpop.permute.xlu2 %7201 }
0x1457   : > { %v7304_v27 = vpop.permute.xlu1 %7303  ;;  %v15509_v8 = vpop.permute.xlu0 %7239 }
0x1458   : > { %v7309_v4 = vsel %vm1613_vm3, %v7296_v33, %v7304_v27  ;;  %v7313_v51 = vsel %vm1613_vm3, %v7304_v27, %v7296_v33  ;;  %v7315_v27 = vmul.f32 %v7311_v1, %v16442_v62  ;;  %v7316_v33 = vmul.f32 %v7307_v55, %v16443_v16  ;;  %v15539_v2 = vpop.permute.xlu2 %7331 }
0x1459   : > { %v7319_v18 = vmul.f32 %v7313_v51, %v16442_v62  ;;  %v7320_v59 = vmul.f32 %v7309_v4, %v16443_v16  ;;  %v7413_v55 = vmul.f32 %v7404_v25, %v16441_v28  ;;  %v7276_v25 = vsel %vm1541_vm6, %v15384_v56, %v7270_v50 }
0x145a   : > { %v7286_v50 = vmul.f32 %v7276_v25, %v9437_v10 }
0x145b   : > { %7500 = vmatpush.msrb.mxu0 %v7319_v18  ;;  %7587 = vmatpush.msra.mxu3 %v7320_v59  ;;  %v7403_v59 = vsel %vm1829_vm5, %v15376_v58, %v15481_v41 }
0x145d   : > { %7501 = vmatpush.msrb.mxu0 %v7317_v63  ;;  %7588 = vmatpush.msra.mxu3 %v7318_v36  ;;  %v7411_v63 = vmul.f32 %v7403_v59, %v16441_v28  ;;  %v7279_v59 = vsel %vm1541_vm6, %v15479_v6, %v15392_v60 }
0x145f   : > { %v15535_v4 = vpop.permute.xlu1 %7399  ;;  %v15537_v51 = vpop.permute.xlu0 %7335  ;;  %7502 = vmatpush.msrb.mxu0 %v7315_v27  ;;  %7589 = vmatpush.msra.mxu3 %v7316_v33 }
0x1460   : > { %v7405_v62 = vsel %vm1829_vm5, %v15438_v61, %v15535_v4  ;;  %v7242_v33 = vpop.permute.xlu2 %7241 }
0x1461   : > { %v7415_v18 = vmul.f32 %v7405_v62, %v16441_v28  ;;  %v7250_v56 = vsel %vm1469_vm1, %v7242_v33, %v15462_v46 }
0x1467   : > { %v15541_v44 = vpop.permute.xlu1 %7333  ;;  %v15543_v26 = vpop.permute.xlu0 %7401 }
0x1468   : > { %v7406_v16 = vsel %vm1829_vm5, %v15428_v54, %v15543_v26 }
0x1469   : > { %v7417_v1 = vmul.f32 %v7406_v16, %v16441_v28 }
0x146b   : > { %7528 = vmatpush.msrb.mxu1 %v7417_v1 }
0x146d   : > { %7529 = vmatpush.msrb.mxu1 %v7415_v18  ;;  %v7288_v18 = vmul.f32 %v7277_v29, %v9437_v10  ;;  %v7246_v29 = vsel %vm1469_vm1, %v15462_v46, %v7242_v33  ;;  %v7245_v46 = vsel %vm1469_vm1, %v15406_v49, %v15509_v8  ;;  %v7257_v33 = vmul.f32 %v7250_v56, %v16260_v57 }
0x146e   : > { %v7256_v25 = vmul.f32 %v7245_v46, %v16261_v5 }
0x146f   : > { %v7274_v36 = vpop.permute.xlu1 %7273  ;;  %v15564_v27 = vpop.permute.xlu0 %7325  ;;  %7530 = vmatpush.msrb.mxu1 %v7413_v55  ;;  %v7285_v55 = vmul.f32 %v7280_v39, %v16259_v30  ;;  %v7371_v39 = vsel %vm1757_vm9, %v15404_v13, %v15491_v9  ;;  %v7252_v9 = vmul.f32 %v15442_v40, %v16261_v5 }
0x1470   : > { %v7278_v62 = vsel %vm1541_vm6, %v15454_v21, %v7274_v36  ;;  %v7282_v28 = vsel %vm1541_vm6, %v7274_v36, %v15454_v21  ;;  %v7275_v21 = vsel %vm1541_vm6, %v15392_v60, %v15479_v6  ;;  %v7373_v60 = vsel %vm1757_vm9, %v15436_v19, %v15483_v32 }
0x1471   : > { %v7289_v16 = vmul.f32 %v7282_v28, %v16259_v30  ;;  %v7290_v1 = vmul.f32 %v7278_v62, %v9437_v10  ;;  %7531 = vmatpush.msrb.mxu1 %v7411_v63  ;;  %v7283_v63 = vmul.f32 %v7279_v59, %v16259_v30  ;;  %v7284_v36 = vmul.f32 %v7275_v21, %v9437_v10 }
0x1472   : > { %v7249_v30 = vsel %vm1469_vm1, %v15509_v8, %v15406_v49  ;;  %v7248_v32 = vsel %vm1469_vm1, %v15505_v20, %v15416_v22  ;;  %v7372_v19 = vsel %vm1757_vm9, %v15394_v17, %v15507_v23  ;;  %v7258_v28 = vmul.f32 %v7246_v29, %v16261_v5 }
0x1473   : > { %7503 = vmatpush.msrb.mxu0 %v7289_v16  ;;  %7590 = vmatpush.msra.mxu3 %v7290_v1  ;;  %v15635_v16 = vpop.permute.xlu2 %7337  ;;  %v7383_v8 = vmul.f32 %v7373_v60, %v9408_v15  ;;  %v7244_v49 = vsel %vm1469_vm1, %v15416_v22, %v15505_v20  ;;  %v7255_v1 = vmul.f32 %v7249_v30, %v16260_v57 }
0x1474   : > { %v7254_v20 = vmul.f32 %v7244_v49, %v16261_v5  ;;  %v7251_v22 = vmul.f32 %v15446_v53, %v16260_v57  ;;  %v7342_v21 = vsel %vm1685_vm4, %v15475_v47, %v15635_v16  ;;  %v7341_v53 = vsel %vm1685_vm4, %v15418_v14, %v15537_v51 }
0x1475   : > { %7504 = vmatpush.msrb.mxu0 %v7287_v35  ;;  %7591 = vmatpush.msra.mxu3 %v7288_v18  ;;  %v7253_v35 = vmul.f32 %v7248_v32, %v16260_v57  ;;  %v7381_v18 = vmul.f32 %v7372_v19, %v9408_v15  ;;  %v7340_v40 = vsel %vm1685_vm4, %v15564_v27, %v15541_v44 }
0x1476   : > { %v7349_v29 = vmul.f32 %v7340_v40, %v8925_v45  ;;  %v16504_v40 = vld [vmem:[#allocation40_spill] sm:$0xff] }
0x1477   : > { %v15606_v34 = vpop.permute.xlu1 %7369  ;;  %v7200_v6 = vpop.permute.xlu0 %7199  ;;  %7505 = vmatpush.msrb.mxu0 %v7285_v55  ;;  %7592 = vmatpush.msra.mxu3 %v7286_v50  ;;  %v7379_v55 = vmul.f32 %v7371_v39, %v9408_v15 }
0x1478   : > { %v7374_v10 = vsel %vm1757_vm9, %v15464_v31, %v15606_v34 }
0x1479   : > { %v7385_v62 = vmul.f32 %v7374_v10, %v9408_v15  ;;  %7506 = vmatpush.msrb.mxu0 %v7283_v63  ;;  %7593 = vmatpush.msra.mxu3 %v7284_v36  ;;  %v7353_v15 = vmul.f32 %v7342_v21, %v8925_v45  ;;  %v7454_v21 = vld [vmem:[%s16500_s5 + $0x18] sm:$0xff] }
0x147b   : > { %7507 = vmatpush.msrb.mxu0 %v7257_v33  ;;  %7532 = vmatpush.msrb.mxu1 %v7385_v62  ;;  %v7198_v63 = vpop.permute.xlu2 %7197 }
0x147c   : > { %7594 = vmatpush.msra.mxu3 %v7258_v28 }
0x147d   : > { %7508 = vmatpush.msrb.mxu0 %v7255_v1  ;;  %7533 = vmatpush.msrb.mxu1 %v7383_v8  ;;  %v7410_v1 = vsel %vm1829_vm5, %v15543_v26, %v15428_v54  ;;  %v15718_v54 = vld [vmem:[%s16500_s5 + $0x8] sm:$0xff] }
0x147e   : > { %7595 = vmatpush.msra.mxu3 %v7256_v25  ;;  %v7418_v26 = vmul.f32 %v7410_v1, %v16483_v3  ;;  %v16507_v1 = vld [vmem:[#allocation73_spill] sm:$0xff] }
0x147f   : > { %v15657_v59 = vpop.permute.xlu1 %7323  ;;  %v7210_v13 = vpop.permute.xlu0 %7209  ;;  %7509 = vmatpush.msrb.mxu0 %v7253_v35  ;;  %7534 = vmatpush.msrb.mxu1 %v7381_v18  ;;  %v7451_v18 = vld [vmem:[%s16500_s5] sm:$0xff] }
0x1480   : > { %v7214_v50 = vsel %vm1398_vm2, %v15531_v12, %v7210_v13  ;;  %v7218_v57 = vsel %vm1398_vm2, %v7210_v13, %v15531_v12  ;;  %7596 = vmatpush.msra.mxu3 %v7254_v20  ;;  %v7351_v12 = vmul.f32 %v7341_v53, %v8925_v45  ;;  %v7339_v36 = vsel %vm1685_vm4, %v15657_v59, %v15539_v2  ;;  %v15736_v13 = vld [vmem:[%s16500_s5 + $0x20] sm:$0xff]  ;;  %v16502_v53 = vld [vmem:[#allocation52_spill] sm:$0xff] }
0x1481   : > { %v7225_v56 = vmul.f32 %v7218_v57, %v16262_v48  ;;  %v7226_v5 = vmul.f32 %v7214_v50, %v16263_v43  ;;  %7510 = vmatpush.msrb.mxu0 %v7251_v22  ;;  %7535 = vmatpush.msrb.mxu1 %v7379_v55  ;;  %v7347_v60 = vmul.f32 %v7339_v36, %v8925_v45 }
0x1482   : > { %7597 = vmatpush.msra.mxu3 %v7252_v9 }
0x1483   : > { %7511 = vmatpush.msrb.mxu0 %v7225_v56  ;;  %7536 = vmatpush.msrb.mxu1 %v7353_v15  ;;  %v7457_v15 = vld [vmem:[%s16500_s5 + $0x30] sm:$0xff] }
0x1484   : > { %7598 = vmatpush.msra.mxu3 %v7226_v5 }
0x1485   : > { %7537 = vmatpush.msrb.mxu1 %v7351_v12 }
0x1487   : > { %v7208_v30 = vpop.permute.xlu1 %7207  ;;  %v7206_v10 = vpop.permute.xlu0 %7205  ;;  %7538 = vmatpush.msrb.mxu1 %v7349_v29  ;;  %v7344_v29 = vsel %vm1685_vm4, %v15541_v44, %v15564_v27 }
0x1488   : > { %v7213_v46 = vsel %vm1398_vm2, %v7200_v6, %v7208_v30  ;;  %v7217_v33 = vsel %vm1398_vm2, %v7208_v30, %v7200_v6  ;;  %v7212_v62 = vsel %vm1398_vm2, %v7198_v63, %v7206_v10  ;;  %v7216_v32 = vsel %vm1398_vm2, %v7206_v10, %v7198_v63  ;;  %v7204_v6 = vpop.permute.xlu2 %7203 }
0x1489   : > { %v7223_v19 = vmul.f32 %v7217_v33, %v16262_v48  ;;  %v7224_v28 = vmul.f32 %v7213_v46, %v16263_v43  ;;  %7539 = vmatpush.msrb.mxu1 %v7347_v60  ;;  %v7221_v45 = vmul.f32 %v7216_v32, %v16262_v48  ;;  %v7222_v8 = vmul.f32 %v7212_v62, %v16263_v43 }
0x148a   : > { %v7343_v10 = vsel %vm1685_vm4, %v15539_v2, %v15657_v59  ;;  %v7350_v27 = vmul.f32 %v7344_v29, %v16504_v40 }
0x148b   : > { %7512 = vmatpush.msrb.mxu0 %v7223_v19  ;;  %7599 = vmatpush.msra.mxu3 %v7224_v28  ;;  %v7348_v59 = vmul.f32 %v7343_v10, %v16504_v40  ;;  %v16512_v10 = vld [vmem:[#allocation66_spill] sm:$0xff] }
0x148c   : > { %7540 = vmatpush.msrb.mxu1 %v15315_v11 }
0x148d   : > { %7513 = vmatpush.msrb.mxu0 %v7221_v45  ;;  %7600 = vmatpush.msra.mxu3 %v7222_v8  ;;  %v7460_v45 = vld [vmem:[%s16500_s5 + $0x48] sm:$0xff]  ;;  %v7453_v8 = vld [vmem:[%s16500_s5 + $0x10] sm:$0xff] }
0x148e   : > { %7541 = vmatpush.msrb.mxu1 %v15300_v42  ;;  %v7409_v42 = vsel %vm1829_vm5, %v15535_v4, %v15438_v61  ;;  %v7378_v61 = vsel %vm1757_vm9, %v15606_v34, %v15464_v31  ;;  %v16501_v34 = vld [vmem:[#allocation53_spill] sm:$0xff] }
0x148f   : > { %v7196_v49 = vpop.permute.xlu1 %7195  ;;  %v7426_v20 = vpop.permute.xlu0 %7425  ;;  %v7386_v9 = vmul.f32 %v7378_v61, %v16486_v0  ;;  %v7380_v55 = vmul.f32 %v16501_v34, %v16486_v0 }
0x1490   : > { %v7211_v25 = vsel %vm1398_vm2, %v7196_v49, %v7204_v6  ;;  %v7215_v39 = vsel %vm1398_vm2, %v7204_v6, %v7196_v49  ;;  %7542 = vmatpush.msrb.mxu1 %v15286_v7  ;;  %v7424_v4 = vpop.permute.xlu2 %7423  ;;  %v7461_v6 = vld [vmem:[%s16500_s5 + $0x50] sm:$0xff] }
0x1491   : > { %v7219_v11 = vmul.f32 %v7215_v39, %v16262_v48  ;;  %v7220_v35 = vmul.f32 %v7211_v25, %v16263_v43  ;;  %v7416_v48 = vmul.f32 %v7409_v42, %v16483_v3  ;;  %v7407_v43 = vsel %vm1829_vm5, %v15481_v41, %v15376_v58  ;;  %v16506_v49 = vld [vmem:[#allocation72_spill] sm:$0xff]  ;;  %v7456_v25 = vld [vmem:[%s16500_s5 + $0x28] sm:$0xff]  ;;  %v16508_v39 = vld [vmem:[#allocation69_spill] sm:$0xff] }
0x1492   : > { %7543 = vmatpush.msrb.mxu1 %v15278_v38  ;;  %v7414_v38 = vmul.f32 %v15469_v24, %v16483_v3  ;;  %v7412_v22 = vmul.f32 %v7407_v43, %v16483_v3  ;;  %v7376_v41 = vsel %vm1757_vm9, %v15507_v23, %v15394_v17  ;;  %v7384_v58 = vmul.f32 %v15489_v52, %v16486_v0 }
0x1493   : > { %7514 = vmatpush.msrb.mxu0 %v7219_v11  ;;  %7601 = vmatpush.msra.mxu3 %v7220_v35  ;;  %v7382_v3 = vmul.f32 %v7376_v41, %v16486_v0  ;;  %v7346_v23 = vsel %vm1685_vm4, %v15635_v16, %v15475_v47  ;;  %v16503_v0 = vld [vmem:[#allocation46_spill] sm:$0xff]  ;;  %v7345_v47 = vsel %vm1685_vm4, %v15537_v51, %v15418_v14  ;;  %v7458_v51 = vld [vmem:[%s16500_s5 + $0x38] sm:$0xff] }
0x1494   : > { %7515 = vmatmul.f32.vlgmr.msrb.gmra.mxu0 %v7451_v18  ;;  %7602 = vmatmul.f32.vlgmr.msra.gmra.mxu3 %v7451_v18  ;;  %v7354_v12 = vmul.f32 %v7346_v23, %v16504_v40  ;;  %v7352_v30 = vmul.f32 %v7345_v47, %v16504_v40  ;;  %v7459_v11 = vld [vmem:[%s16500_s5 + $0x40] sm:$0xff]  ;;  %v7462_v35 = vld [vmem:[%s16500_s5 + $0x58] sm:$0xff] }
0x1495   : > { %7615 = vmatpush.msra.mxu0 %v7418_v26  ;;  %7544 = vmatmul.f32.vlgmr.msrb.gmra.mxu1 %v15718_v54 }
0x1497   : > { %7616 = vmatpush.msra.mxu0 %v7416_v48  ;;  %v7422_v7 = vpop.permute.xlu1 %7421  ;;  %v7432_v31 = vpop.permute.xlu0 %7431 }
0x1498   : > { %v7437_v50 = vsel %vm1901_vm8, %v7424_v4, %v7432_v31  ;;  %v7441_v57 = vsel %vm1901_vm8, %v7432_v31, %v7424_v4  ;;  %v7430_v16 = vpop.permute.xlu2 %7429 }
0x1499   : > { %7617 = vmatpush.msra.mxu0 %v7414_v38  ;;  %v7436_v63 = vsel %vm1901_vm8, %v7422_v7, %v7430_v16  ;;  %v7440_v36 = vsel %vm1901_vm8, %v7430_v16, %v7422_v7  ;;  %v7447_v60 = vmul.f32 %v7437_v50, %v16502_v53  ;;  %v7448_v14 = vmul.f32 %v7441_v57, %v16503_v0  ;;  %v16510_v57 = vld [vmem:[#allocation36_spill] sm:$0xff] }
0x149a   : > { %v7445_v46 = vmul.f32 %v7436_v63, %v16502_v53  ;;  %v7446_v44 = vmul.f32 %v7440_v36, %v16503_v0 }
0x149b   : > { %7618 = vmatpush.msra.mxu0 %v7412_v22 }
0x149c   : > { %7518 = vmatmul.f32.gmra.mxu0 %v7454_v21  ;;  %7605 = vmatmul.f32.gmra.mxu3 %v7454_v21 }
0x149d   : > { %7619 = vmatpush.msra.mxu0 %v7386_v9  ;;  %7547 = vmatmul.f32.gmra.mxu1 %v15736_v13 }
0x149f   : > { %7620 = vmatpush.msra.mxu0 %v7384_v58  ;;  %v7434_v24 = vpop.permute.xlu1 %7433  ;;  %v7420_v33 = vpop.permute.xlu0 %7419 }
0x14a0   : > { %v7438_v17 = vsel %vm1901_vm8, %v7426_v20, %v7434_v24  ;;  %v7442_v52 = vsel %vm1901_vm8, %v7434_v24, %v7426_v20  ;;  %v7470_v7 = vpop.permute.xlu2 %7469  ;;  %v16509_v24 = vld [vmem:[#allocation57_spill] sm:$0xff] }
0x14a1   : > { %v7449_v56 = vmul.f32 %v7438_v17, %v16502_v53  ;;  %v7450_v5 = vmul.f32 %v7442_v52, %v16503_v0  ;;  %7621 = vmatpush.msra.mxu0 %v7382_v3 }
0x14a3   : > { %7622 = vmatpush.msra.mxu0 %v7380_v55  ;;  %7569 = vmatpush.msra.mxu2 %v7449_v56 }
0x14a4   : > { %7656 = vmatpush.msra.mxu1 %v7450_v5  ;;  %7521 = vmatmul.f32.gmra.mxu0 %v7457_v15 }
0x14a5   : > { %7608 = vmatmul.f32.gmra.mxu3 %v7457_v15  ;;  %7623 = vmatpush.msra.mxu0 %v7354_v12  ;;  %v16511_v12 = vld [vmem:[#allocation56_spill] sm:$0xff] }
0x14a6   : > { %7570 = vmatpush.msra.mxu2 %v7447_v60  ;;  %7657 = vmatpush.msra.mxu1 %v7448_v14 }
0x14a7   : > { %7550 = vmatmul.f32.gmra.mxu1 %v7458_v51  ;;  %7624 = vmatpush.msra.mxu0 %v7352_v30  ;;  %v7428_v62 = vpop.permute.xlu1 %7427 }
0x14a8   : > { %v7435_v32 = vsel %vm1901_vm8, %v7420_v33, %v7428_v62  ;;  %v7439_v2 = vsel %vm1901_vm8, %v7428_v62, %v7420_v33  ;;  %7571 = vmatpush.msra.mxu2 %v7445_v46  ;;  %7658 = vmatpush.msra.mxu1 %v7446_v44 }
0x14a9   : > { %v7443_v19 = vmul.f32 %v7435_v32, %v16502_v53  ;;  %v7444_v28 = vmul.f32 %v7439_v2, %v16503_v0  ;;  %7625 = vmatpush.msra.mxu0 %v7350_v27  ;;  %v7485_v32 = vpop.permute.xlu2 %7484 }
0x14ab   : > { %7626 = vmatpush.msra.mxu0 %v7348_v59  ;;  %7572 = vmatpush.msra.mxu2 %v7443_v19  ;;  %v16513_v19 = vld [vmem:[#allocation49_spill] sm:$0xff] }
0x14ac   : > { %7659 = vmatpush.msra.mxu1 %v7444_v28  ;;  %7524 = vmatmul.f32.gmra.mxu0 %v7460_v45 }
0x14ad   : > { %7997 = vmatmul.msk.f32.vlgmr.msra.gmra.mxu2 %vm1096_vm0, %v7453_v8  ;;  %7611 = vmatmul.f32.gmra.mxu3 %v7460_v45 }
0x14ae   : > { %7627 = vmatpush.msra.mxu0 %v16505_v37 }
0x14af   : > { %7553 = vmatmul.f32.gmra.mxu1 %v7461_v6  ;;  %v7480_v47 = vpop.permute.xlu1 %7479 }
0x14b0   : > { %7628 = vmatpush.msra.mxu0 %v16506_v49 }
0x14b2   : > { %7629 = vmatpush.msra.mxu0 %v16507_v1 }
0x14b4   : > { %7630 = vmatpush.msra.mxu0 %v16508_v39 }
0x14b5   : > { %7998 = vmatmul.msk.f32.gmra.mxu2 %vm1096_vm0, %v7456_v25  ;;  %7631 = vmatmul.f32.vlgmr.msra.gmra.mxu0 %v15718_v54 }
0x14b7   : > { %8001 = vmatmul.msk.f32.vlgmr.msra.gmra.mxu1 %vm1096_vm0, %v7453_v8 }
0x14bd   : > { %7999 = vmatmul.msk.f32.gmra.mxu2 %vm1096_vm0, %v7459_v11  ;;  %7634 = vmatmul.f32.gmra.mxu0 %v15736_v13  ;;  %v7475_v13 = vpop.permute.xlu0 %7474 }
0x14bf   : > { %8002 = vmatmul.msk.f32.gmra.mxu1 %vm1096_vm0, %v7456_v25  ;;  %v16514_v25 = vld [vmem:[#allocation68_spill] sm:$0xff] }
0x14c5   : > { %8000 = vmatmul.msk.f32.gmra.mxu2 %vm1096_vm0, %v7462_v35  ;;  %7637 = vmatmul.f32.gmra.mxu0 %v7458_v51 }
0x14c7   : > { %8003 = vmatmul.msk.f32.gmra.mxu1 %vm1096_vm0, %v7459_v11 }
0x14cd   : > { %7640 = vmatmul.f32.gmra.mxu0 %v7461_v6 }
0x14cf   : > { %8004 = vmatmul.msk.f32.gmra.mxu1 %vm1096_vm0, %v7462_v35 }
0x1511   : > { %v7516_v18 = vpop.f32.mrf.mxu0 }
0x1512   : > { %v7545_v42 = vpop.f32.mrf.mxu1  ;;  %v7517_v61 = vadd.f32 %v7516_v18, %v7470_v7 }
0x1514   : > { %v7546_v22 = vadd.f32 %v7545_v42, %v7517_v61  ;;  %v16516_v61 = vld [vmem:[#allocation62_spill] sm:$0xff] }
0x1517   : > { %v7603_v43 = vpop.f32.mrf.mxu3 }
0x1518   : > { %v7604_v9 = vadd.f32 %v7603_v43, %v7470_v7 }
0x1519   : > { %v7519_v54 = vpop.f32.mrf.mxu0 }
0x151a   : > { %v7548_v26 = vpop.f32.mrf.mxu1  ;;  %v7520_v3 = vadd.f32 %v7519_v54, %v7475_v13 }
0x151c   : > { %v7549_v50 = vadd.f32 %v7548_v26, %v7520_v3  ;;  %v16515_v26 = vld [vmem:[#allocation47_spill] sm:$0xff] }
0x151f   : > { %v7606_v58 = vpop.f32.mrf.mxu3 }
0x1520   : > { %v7607_v0 = vadd.f32 %v7606_v58, %v7475_v13 }
0x1521   : > { %v7522_v20 = vpop.f32.mrf.mxu0 }
0x1522   : > { %v7523_v40 = vadd.f32 %v7522_v20, %v7480_v47 }
0x1524   : > { %v7551_v48 = vpop.f32.mrf.mxu1 }
0x1525   : > { %v7552_v30 = vadd.f32 %v7551_v48, %v7523_v40 }
0x1528   : > { %v7609_v29 = vpop.f32.mrf.mxu3 }
0x1529   : > { %v7525_v38 = vpop.f32.mrf.mxu0  ;;  %v7610_v27 = vadd.f32 %v7609_v29, %v7480_v47 }
0x152a   : > { %v7526_v59 = vadd.f32 %v7525_v38, %v7485_v32 }
0x152c   : > { %v7554_v4 = vpop.f32.mrf.mxu1 }
0x152d   : > { %v7555_v1 = vadd.f32 %v7554_v4, %v7526_v59 }
0x1530   : > { %v7574_v21 = vpop.f32.mrf.mxu2  ;;  %v7612_v49 = vpop.f32.mrf.mxu3 }
0x1531   : > { %v7575_v41 = vadd.f32 %v7574_v21, %v7546_v22  ;;  %v7613_v35 = vadd.f32 %v7612_v49, %v7485_v32 }
0x1532   : > { %v7632_v31 = vpop.f32.mrf.mxu0 }
0x1533   : > { %v7673_v34 = vadd.f32 %v7575_v41, %v16509_v24  ;;  %v7633_v55 = vadd.f32 %v7632_v31, %v7604_v9 }
0x1534   : > { %v7661_v23 = vpop.f32.mrf.mxu1 }
0x1535   : > { %v7681_v17 = vmax.f32 %v7673_v34, 0.0  ;;  %v7662_v52 = vadd.f32 %v7661_v23, %v7633_v55 }
0x1537   : > { %7689 = vst [vmem:[%s15818_s3] sm:$0xff] %v7681_v17  ;;  %v7674_v53 = vadd.f32 %v7662_v52, %v16510_v57 }
0x1538   : > { %v7577_v56 = vpop.f32.mrf.mxu2 }
0x1539   : > { %v7682_v5 = vmax.f32 %v7674_v53, 0.0  ;;  %v7578_v15 = vadd.f32 %v7577_v56, %v7549_v50 }
0x153a   : > { %v7635_v16 = vpop.f32.mrf.mxu0 }
0x153b   : > { %7690 = vst [vmem:[%s15818_s3 + $0x8] sm:$0xff] %v7682_v5  ;;  %v7675_v63 = vadd.f32 %v7578_v15, %v16511_v12  ;;  %v7636_v36 = vadd.f32 %v7635_v16, %v7607_v0 }
0x153c   : > { %v7664_v60 = vpop.f32.mrf.mxu1 }
0x153d   : > { %v7683_v14 = vmax.f32 %v7675_v63, 0.0  ;;  %v7665_v51 = vadd.f32 %v7664_v60, %v7636_v36 }
0x153f   : > { %7691 = vst [vmem:[%s15818_s3 + $0x10] sm:$0xff] %v7683_v14  ;;  %v7676_v46 = vadd.f32 %v7665_v51, %v16512_v10 }
0x1540   : > { %v7580_v44 = vpop.f32.mrf.mxu2 }
0x1541   : > { %v7684_v33 = vmax.f32 %v7676_v46, 0.0  ;;  %v7581_v62 = vadd.f32 %v7580_v44, %v7552_v30 }
0x1542   : > { %v7638_v2 = vpop.f32.mrf.mxu0 }
0x1543   : > { %7692 = vst [vmem:[%s15818_s3 + $0x18] sm:$0xff] %v7684_v33  ;;  %v7677_v28 = vadd.f32 %v7581_v62, %v16513_v19  ;;  %v7639_v45 = vadd.f32 %v7638_v2, %v7610_v27 }
0x1544   : > { %v7667_v8 = vpop.f32.mrf.mxu1 }
0x1545   : > { %v7685_v6 = vmax.f32 %v7677_v28, 0.0  ;;  %v7668_v37 = vadd.f32 %v7667_v8, %v7639_v45 }
0x1547   : > { %7693 = vst [vmem:[%s15818_s3 + $0x20] sm:$0xff] %v7685_v6  ;;  %v7678_v39 = vadd.f32 %v7668_v37, %v16514_v25 }
0x1548   : > { %v7583_v11 = vpop.f32.mrf.mxu2 }
0x1549   : > { %v7686_v18 = vmax.f32 %v7678_v39, 0.0  ;;  %v7584_v42 = vadd.f32 %v7583_v11, %v7555_v1 }
0x154a   : > { %v7641_v54 = vpop.f32.mrf.mxu0 }
0x154b   : > { %7694 = vst [vmem:[%s15818_s3 + $0x28] sm:$0xff] %v7686_v18  ;;  %v7679_v20 = vadd.f32 %v7584_v42, %v16515_v26  ;;  %v7642_v48 = vadd.f32 %v7641_v54, %v7613_v35 }
0x154c   : > { %v7670_v43 = vpop.f32.mrf.mxu1 }
0x154d   : > { %v7687_v38 = vmax.f32 %v7679_v20, 0.0  ;;  %v7671_v7 = vadd.f32 %v7670_v43, %v7642_v48 }
0x154f   : > { %7695 = vst [vmem:[%s15818_s3 + $0x30] sm:$0xff] %v7687_v38  ;;  %v7680_v22 = vadd.f32 %v7671_v7, %v16516_v61 }
0x1551   : > { %v7688_v4 = vmax.f32 %v7680_v22, 0.0 }
0x1553   : > { %7696 = vst [vmem:[%s15818_s3 + $0x38] sm:$0xff] %v7688_v4 }
0x1554 PF: > { %s78_s7 = sadd.s32 1, %s8091_s7  }
0x1555   : > { %p75_p4 = scmp.ge.s32.totalorder %s78_s7, 4  }
0x1557   :  { %77 = sbr.rel (!%p75_p4) target bundleno = 64 (0x40), region = 241 }

</bundles_post_ra>
